<compile_context>
chip_gen: v7x
topology: tpu7x:2x2x1
jax: 0.10.0
libtpu: 0.0.40
codegen_flags: <defaults>
</compile_context>

<pallas_src>
import functools

import jax
import jax.numpy as jnp
import numpy as np
from jax.experimental import pallas as pl
from jax.experimental.pallas import tpu as pltpu

# -----------------------------------------------------------------------------
# Small synthetic shapes consistent with the module's forward:
#   roi_featuremap_resolution = 14 -> common head (stride 2) -> 7x7 RoI maps
#   head_dim (2048 real) -> 64 here; MaskHead dim_internal (256 real) -> 32 here
# -----------------------------------------------------------------------------
NUM_ROIS = 32
ROI_BLK = 16             # ROI_BLK*49 = 784 (multiple of 16 for bf16 row pairing);
                         # grid = 2 even "parallel" steps (both v7x TCs busy).
HEAD_DIM = 64            # channels out of common_detection_mask_head
MASK_DIM_INTERNAL = 32   # MaskHead dim_internal
CLS_NUM = 8
ROI_HW = 7               # spatial size after the stride-2 common head
S = ROI_HW * ROI_HW      # 49
BOX_DIM = 4 * CLS_NUM    # cls_agnostic_bbox_regression = False
DET_PAD = 128            # cls(8) + box(32) = 40, padded to a full 128-lane store
VMEM_LIMIT_BYTES = 48 * 1024 * 1024   # explicit; leaves headroom on v7x's 64 MiB


def _round_up(x, m):
    return (x + m - 1) // m * m


# -----------------------------------------------------------------------------
# Fused heads kernel (eval mode), one RoI chunk per grid step.
#   xf            : (R_blk*S, Cin)  bf16 RoI features (channels-last, flat)
#   mask branch   : h = relu(xf @ Wup_stacked + bup); per-tap z_t = h_t @ Wseg + b
#                   mask = sigmoid(concat(z_t))      -> (R_blk*S, 4*CLS_PAD) bf16
#   detect branch : pooled_sum = per-RoI sublane reduce of xf (AvgPool; 1/S is
#                   pre-folded into Wdet); det = pooled @ [Wcls|Wbox|0] + b
#                   softmax over the first `num_cls` lanes (lane-dense store)
# -----------------------------------------------------------------------------
def fused_heads_kernel(num_cls, x_ref, wdet_ref, bdet_ref, wup_ref, bup_ref,
                       wseg_ref, bseg_ref, det_ref, mask_ref):
    cmid = wseg_ref.shape[0]
    rb_s = x_ref.shape[0]
    r_blk = det_ref.shape[0]
    s = rb_s // r_blk

    xf = x_ref[...]                                        # (R_blk*S, Cin) bf16

    # ---- Mask head: stacked-tap deconv + ReLU, then per-tap dense segm 1x1 ----
    h = jnp.dot(xf, wup_ref[...],
                preferred_element_type=jnp.float32) + bup_ref[...]
    h = jnp.maximum(h, 0.0).astype(jnp.bfloat16)           # (R_blk*S, 4*Cmid)
    wseg = wseg_ref[...]
    bseg = bseg_ref[...]
    taps = []
    for t in range(4):                                     # static unroll, no zero flops
        z_t = jnp.dot(h[:, t * cmid:(t + 1) * cmid], wseg,
                      preferred_element_type=jnp.float32) + bseg
        taps.append(z_t)
    z = jnp.concatenate(taps, axis=-1)                     # (R_blk*S, 4*CLS_PAD)
    mask_ref[...] = jax.nn.sigmoid(z).astype(mask_ref.dtype)   # single bf16 store

    # ---- Detection head: AvgPool(7x7) as per-RoI sublane sums (scale in Wdet) ----
    pooled = jnp.concatenate(
        [jnp.sum(x_ref[r * s:(r + 1) * s, :].astype(jnp.float32),
                 axis=0, keepdims=True)
         for r in range(r_blk)], axis=0)                   # (R_blk, Cin) f32 sums
    det = jnp.dot(pooled.astype(jnp.bfloat16), wdet_ref[...],
                  preferred_element_type=jnp.float32) + bdet_ref[...]  # (R_blk, 128)
    # Masked softmax over the first num_cls lanes; box lanes pass through.
    lane = jax.lax.broadcasted_iota(jnp.int32, det.shape, 1)
    is_cls = lane < num_cls
    m = jnp.max(jnp.where(is_cls, det, -jnp.inf), axis=-1, keepdims=True)
    e = jnp.where(is_cls, jnp.exp(jnp.where(is_cls, det, m) - m), 0.0)
    inv = pl.reciprocal(jnp.sum(e, axis=-1, keepdims=True), approx=True)
    det_ref[...] = jnp.where(is_cls, e * inv, det)         # single 128-lane store


def resnet50_c4_heads(common_roi_features, params, *, roi_block=ROI_BLK):
    """common_roi_features: (R, H, W, Cin) NHWC (bf16 preferred; cast upstream)."""
    (w_cls, b_cls, w_box, b_box, w_up, b_up, w_seg, b_seg) = params
    R, H, W, Cin = common_roi_features.shape
    s = H * W
    Cmid = w_up.shape[1]
    num_cls = w_cls.shape[1]
    box_dim = w_box.shape[1]
    det_n = num_cls + box_dim
    cls_pad = _round_up(4 * num_cls, 128) // 4             # lane-dense mask store
    assert R % roi_block == 0 and (R // roi_block) % 2 == 0, \
        "pad the RoI batch so the grid has an even number (>=2) of steps"
    assert det_n <= DET_PAD

    # Fused + lane-padded detection weight with the AvgPool 1/S scale folded in
    # (bias is added after pooling, so it is NOT scaled).
    w_det = jnp.zeros((Cin, DET_PAD), jnp.float32)
    w_det = w_det.at[:, :num_cls].set(w_cls * (1.0 / s))
    w_det = w_det.at[:, num_cls:det_n].set(w_box * (1.0 / s))
    b_det = jnp.zeros((1, DET_PAD), jnp.float32)
    b_det = b_det.at[0, :num_cls].set(b_cls).at[0, num_cls:det_n].set(b_box)

    # 2x2 stride-2 deconv has no output overlap -> 4 taps t = di*2+dj stacked
    # along lanes: (Cin, 4*Cmid). Segm 1x1 conv stays dense per-tap, lane-padded
    # so the concatenated mask slab is a multiple of 128 lanes.
    w_up_st = jnp.transpose(w_up, (0, 2, 3, 1)).reshape(Cin, 4 * Cmid)
    b_up4 = jnp.tile(b_up.reshape(1, Cmid), (1, 4))
    w_seg_p = jnp.zeros((Cmid, cls_pad), jnp.float32).at[:, :num_cls].set(w_seg)
    b_seg_p = jnp.zeros((1, cls_pad), jnp.float32).at[0, :num_cls].set(b_seg)

    # bf16 MXU operands (f32 accumulation in-kernel); biases stay f32.
    # NOTE: feed bf16 features from the producer so this astype is a no-op.
    x_flat = common_roi_features.reshape(R * s, Cin).astype(jnp.bfloat16)
    w_det_bf = w_det.astype(jnp.bfloat16)
    w_up_bf = w_up_st.astype(jnp.bfloat16)
    w_seg_bf = w_seg_p.astype(jnp.bfloat16)

    rb_s = roi_block * s
    const = dict(pipeline_mode=pl.Buffered(buffer_count=1))  # grid-invariant blocks
    cost = pl.CostEstimate(
        flops=int(2 * R * s * Cin * 4 * Cmid + 2 * R * s * 4 * Cmid * cls_pad
                  + 2 * R * Cin * DET_PAD + R * s * Cin),
        transcendentals=int(R * s * 4 * cls_pad + R * num_cls),
        bytes_accessed=int(R * s * Cin * 2 + R * s * 4 * cls_pad * 2
                           + R * DET_PAD * 4
                           + (Cin * DET_PAD + Cin * 4 * Cmid + Cmid * cls_pad) * 2),
    )

    det, mask = pl.pallas_call(
        functools.partial(fused_heads_kernel, num_cls),
        out_shape=(jax.ShapeDtypeStruct((R, DET_PAD), jnp.float32),
                   jax.ShapeDtypeStruct((R * s, 4 * cls_pad), jnp.bfloat16)),
        grid=(R // roi_block,),
        in_specs=[
            pl.BlockSpec((rb_s, Cin), lambda r: (r, 0)),          # RoI feature chunk
            pl.BlockSpec((Cin, DET_PAD), lambda r: (0, 0), **const),
            pl.BlockSpec((1, DET_PAD), lambda r: (0, 0), **const),
            pl.BlockSpec((Cin, 4 * Cmid), lambda r: (0, 0), **const),
            pl.BlockSpec((1, 4 * Cmid), lambda r: (0, 0), **const),
            pl.BlockSpec((Cmid, cls_pad), lambda r: (0, 0), **const),
            pl.BlockSpec((1, cls_pad), lambda r: (0, 0), **const),
        ],
        out_specs=(pl.BlockSpec((roi_block, DET_PAD), lambda r: (r, 0)),
                   pl.BlockSpec((rb_s, 4 * cls_pad), lambda r: (r, 0))),
        compiler_params=pltpu.CompilerParams(
            dimension_semantics=("parallel",),      # RoI chunks independent -> 2 TCs on v7x
            vmem_limit_bytes=VMEM_LIMIT_BYTES),
        cost_estimate=cost,
    )(x_flat, w_det_bf, b_det, w_up_bf, b_up4, w_seg_bf, b_seg_p)

    cls_score = det[:, :num_cls]
    bbox_pred = det[:, num_cls:det_n]
    # Unpack the stacked taps into the 2x-upsampled mask: row = r*S + i*W + j,
    # lane = t*cls_pad + c, t = di*2 + dj  ->  (r, 2i+di, 2j+dj, c).
    # Slice the lane padding BEFORE the de-interleave.
    mask = mask.reshape(R, H, W, 2, 2, cls_pad)[..., :num_cls]
    mask = jnp.transpose(mask, (0, 1, 3, 2, 4, 5)).reshape(R, 2 * H, 2 * W, num_cls)
    return cls_score, bbox_pred, mask  # NHWC (PyTorch NCHW: transpose (0, 3, 1, 2))


# -----------------------------------------------------------------------------
# Pure-JAX references for validation.
# -----------------------------------------------------------------------------
def detection_head_ref(x, w_cls, b_cls, w_box, b_box):
    pooled = jnp.mean(x, axis=(1, 2))                      # AvgPool2d(7)
    cls = jax.nn.softmax(pooled @ w_cls + b_cls, axis=-1)  # eval-mode softmax
    box = pooled @ w_box + b_box
    return cls, box


def mask_head_ref(x, w_up, b_up, w_seg, b_seg):
    R, H, W, Cin = x.shape
    Cmid = w_up.shape[1]
    up = jnp.einsum('rhwc,cmij->rhiwjm', x, w_up)          # ConvTranspose2d(2,2)
    up = up.reshape(R, 2 * H, 2 * W, Cmid) + b_up
    up = jnp.maximum(up, 0.0)
    z = jnp.einsum('rhwm,mk->rhwk', up, w_seg) + b_seg
    return jax.nn.sigmoid(z)                               # eval-mode sigmoid


# -----------------------------------------------------------------------------
# Deterministic parameter init (matching the torch _init_weights semantics).
# -----------------------------------------------------------------------------
def init_params(key):
    ks = jax.random.split(key, 4)
    # BboxHead: cls_score ~ N(0, 0.01), bbox_pred ~ N(0, 0.001), biases = 0.
    w_cls = 0.01 * jax.random.normal(ks[0], (HEAD_DIM, CLS_NUM), jnp.float32)
    b_cls = jnp.zeros((CLS_NUM,), jnp.float32)
    w_box = 0.001 * jax.random.normal(ks[1], (HEAD_DIM, BOX_DIM), jnp.float32)
    b_box = jnp.zeros((BOX_DIM,), jnp.float32)
    # MaskHead: kaiming-uniform, biases = 0.
    fan_up = MASK_DIM_INTERNAL * 4
    bound_up = np.sqrt(2.0) * np.sqrt(3.0 / fan_up)
    w_up = jax.random.uniform(ks[2], (HEAD_DIM, MASK_DIM_INTERNAL, 2, 2),
                              jnp.float32, -bound_up, bound_up)
    b_up = jnp.zeros((MASK_DIM_INTERNAL,), jnp.float32)
    fan_seg = MASK_DIM_INTERNAL
    bound_seg = np.sqrt(2.0) * np.sqrt(3.0 / fan_seg)
    w_seg = jax.random.uniform(ks[3], (MASK_DIM_INTERNAL, CLS_NUM),
                               jnp.float32, -bound_seg, bound_seg)
    b_seg = jnp.zeros((CLS_NUM,), jnp.float32)
    return (w_cls, b_cls, w_box, b_box, w_up, b_up, w_seg, b_seg)


if __name__ == "__main__":
    key = jax.random.PRNGKey(0)
    k_feat, k_params = jax.random.split(key)

    # TODO(synk): ResNetBody backbone, RPN + PriorBox, generate_proposals/NMS,
    # RoIAlign (extract_roi_features), the common ResNet stage and DetectionOutput
    # are dynamic-shape / data-dependent stages defined by classes not provided;
    # we synthesize the post-common-head RoI features that feed the Pallas heads.
    common_roi_features = jax.random.normal(
        k_feat, (NUM_ROIS, ROI_HW, ROI_HW, HEAD_DIM), jnp.float32)
    # Cast once here ("fused into the producer"); the wrapper adds no extra pass.
    roi_features_bf16 = common_roi_features.astype(jnp.bfloat16)

    params = init_params(k_params)

    cls_score, bbox_pred, mask_out = resnet50_c4_heads(roi_features_bf16, params)
    jax.block_until_ready((cls_score, bbox_pred, mask_out))

    # Validate against pure-JAX f32 references computed from the same bf16-rounded
    # operands (kernel matmuls are bf16 x bf16 -> f32 accumulate; mask stored bf16),
    # with bf16-appropriate tolerances.
    (w_cls, b_cls, w_box, b_box, w_up, b_up, w_seg, b_seg) = params
    q = lambda a: a.astype(jnp.bfloat16).astype(jnp.float32)
    xq = q(common_roi_features)
    cls_ref, box_ref = detection_head_ref(xq, q(w_cls), b_cls, q(w_box), b_box)
    m_ref = mask_head_ref(xq, q(w_up), b_up, q(w_seg), b_seg)

    np.testing.assert_allclose(np.asarray(cls_score), np.asarray(cls_ref),
                               atol=2e-2, rtol=2e-2)
    np.testing.assert_allclose(np.asarray(bbox_pred), np.asarray(box_ref),
                               atol=2e-2, rtol=2e-2)
    np.testing.assert_allclose(np.asarray(mask_out.astype(jnp.float32)),
                               np.asarray(m_ref), atol=2e-2, rtol=2e-2)

    assert cls_score.shape == (NUM_ROIS, CLS_NUM)
    assert bbox_pred.shape == (NUM_ROIS, BOX_DIM)
    assert mask_out.shape == (NUM_ROIS, 2 * ROI_HW, 2 * ROI_HW, CLS_NUM)
    print("KERNEL_OK")
</pallas_src>

<mosaic_0001>
module attributes {stable_mosaic.version = 11 : i64} {
  func.func @fused_heads_kernel(%arg0: i32, %arg1: memref<784x64xbf16, #tpu.memory_space<vmem>>, %arg2: memref<64x128xbf16, #tpu.memory_space<vmem>>, %arg3: memref<1x128xf32, #tpu.memory_space<vmem>>, %arg4: memref<64x128xbf16, #tpu.memory_space<vmem>>, %arg5: memref<1x128xf32, #tpu.memory_space<vmem>>, %arg6: memref<32x32xbf16, #tpu.memory_space<vmem>>, %arg7: memref<1x32xf32, #tpu.memory_space<vmem>>, %arg8: memref<16x128xf32, #tpu.memory_space<vmem>>, %arg9: memref<784x128xbf16, #tpu.memory_space<vmem>>) attributes {dimension_semantics = [#tpu.dimension_semantics<parallel>], iteration_bounds = array<i64: 2>, scalar_prefetch = 0 : i64, scratch_operands = 0 : i64, tpu.core_type = #tpu.core_type<tc>, window_params = [{transform_indices = @transform_0, window_bounds = array<i64: 784, 64>}, {pipeline_mode = #tpu.pipeline_mode<synchronous>, transform_indices = @transform_1, window_bounds = array<i64: 64, 128>}, {pipeline_mode = #tpu.pipeline_mode<synchronous>, transform_indices = @transform_2, window_bounds = array<i64: 1, 128>}, {pipeline_mode = #tpu.pipeline_mode<synchronous>, transform_indices = @transform_3, window_bounds = array<i64: 64, 128>}, {pipeline_mode = #tpu.pipeline_mode<synchronous>, transform_indices = @transform_4, window_bounds = array<i64: 1, 128>}, {pipeline_mode = #tpu.pipeline_mode<synchronous>, transform_indices = @transform_5, window_bounds = array<i64: 32, 32>}, {pipeline_mode = #tpu.pipeline_mode<synchronous>, transform_indices = @transform_6, window_bounds = array<i64: 1, 32>}, {transform_indices = @transform_7, window_bounds = array<i64: 16, 128>}, {transform_indices = @transform_8, window_bounds = array<i64: 784, 128>}]} {
    %c0 = arith.constant 0 : index
    %c0_0 = arith.constant 0 : index
    %0 = vector.load %arg1[%c0, %c0_0] : memref<784x64xbf16, #tpu.memory_space<vmem>>, vector<784x64xbf16>
    %c0_1 = arith.constant 0 : index
    %c0_2 = arith.constant 0 : index
    %1 = vector.load %arg4[%c0_1, %c0_2] : memref<64x128xbf16, #tpu.memory_space<vmem>>, vector<64x128xbf16>
    %cst = arith.constant dense<0.000000e+00> : vector<784x128xf32>
    %2 = tpu.matmul %0, %1, %cst {dimension_numbers = #tpu.dot_dimension_numbers<[1], [0], [0], [1], [0, 0, 1, 1], [], []>} : vector<784x64xbf16>, vector<64x128xbf16>, vector<784x128xf32> -> vector<784x128xf32>
    %c0_3 = arith.constant 0 : index
    %c0_4 = arith.constant 0 : index
    %3 = vector.load %arg5[%c0_3, %c0_4] : memref<1x128xf32, #tpu.memory_space<vmem>>, vector<1x128xf32>
    %4 = vector.broadcast %3 : vector<1x128xf32> to vector<784x128xf32>
    %5 = arith.addf %2, %4 : vector<784x128xf32>
    %cst_5 = arith.constant 0.000000e+00 : f32
    %6 = vector.broadcast %cst_5 : f32 to vector<784x128xf32>
    %7 = arith.maximumf %5, %6 : vector<784x128xf32>
    %8 = arith.truncf %7 : vector<784x128xf32> to vector<784x128xbf16>
    %c0_6 = arith.constant 0 : index
    %c0_7 = arith.constant 0 : index
    %9 = vector.load %arg6[%c0_6, %c0_7] : memref<32x32xbf16, #tpu.memory_space<vmem>>, vector<32x32xbf16>
    %c0_8 = arith.constant 0 : index
    %c0_9 = arith.constant 0 : index
    %10 = vector.load %arg7[%c0_8, %c0_9] : memref<1x32xf32, #tpu.memory_space<vmem>>, vector<1x32xf32>
    %11 = vector.extract_strided_slice %8 {offsets = [0, 0], sizes = [784, 32], strides = [1, 1]} : vector<784x128xbf16> to vector<784x32xbf16>
    %cst_10 = arith.constant dense<0.000000e+00> : vector<784x32xf32>
    %12 = tpu.matmul %11, %9, %cst_10 {dimension_numbers = #tpu.dot_dimension_numbers<[1], [0], [0], [1], [0, 0, 1, 1], [], []>} : vector<784x32xbf16>, vector<32x32xbf16>, vector<784x32xf32> -> vector<784x32xf32>
    %13 = vector.broadcast %10 : vector<1x32xf32> to vector<784x32xf32>
    %14 = arith.addf %12, %13 : vector<784x32xf32>
    %15 = vector.extract_strided_slice %8 {offsets = [0, 32], sizes = [784, 32], strides = [1, 1]} : vector<784x128xbf16> to vector<784x32xbf16>
    %cst_11 = arith.constant dense<0.000000e+00> : vector<784x32xf32>
    %16 = tpu.matmul %15, %9, %cst_11 {dimension_numbers = #tpu.dot_dimension_numbers<[1], [0], [0], [1], [0, 0, 1, 1], [], []>} : vector<784x32xbf16>, vector<32x32xbf16>, vector<784x32xf32> -> vector<784x32xf32>
    %17 = vector.broadcast %10 : vector<1x32xf32> to vector<784x32xf32>
    %18 = arith.addf %16, %17 : vector<784x32xf32>
    %19 = vector.extract_strided_slice %8 {offsets = [0, 64], sizes = [784, 32], strides = [1, 1]} : vector<784x128xbf16> to vector<784x32xbf16>
    %cst_12 = arith.constant dense<0.000000e+00> : vector<784x32xf32>
    %20 = tpu.matmul %19, %9, %cst_12 {dimension_numbers = #tpu.dot_dimension_numbers<[1], [0], [0], [1], [0, 0, 1, 1], [], []>} : vector<784x32xbf16>, vector<32x32xbf16>, vector<784x32xf32> -> vector<784x32xf32>
    %21 = vector.broadcast %10 : vector<1x32xf32> to vector<784x32xf32>
    %22 = arith.addf %20, %21 : vector<784x32xf32>
    %23 = vector.extract_strided_slice %8 {offsets = [0, 96], sizes = [784, 32], strides = [1, 1]} : vector<784x128xbf16> to vector<784x32xbf16>
    %cst_13 = arith.constant dense<0.000000e+00> : vector<784x32xf32>
    %24 = tpu.matmul %23, %9, %cst_13 {dimension_numbers = #tpu.dot_dimension_numbers<[1], [0], [0], [1], [0, 0, 1, 1], [], []>} : vector<784x32xbf16>, vector<32x32xbf16>, vector<784x32xf32> -> vector<784x32xf32>
    %25 = vector.broadcast %10 : vector<1x32xf32> to vector<784x32xf32>
    %26 = arith.addf %24, %25 : vector<784x32xf32>
    %27 = tpu.concatenate %14, %18, %22, %26 in 1 : vector<784x32xf32>, vector<784x32xf32>, vector<784x32xf32>, vector<784x32xf32> -> vector<784x128xf32>
    %28 = arith.negf %27 : vector<784x128xf32>
    %29 = math.exp %28 : vector<784x128xf32>
    %cst_14 = arith.constant 1.000000e+00 : f32
    %30 = vector.broadcast %cst_14 : f32 to vector<784x128xf32>
    %31 = arith.addf %30, %29 : vector<784x128xf32>
    %32 = arith.divf %30, %31 : vector<784x128xf32>
    %33 = arith.truncf %32 : vector<784x128xf32> to vector<784x128xbf16>
    %c0_15 = arith.constant 0 : index
    %c0_16 = arith.constant 0 : index
    %34 = vector.load %arg9[%c0_15, %c0_16] : memref<784x128xbf16, #tpu.memory_space<vmem>>, vector<784x128xbf16>
    tpu.vector_store %arg9[%c0_15, %c0_16], %33 {strides = array<i32>} : memref<784x128xbf16, #tpu.memory_space<vmem>>, vector<784x128xbf16>,
    %c0_17 = arith.constant 0 : index
    %c0_18 = arith.constant 0 : index
    %35 = vector.load %arg1[%c0_17, %c0_18] : memref<784x64xbf16, #tpu.memory_space<vmem>>, vector<49x64xbf16>
    %36 = arith.extf %35 : vector<49x64xbf16> to vector<49x64xf32>
    %cst_19 = arith.constant dense<0.000000e+00> : vector<64xf32>
    %37 = vector.multi_reduction <add>, %36, %cst_19 [0] : vector<49x64xf32> to vector<64xf32>
    %38 = vector.shape_cast %37 : vector<64xf32> to vector<1x64xf32>
    %c49 = arith.constant 49 : index
    %c0_20 = arith.constant 0 : index
    %39 = vector.load %arg1[%c49, %c0_20] : memref<784x64xbf16, #tpu.memory_space<vmem>>, vector<49x64xbf16>
    %40 = arith.extf %39 : vector<49x64xbf16> to vector<49x64xf32>
    %cst_21 = arith.constant dense<0.000000e+00> : vector<64xf32>
    %41 = vector.multi_reduction <add>, %40, %cst_21 [0] : vector<49x64xf32> to vector<64xf32>
    %42 = vector.shape_cast %41 : vector<64xf32> to vector<1x64xf32>
    %c98 = arith.constant 98 : index
    %c0_22 = arith.constant 0 : index
    %43 = vector.load %arg1[%c98, %c0_22] : memref<784x64xbf16, #tpu.memory_space<vmem>>, vector<49x64xbf16>
    %44 = arith.extf %43 : vector<49x64xbf16> to vector<49x64xf32>
    %cst_23 = arith.constant dense<0.000000e+00> : vector<64xf32>
    %45 = vector.multi_reduction <add>, %44, %cst_23 [0] : vector<49x64xf32> to vector<64xf32>
    %46 = vector.shape_cast %45 : vector<64xf32> to vector<1x64xf32>
    %c147 = arith.constant 147 : index
    %c0_24 = arith.constant 0 : index
    %47 = vector.load %arg1[%c147, %c0_24] : memref<784x64xbf16, #tpu.memory_space<vmem>>, vector<49x64xbf16>
    %48 = arith.extf %47 : vector<49x64xbf16> to vector<49x64xf32>
    %cst_25 = arith.constant dense<0.000000e+00> : vector<64xf32>
    %49 = vector.multi_reduction <add>, %48, %cst_25 [0] : vector<49x64xf32> to vector<64xf32>
    %50 = vector.shape_cast %49 : vector<64xf32> to vector<1x64xf32>
    %c196 = arith.constant 196 : index
    %c0_26 = arith.constant 0 : index
    %51 = vector.load %arg1[%c196, %c0_26] : memref<784x64xbf16, #tpu.memory_space<vmem>>, vector<49x64xbf16>
    %52 = arith.extf %51 : vector<49x64xbf16> to vector<49x64xf32>
    %cst_27 = arith.constant dense<0.000000e+00> : vector<64xf32>
    %53 = vector.multi_reduction <add>, %52, %cst_27 [0] : vector<49x64xf32> to vector<64xf32>
    %54 = vector.shape_cast %53 : vector<64xf32> to vector<1x64xf32>
    %c245 = arith.constant 245 : index
    %c0_28 = arith.constant 0 : index
    %55 = vector.load %arg1[%c245, %c0_28] : memref<784x64xbf16, #tpu.memory_space<vmem>>, vector<49x64xbf16>
    %56 = arith.extf %55 : vector<49x64xbf16> to vector<49x64xf32>
    %cst_29 = arith.constant dense<0.000000e+00> : vector<64xf32>
    %57 = vector.multi_reduction <add>, %56, %cst_29 [0] : vector<49x64xf32> to vector<64xf32>
    %58 = vector.shape_cast %57 : vector<64xf32> to vector<1x64xf32>
    %c294 = arith.constant 294 : index
    %c0_30 = arith.constant 0 : index
    %59 = vector.load %arg1[%c294, %c0_30] : memref<784x64xbf16, #tpu.memory_space<vmem>>, vector<49x64xbf16>
    %60 = arith.extf %59 : vector<49x64xbf16> to vector<49x64xf32>
    %cst_31 = arith.constant dense<0.000000e+00> : vector<64xf32>
    %61 = vector.multi_reduction <add>, %60, %cst_31 [0] : vector<49x64xf32> to vector<64xf32>
    %62 = vector.shape_cast %61 : vector<64xf32> to vector<1x64xf32>
    %c343 = arith.constant 343 : index
    %c0_32 = arith.constant 0 : index
    %63 = vector.load %arg1[%c343, %c0_32] : memref<784x64xbf16, #tpu.memory_space<vmem>>, vector<49x64xbf16>
    %64 = arith.extf %63 : vector<49x64xbf16> to vector<49x64xf32>
    %cst_33 = arith.constant dense<0.000000e+00> : vector<64xf32>
    %65 = vector.multi_reduction <add>, %64, %cst_33 [0] : vector<49x64xf32> to vector<64xf32>
    %66 = vector.shape_cast %65 : vector<64xf32> to vector<1x64xf32>
    %c392 = arith.constant 392 : index
    %c0_34 = arith.constant 0 : index
    %67 = vector.load %arg1[%c392, %c0_34] : memref<784x64xbf16, #tpu.memory_space<vmem>>, vector<49x64xbf16>
    %68 = arith.extf %67 : vector<49x64xbf16> to vector<49x64xf32>
    %cst_35 = arith.constant dense<0.000000e+00> : vector<64xf32>
    %69 = vector.multi_reduction <add>, %68, %cst_35 [0] : vector<49x64xf32> to vector<64xf32>
    %70 = vector.shape_cast %69 : vector<64xf32> to vector<1x64xf32>
    %c441 = arith.constant 441 : index
    %c0_36 = arith.constant 0 : index
    %71 = vector.load %arg1[%c441, %c0_36] : memref<784x64xbf16, #tpu.memory_space<vmem>>, vector<49x64xbf16>
    %72 = arith.extf %71 : vector<49x64xbf16> to vector<49x64xf32>
    %cst_37 = arith.constant dense<0.000000e+00> : vector<64xf32>
    %73 = vector.multi_reduction <add>, %72, %cst_37 [0] : vector<49x64xf32> to vector<64xf32>
    %74 = vector.shape_cast %73 : vector<64xf32> to vector<1x64xf32>
    %c490 = arith.constant 490 : index
    %c0_38 = arith.constant 0 : index
    %75 = vector.load %arg1[%c490, %c0_38] : memref<784x64xbf16, #tpu.memory_space<vmem>>, vector<49x64xbf16>
    %76 = arith.extf %75 : vector<49x64xbf16> to vector<49x64xf32>
    %cst_39 = arith.constant dense<0.000000e+00> : vector<64xf32>
    %77 = vector.multi_reduction <add>, %76, %cst_39 [0] : vector<49x64xf32> to vector<64xf32>
    %78 = vector.shape_cast %77 : vector<64xf32> to vector<1x64xf32>
    %c539 = arith.constant 539 : index
    %c0_40 = arith.constant 0 : index
    %79 = vector.load %arg1[%c539, %c0_40] : memref<784x64xbf16, #tpu.memory_space<vmem>>, vector<49x64xbf16>
    %80 = arith.extf %79 : vector<49x64xbf16> to vector<49x64xf32>
    %cst_41 = arith.constant dense<0.000000e+00> : vector<64xf32>
    %81 = vector.multi_reduction <add>, %80, %cst_41 [0] : vector<49x64xf32> to vector<64xf32>
    %82 = vector.shape_cast %81 : vector<64xf32> to vector<1x64xf32>
    %c588 = arith.constant 588 : index
    %c0_42 = arith.constant 0 : index
    %83 = vector.load %arg1[%c588, %c0_42] : memref<784x64xbf16, #tpu.memory_space<vmem>>, vector<49x64xbf16>
    %84 = arith.extf %83 : vector<49x64xbf16> to vector<49x64xf32>
    %cst_43 = arith.constant dense<0.000000e+00> : vector<64xf32>
    %85 = vector.multi_reduction <add>, %84, %cst_43 [0] : vector<49x64xf32> to vector<64xf32>
    %86 = vector.shape_cast %85 : vector<64xf32> to vector<1x64xf32>
    %c637 = arith.constant 637 : index
    %c0_44 = arith.constant 0 : index
    %87 = vector.load %arg1[%c637, %c0_44] : memref<784x64xbf16, #tpu.memory_space<vmem>>, vector<49x64xbf16>
    %88 = arith.extf %87 : vector<49x64xbf16> to vector<49x64xf32>
    %cst_45 = arith.constant dense<0.000000e+00> : vector<64xf32>
    %89 = vector.multi_reduction <add>, %88, %cst_45 [0] : vector<49x64xf32> to vector<64xf32>
    %90 = vector.shape_cast %89 : vector<64xf32> to vector<1x64xf32>
    %c686 = arith.constant 686 : index
    %c0_46 = arith.constant 0 : index
    %91 = vector.load %arg1[%c686, %c0_46] : memref<784x64xbf16, #tpu.memory_space<vmem>>, vector<49x64xbf16>
    %92 = arith.extf %91 : vector<49x64xbf16> to vector<49x64xf32>
    %cst_47 = arith.constant dense<0.000000e+00> : vector<64xf32>
    %93 = vector.multi_reduction <add>, %92, %cst_47 [0] : vector<49x64xf32> to vector<64xf32>
    %94 = vector.shape_cast %93 : vector<64xf32> to vector<1x64xf32>
    %c735 = arith.constant 735 : index
    %c0_48 = arith.constant 0 : index
    %95 = vector.load %arg1[%c735, %c0_48] : memref<784x64xbf16, #tpu.memory_space<vmem>>, vector<49x64xbf16>
    %96 = arith.extf %95 : vector<49x64xbf16> to vector<49x64xf32>
    %cst_49 = arith.constant dense<0.000000e+00> : vector<64xf32>
    %97 = vector.multi_reduction <add>, %96, %cst_49 [0] : vector<49x64xf32> to vector<64xf32>
    %98 = vector.shape_cast %97 : vector<64xf32> to vector<1x64xf32>
    %99 = tpu.concatenate %38, %42, %46, %50, %54, %58, %62, %66, %70, %74, %78, %82, %86, %90, %94, %98 in 0 : vector<1x64xf32>, vector<1x64xf32>, vector<1x64xf32>, vector<1x64xf32>, vector<1x64xf32>, vector<1x64xf32>, vector<1x64xf32>, vector<1x64xf32>, vector<1x64xf32>, vector<1x64xf32>, vector<1x64xf32>, vector<1x64xf32>, vector<1x64xf32>, vector<1x64xf32>, vector<1x64xf32>, vector<1x64xf32> -> vector<16x64xf32>
    %100 = arith.truncf %99 : vector<16x64xf32> to vector<16x64xbf16>
    %c0_50 = arith.constant 0 : index
    %c0_51 = arith.constant 0 : index
    %101 = vector.load %arg2[%c0_50, %c0_51] : memref<64x128xbf16, #tpu.memory_space<vmem>>, vector<64x128xbf16>
    %cst_52 = arith.constant dense<0.000000e+00> : vector<16x128xf32>
    %102 = tpu.matmul %100, %101, %cst_52 {dimension_numbers = #tpu.dot_dimension_numbers<[1], [0], [0], [1], [0, 0, 1, 1], [], []>} : vector<16x64xbf16>, vector<64x128xbf16>, vector<16x128xf32> -> vector<16x128xf32>
    %c0_53 = arith.constant 0 : index
    %c0_54 = arith.constant 0 : index
    %103 = vector.load %arg3[%c0_53, %c0_54] : memref<1x128xf32, #tpu.memory_space<vmem>>, vector<1x128xf32>
    %104 = vector.broadcast %103 : vector<1x128xf32> to vector<16x128xf32>
    %105 = arith.addf %102, %104 : vector<16x128xf32>
    %106 = tpu.iota {dimensions = array<i32: 1>} : vector<16x128xi32>
    %c8_i32 = arith.constant 8 : i32
    %107 = vector.broadcast %c8_i32 : i32 to vector<16x128xi32>
    %108 = arith.cmpi slt, %106, %107 : vector<16x128xi32>
    %cst_55 = arith.constant 0xFF800000 : f32
    %109 = vector.broadcast %cst_55 : f32 to vector<16x128xf32>
    %110 = arith.select %108, %105, %109 : vector<16x128xi1>, vector<16x128xf32>
    %cst_56 = arith.constant dense<0xFF800000> : vector<16xf32>
    %111 = vector.multi_reduction <maximumf>, %110, %cst_56 [1] : vector<16x128xf32> to vector<16xf32>
    %112 = vector.shape_cast %111 : vector<16xf32> to vector<16x1xf32>
    %113 = vector.shape_cast %112 : vector<16x1xf32> to vector<16x1xf32>
    %114 = vector.broadcast %113 : vector<16x1xf32> to vector<16x128xf32>
    %115 = arith.select %108, %105, %114 : vector<16x128xi1>, vector<16x128xf32>
    %116 = vector.broadcast %112 : vector<16x1xf32> to vector<16x128xf32>
    %117 = arith.subf %115, %116 : vector<16x128xf32>
    %118 = math.exp %117 : vector<16x128xf32>
    %cst_57 = arith.constant 0.000000e+00 : f32
    %119 = vector.broadcast %cst_57 : f32 to vector<16x128xf32>
    %120 = arith.select %108, %118, %119 : vector<16x128xi1>, vector<16x128xf32>
    %cst_58 = arith.constant dense<0.000000e+00> : vector<16xf32>
    %121 = vector.multi_reduction <add>, %120, %cst_58 [1] : vector<16x128xf32> to vector<16xf32>
    %122 = vector.shape_cast %121 : vector<16xf32> to vector<16x1xf32>
    %123 = tpu.reciprocal %122 {approx = true} : vector<16x1xf32> -> vector<16x1xf32>
    %124 = vector.broadcast %123 : vector<16x1xf32> to vector<16x128xf32>
    %125 = arith.mulf %120, %124 : vector<16x128xf32>
    %126 = arith.select %108, %125, %105 : vector<16x128xi1>, vector<16x128xf32>
    %c0_59 = arith.constant 0 : index
    %c0_60 = arith.constant 0 : index
    %127 = vector.load %arg8[%c0_59, %c0_60] : memref<16x128xf32, #tpu.memory_space<vmem>>, vector<16x128xf32>
    tpu.vector_store %arg8[%c0_59, %c0_60], %126 {strides = array<i32>} : memref<16x128xf32, #tpu.memory_space<vmem>>, vector<16x128xf32>,
    return
  }
  func.func @transform_0(%arg0: i32) -> (i32, i32) {
    %c0_i32 = arith.constant 0 : i32
    %c0_i32_0 = arith.constant 0 : i32
    return %arg0, %c0_i32 : i32, i32
  }
  func.func @transform_1(%arg0: i32) -> (i32, i32) {
    %c0_i32 = arith.constant 0 : i32
    %c0_i32_0 = arith.constant 0 : i32
    %c0_i32_1 = arith.constant 0 : i32
    return %c0_i32, %c0_i32_0 : i32, i32
  }
  func.func @transform_2(%arg0: i32) -> (i32, i32) {
    %c0_i32 = arith.constant 0 : i32
    %c0_i32_0 = arith.constant 0 : i32
    %c0_i32_1 = arith.constant 0 : i32
    return %c0_i32, %c0_i32_0 : i32, i32
  }
  func.func @transform_3(%arg0: i32) -> (i32, i32) {
    %c0_i32 = arith.constant 0 : i32
    %c0_i32_0 = arith.constant 0 : i32
    %c0_i32_1 = arith.constant 0 : i32
    return %c0_i32, %c0_i32_0 : i32, i32
  }
  func.func @transform_4(%arg0: i32) -> (i32, i32) {
    %c0_i32 = arith.constant 0 : i32
    %c0_i32_0 = arith.constant 0 : i32
    %c0_i32_1 = arith.constant 0 : i32
    return %c0_i32, %c0_i32_0 : i32, i32
  }
  func.func @transform_5(%arg0: i32) -> (i32, i32) {
    %c0_i32 = arith.constant 0 : i32
    %c0_i32_0 = arith.constant 0 : i32
    %c0_i32_1 = arith.constant 0 : i32
    return %c0_i32, %c0_i32_0 : i32, i32
  }
  func.func @transform_6(%arg0: i32) -> (i32, i32) {
    %c0_i32 = arith.constant 0 : i32
    %c0_i32_0 = arith.constant 0 : i32
    %c0_i32_1 = arith.constant 0 : i32
    return %c0_i32, %c0_i32_0 : i32, i32
  }
  func.func @transform_7(%arg0: i32) -> (i32, i32) {
    %c0_i32 = arith.constant 0 : i32
    %c0_i32_0 = arith.constant 0 : i32
    return %arg0, %c0_i32 : i32, i32
  }
  func.func @transform_8(%arg0: i32) -> (i32, i32) {
    %c0_i32 = arith.constant 0 : i32
    %c0_i32_0 = arith.constant 0 : i32
    return %arg0, %c0_i32 : i32, i32
  }
}

</mosaic_0001>

<bundles_post_ra>
// kernel: tpu_custom_call.1
= control target key start
LH: loop header
LB: loop body
LE: loop exit
PB: predicated region body
PF: predicated region fallthrough
CT: control target
= control target key end

     0   :  { %14 = vsyncpa [#allocation3], 0  ;;  %s15552_s0 = inlined_call_operand.vmem [shape: bf16[1568,64], index: 0, kind: input, shape index: {}]   ;;  %s15553_s1 = inlined_call_operand.vmem [shape: bf16[64,128], index: 1, kind: input, shape index: {}]   ;;  %s15554_s2 = inlined_call_operand.vmem [shape: f32[1,128], index: 2, kind: input, shape index: {}]   ;;  %s15555_s3 = inlined_call_operand.vmem [shape: bf16[64,128], index: 3, kind: input, shape index: {}]   ;;  %s15556_s4 = inlined_call_operand.vmem [shape: f32[1,128], index: 4, kind: input, shape index: {}]   ;;  %s15557_s5 = inlined_call_operand.vmem [shape: bf16[32,32], index: 5, kind: input, shape index: {}]   ;;  %s15558_s6 = inlined_call_operand.vmem [shape: f32[1,32], index: 6, kind: input, shape index: {}]   ;;  %s15559_s7 = inlined_call_operand.hbm [shape: f32[32,128], index: 7, kind: output, shape index: {0}]   ;;  %s15560_s8 = inlined_call_operand.hbm [shape: bf16[1568,128], index: 8, kind: output, shape index: {1}]  }
   0x1   :  { %16 = vsyncpa [#allocation3 + $0x1], 0 }
   0x2   :  { %17 = vsyncpa [#allocation5], 0 }
   0x3   :  { %19 = vsyncpa [#allocation5 + $0x1], 0  ;;  %s10840_s27 = smov 0   ;;  %s10842_s28 = smov 0  }
   0x4   :  { %s10844_s29 = smov 0   ;;  %s10846_s30 = smov 0  }
   0x5 LB: > { %s10861_s9 = sadd.s32 4294967295, %s10783_s30   ;;  %s7798_s10 = sadd.s32 4294967294, %s10783_s30   ;;  %s10783_s30 = sphi %s10846_s30, %s16210_s30   ;;  %s10779_s29 = sphi %s10844_s29, %s16209_s29   ;;  %s10775_s28 = sphi %s10842_s28, %s16208_s28   ;;  %s10771_s27 = sphi %s10840_s27, %s16207_s27  }
   0x6   : > { %s10865_s11 = sadd.s32 1, %s10783_s30   ;;  %s184_s12 = sadd.s32 1, %s10779_s29 }
   0x7   : > { %s181_s13 = ssub.s32 %s10783_s30, %s10865_s11  ;;  %p194_p0 = scmp.ne.s32.totalorder %s10779_s29, %s10775_s28 }
   0x8   : > { %p182_p1 = scmp.eq.s32.totalorder %s181_s13, 0  ;;  %p195_p2 = scmp.eq.s32.totalorder %s10861_s9, 1 }
   0x9   : > { %p200_p3 = scmp.ne.s32.totalorder %s10775_s28, %s10771_s27  ;;  %p201_p4 = scmp.eq.s32.totalorder %s7798_s10, 1 }
   0xa   : > { %s10876_s14 = scalar_select %p182_p1, %s10779_s29, %s184_s12  }
   0xb   : > { %p10878_p5 = por %p195_p2, %p194_p0  ;;  %p10882_p6 = por %p201_p4, %p200_p3 }
   0xc   : > { %p7801_p7 = scmp.ge.s32.totalorder %s10783_s30, 1  ;;  %p272_p8 = scmp.lt.s32.totalorder %s10783_s30, 3 }
   0xe   : > { %p273_p9 = pnand %p7801_p7, %p272_p8 }
  0x10   : > { %276 = sbr.rel (%p273_p9) target bundleno = 1850 (0x73a), region = 48 }
  0x17   : > { %v10221_v0 = vld [vmem:[%s15555_s3] sm:$0xff]   ;;  %v15561_v1 = vmov 0.0   ;;  %v10222_v2 = vld [vmem:[%s15555_s3 + $0x8] sm:$0xff]   ;;  %vm10786_vm0 = vmmov 0   ;;  %s311_s21 = smul.u32 98, %s10861_s9  ;;  %v10223_v3 = vld [vmem:[%s15555_s3 + $0x10] sm:$0xff]  }
  0x18   : > { %9148 = vmatprep.subr.bf16.mxu0 %v15561_v1  ;;  %10164 = vmatprep.subr.bf16.mxu1 %v15561_v1  ;;  %v10224_v4 = vld [vmem:[%s15555_s3 + $0x18] sm:$0xff]   ;;  %vm702_vm1 = vcmask 523264   ;;  %v10937_v10 = vld [vmem:[%s15557_s5] sm:$0xff]   ;;  %vm1445_vm2 = vcmask 261120   ;;  %s10789_s25 = smov 32   ;;  %vm6681_vm3 = vcmask 1046528  }
  0x19   : > { %9149 = vmatpush3.bf16.msra.mxu0 %v10221_v0  ;;  %9156 = vmatprep.mubr.msk.bf16.mxu0 %vm10786_vm0, %v15561_v1  ;;  %p312_p10 = scmp.lt.s32.totalorder %s311_s21, 195  ;;  %v11034_v33 = vld [vmem:[%s15556_s4] ss:$0 sm:$0xff]  ;;  %v11069_v0 = vld [vmem:[%s15557_s5 + $0x8] sm:$0xff]   ;;  %vm6742_vm4 = vcmask 1045504   ;;  %vm6651_vm5 = vcmask 516096  }
  0x1a   : > { %9150 = vmatprep.subr.bf16.mxu0 %v15561_v1  ;;  %9448 = vmatprep.mubr.msk.bf16.mxu1 %vm10786_vm0, %v15561_v1  ;;  %vm6803_vm6 = vcmask 1044480   ;;  %vm6864_vm7 = vcmask 1043456   ;;  %vm6925_vm8 = vcmask 1042432   ;;  %vm6986_vm9 = vcmask 1041408   ;;  %s14703_s20 = sand.u32 1, %s10775_s28   ;;  %s10790_s12 = smov [#allocation4]  }
  0x1b   : > { %s16212_s21 = smov (!%p312_p10, %s311_s21), 195  ;;  %10166 = vmatpush3.bf16.msra.mxu1 %v10937_v10  ;;  %vm7047_vm10 = vcmask 1040384   ;;  %vm5449_vm12 = vcmask 785408   ;;  %s10168_s22 = smul.u32 392, %s14703_s20 }
  0x1c   : > { %s7803_s24 = sshll.u32 %s16212_s21, 2  ;;  %10165 = vmatprep.subr.bf16.mxu1 %v15561_v1  ;;  %s10787_s21 = smov 96  }
  0x1d   : > { %9151 = vmatpush3.bf16.msra.mxu0 %v10222_v2  ;;  %s10909_s10 = scalar_lea.vmem %s15552_s0, %s7803_s24  ;;  %s10788_s24 = smov 64  }
  0x1e   : > { %9152 = vmatprep.subr.bf16.mxu0 %v15561_v1  ;;  %v10225_v5 = vld [vmem:[%s10909_s10] sm:$0xff]   ;;  %v10226_v6 = vld [vmem:[%s10909_s10 + $0x8] sm:$0xff]   ;;  %v10227_v7 = vld [vmem:[%s10909_s10 + $0x10] sm:$0xff]   ;;  %s14746_s23 = scalar_lea.vmem [#allocation4], %s10168_s22  ;;  %s7675_s22 = scalar_lea.sflag [#allocation5], %s14703_s20 }
  0x1f   : > { %v10228_v8 = vld [vmem:[%s10909_s10 + $0x18] sm:$0xff]   ;;  %v10229_v9 = vld [vmem:[%s10909_s10 + $0x20] sm:$0xff]   ;;  %v10230_v11 = vld [vmem:[%s10909_s10 + $0x28] sm:$0xff]   ;;  %10167 = vmatpush3.bf16.msra.mxu1 %v11069_v0  ;;  %s7704_s17 = sshll.u32 %s14746_s23, 4  ;;  %s15460_s17 = int_to_ptr.vmem [resolvable:$true] %s7704_s17 }
  0x20   : > { %v10231_v12 = vld [vmem:[%s10909_s10 + $0x30] sm:$0xff]   ;;  %v10232_v13 = vld [vmem:[%s10909_s10 + $0x38] sm:$0xff]   ;;  %v10233_v14 = vld [vmem:[%s10909_s10 + $0x40] sm:$0xff]   ;;  %9552 = vmatprep.subr.bf16.mxu1 %v15561_v1  ;;  %s10689_s26 = scalar_lea.vmem %s15460_s17, 6272 }
  0x21   : > { %9153 = vmatpush3.bf16.msra.mxu0 %v10223_v3  ;;  %v10234_v15 = vld [vmem:[%s10909_s10 + $0x48] sm:$0xff]   ;;  %v10235_v16 = vld [vmem:[%s10909_s10 + $0x50] sm:$0xff]   ;;  %v10236_v17 = vld [vmem:[%s10909_s10 + $0x58] sm:$0xff]   ;;  %p10690_p11 = scmp.ne.s32.totalorder %s15460_s17, %s10689_s26 }
  0x22   : > { %9154 = vmatprep.subr.bf16.mxu0 %v15561_v1  ;;  %v10237_v18 = vld [vmem:[%s10909_s10 + $0x60] sm:$0xff]   ;;  %v10238_v19 = vld [vmem:[%s10909_s10 + $0x68] sm:$0xff]   ;;  %v10239_v20 = vld [vmem:[%s10909_s10 + $0x70] sm:$0xff]  }
  0x23   : > { %v10240_v21 = vld [vmem:[%s10909_s10 + $0x78] sm:$0xff]   ;;  %v10241_v22 = vld [vmem:[%s10909_s10 + $0x80] sm:$0xff]   ;;  %v10242_v23 = vld [vmem:[%s10909_s10 + $0x88] sm:$0xff]   ;;  %p10691_p12 = pnand %p10690_p11, %p10878_p5 }
  0x24   : > { %v10243_v24 = vld [vmem:[%s10909_s10 + $0x90] sm:$0xff]   ;;  %v10244_v25 = vld [vmem:[%s10909_s10 + $0x98] sm:$0xff]   ;;  %v10245_v26 = vld [vmem:[%s10909_s10 + $0xa0] sm:$0xff]  }
  0x25   : > { %9155 = vmatpush3.bf16.msra.mxu0 %v10224_v4  ;;  %v10247_v27 = vld [vmem:[%s10909_s10 + $0xa8] sm:$0xff]   ;;  %v10248_v28 = vld [vmem:[%s10909_s10 + $0xb0] sm:$0xff]   ;;  %v10249_v29 = vld [vmem:[%s10909_s10 + $0xb8] sm:$0xff]   ;;  %p10692_p13 = pneg %p10691_p12 }
  0x26   : > { %9352 = vmatprep.subr.bf16.mxu0 %v15561_v1  ;;  %v10250_v30 = vld [vmem:[%s10909_s10 + $0xc0] sm:$0xff]   ;;  %v10251_v31 = vld [vmem:[%s10909_s10 + $0xc8] sm:$0xff]   ;;  %v10252_v32 = vld [vmem:[%s10909_s10 + $0xd0] sm:$0xff]  }
  0x27   : > { %v10253_v37 = vld [vmem:[%s10909_s10 + $0xd8] sm:$0xff]   ;;  %v10254_v47 = vld [vmem:[%s10909_s10 + $0xe0] sm:$0xff]   ;;  %v10255_v57 = vld [vmem:[%s10909_s10 + $0xe8] sm:$0xff]  }
  0x28   : > { %9157 = vmatmul.mubr.msk.bf16.vlgmr.msra.gmra.mrb[0].mxu0 %vm702_vm1, %v10225_v5  ;;  %v10256_v5 = vld [vmem:[%s10909_s10 + $0xf0] sm:$0xff]  }
  0x29   : > { %9160 = vmatprep.mubr.msk.bf16.mxu0 %vm10786_vm0, %v15561_v1  ;;  %9353 = vmatpush3.bf16.msra.mxu0 %v10937_v10 }
  0x2a   : > { %9354 = vmatprep.subr.bf16.mxu0 %v15561_v1 }
  0x2d   : > { %9355 = vmatpush3.bf16.msra.mxu0 %v11069_v0 }
  0x2e   : > { %9752 = vmatprep.subr.bf16.mxu0 %v15561_v1 }
  0x30   : > { %9161 = vmatmul.mubr.msk.bf16.gmra.mrb[4].mxu0 %vm702_vm1, %v10226_v6 }
  0x31   : > { %9164 = vmatprep.mubr.msk.bf16.mxu0 %vm10786_vm0, %v15561_v1 }
  0x38   : > { %9165 = vmatmul.mubr.msk.bf16.gmra.mrb[8].mxu0 %vm702_vm1, %v10227_v7 }
  0x39   : > { %9168 = vmatprep.mubr.msk.bf16.mxu0 %vm10786_vm0, %v15561_v1 }
  0x40   : > { %9169 = vmatmul.mubr.msk.bf16.gmra.mrb[12].mxu0 %vm702_vm1, %v10228_v8 }
  0x41   : > { %9172 = vmatprep.mubr.msk.bf16.mxu0 %vm10786_vm0, %v15561_v1 }
  0x48   : > { %9173 = vmatmul.mubr.msk.bf16.gmra.mrb[16].mxu0 %vm702_vm1, %v10229_v9 }
  0x49   : > { %9176 = vmatprep.mubr.msk.bf16.mxu0 %vm10786_vm0, %v15561_v1 }
  0x50   : > { %9177 = vmatmul.mubr.msk.bf16.gmra.mrb[20].mxu0 %vm702_vm1, %v10230_v11 }
  0x51   : > { %9180 = vmatprep.mubr.msk.bf16.mxu0 %vm10786_vm0, %v15561_v1 }
  0x58   : > { %9181 = vmatmul.mubr.msk.bf16.gmra.mrb[24].mxu0 %vm702_vm1, %v10231_v12 }
  0x59   : > { %9184 = vmatprep.mubr.msk.bf16.mxu0 %vm10786_vm0, %v15561_v1 }
  0x60   : > { %9185 = vmatmul.mubr.msk.bf16.gmra.mrb[28].mxu0 %vm702_vm1, %v10232_v13 }
  0x61   : > { %9188 = vmatprep.mubr.msk.bf16.mxu0 %vm10786_vm0, %v15561_v1 }
  0x68   : > { %9189 = vmatmul.mubr.msk.bf16.gmra.mrb[32].mxu0 %vm702_vm1, %v10233_v14 }
  0x69   : > { %9192 = vmatprep.mubr.msk.bf16.mxu0 %vm10786_vm0, %v15561_v1 }
  0x70   : > { %9193 = vmatmul.mubr.msk.bf16.gmra.mrb[36].mxu0 %vm702_vm1, %v10234_v15 }
  0x71   : > { %9196 = vmatprep.mubr.msk.bf16.mxu0 %vm10786_vm0, %v15561_v1 }
  0x78   : > { %9197 = vmatmul.mubr.msk.bf16.gmra.mrb[40].mxu0 %vm702_vm1, %v10235_v16  ;;  %v10257_v16 = vld [vmem:[%s10909_s10 + $0xf8] sm:$0xff]  }
  0x79   : > { %9200 = vmatprep.mubr.msk.bf16.mxu0 %vm10786_vm0, %v15561_v1 }
  0x80   : > { %9201 = vmatmul.mubr.msk.bf16.gmra.mrb[44].mxu0 %vm702_vm1, %v10236_v17 }
  0x81   : > { %9204 = vmatprep.mubr.msk.bf16.mxu0 %vm10786_vm0, %v15561_v1 }
  0x88   : > { %9205 = vmatmul.mubr.msk.bf16.gmra.mrb[48].mxu0 %vm702_vm1, %v10237_v18 }
  0x89   : > { %9208 = vmatprep.mubr.msk.bf16.mxu0 %vm10786_vm0, %v15561_v1 }
  0x90   : > { %9209 = vmatmul.mubr.msk.bf16.gmra.mrb[52].mxu0 %vm702_vm1, %v10238_v19 }
  0x91   : > { %9212 = vmatprep.mubr.msk.bf16.mxu0 %vm10786_vm0, %v15561_v1 }
  0x98   : > { %9213 = vmatmul.mubr.msk.bf16.gmra.mrb[56].mxu0 %vm702_vm1, %v10239_v20 }
  0x99   : > { %9216 = vmatprep.mubr.msk.bf16.mxu0 %vm10786_vm0, %v15561_v1 }
  0xa0   : > { %9217 = vmatmul.mubr.msk.bf16.gmra.mrb[60].mxu0 %vm702_vm1, %v10240_v21 }
  0xa1   : > { %9220 = vmatprep.mubr.msk.bf16.mxu0 %vm10786_vm0, %v15561_v1 }
  0xa8   : > { %9221 = vmatmul.mubr.msk.bf16.gmra.mrb[64].mxu0 %vm702_vm1, %v10241_v22 }
  0xa9   : > { %9224 = vmatprep.mubr.msk.bf16.mxu0 %vm10786_vm0, %v15561_v1 }
  0xb0   : > { %9225 = vmatmul.mubr.msk.bf16.gmra.mrb[68].mxu0 %vm702_vm1, %v10242_v23 }
  0xb1   : > { %9228 = vmatprep.mubr.msk.bf16.mxu0 %vm10786_vm0, %v15561_v1 }
  0xb8   : > { %9229 = vmatmul.mubr.msk.bf16.gmra.mrb[72].mxu0 %vm702_vm1, %v10243_v24 }
  0xb9   : > { %9232 = vmatprep.mubr.msk.bf16.mxu0 %vm10786_vm0, %v15561_v1 }
  0xc0   : > { %9233 = vmatmul.mubr.msk.bf16.gmra.mrb[76].mxu0 %vm702_vm1, %v10244_v25 }
  0xc1   : > { %9236 = vmatprep.mubr.msk.bf16.mxu0 %vm10786_vm0, %v15561_v1 }
  0xc8   : > { %9237 = vmatmul.mubr.msk.bf16.gmra.mrb[80].mxu0 %vm702_vm1, %v10245_v26  ;;  %v10258_v26 = vld [vmem:[%s10909_s10 + $0x100] sm:$0xff]  }
  0xc9   : > { %9240 = vmatprep.mubr.msk.bf16.mxu0 %vm10786_vm0, %v15561_v1 }
  0xd0   : > { %9241 = vmatmul.mubr.msk.bf16.gmra.mrb[84].mxu0 %vm702_vm1, %v10247_v27 }
  0xd1   : > { %9244 = vmatprep.mubr.msk.bf16.mxu0 %vm10786_vm0, %v15561_v1 }
  0xd8   : > { %9245 = vmatmul.mubr.msk.bf16.gmra.mrb[88].mxu0 %vm702_vm1, %v10248_v28 }
  0xd9   : > { %9248 = vmatprep.mubr.msk.bf16.mxu0 %vm10786_vm0, %v15561_v1 }
  0xe0   : > { %9249 = vmatmul.mubr.msk.bf16.gmra.mrb[92].mxu0 %vm702_vm1, %v10249_v29 }
  0xe1   : > { %9252 = vmatprep.mubr.msk.bf16.mxu0 %vm10786_vm0, %v15561_v1 }
  0xe8   : > { %9253 = vmatmul.mubr.msk.bf16.gmra.mrb[96].mxu0 %vm702_vm1, %v10250_v30 }
  0xe9   : > { %9256 = vmatprep.mubr.msk.bf16.mxu0 %vm10786_vm0, %v15561_v1 }
  0xf0   : > { %9257 = vmatmul.mubr.msk.bf16.gmra.mrb[100].mxu0 %vm702_vm1, %v10251_v31 }
  0xf1   : > { %9260 = vmatprep.mubr.msk.bf16.mxu0 %vm10786_vm0, %v15561_v1 }
  0xf8   : > { %9261 = vmatmul.mubr.msk.bf16.gmra.mrb[104].mxu0 %vm702_vm1, %v10252_v32 }
  0xf9   : > { %9264 = vmatprep.mubr.msk.bf16.mxu0 %vm10786_vm0, %v15561_v1 }
  0xfb   : > { %v884_v34 = vpop.f32.mrb[0].mxu0 }
  0xfc   : > { %v885_v35 = vadd.f32 %v11034_v33, %v884_v34  ;;  %v9158_v36 = vpop.f32.mrb[1].mxu0 }
  0xfd   : > { %v887_v38 = vpop.f32.mrb[2].mxu0 }
  0xfe   : > { %v888_v39 = vadd.f32 %v11034_v33, %v887_v38  ;;  %v9159_v40 = vpop.f32.mrb[3].mxu0  ;;  %v1275_v41 = vmax.f32 %v885_v35, 0.0 }
 0x100   : > { %v1276_v42 = vmax.f32 %v888_v39, 0.0  ;;  %9265 = vmatmul.mubr.msk.bf16.gmra.mrb[108].mxu0 %vm702_vm1, %v10253_v37  ;;  %v10259_v37 = vld [vmem:[%s10909_s10 + $0x108] sm:$0xff]  }
 0x101   : > { %9268 = vmatprep.mubr.msk.bf16.mxu0 %vm10786_vm0, %v15561_v1 }
 0x102   : > { %v11044_v43 = vpack.c.bf16 %v1276_v42, %v1275_v41 }
 0x103   : > { %v892_v44 = vpop.f32.mrb[4].mxu0 }
 0x104   : > { %v893_v45 = vadd.f32 %v11034_v33, %v892_v44  ;;  %2067 = vrot.lane.b32.xlu0 %v11044_v43, %s10787_s21  ;;  %v9162_v46 = vpop.f32.mrb[5].mxu0 }
 0x105   : > { %v895_v48 = vpop.f32.mrb[6].mxu0 }
 0x106   : > { %v896_v49 = vadd.f32 %v11034_v33, %v895_v48  ;;  %v9163_v50 = vpop.f32.mrb[7].mxu0  ;;  %v1277_v51 = vmax.f32 %v893_v45, 0.0  ;;  %v10260_v48 = vld [vmem:[%s10909_s10 + $0x110] sm:$0xff]  }
 0x108   : > { %v1278_v52 = vmax.f32 %v896_v49, 0.0  ;;  %9269 = vmatmul.mubr.msk.bf16.gmra.mrb[112].mxu0 %vm702_vm1, %v10254_v47 }
 0x109   : > { %9272 = vmatprep.mubr.msk.bf16.mxu0 %vm10786_vm0, %v15561_v1 }
 0x10a   : > { %v11054_v53 = vpack.c.bf16 %v1278_v52, %v1277_v51 }
 0x10b   : > { %v900_v54 = vpop.f32.mrb[8].mxu0 }
 0x10c   : > { %v901_v55 = vadd.f32 %v11034_v33, %v900_v54  ;;  %2069 = vrot.lane.b32.xlu0 %v11054_v53, %s10787_s21  ;;  %v9166_v56 = vpop.f32.mrb[9].mxu0 }
 0x10d   : > { %v903_v58 = vpop.f32.mrb[10].mxu0 }
 0x10e   : > { %v904_v59 = vadd.f32 %v11034_v33, %v903_v58  ;;  %v9167_v60 = vpop.f32.mrb[11].mxu0  ;;  %v1279_v61 = vmax.f32 %v901_v55, 0.0 }
 0x110   : > { %v1280_v62 = vmax.f32 %v904_v59, 0.0  ;;  %9273 = vmatmul.mubr.msk.bf16.gmra.mrb[116].mxu0 %vm702_vm1, %v10255_v57  ;;  %v10261_v59 = vld [vmem:[%s10909_s10 + $0x118] sm:$0xff]  }
 0x111   : > { %9276 = vmatprep.mubr.msk.bf16.mxu0 %vm10786_vm0, %v15561_v1 }
 0x112   : > { %v11064_v63 = vpack.c.bf16 %v1280_v62, %v1279_v61 }
 0x113   : > { %v908_v2 = vpop.f32.mrb[12].mxu0 }
 0x114   : > { %v909_v3 = vadd.f32 %v11034_v33, %v908_v2  ;;  %2071 = vrot.lane.b32.xlu1 %v11064_v63, %s10787_s21  ;;  %v9170_v4 = vpop.f32.mrb[13].mxu0 }
 0x115   : > { %v911_v6 = vpop.f32.mrb[14].mxu0 }
 0x116   : > { %v912_v7 = vadd.f32 %v11034_v33, %v911_v6  ;;  %v9171_v8 = vpop.f32.mrb[15].mxu0  ;;  %v1281_v9 = vmax.f32 %v909_v3, 0.0 }
 0x117   : > { %v10262_v8 = vld [vmem:[%s10909_s10 + $0x120] sm:$0xff]  }
 0x118   : > { %v1282_v11 = vmax.f32 %v912_v7, 0.0  ;;  %9277 = vmatmul.mubr.msk.bf16.gmra.mrb[120].mxu0 %vm702_vm1, %v10256_v5 }
 0x119   : > { %9280 = vmatprep.mubr.msk.bf16.mxu0 %vm10786_vm0, %v15561_v1 }
 0x11a   : > { %v11083_v12 = vpack.c.bf16 %v1282_v11, %v1281_v9 }
 0x11b   : > { %v916_v13 = vpop.f32.mrb[16].mxu0 }
 0x11c   : > { %v917_v14 = vadd.f32 %v11034_v33, %v916_v13  ;;  %2073 = vrot.lane.b32.xlu1 %v11083_v12, %s10787_s21  ;;  %v9174_v15 = vpop.f32.mrb[17].mxu0 }
 0x11d   : > { %v919_v17 = vpop.f32.mrb[18].mxu0 }
 0x11e   : > { %v920_v18 = vadd.f32 %v11034_v33, %v919_v17  ;;  %v9175_v19 = vpop.f32.mrb[19].mxu0  ;;  %v1283_v20 = vmax.f32 %v917_v14, 0.0 }
 0x120   : > { %v1284_v21 = vmax.f32 %v920_v18, 0.0  ;;  %9281 = vmatmul.mubr.msk.bf16.gmra.mrb[124].mxu0 %vm702_vm1, %v10257_v16 }
 0x121   : > { %9284 = vmatprep.mubr.msk.bf16.mxu0 %vm10786_vm0, %v15561_v1 }
 0x122   : > { %v11093_v22 = vpack.c.bf16 %v1284_v21, %v1283_v20  ;;  %v10263_v20 = vld [vmem:[%s10909_s10 + $0x128] sm:$0xff]  }
 0x123   : > { %v924_v23 = vpop.f32.mrb[20].mxu0 }
 0x124   : > { %v925_v24 = vadd.f32 %v11034_v33, %v924_v23  ;;  %2075 = vrot.lane.b32.xlu0 %v11093_v22, %s10787_s21  ;;  %v9178_v25 = vpop.f32.mrb[21].mxu0 }
 0x125   : > { %v927_v27 = vpop.f32.mrb[22].mxu0 }
 0x126   : > { %v928_v28 = vadd.f32 %v11034_v33, %v927_v27  ;;  %v9179_v29 = vpop.f32.mrb[23].mxu0  ;;  %v1285_v30 = vmax.f32 %v925_v24, 0.0 }
 0x128   : > { %v1286_v31 = vmax.f32 %v928_v28, 0.0  ;;  %9285 = vmatmul.mubr.msk.bf16.gmra.mrb[128].mxu0 %vm702_vm1, %v10258_v26 }
 0x129   : > { %9288 = vmatprep.mubr.msk.bf16.mxu0 %vm10786_vm0, %v15561_v1 }
 0x12a   : > { %v11103_v32 = vpack.c.bf16 %v1286_v31, %v1285_v30  ;;  %v10264_v31 = vld [vmem:[%s10909_s10 + $0x130] sm:$0xff]  }
 0x12b   : > { %v932_v34 = vpop.f32.mrb[24].mxu0 }
 0x12c   : > { %v933_v35 = vadd.f32 %v11034_v33, %v932_v34  ;;  %2077 = vrot.lane.b32.xlu1 %v11103_v32, %s10787_s21  ;;  %v9182_v36 = vpop.f32.mrb[25].mxu0 }
 0x12d   : > { %v935_v38 = vpop.f32.mrb[26].mxu0 }
 0x12e   : > { %v936_v39 = vadd.f32 %v11034_v33, %v935_v38  ;;  %v9183_v40 = vpop.f32.mrb[27].mxu0  ;;  %v1287_v41 = vmax.f32 %v933_v35, 0.0 }
 0x130   : > { %v1288_v42 = vmax.f32 %v936_v39, 0.0  ;;  %9289 = vmatmul.mubr.msk.bf16.gmra.mrb[132].mxu0 %vm702_vm1, %v10259_v37 }
 0x131   : > { %9292 = vmatprep.mubr.msk.bf16.mxu0 %vm10786_vm0, %v15561_v1 }
 0x132   : > { %v11113_v44 = vpack.c.bf16 %v1288_v42, %v1287_v41 }
 0x133   : > { %v940_v45 = vpop.f32.mrb[28].mxu0 }
 0x134   : > { %v941_v46 = vadd.f32 %v11034_v33, %v940_v45  ;;  %2079 = vrot.lane.b32.xlu0 %v11113_v44, %s10787_s21  ;;  %v9186_v47 = vpop.f32.mrb[29].mxu0  ;;  %v10265_v45 = vld [vmem:[%s10909_s10 + $0x138] sm:$0xff]  }
 0x135   : > { %v943_v49 = vpop.f32.mrb[30].mxu0 }
 0x136   : > { %v944_v50 = vadd.f32 %v11034_v33, %v943_v49  ;;  %v9187_v51 = vpop.f32.mrb[31].mxu0  ;;  %v1289_v52 = vmax.f32 %v941_v46, 0.0 }
 0x138   : > { %v1290_v54 = vmax.f32 %v944_v50, 0.0  ;;  %9293 = vmatmul.mubr.msk.bf16.gmra.mrb[136].mxu0 %vm702_vm1, %v10260_v48 }
 0x139   : > { %9296 = vmatprep.mubr.msk.bf16.mxu0 %vm10786_vm0, %v15561_v1 }
 0x13a   : > { %v11123_v55 = vpack.c.bf16 %v1290_v54, %v1289_v52 }
 0x13b   : > { %v948_v56 = vpop.f32.mrb[32].mxu0 }
 0x13c   : > { %v949_v57 = vadd.f32 %v11034_v33, %v948_v56  ;;  %2081 = vrot.lane.b32.xlu1 %v11123_v55, %s10787_s21  ;;  %v9190_v58 = vpop.f32.mrb[33].mxu0 }
 0x13d   : > { %v951_v60 = vpop.f32.mrb[34].mxu0 }
 0x13e   : > { %v952_v61 = vadd.f32 %v11034_v33, %v951_v60  ;;  %v9191_v62 = vpop.f32.mrb[35].mxu0  ;;  %v1291_v2 = vmax.f32 %v949_v57, 0.0  ;;  %v10266_v57 = vld [vmem:[%s10909_s10 + $0x140] sm:$0xff]  }
 0x140   : > { %v1292_v3 = vmax.f32 %v952_v61, 0.0  ;;  %9297 = vmatmul.mubr.msk.bf16.gmra.mrb[140].mxu0 %vm702_vm1, %v10261_v59 }
 0x141   : > { %9300 = vmatprep.mubr.msk.bf16.mxu0 %vm10786_vm0, %v15561_v1 }
 0x142   : > { %v11133_v4 = vpack.c.bf16 %v1292_v3, %v1291_v2 }
 0x143   : > { %v956_v5 = vpop.f32.mrb[36].mxu0 }
 0x144   : > { %v957_v6 = vadd.f32 %v11034_v33, %v956_v5  ;;  %2083 = vrot.lane.b32.xlu0 %v11133_v4, %s10787_s21  ;;  %v9194_v7 = vpop.f32.mrb[37].mxu0 }
 0x145   : > { %v959_v9 = vpop.f32.mrb[38].mxu0  ;;  %v10267_v7 = vld [vmem:[%s10909_s10 + $0x148] sm:$0xff]  }
 0x146   : > { %v960_v11 = vadd.f32 %v11034_v33, %v959_v9  ;;  %v9195_v13 = vpop.f32.mrb[39].mxu0  ;;  %v1293_v14 = vmax.f32 %v957_v6, 0.0 }
 0x148   : > { %v1294_v15 = vmax.f32 %v960_v11, 0.0  ;;  %9301 = vmatmul.mubr.msk.bf16.gmra.mrb[144].mxu0 %vm702_vm1, %v10262_v8 }
 0x149   : > { %9304 = vmatprep.mubr.msk.bf16.mxu0 %vm10786_vm0, %v15561_v1 }
 0x14a   : > { %v11143_v16 = vpack.c.bf16 %v1294_v15, %v1293_v14 }
 0x14b   : > { %v964_v17 = vpop.f32.mrb[40].mxu0 }
 0x14c   : > { %v965_v18 = vadd.f32 %v11034_v33, %v964_v17  ;;  %2085 = vrot.lane.b32.xlu1 %v11143_v16, %s10787_s21  ;;  %v9198_v19 = vpop.f32.mrb[41].mxu0 }
 0x14d   : > { %v967_v21 = vpop.f32.mrb[42].mxu0 }
 0x14e   : > { %v968_v23 = vadd.f32 %v11034_v33, %v967_v21  ;;  %v9199_v24 = vpop.f32.mrb[43].mxu0  ;;  %v1295_v25 = vmax.f32 %v965_v18, 0.0 }
 0x150   : > { %v1296_v26 = vmax.f32 %v968_v23, 0.0  ;;  %9305 = vmatmul.mubr.msk.bf16.gmra.mrb[148].mxu0 %vm702_vm1, %v10263_v20  ;;  %v10268_v20 = vld [vmem:[%s10909_s10 + $0x150] sm:$0xff]  }
 0x151   : > { %9308 = vmatprep.mubr.msk.bf16.mxu0 %vm10786_vm0, %v15561_v1 }
 0x152   : > { %v11153_v27 = vpack.c.bf16 %v1296_v26, %v1295_v25 }
 0x153   : > { %v972_v28 = vpop.f32.mrb[44].mxu0 }
 0x154   : > { %v973_v29 = vadd.f32 %v11034_v33, %v972_v28  ;;  %2087 = vrot.lane.b32.xlu0 %v11153_v27, %s10787_s21  ;;  %v9202_v30 = vpop.f32.mrb[45].mxu0 }
 0x155   : > { %v975_v34 = vpop.f32.mrb[46].mxu0 }
 0x156   : > { %v976_v35 = vadd.f32 %v11034_v33, %v975_v34  ;;  %v9203_v36 = vpop.f32.mrb[47].mxu0  ;;  %v1297_v37 = vmax.f32 %v973_v29, 0.0  ;;  %v10269_v34 = vld [vmem:[%s10909_s10 + $0x158] sm:$0xff]  }
 0x158   : > { %v1298_v38 = vmax.f32 %v976_v35, 0.0  ;;  %9309 = vmatmul.mubr.msk.bf16.gmra.mrb[152].mxu0 %vm702_vm1, %v10264_v31 }
 0x159   : > { %9312 = vmatprep.mubr.msk.bf16.mxu0 %vm10786_vm0, %v15561_v1 }
 0x15a   : > { %v11163_v39 = vpack.c.bf16 %v1298_v38, %v1297_v37 }
 0x15b   : > { %v980_v40 = vpop.f32.mrb[48].mxu0 }
 0x15c   : > { %v981_v41 = vadd.f32 %v11034_v33, %v980_v40  ;;  %2089 = vrot.lane.b32.xlu1 %v11163_v39, %s10787_s21  ;;  %v9206_v42 = vpop.f32.mrb[49].mxu0 }
 0x15d   : > { %v983_v46 = vpop.f32.mrb[50].mxu0 }
 0x15e   : > { %v984_v47 = vadd.f32 %v11034_v33, %v983_v46  ;;  %v9207_v48 = vpop.f32.mrb[51].mxu0  ;;  %v1299_v49 = vmax.f32 %v981_v41, 0.0 }
 0x160   : > { %v1300_v50 = vmax.f32 %v984_v47, 0.0  ;;  %9313 = vmatmul.mubr.msk.bf16.gmra.mrb[156].mxu0 %vm702_vm1, %v10265_v45  ;;  %v10270_v47 = vld [vmem:[%s10909_s10 + $0x160] sm:$0xff]  }
 0x161   : > { %9316 = vmatprep.mubr.msk.bf16.mxu0 %vm10786_vm0, %v15561_v1 }
 0x162   : > { %v11173_v51 = vpack.c.bf16 %v1300_v50, %v1299_v49 }
 0x163   : > { %v988_v52 = vpop.f32.mrb[52].mxu0 }
 0x164   : > { %v989_v54 = vadd.f32 %v11034_v33, %v988_v52  ;;  %2091 = vrot.lane.b32.xlu0 %v11173_v51, %s10787_s21  ;;  %v9210_v56 = vpop.f32.mrb[53].mxu0 }
 0x165   : > { %v991_v58 = vpop.f32.mrb[54].mxu0 }
 0x166   : > { %v992_v59 = vadd.f32 %v11034_v33, %v991_v58  ;;  %v9211_v60 = vpop.f32.mrb[55].mxu0  ;;  %v1301_v61 = vmax.f32 %v989_v54, 0.0 }
 0x167   : > { %v10272_v60 = vld [vmem:[%s10909_s10 + $0x168] sm:$0xff]  }
 0x168   : > { %v1302_v62 = vmax.f32 %v992_v59, 0.0  ;;  %9317 = vmatmul.mubr.msk.bf16.gmra.mrb[160].mxu0 %vm702_vm1, %v10266_v57 }
 0x169   : > { %9320 = vmatprep.mubr.msk.bf16.mxu0 %vm10786_vm0, %v15561_v1 }
 0x16a   : > { %v11183_v2 = vpack.c.bf16 %v1302_v62, %v1301_v61 }
 0x16b   : > { %v996_v3 = vpop.f32.mrb[56].mxu0 }
 0x16c   : > { %v997_v5 = vadd.f32 %v11034_v33, %v996_v3  ;;  %2093 = vrot.lane.b32.xlu1 %v11183_v2, %s10787_s21  ;;  %v9214_v6 = vpop.f32.mrb[57].mxu0 }
 0x16d   : > { %v999_v8 = vpop.f32.mrb[58].mxu0 }
 0x16e   : > { %v1000_v9 = vadd.f32 %v11034_v33, %v999_v8  ;;  %v9215_v11 = vpop.f32.mrb[59].mxu0  ;;  %v1303_v13 = vmax.f32 %v997_v5, 0.0 }
 0x170   : > { %v1304_v14 = vmax.f32 %v1000_v9, 0.0  ;;  %9321 = vmatmul.mubr.msk.bf16.gmra.mrb[164].mxu0 %vm702_vm1, %v10267_v7 }
 0x171   : > { %9324 = vmatprep.mubr.msk.bf16.mxu0 %vm10786_vm0, %v15561_v1 }
 0x172   : > { %v11193_v15 = vpack.c.bf16 %v1304_v14, %v1303_v13  ;;  %v10273_v13 = vld [vmem:[%s10909_s10 + $0x170] sm:$0xff]  }
 0x173   : > { %v1004_v17 = vpop.f32.mrb[60].mxu0 }
 0x174   : > { %v1005_v18 = vadd.f32 %v11034_v33, %v1004_v17  ;;  %2095 = vrot.lane.b32.xlu0 %v11193_v15, %s10787_s21  ;;  %v9218_v19 = vpop.f32.mrb[61].mxu0 }
 0x175   : > { %v1007_v21 = vpop.f32.mrb[62].mxu0 }
 0x176   : > { %v1008_v23 = vadd.f32 %v11034_v33, %v1007_v21  ;;  %v9219_v24 = vpop.f32.mrb[63].mxu0  ;;  %v1305_v25 = vmax.f32 %v1005_v18, 0.0 }
 0x178   : > { %v1306_v26 = vmax.f32 %v1008_v23, 0.0  ;;  %9325 = vmatmul.mubr.msk.bf16.gmra.mrb[168].mxu0 %vm702_vm1, %v10268_v20 }
 0x179   : > { %9328 = vmatprep.mubr.msk.bf16.mxu0 %vm10786_vm0, %v15561_v1 }
 0x17a   : > { %v11203_v28 = vpack.c.bf16 %v1306_v26, %v1305_v25  ;;  %v10274_v26 = vld [vmem:[%s10909_s10 + $0x178] sm:$0xff]  }
 0x17b   : > { %v1012_v29 = vpop.f32.mrb[64].mxu0 }
 0x17c   : > { %v1013_v30 = vadd.f32 %v11034_v33, %v1012_v29  ;;  %2097 = vrot.lane.b32.xlu1 %v11203_v28, %s10787_s21  ;;  %v9222_v31 = vpop.f32.mrb[65].mxu0 }
 0x17d   : > { %v1015_v35 = vpop.f32.mrb[66].mxu0 }
 0x17e   : > { %v1016_v36 = vadd.f32 %v11034_v33, %v1015_v35  ;;  %v9223_v37 = vpop.f32.mrb[67].mxu0  ;;  %v1307_v38 = vmax.f32 %v1013_v30, 0.0 }
 0x180   : > { %v1308_v40 = vmax.f32 %v1016_v36, 0.0  ;;  %9329 = vmatmul.mubr.msk.bf16.gmra.mrb[172].mxu0 %vm702_vm1, %v10269_v34 }
 0x181   : > { %9332 = vmatprep.mubr.msk.bf16.mxu0 %vm10786_vm0, %v15561_v1 }
 0x182   : > { %v11213_v41 = vpack.c.bf16 %v1308_v40, %v1307_v38 }
 0x183   : > { %v1020_v42 = vpop.f32.mrb[68].mxu0 }
 0x184   : > { %v1021_v45 = vadd.f32 %v11034_v33, %v1020_v42  ;;  %2099 = vrot.lane.b32.xlu0 %v11213_v41, %s10787_s21  ;;  %v9226_v46 = vpop.f32.mrb[69].mxu0  ;;  %v10275_v42 = vld [vmem:[%s10909_s10 + $0x180] sm:$0xff]  }
 0x185   : > { %v1023_v48 = vpop.f32.mrb[70].mxu0 }
 0x186   : > { %v1024_v49 = vadd.f32 %v11034_v33, %v1023_v48  ;;  %v9227_v50 = vpop.f32.mrb[71].mxu0  ;;  %v1309_v52 = vmax.f32 %v1021_v45, 0.0 }
 0x188   : > { %v1310_v54 = vmax.f32 %v1024_v49, 0.0  ;;  %9333 = vmatmul.mubr.msk.bf16.gmra.mrb[176].mxu0 %vm702_vm1, %v10270_v47 }
 0x189   : > { %9336 = vmatprep.mubr.msk.bf16.mxu0 %vm10786_vm0, %v15561_v1 }
 0x18a   : > { %v11223_v56 = vpack.c.bf16 %v1310_v54, %v1309_v52 }
 0x18b   : > { %v1028_v57 = vpop.f32.mrb[72].mxu0 }
 0x18c   : > { %v1029_v58 = vadd.f32 %v11034_v33, %v1028_v57  ;;  %2101 = vrot.lane.b32.xlu1 %v11223_v56, %s10787_s21  ;;  %v9230_v59 = vpop.f32.mrb[73].mxu0 }
 0x18d   : > { %v1031_v61 = vpop.f32.mrb[74].mxu0 }
 0x18e   : > { %v1032_v62 = vadd.f32 %v11034_v33, %v1031_v61  ;;  %v9231_v3 = vpop.f32.mrb[75].mxu0  ;;  %v1311_v5 = vmax.f32 %v1029_v58, 0.0 }
 0x190   : > { %v1312_v6 = vmax.f32 %v1032_v62, 0.0  ;;  %9337 = vmatmul.mubr.msk.bf16.gmra.mrb[180].mxu0 %vm702_vm1, %v10272_v60  ;;  %2737 = vrot.lane.b32.xlu1 %v11044_v43, %s10788_s24 }
 0x191   : > { %9340 = vmatprep.mubr.msk.bf16.mxu0 %vm10786_vm0, %v15561_v1 }
 0x192   : > { %v11235_v7 = vpack.c.bf16 %v1312_v6, %v1311_v5 }
 0x193   : > { %v1036_v8 = vpop.f32.mrb[76].mxu0 }
 0x194   : > { %v1037_v9 = vadd.f32 %v11034_v33, %v1036_v8  ;;  %2103 = vrot.lane.b32.xlu0 %v11235_v7, %s10787_s21  ;;  %v9234_v11 = vpop.f32.mrb[77].mxu0 }
 0x195   : > { %v1039_v14 = vpop.f32.mrb[78].mxu0 }
 0x196   : > { %v1040_v17 = vadd.f32 %v11034_v33, %v1039_v14  ;;  %v9235_v18 = vpop.f32.mrb[79].mxu0  ;;  %v1313_v19 = vmax.f32 %v1037_v9, 0.0 }
 0x198   : > { %v1314_v20 = vmax.f32 %v1040_v17, 0.0  ;;  %9341 = vmatmul.mubr.msk.bf16.gmra.mrb[184].mxu0 %vm702_vm1, %v10273_v13 }
 0x199   : > { %9344 = vmatprep.mubr.msk.bf16.mxu0 %vm10786_vm0, %v15561_v1 }
 0x19a   : > { %v11245_v21 = vpack.c.bf16 %v1314_v20, %v1313_v19 }
 0x19b   : > { %v1044_v23 = vpop.f32.mrb[80].mxu0 }
 0x19c   : > { %v1045_v24 = vadd.f32 %v11034_v33, %v1044_v23  ;;  %2105 = vrot.lane.b32.xlu1 %v11245_v21, %s10787_s21  ;;  %v9238_v25 = vpop.f32.mrb[81].mxu0 }
 0x19d   : > { %v1047_v29 = vpop.f32.mrb[82].mxu0 }
 0x19e   : > { %v1048_v30 = vadd.f32 %v11034_v33, %v1047_v29  ;;  %v9239_v31 = vpop.f32.mrb[83].mxu0  ;;  %v1315_v34 = vmax.f32 %v1045_v24, 0.0 }
 0x1a0   : > { %v1316_v35 = vmax.f32 %v1048_v30, 0.0  ;;  %9345 = vmatmul.mubr.msk.bf16.gmra.mrb[188].mxu0 %vm702_vm1, %v10274_v26  ;;  %2739 = vrot.lane.b32.xlu1 %v11054_v53, %s10788_s24 }
 0x1a1   : > { %9348 = vmatprep.mubr.msk.bf16.mxu0 %vm10786_vm0, %v15561_v1 }
 0x1a2   : > { %v11257_v36 = vpack.c.bf16 %v1316_v35, %v1315_v34 }
 0x1a3   : > { %v1052_v37 = vpop.f32.mrb[84].mxu0 }
 0x1a4   : > { %v1053_v38 = vadd.f32 %v11034_v33, %v1052_v37  ;;  %2741 = vrot.lane.b32.xlu1 %v11064_v63, %s10788_s24  ;;  %2107 = vrot.lane.b32.xlu0 %v11257_v36, %s10787_s21  ;;  %v9242_v40 = vpop.f32.mrb[85].mxu0 }
 0x1a5   : > { %v1055_v45 = vpop.f32.mrb[86].mxu0 }
 0x1a6   : > { %v1056_v46 = vadd.f32 %v11034_v33, %v1055_v45  ;;  %v9243_v47 = vpop.f32.mrb[87].mxu0  ;;  %v1317_v48 = vmax.f32 %v1053_v38, 0.0 }
 0x1a8   : > { %v1318_v49 = vmax.f32 %v1056_v46, 0.0  ;;  %9349 = vmatmul.mubr.msk.bf16.gmra.mrb[192].mxu0 %vm702_vm1, %v10275_v42  ;;  %2743 = vrot.lane.b32.xlu1 %v11083_v12, %s10788_s24 }
 0x1a9   : > { %2751 = vrot.lane.b32.xlu0 %v11123_v55, %s10788_s24  ;;  %9356 = vmatprep.mubr.msk.bf16.mxu0 %vm10786_vm0, %v15561_v1 }
 0x1aa   : > { %v11273_v50 = vpack.c.bf16 %v1318_v49, %v1317_v48 }
 0x1ab   : > { %v1060_v52 = vpop.f32.mrb[88].mxu0 }
 0x1ac   : > { %v1061_v54 = vadd.f32 %v11034_v33, %v1060_v52  ;;  %2109 = vrot.lane.b32.xlu1 %v11273_v50, %s10787_s21  ;;  %v9246_v57 = vpop.f32.mrb[89].mxu0 }
 0x1ad   : > { %v1063_v58 = vpop.f32.mrb[90].mxu0 }
 0x1ae   : > { %v1064_v59 = vadd.f32 %v11034_v33, %v1063_v58  ;;  %v9247_v60 = vpop.f32.mrb[91].mxu0  ;;  %v1319_v61 = vmax.f32 %v1061_v54, 0.0 }
 0x1b0   : > { %v1320_v62 = vmax.f32 %v1064_v59, 0.0  ;;  %9357 = vmatmul.mubr.msk.bf16.vlgmr.msra.gmra.mrb[196].mxu0 %vm1445_vm2, %v11044_v43  ;;  %2745 = vrot.lane.b32.xlu1 %v11093_v22, %s10788_s24 }
 0x1b1   : > { %9360 = vmatprep.mubr.msk.bf16.mxu0 %vm10786_vm0, %v15561_v1  ;;  %9753 = vmatpush3.bf16.msra.mxu0 %v10937_v10 }
 0x1b2   : > { %v11286_v3 = vpack.c.bf16 %v1320_v62, %v1319_v61  ;;  %9754 = vmatprep.subr.bf16.mxu0 %v15561_v1 }
 0x1b3   : > { %v1068_v5 = vpop.f32.mrb[92].mxu0 }
 0x1b4   : > { %v1069_v6 = vadd.f32 %v11034_v33, %v1068_v5  ;;  %2747 = vrot.lane.b32.xlu1 %v11103_v32, %s10788_s24  ;;  %2111 = vrot.lane.b32.xlu0 %v11286_v3, %s10787_s21  ;;  %v9250_v8 = vpop.f32.mrb[93].mxu0 }
 0x1b5   : > { %v1071_v9 = vpop.f32.mrb[94].mxu0  ;;  %9755 = vmatpush3.bf16.msra.mxu0 %v11069_v0 }
 0x1b6   : > { %v1072_v11 = vadd.f32 %v11034_v33, %v1071_v9  ;;  %v9251_v13 = vpop.f32.mrb[95].mxu0  ;;  %10152 = vmatprep.subr.bf16.mxu0 %v15561_v1  ;;  %v1321_v14 = vmax.f32 %v1069_v6, 0.0 }
 0x1b8   : > { %v1322_v17 = vmax.f32 %v1072_v11, 0.0  ;;  %9361 = vmatmul.mubr.msk.bf16.gmra.mrb[200].mxu0 %vm1445_vm2, %v11054_v53  ;;  %2749 = vrot.lane.b32.xlu1 %v11113_v44, %s10788_s24 }
 0x1b9   : > { %2755 = vrot.lane.b32.xlu0 %v11143_v16, %s10788_s24  ;;  %9364 = vmatprep.mubr.msk.bf16.mxu0 %vm10786_vm0, %v15561_v1 }
 0x1ba   : > { %v11305_v18 = vpack.c.bf16 %v1322_v17, %v1321_v14 }
 0x1bb   : > { %v1076_v19 = vpop.f32.mrb[96].mxu0 }
 0x1bc   : > { %v1077_v20 = vadd.f32 %v11034_v33, %v1076_v19  ;;  %2113 = vrot.lane.b32.xlu1 %v11305_v18, %s10787_s21  ;;  %v9254_v23 = vpop.f32.mrb[97].mxu0  ;;  %9449 = vmatmul.mubr.msk.bf16.vlgmr.msra.gmra.mrb[0].mxu1 %vm1445_vm2, %v11305_v18 }
 0x1bd   : > { %2759 = vrot.lane.b32.xlu0 %v11163_v39, %s10788_s24  ;;  %9553 = vmatpush3.bf16.msra.mxu1 %v10937_v10  ;;  %v1079_v24 = vpop.f32.mrb[98].mxu0 }
 0x1be   : > { %v1080_v25 = vadd.f32 %v11034_v33, %v1079_v24  ;;  %v9255_v26 = vpop.f32.mrb[99].mxu0  ;;  %9452 = vmatprep.mubr.msk.bf16.mxu1 %vm10786_vm0, %v15561_v1  ;;  %9554 = vmatprep.subr.bf16.mxu1 %v15561_v1  ;;  %v1323_v29 = vmax.f32 %v1077_v20, 0.0 }
 0x1c0   : > { %v1324_v30 = vmax.f32 %v1080_v25, 0.0  ;;  %9365 = vmatmul.mubr.msk.bf16.gmra.mrb[204].mxu0 %vm1445_vm2, %v11064_v63  ;;  %2753 = vrot.lane.b32.xlu1 %v11133_v4, %s10788_s24 }
 0x1c1   : > { %2763 = vrot.lane.b32.xlu0 %v11183_v2, %s10788_s24  ;;  %9368 = vmatprep.mubr.msk.bf16.mxu0 %vm10786_vm0, %v15561_v1 }
 0x1c2   : > { %v11327_v10 = vpack.c.bf16 %v1324_v30, %v1323_v29  ;;  %9555 = vmatpush3.bf16.msra.mxu1 %v11069_v0 }
 0x1c3   : > { %v1084_v31 = vpop.f32.mrb[100].mxu0  ;;  %9952 = vmatprep.subr.bf16.mxu1 %v15561_v1 }
 0x1c4   : > { %v1085_v34 = vadd.f32 %v11034_v33, %v1084_v31  ;;  %2757 = vrot.lane.b32.xlu1 %v11153_v27, %s10788_s24  ;;  %v9258_v35 = vpop.f32.mrb[101].mxu0  ;;  %9453 = vmatmul.mubr.msk.bf16.gmra.mrb[4].mxu1 %vm1445_vm2, %v11327_v10 }
 0x1c5   : > { %2115 = vrot.lane.b32.xlu0 %v11327_v10, %s10787_s21  ;;  %v1087_v37 = vpop.f32.mrb[102].mxu0  ;;  %9456 = vmatprep.mubr.msk.bf16.mxu1 %vm10786_vm0, %v15561_v1 }
 0x1c6   : > { %v1088_v0 = vadd.f32 %v11034_v33, %v1087_v37  ;;  %v9259_v38 = vpop.f32.mrb[103].mxu0  ;;  %v1325_v40 = vmax.f32 %v1085_v34, 0.0 }
 0x1c8   : > { %v1326_v42 = vmax.f32 %v1088_v0, 0.0  ;;  %9369 = vmatmul.mubr.msk.bf16.gmra.mrb[208].mxu0 %vm1445_vm2, %v11083_v12  ;;  %2761 = vrot.lane.b32.xlu1 %v11173_v51, %s10788_s24 }
 0x1c9   : > { %2767 = vrot.lane.b32.xlu0 %v11203_v28, %s10788_s24  ;;  %9372 = vmatprep.mubr.msk.bf16.mxu0 %vm10786_vm0, %v15561_v1 }
 0x1ca   : > { %v11349_v45 = vpack.c.bf16 %v1326_v42, %v1325_v40 }
 0x1cb   : > { %v1092_v46 = vpop.f32.mrb[104].mxu0 }
 0x1cc   : > { %v1093_v47 = vadd.f32 %v11034_v33, %v1092_v46  ;;  %2117 = vrot.lane.b32.xlu1 %v11349_v45, %s10787_s21  ;;  %v9262_v48 = vpop.f32.mrb[105].mxu0  ;;  %9457 = vmatmul.mubr.msk.bf16.gmra.mrb[8].mxu1 %vm1445_vm2, %v11349_v45 }
 0x1cd   : > { %2771 = vrot.lane.b32.xlu0 %v11223_v56, %s10788_s24  ;;  %v1095_v49 = vpop.f32.mrb[106].mxu0  ;;  %9460 = vmatprep.mubr.msk.bf16.mxu1 %vm10786_vm0, %v15561_v1 }
 0x1ce   : > { %v1096_v52 = vadd.f32 %v11034_v33, %v1095_v49  ;;  %v9263_v54 = vpop.f32.mrb[107].mxu0  ;;  %v1327_v57 = vmax.f32 %v1093_v47, 0.0 }
 0x1d0   : > { %v1328_v58 = vmax.f32 %v1096_v52, 0.0  ;;  %9373 = vmatmul.mubr.msk.bf16.gmra.mrb[212].mxu0 %vm1445_vm2, %v11093_v22  ;;  %2765 = vrot.lane.b32.xlu1 %v11193_v15, %s10788_s24 }
 0x1d1   : > { %2775 = vrot.lane.b32.xlu0 %v11245_v21, %s10788_s24  ;;  %9376 = vmatprep.mubr.msk.bf16.mxu0 %vm10786_vm0, %v15561_v1 }
 0x1d2   : > { %v11369_v59 = vpack.c.bf16 %v1328_v58, %v1327_v57 }
 0x1d3   : > { %v1100_v60 = vpop.f32.mrb[108].mxu0 }
 0x1d4   : > { %v1101_v61 = vadd.f32 %v11034_v33, %v1100_v60  ;;  %2769 = vrot.lane.b32.xlu1 %v11213_v41, %s10788_s24  ;;  %v9266_v62 = vpop.f32.mrb[109].mxu0  ;;  %9461 = vmatmul.mubr.msk.bf16.gmra.mrb[12].mxu1 %vm1445_vm2, %v11369_v59 }
 0x1d5   : > { %2119 = vrot.lane.b32.xlu0 %v11369_v59, %s10787_s21  ;;  %v1103_v5 = vpop.f32.mrb[110].mxu0  ;;  %9464 = vmatprep.mubr.msk.bf16.mxu1 %vm10786_vm0, %v15561_v1 }
 0x1d6   : > { %v1104_v6 = vadd.f32 %v11034_v33, %v1103_v5  ;;  %v9267_v8 = vpop.f32.mrb[111].mxu0  ;;  %v1329_v9 = vmax.f32 %v1101_v61, 0.0 }
 0x1d8   : > { %v1330_v11 = vmax.f32 %v1104_v6, 0.0  ;;  %9377 = vmatmul.mubr.msk.bf16.gmra.mrb[216].mxu0 %vm1445_vm2, %v11103_v32  ;;  %2773 = vrot.lane.b32.xlu1 %v11235_v7, %s10788_s24 }
 0x1d9   : > { %2779 = vrot.lane.b32.xlu0 %v11273_v50, %s10788_s24  ;;  %9380 = vmatprep.mubr.msk.bf16.mxu0 %vm10786_vm0, %v15561_v1 }
 0x1da   : > { %v11389_v13 = vpack.c.bf16 %v1330_v11, %v1329_v9 }
 0x1db   : > { %v1108_v14 = vpop.f32.mrb[112].mxu0 }
 0x1dc   : > { %v1109_v17 = vadd.f32 %v11034_v33, %v1108_v14  ;;  %2121 = vrot.lane.b32.xlu1 %v11389_v13, %s10787_s21  ;;  %v9270_v19 = vpop.f32.mrb[113].mxu0  ;;  %9465 = vmatmul.mubr.msk.bf16.gmra.mrb[16].mxu1 %vm1445_vm2, %v11389_v13 }
 0x1dd   : > { %2783 = vrot.lane.b32.xlu0 %v11305_v18, %s10788_s24  ;;  %v1111_v20 = vpop.f32.mrb[114].mxu0  ;;  %9468 = vmatprep.mubr.msk.bf16.mxu1 %vm10786_vm0, %v15561_v1 }
 0x1de   : > { %v1112_v23 = vadd.f32 %v11034_v33, %v1111_v20  ;;  %v9271_v24 = vpop.f32.mrb[115].mxu0  ;;  %v1331_v25 = vmax.f32 %v1109_v17, 0.0 }
 0x1e0   : > { %v1332_v26 = vmax.f32 %v1112_v23, 0.0  ;;  %9381 = vmatmul.mubr.msk.bf16.gmra.mrb[220].mxu0 %vm1445_vm2, %v11113_v44  ;;  %2777 = vrot.lane.b32.xlu1 %v11257_v36, %s10788_s24 }
 0x1e1   : > { %2787 = vrot.lane.b32.xlu0 %v11349_v45, %s10788_s24  ;;  %9384 = vmatprep.mubr.msk.bf16.mxu0 %vm10786_vm0, %v15561_v1 }
 0x1e2   : > { %v11409_v29 = vpack.c.bf16 %v1332_v26, %v1331_v25 }
 0x1e3   : > { %v1116_v30 = vpop.f32.mrb[116].mxu0 }
 0x1e4   : > { %v1117_v31 = vadd.f32 %v11034_v33, %v1116_v30  ;;  %2781 = vrot.lane.b32.xlu1 %v11286_v3, %s10788_s24  ;;  %v9274_v34 = vpop.f32.mrb[117].mxu0  ;;  %9469 = vmatmul.mubr.msk.bf16.gmra.mrb[20].mxu1 %vm1445_vm2, %v11409_v29 }
 0x1e5   : > { %2123 = vrot.lane.b32.xlu0 %v11409_v29, %s10787_s21  ;;  %v1119_v35 = vpop.f32.mrb[118].mxu0  ;;  %9472 = vmatprep.mubr.msk.bf16.mxu1 %vm10786_vm0, %v15561_v1 }
 0x1e6   : > { %v1120_v37 = vadd.f32 %v11034_v33, %v1119_v35  ;;  %v9275_v0 = vpop.f32.mrb[119].mxu0  ;;  %v1333_v38 = vmax.f32 %v1117_v31, 0.0 }
 0x1e8   : > { %v1334_v40 = vmax.f32 %v1120_v37, 0.0  ;;  %9385 = vmatmul.mubr.msk.bf16.gmra.mrb[224].mxu0 %vm1445_vm2, %v11123_v55  ;;  %2785 = vrot.lane.b32.xlu1 %v11327_v10, %s10788_s24 }
 0x1e9   : > { %2791 = vrot.lane.b32.xlu0 %v11389_v13, %s10788_s24  ;;  %9388 = vmatprep.mubr.msk.bf16.mxu0 %vm10786_vm0, %v15561_v1 }
 0x1ea   : > { %v11429_v42 = vpack.c.bf16 %v1334_v40, %v1333_v38 }
 0x1eb   : > { %v1124_v46 = vpop.f32.mrb[120].mxu0 }
 0x1ec   : > { %v1125_v47 = vadd.f32 %v11034_v33, %v1124_v46  ;;  %2125 = vrot.lane.b32.xlu1 %v11429_v42, %s10787_s21  ;;  %v9278_v48 = vpop.f32.mrb[121].mxu0  ;;  %9473 = vmatmul.mubr.msk.bf16.gmra.mrb[24].mxu1 %vm1445_vm2, %v11429_v42 }
 0x1ed   : > { %2795 = vrot.lane.b32.xlu0 %v11429_v42, %s10788_s24  ;;  %v1127_v49 = vpop.f32.mrb[122].mxu0  ;;  %9476 = vmatprep.mubr.msk.bf16.mxu1 %vm10786_vm0, %v15561_v1 }
 0x1ee   : > { %v1128_v52 = vadd.f32 %v11034_v33, %v1127_v49  ;;  %v9279_v54 = vpop.f32.mrb[123].mxu0  ;;  %v1335_v57 = vmax.f32 %v1125_v47, 0.0 }
 0x1f0   : > { %v1336_v58 = vmax.f32 %v1128_v52, 0.0  ;;  %9389 = vmatmul.mubr.msk.bf16.gmra.mrb[228].mxu0 %vm1445_vm2, %v11133_v4  ;;  %2789 = vrot.lane.b32.xlu1 %v11369_v59, %s10788_s24 }
 0x1f1   : > { %9392 = vmatprep.mubr.msk.bf16.mxu0 %vm10786_vm0, %v15561_v1 }
 0x1f2   : > { %v11447_v60 = vpack.c.bf16 %v1336_v58, %v1335_v57 }
 0x1f3   : > { %v1132_v61 = vpop.f32.mrb[124].mxu0 }
 0x1f4   : > { %v1133_v62 = vadd.f32 %v11034_v33, %v1132_v61  ;;  %2793 = vrot.lane.b32.xlu1 %v11409_v29, %s10788_s24  ;;  %2127 = vrot.lane.b32.xlu0 %v11447_v60, %s10787_s21  ;;  %v9282_v5 = vpop.f32.mrb[125].mxu0 }
 0x1f5   : > { %9477 = vmatmul.mubr.msk.bf16.gmra.mrb[28].mxu1 %vm1445_vm2, %v11447_v60  ;;  %v1135_v6 = vpop.f32.mrb[126].mxu0 }
 0x1f6   : > { %v1136_v8 = vadd.f32 %v11034_v33, %v1135_v6  ;;  %v9283_v9 = vpop.f32.mrb[127].mxu0  ;;  %9480 = vmatprep.mubr.msk.bf16.mxu1 %vm10786_vm0, %v15561_v1  ;;  %v1337_v11 = vmax.f32 %v1133_v62, 0.0 }
 0x1f8   : > { %v1338_v14 = vmax.f32 %v1136_v8, 0.0  ;;  %9393 = vmatmul.mubr.msk.bf16.gmra.mrb[232].mxu0 %vm1445_vm2, %v11143_v16  ;;  %3407 = vrot.lane.b32.xlu1 %v11044_v43, %s10789_s25 }
 0x1f9   : > { %2797 = vrot.lane.b32.xlu0 %v11447_v60, %s10788_s24  ;;  %9396 = vmatprep.mubr.msk.bf16.mxu0 %vm10786_vm0, %v15561_v1 }
 0x1fa   : > { %v11467_v17 = vpack.c.bf16 %v1338_v14, %v1337_v11 }
 0x1fb   : > { %v1140_v19 = vpop.f32.mrb[128].mxu0 }
 0x1fc   : > { %v1141_v20 = vadd.f32 %v11034_v33, %v1140_v19  ;;  %2129 = vrot.lane.b32.xlu1 %v11467_v17, %s10787_s21  ;;  %v9286_v23 = vpop.f32.mrb[129].mxu0 }
 0x1fd   : > { %9481 = vmatmul.mubr.msk.bf16.gmra.mrb[32].mxu1 %vm1445_vm2, %v11467_v17  ;;  %v1143_v24 = vpop.f32.mrb[130].mxu0 }
 0x1fe   : > { %v1144_v43 = vadd.f32 %v11034_v33, %v1143_v24  ;;  %v9287_v25 = vpop.f32.mrb[131].mxu0  ;;  %9484 = vmatprep.mubr.msk.bf16.mxu1 %vm10786_vm0, %v15561_v1  ;;  %v1339_v26 = vmax.f32 %v1141_v20, 0.0  ;;  %v11548_v20 = vpop.permute.xlu1 %2071 }
 0x200   : > { %v1340_v30 = vmax.f32 %v1144_v43, 0.0  ;;  %9397 = vmatmul.mubr.msk.bf16.gmra.mrb[236].mxu0 %vm1445_vm2, %v11153_v27  ;;  %3409 = vrot.lane.b32.xlu1 %v11054_v53, %s10789_s25 }
 0x201   : > { %9400 = vmatprep.mubr.msk.bf16.mxu0 %vm10786_vm0, %v15561_v1 }
 0x202   : > { %v11483_v31 = vpack.c.bf16 %v1340_v30, %v1339_v26  ;;  %v11560_v30 = vpop.permute.xlu1 %2073 }
 0x203   : > { %v1148_v34 = vpop.f32.mrb[132].mxu0 }
 0x204   : > { %v1149_v35 = vadd.f32 %v11034_v33, %v1148_v34  ;;  %3411 = vrot.lane.b32.xlu1 %v11064_v63, %s10789_s25  ;;  %2131 = vrot.lane.b32.xlu0 %v11483_v31, %s10787_s21  ;;  %v9290_v37 = vpop.f32.mrb[133].mxu0 }
 0x205   : > { %9485 = vmatmul.mubr.msk.bf16.gmra.mrb[36].mxu1 %vm1445_vm2, %v11483_v31  ;;  %v1151_v0 = vpop.f32.mrb[134].mxu0 }
 0x206   : > { %v1152_v53 = vadd.f32 %v11034_v33, %v1151_v0  ;;  %v9291_v38 = vpop.f32.mrb[135].mxu0  ;;  %9488 = vmatprep.mubr.msk.bf16.mxu1 %vm10786_vm0, %v15561_v1  ;;  %v1341_v40 = vmax.f32 %v1149_v35, 0.0  ;;  %v11572_v37 = vpop.permute.xlu1 %2077 }
 0x208   : > { %v1342_v46 = vmax.f32 %v1152_v53, 0.0  ;;  %9401 = vmatmul.mubr.msk.bf16.gmra.mrb[240].mxu0 %vm1445_vm2, %v11163_v39  ;;  %2799 = vrot.lane.b32.xlu1 %v11467_v17, %s10788_s24  ;;  %v11574_v53 = vpop.permute.xlu0 %2067 }
 0x209   : > { %2801 = vrot.lane.b32.xlu0 %v11483_v31, %s10788_s24  ;;  %9404 = vmatprep.mubr.msk.bf16.mxu0 %vm10786_vm0, %v15561_v1 }
 0x20a   : > { %v11503_v63 = vpack.c.bf16 %v1342_v46, %v1341_v40  ;;  %v11586_v46 = vpop.permute.xlu1 %2081 }
 0x20b   : > { %v1156_v47 = vpop.f32.mrb[136].mxu0 }
 0x20c   : > { %v1157_v48 = vadd.f32 %v11034_v33, %v1156_v47  ;;  %2133 = vrot.lane.b32.xlu1 %v11503_v63, %s10787_s21  ;;  %v9294_v49 = vpop.f32.mrb[137].mxu0 }
 0x20d   : > { %2803 = vrot.lane.b32.xlu0 %v11503_v63, %s10788_s24  ;;  %9489 = vmatmul.mubr.msk.bf16.gmra.mrb[40].mxu1 %vm1445_vm2, %v11503_v63  ;;  %v1159_v52 = vpop.f32.mrb[138].mxu0 }
 0x20e   : > { %v1160_v54 = vadd.f32 %v11034_v33, %v1159_v52  ;;  %v9295_v57 = vpop.f32.mrb[139].mxu0  ;;  %9492 = vmatprep.mubr.msk.bf16.mxu1 %vm10786_vm0, %v15561_v1  ;;  %v1343_v58 = vmax.f32 %v1157_v48, 0.0  ;;  %v11526_v33 = vld [vmem:[%s15556_s4] ss:$0 sm:$0xff]  ;;  %v11588_v48 = vpop.permute.xlu0 %2069 }
 0x20f   : > { %v11600_v52 = vpop.permute.xlu1 %2085 }
 0x210   : > { %v1344_v61 = vmax.f32 %v1160_v54, 0.0  ;;  %9405 = vmatmul.mubr.msk.bf16.gmra.mrb[244].mxu0 %vm1445_vm2, %v11173_v51  ;;  %3413 = vrot.lane.b32.xlu1 %v11083_v12, %s10789_s25 }
 0x211   : > { %9408 = vmatprep.mubr.msk.bf16.mxu0 %vm10786_vm0, %v15561_v1 }
 0x212   : > { %v11521_v62 = vpack.c.bf16 %v1344_v61, %v1343_v58  ;;  %v11602_v57 = vpop.permute.xlu0 %2075 }
 0x213   : > { %v1164_v5 = vpop.f32.mrb[140].mxu0 }
 0x214   : > { %v1165_v6 = vadd.f32 %v11526_v33, %v1164_v5  ;;  %3415 = vrot.lane.b32.xlu1 %v11093_v22, %s10789_s25  ;;  %2135 = vrot.lane.b32.xlu0 %v11521_v62, %s10787_s21  ;;  %v9298_v12 = vpop.f32.mrb[141].mxu0 }
 0x215   : > { %9493 = vmatmul.mubr.msk.bf16.gmra.mrb[44].mxu1 %vm1445_vm2, %v11521_v62  ;;  %v1167_v8 = vpop.f32.mrb[142].mxu0  ;;  %v11614_v12 = vpop.permute.xlu1 %2089 }
 0x216   : > { %v1168_v9 = vadd.f32 %v11526_v33, %v1167_v8  ;;  %9496 = vmatprep.mubr.msk.bf16.mxu1 %vm10786_vm0, %v15561_v1  ;;  %v9299_v11 = vpop.f32.mrb[143].mxu0  ;;  %v1345_v14 = vmax.f32 %v1165_v6, 0.0  ;;  %v11616_v8 = vpop.permute.xlu0 %2079 }
 0x218   : > { %v1346_v19 = vmax.f32 %v1168_v9, 0.0  ;;  %9409 = vmatmul.mubr.msk.bf16.gmra.mrb[248].mxu0 %vm1445_vm2, %v11183_v2  ;;  %2805 = vrot.lane.b32.xlu1 %v11521_v62, %s10788_s24 }
 0x219   : > { %3423 = vrot.lane.b32.xlu0 %v11133_v4, %s10789_s25  ;;  %9412 = vmatprep.mubr.msk.bf16.mxu0 %vm10786_vm0, %v15561_v1 }
 0x21a   : > { %v11546_v22 = vpack.c.bf16 %v1346_v19, %v1345_v14  ;;  %v11628_v14 = vpop.permute.xlu1 %2093 }
 0x21b   : > { %v1172_v23 = vpop.f32.mrb[144].mxu0 }
 0x21c   : > { %v1173_v24 = vadd.f32 %v11526_v33, %v1172_v23  ;;  %2137 = vrot.lane.b32.xlu1 %v11546_v22, %s10787_s21  ;;  %v9302_v43 = vpop.f32.mrb[145].mxu0  ;;  %v11630_v23 = vpop.permute.xlu0 %2083 }
 0x21d   : > { %3427 = vrot.lane.b32.xlu0 %v11153_v27, %s10789_s25  ;;  %9497 = vmatmul.mubr.msk.bf16.gmra.mrb[48].mxu1 %vm1445_vm2, %v11546_v22  ;;  %v1175_v4 = vpop.f32.mrb[146].mxu0 }
 0x21e   : > { %v1176_v25 = vadd.f32 %v11526_v33, %v1175_v4  ;;  %v9303_v26 = vpop.f32.mrb[147].mxu0  ;;  %9500 = vmatprep.mubr.msk.bf16.mxu1 %vm10786_vm0, %v15561_v1  ;;  %v1347_v34 = vmax.f32 %v1173_v24, 0.0 }
 0x220   : > { %v1348_v35 = vmax.f32 %v1176_v25, 0.0  ;;  %9413 = vmatmul.mubr.msk.bf16.gmra.mrb[252].mxu0 %vm1445_vm2, %v11193_v15  ;;  %3417 = vrot.lane.b32.xlu1 %v11103_v32, %s10789_s25  ;;  %v11642_v25 = vpop.permute.xlu1 %2097  ;;  %v11644_v26 = vpop.permute.xlu0 %2087 }
 0x221   : > { %3431 = vrot.lane.b32.xlu0 %v11173_v51, %s10789_s25  ;;  %9416 = vmatprep.mubr.msk.bf16.mxu0 %vm10786_vm0, %v15561_v1 }
 0x222   : > { %v11570_v27 = vpack.c.bf16 %v1348_v35, %v1347_v34 }
 0x223   : > { %v1180_v0 = vpop.f32.mrb[148].mxu0 }
 0x224   : > { %v1181_v38 = vadd.f32 %v11526_v33, %v1180_v0  ;;  %3419 = vrot.lane.b32.xlu1 %v11113_v44, %s10789_s25  ;;  %v9306_v40 = vpop.f32.mrb[149].mxu0  ;;  %v11656_v0 = vpop.permute.xlu1 %2101 }
 0x225   : > { %3435 = vrot.lane.b32.xlu0 %v11193_v15, %s10789_s25  ;;  %9501 = vmatmul.mubr.msk.bf16.gmra.mrb[52].mxu1 %vm1445_vm2, %v11570_v27  ;;  %v1183_v32 = vpop.f32.mrb[150].mxu0  ;;  %v11658_v40 = vpop.permute.xlu0 %2091 }
 0x226   : > { %v1184_v51 = vadd.f32 %v11526_v33, %v1183_v32  ;;  %9504 = vmatprep.mubr.msk.bf16.mxu1 %vm10786_vm0, %v15561_v1  ;;  %v9307_v47 = vpop.f32.mrb[151].mxu0  ;;  %v1349_v49 = vmax.f32 %v1181_v38, 0.0 }
 0x228   : > { %v1350_v44 = vmax.f32 %v1184_v51, 0.0  ;;  %9417 = vmatmul.mubr.msk.bf16.gmra.mrb[0].mxu0 %vm1445_vm2, %v11203_v28  ;;  %3421 = vrot.lane.b32.xlu1 %v11123_v55, %s10789_s25 }
 0x229   : > { %3439 = vrot.lane.b32.xlu0 %v11213_v41, %s10789_s25  ;;  %9420 = vmatprep.mubr.msk.bf16.mxu0 %vm10786_vm0, %v15561_v1 }
 0x22a   : > { %v11598_v15 = vpack.c.bf16 %v1350_v44, %v1349_v49  ;;  %v11670_v44 = vpop.permute.xlu0 %2095 }
 0x22b   : > { %v1188_v54 = vpop.f32.mrb[152].mxu0 }
 0x22c   : > { %v1189_v58 = vadd.f32 %v11526_v33, %v1188_v54  ;;  %3425 = vrot.lane.b32.xlu1 %v11143_v16, %s10789_s25  ;;  %v9310_v61 = vpop.f32.mrb[153].mxu0 }
 0x22d   : > { %3443 = vrot.lane.b32.xlu0 %v11235_v7, %s10789_s25  ;;  %9505 = vmatmul.mubr.msk.bf16.gmra.mrb[56].mxu1 %vm1445_vm2, %v11598_v15  ;;  %v1191_v55 = vpop.f32.mrb[154].mxu0 }
 0x22e   : > { %v1192_v5 = vadd.f32 %v11526_v33, %v1191_v55  ;;  %v9311_v6 = vpop.f32.mrb[155].mxu0  ;;  %9508 = vmatprep.mubr.msk.bf16.mxu1 %vm10786_vm0, %v15561_v1  ;;  %v1351_v9 = vmax.f32 %v1189_v58, 0.0 }
 0x230   : > { %v1352_v16 = vmax.f32 %v1192_v5, 0.0  ;;  %9421 = vmatmul.mubr.msk.bf16.gmra.mrb[4].mxu0 %vm1445_vm2, %v11213_v41  ;;  %3429 = vrot.lane.b32.xlu1 %v11163_v39, %s10789_s25  ;;  %v11684_v5 = vpop.permute.xlu0 %2099 }
 0x231   : > { %3447 = vrot.lane.b32.xlu0 %v11257_v36, %s10789_s25  ;;  %9424 = vmatprep.mubr.msk.bf16.mxu0 %vm10786_vm0, %v15561_v1 }
 0x232   : > { %v11626_v11 = vpack.c.bf16 %v1352_v16, %v1351_v9 }
 0x233   : > { %v1196_v19 = vpop.f32.mrb[156].mxu0 }
 0x234   : > { %v1197_v24 = vadd.f32 %v11526_v33, %v1196_v19  ;;  %3433 = vrot.lane.b32.xlu1 %v11183_v2, %s10789_s25  ;;  %v9314_v41 = vpop.f32.mrb[157].mxu0 }
 0x235   : > { %2807 = vrot.lane.b32.xlu0 %v11546_v22, %s10788_s24  ;;  %9509 = vmatmul.mubr.msk.bf16.gmra.mrb[60].mxu1 %vm1445_vm2, %v11626_v11  ;;  %v1199_v39 = vpop.f32.mrb[158].mxu0  ;;  %v11698_v41 = vpop.permute.xlu0 %2103 }
 0x236   : > { %v1200_v43 = vadd.f32 %v11526_v33, %v1199_v39  ;;  %v9315_v4 = vpop.f32.mrb[159].mxu0  ;;  %9512 = vmatprep.mubr.msk.bf16.mxu1 %vm10786_vm0, %v15561_v1  ;;  %v1353_v34 = vmax.f32 %v1197_v24, 0.0 }
 0x238   : > { %v1354_v2 = vmax.f32 %v1200_v43, 0.0  ;;  %9425 = vmatmul.mubr.msk.bf16.gmra.mrb[8].mxu0 %vm1445_vm2, %v11223_v56  ;;  %3437 = vrot.lane.b32.xlu1 %v11203_v28, %s10789_s25 }
 0x239   : > { %2139 = vrot.lane.b32.xlu0 %v11570_v27, %s10787_s21  ;;  %9428 = vmatprep.mubr.msk.bf16.mxu0 %vm10786_vm0, %v15561_v1 }
 0x23a   : > { %v11654_v35 = vpack.c.bf16 %v1354_v2, %v1353_v34 }
 0x23b   : > { %v1204_v38 = vpop.f32.mrb[160].mxu0 }
 0x23c   : > { %v1205_v32 = vadd.f32 %v11526_v33, %v1204_v38  ;;  %3441 = vrot.lane.b32.xlu1 %v11223_v56, %s10789_s25  ;;  %v9318_v51 = vpop.f32.mrb[161].mxu0  ;;  %v11676_v56 = vpop.permute.xlu1 %2737 }
 0x23d   : > { %2809 = vrot.lane.b32.xlu0 %v11570_v27, %s10788_s24  ;;  %9513 = vmatmul.mubr.msk.bf16.gmra.mrb[64].mxu1 %vm1445_vm2, %v11654_v35  ;;  %v1207_v28 = vpop.f32.mrb[162].mxu0  ;;  %v11712_v38 = vpop.permute.xlu0 %2107 }
 0x23e   : > { %v1208_v47 = vadd.f32 %v11526_v33, %v1207_v28  ;;  %v9319_v49 = vpop.f32.mrb[163].mxu0  ;;  %9516 = vmatprep.mubr.msk.bf16.mxu1 %vm10786_vm0, %v15561_v1  ;;  %v1355_v54 = vmax.f32 %v1205_v32, 0.0 }
 0x240   : > { %v1356_v58 = vmax.f32 %v1208_v47, 0.0  ;;  %9429 = vmatmul.mubr.msk.bf16.gmra.mrb[12].mxu0 %vm1445_vm2, %v11235_v7  ;;  %3445 = vrot.lane.b32.xlu1 %v11245_v21, %s10789_s25  ;;  %v11689_v9 = vpop.permute.xlu1 %2105 }
 0x241   : > { %2141 = vrot.lane.b32.xlu0 %v11598_v15, %s10787_s21  ;;  %9432 = vmatprep.mubr.msk.bf16.mxu0 %vm10786_vm0, %v15561_v1 }
 0x242   : > { %v11682_v61 = vpack.c.bf16 %v1356_v58, %v1355_v54 }
 0x243   : > { %v1212_v55 = vpop.f32.mrb[164].mxu0 }
 0x244   : > { %v1213_v6 = vadd.f32 %v11526_v33, %v1212_v55  ;;  %2811 = vrot.lane.b32.xlu1 %v11598_v15, %s10788_s24  ;;  %v9322_v7 = vpop.f32.mrb[165].mxu0  ;;  %v11710_v34 = vpop.permute.xlu1 %2739 }
 0x245   : > { %2143 = vrot.lane.b32.xlu0 %v11626_v11, %s10787_s21  ;;  %9517 = vmatmul.mubr.msk.bf16.gmra.mrb[68].mxu1 %vm1445_vm2, %v11682_v61  ;;  %v1215_v16 = vpop.f32.mrb[166].mxu0  ;;  %v11734_v55 = vpop.permute.xlu0 %2751 }
 0x246   : > { %v1216_v19 = vadd.f32 %v11526_v33, %v1215_v16  ;;  %v9323_v24 = vpop.f32.mrb[167].mxu0  ;;  %9520 = vmatprep.mubr.msk.bf16.mxu1 %vm10786_vm0, %v15561_v1  ;;  %v1357_v39 = vmax.f32 %v1213_v6, 0.0 }
 0x248   : > { %v1358_v43 = vmax.f32 %v1216_v19, 0.0  ;;  %9433 = vmatmul.mubr.msk.bf16.gmra.mrb[16].mxu0 %vm1445_vm2, %v11245_v21  ;;  %2817 = vrot.lane.b32.xlu1 %v11682_v61, %s10788_s24  ;;  %v11732_v58 = vpop.permute.xlu1 %2741 }
 0x249   : > { %2813 = vrot.lane.b32.xlu0 %v11626_v11, %s10788_s24  ;;  %9436 = vmatprep.mubr.msk.bf16.mxu0 %vm10786_vm0, %v15561_v1  ;;  %v11745_v24 = vpop.permute.xlu0 %2111 }
 0x24a   : > { %v11708_v4 = vpack.c.bf16 %v1358_v43, %v1357_v39 }
 0x24b   : > { %v1220_v2 = vpop.f32.mrb[168].mxu0 }
 0x24c   : > { %v1221_v32 = vadd.f32 %v11526_v33, %v1220_v2  ;;  %2149 = vrot.lane.b32.xlu1 %v11708_v4, %s10787_s21  ;;  %v9326_v21 = vpop.f32.mrb[169].mxu0  ;;  %v11750_v2 = vpop.permute.xlu1 %2743 }
 0x24d   : > { %2145 = vrot.lane.b32.xlu0 %v11654_v35, %s10787_s21  ;;  %9521 = vmatmul.mubr.msk.bf16.gmra.mrb[72].mxu1 %vm1445_vm2, %v11708_v4  ;;  %v1223_v51 = vpop.f32.mrb[170].mxu0 }
 0x24e   : > { %v1224_v28 = vadd.f32 %v11526_v33, %v1223_v51  ;;  %v9327_v47 = vpop.f32.mrb[171].mxu0  ;;  %9524 = vmatprep.mubr.msk.bf16.mxu1 %vm10786_vm0, %v15561_v1  ;;  %v1359_v49 = vmax.f32 %v1221_v32, 0.0 }
 0x250   : > { %v1360_v54 = vmax.f32 %v1224_v28, 0.0  ;;  %9437 = vmatmul.mubr.msk.bf16.gmra.mrb[20].mxu0 %vm1445_vm2, %v11257_v36  ;;  %3449 = vrot.lane.b32.xlu1 %v11273_v50, %s10789_s25  ;;  %v11762_v28 = vpop.permute.xlu0 %2755 }
 0x251   : > { %2815 = vrot.lane.b32.xlu0 %v11654_v35, %s10788_s24  ;;  %9440 = vmatprep.mubr.msk.bf16.mxu0 %vm10786_vm0, %v15561_v1 }
 0x252   : > { %v11736_v6 = vpack.c.bf16 %v1360_v54, %v1359_v49  ;;  %v11771_v49 = vpop.permute.xlu1 %2109 }
 0x253   : > { %v1228_v7 = vpop.f32.mrb[172].mxu0 }
 0x254   : > { %v1229_v16 = vadd.f32 %v11526_v33, %v1228_v7  ;;  %3453 = vrot.lane.b32.xlu1 %v11305_v18, %s10789_s25  ;;  %v9330_v36 = vpop.f32.mrb[173].mxu0 }
 0x255   : > { %2147 = vrot.lane.b32.xlu0 %v11682_v61, %s10787_s21  ;;  %9525 = vmatmul.mubr.msk.bf16.gmra.mrb[76].mxu1 %vm1445_vm2, %v11736_v6  ;;  %v1231_v19 = vpop.f32.mrb[174].mxu0 }
 0x256   : > { %v1232_v39 = vadd.f32 %v11526_v33, %v1231_v19  ;;  %v9331_v43 = vpop.f32.mrb[175].mxu0  ;;  %9528 = vmatprep.mubr.msk.bf16.mxu1 %vm10786_vm0, %v15561_v1  ;;  %v1361_v32 = vmax.f32 %v1229_v16, 0.0 }
 0x258   : > { %v1362_v18 = vmax.f32 %v1232_v39, 0.0  ;;  %9441 = vmatmul.mubr.msk.bf16.gmra.mrb[24].mxu0 %vm1445_vm2, %v11273_v50  ;;  %3457 = vrot.lane.b32.xlu1 %v11349_v45, %s10789_s25  ;;  %v11788_v39 = vpop.permute.xlu1 %2745 }
 0x259   : > { %3451 = vrot.lane.b32.xlu0 %v11286_v3, %s10789_s25  ;;  %9444 = vmatprep.mubr.msk.bf16.mxu0 %vm10786_vm0, %v15561_v1 }
 0x25a   : > { %v11760_v21 = vpack.c.bf16 %v1362_v18, %v1361_v32 }
 0x25b   : > { %v1236_v51 = vpop.f32.mrb[176].mxu0 }
 0x25c   : > { %v1237_v47 = vadd.f32 %v11526_v33, %v1236_v51  ;;  %3461 = vrot.lane.b32.xlu1 %v11389_v13, %s10789_s25  ;;  %v9334_v50 = vpop.f32.mrb[177].mxu0 }
 0x25d   : > { %3455 = vrot.lane.b32.xlu0 %v11327_v10, %s10789_s25  ;;  %9529 = vmatmul.mubr.msk.bf16.gmra.mrb[80].mxu1 %vm1445_vm2, %v11760_v21  ;;  %v1239_v45 = vpop.f32.mrb[178].mxu0  ;;  %v11784_v10 = vpop.permute.xlu0 %2759 }
 0x25e   : > { %v1240_v54 = vadd.f32 %v11526_v33, %v1239_v45  ;;  %v9335_v7 = vpop.f32.mrb[179].mxu0  ;;  %9532 = vmatprep.mubr.msk.bf16.mxu1 %vm10786_vm0, %v15561_v1  ;;  %v1363_v16 = vmax.f32 %v1237_v47, 0.0 }
 0x260   : > { %v1364_v36 = vmax.f32 %v1240_v54, 0.0  ;;  %9445 = vmatmul.mubr.msk.bf16.gmra.mrb[28].mxu0 %vm1445_vm2, %v11286_v3  ;;  %2823 = vrot.lane.b32.xlu1 %v11760_v21, %s10788_s24 }
 0x261   : > { %3459 = vrot.lane.b32.xlu0 %v11369_v59, %s10789_s25  ;;  %9756 = vmatprep.mubr.msk.bf16.mxu0 %vm10786_vm0, %v15561_v1  ;;  %v11800_v51 = vpop.permute.xlu0 %2763 }
 0x262   : > { %v11786_v13 = vpack.c.bf16 %v1364_v36, %v1363_v16 }
 0x263   : > { %v1244_v19 = vpop.f32.mrb[180].mxu0 }
 0x264   : > { %v1245_v43 = vadd.f32 %v11526_v33, %v1244_v19  ;;  %2155 = vrot.lane.b32.xlu1 %v11786_v13, %s10787_s21  ;;  %v9338_v3 = vpop.f32.mrb[181].mxu0 }
 0x265   : > { %3463 = vrot.lane.b32.xlu0 %v11409_v29, %s10789_s25  ;;  %9533 = vmatmul.mubr.msk.bf16.gmra.mrb[84].mxu1 %vm1445_vm2, %v11786_v13  ;;  %v1247_v59 = vpop.f32.mrb[182].mxu0  ;;  %v11810_v29 = vpop.permute.xlu1 %2747 }
 0x266   : > { %v1248_v32 = vadd.f32 %v11526_v33, %v1247_v59  ;;  %9536 = vmatprep.mubr.msk.bf16.mxu1 %vm10786_vm0, %v15561_v1  ;;  %v9339_v18 = vpop.f32.mrb[183].mxu0  ;;  %v1365_v47 = vmax.f32 %v1245_v43, 0.0  ;;  %v11821_v16 = vpop.permute.xlu0 %2115 }
 0x268   : > { %v1366_v50 = vmax.f32 %v1248_v32, 0.0  ;;  %9757 = vmatmul.mubr.msk.bf16.vlgmr.msra.gmra.mrb[32].mxu0 %vm1445_vm2, %v11676_v56  ;;  %3465 = vrot.lane.b32.xlu1 %v11429_v42, %s10789_s25 }
 0x269   : > { %2819 = vrot.lane.b32.xlu0 %v11708_v4, %s10788_s24  ;;  %9760 = vmatprep.mubr.msk.bf16.mxu0 %vm10786_vm0, %v15561_v1  ;;  %v11826_v43 = vpop.permute.xlu1 %2749 }
 0x26a   : > { %v11812_v45 = vpack.c.bf16 %v1366_v50, %v1365_v47  ;;  %v11838_v18 = vpop.permute.xlu0 %2767 }
 0x26b   : > { %v1252_v54 = vpop.f32.mrb[184].mxu0 }
 0x26c   : > { %v1253_v7 = vadd.f32 %v11526_v33, %v1252_v54  ;;  %3469 = vrot.lane.b32.xlu1 %v11467_v17, %s10789_s25  ;;  %v9342_v56 = vpop.f32.mrb[185].mxu0 }
 0x26d   : > { %2151 = vrot.lane.b32.xlu0 %v11736_v6, %s10787_s21  ;;  %9537 = vmatmul.mubr.msk.bf16.gmra.mrb[88].mxu1 %vm1445_vm2, %v11812_v45  ;;  %v1255_v42 = vpop.f32.mrb[186].mxu0  ;;  %v11847_v50 = vpop.permute.xlu1 %2113 }
 0x26e   : > { %v1256_v36 = vadd.f32 %v11526_v33, %v1255_v42  ;;  %v9343_v19 = vpop.f32.mrb[187].mxu0  ;;  %9540 = vmatprep.mubr.msk.bf16.mxu1 %vm10786_vm0, %v15561_v1  ;;  %v1367_v3 = vmax.f32 %v1253_v7, 0.0 }
 0x270   : > { %v1368_v17 = vmax.f32 %v1256_v36, 0.0  ;;  %9761 = vmatmul.mubr.msk.bf16.gmra.mrb[36].mxu0 %vm1445_vm2, %v11710_v34  ;;  %3473 = vrot.lane.b32.xlu1 %v11503_v63, %s10789_s25 }
 0x271   : > { %2821 = vrot.lane.b32.xlu0 %v11736_v6, %s10788_s24  ;;  %9764 = vmatprep.mubr.msk.bf16.mxu0 %vm10786_vm0, %v15561_v1 }
 0x272   : > { %v11836_v59 = vpack.c.bf16 %v1368_v17, %v1367_v3  ;;  %v11864_v3 = vpop.permute.xlu1 %2753 }
 0x273   : > { %v1260_v32 = vpop.f32.mrb[188].mxu0 }
 0x274   : > { %v1261_v47 = vadd.f32 %v11526_v33, %v1260_v32  ;;  %3477 = vrot.lane.b32.xlu1 %v11546_v22, %s10789_s25  ;;  %v9346_v34 = vpop.f32.mrb[189].mxu0  ;;  %v11860_v22 = vpop.permute.xlu0 %2771 }
 0x275   : > { %2153 = vrot.lane.b32.xlu0 %v11760_v21, %s10787_s21  ;;  %9541 = vmatmul.mubr.msk.bf16.gmra.mrb[92].mxu1 %vm1445_vm2, %v11836_v59  ;;  %v1263_v63 = vpop.f32.mrb[190].mxu0 }
 0x276   : > { %v1264_v54 = vadd.f32 %v11526_v33, %v1263_v63  ;;  %9544 = vmatprep.mubr.msk.bf16.mxu1 %vm10786_vm0, %v15561_v1  ;;  %v9347_v7 = vpop.f32.mrb[191].mxu0  ;;  %v1369_v56 = vmax.f32 %v1261_v47, 0.0 }
 0x278   : > { %v1370_v42 = vmax.f32 %v1264_v54, 0.0  ;;  %9765 = vmatmul.mubr.msk.bf16.gmra.mrb[40].mxu0 %vm1445_vm2, %v11732_v58  ;;  %2829 = vrot.lane.b32.xlu1 %v11836_v59, %s10788_s24  ;;  %v11876_v34 = vpop.permute.xlu0 %2775 }
 0x279   : > { %3467 = vrot.lane.b32.xlu0 %v11447_v60, %s10789_s25  ;;  %9768 = vmatprep.mubr.msk.bf16.mxu0 %vm10786_vm0, %v15561_v1 }
 0x27a   : > { %v11862_v36 = vpack.c.bf16 %v1370_v42, %v1369_v56 }
 0x27b   : > { %v1268_v19 = vpop.f32.mrb[192].mxu0 }
 0x27c   : > { %v1269_v17 = vadd.f32 %v11526_v33, %v1268_v19  ;;  %2161 = vrot.lane.b32.xlu1 %v11862_v36, %s10787_s21  ;;  %v9350_v58 = vpop.f32.mrb[193].mxu0 }
 0x27d   : > { %3471 = vrot.lane.b32.xlu0 %v11483_v31, %s10789_s25  ;;  %9545 = vmatmul.mubr.msk.bf16.gmra.mrb[96].mxu1 %vm1445_vm2, %v11862_v36  ;;  %v1271_v60 = vpop.f32.mrb[194].mxu0  ;;  %v11886_v31 = vpop.permute.xlu1 %2757 }
 0x27e   : > { %v1272_v32 = vadd.f32 %v11526_v33, %v1271_v60  ;;  %v9351_v47 = vpop.f32.mrb[195].mxu0  ;;  %9548 = vmatprep.mubr.msk.bf16.mxu1 %vm10786_vm0, %v15561_v1  ;;  %v1371_v63 = vmax.f32 %v1269_v17, 0.0  ;;  %v10681_v17 = vld [vmem:[%s15557_s5] sm:$0xff]  }
 0x280   : > { %v1372_v54 = vmax.f32 %v1272_v32, 0.0  ;;  %9769 = vmatmul.mubr.msk.bf16.gmra.mrb[44].mxu0 %vm1445_vm2, %v11750_v2  ;;  %3481 = vrot.lane.b32.xlu1 %v11598_v15, %s10789_s25  ;;  %v11900_v15 = vpop.permute.xlu0 %2119 }
 0x281   : > { %3475 = vrot.lane.b32.xlu0 %v11521_v62, %s10789_s25  ;;  %9772 = vmatprep.mubr.msk.bf16.mxu0 %vm10786_vm0, %v15561_v1  ;;  %v11904_v42 = vpop.permute.xlu1 %2761 }
 0x282   : > { %v11888_v33 = vpack.c.bf16 %v1372_v54, %v1371_v63  ;;  %v10682_v63 = vld [vmem:[%s15557_s5 + $0x8] sm:$0xff]  }
 0x283   : > { %v11890_v7 = vpop.f32.mrb[196].mxu0 }
 0x284   : > { %15573 = vst [vmem:[#allocation8_spill] sm:$0xff] %v11890_v7  ;;  %3485 = vrot.lane.b32.xlu1 %v11654_v35, %s10789_s25  ;;  %v9358_v56 = vpop.f32.mrb[197].mxu0  ;;  %v11916_v35 = vpop.permute.xlu0 %2779 }
 0x285   : > { %3479 = vrot.lane.b32.xlu0 %v11570_v27, %s10789_s25  ;;  %9549 = vmatmul.mubr.msk.bf16.gmra.mrb[100].mxu1 %vm1445_vm2, %v11888_v33  ;;  %v11898_v62 = vpop.f32.mrb[198].mxu0 }
 0x286   : > { %15574 = vst [vmem:[#allocation9_spill] sm:$0xff] %v11898_v62  ;;  %9556 = vmatprep.mubr.msk.bf16.mxu1 %vm10786_vm0, %v15561_v1  ;;  %v9359_v2 = vpop.f32.mrb[199].mxu0  ;;  %v15681_v62 = vmov 0.0  }
 0x288   : > { %9773 = vmatmul.mubr.msk.bf16.gmra.mrb[48].mxu0 %vm1445_vm2, %v11788_v39  ;;  %3489 = vrot.lane.b32.xlu1 %v11708_v4, %s10789_s25  ;;  %v11926_v39 = vpop.permute.xlu1 %2117  ;;  %v11946_v32 = vpop.permute.xlu0 %2783 }
 0x289   : > { %2825 = vrot.lane.b32.xlu0 %v11786_v13, %s10788_s24  ;;  %9776 = vmatprep.mubr.msk.bf16.mxu0 %vm10786_vm0, %v15561_v1 }
 0x28b   : > { %v11914_v27 = vpop.f32.mrb[200].mxu0 }
 0x28c   : > { %15575 = vst [vmem:[#allocation10_spill] sm:$0xff] %v11914_v27  ;;  %3493 = vrot.lane.b32.xlu1 %v11760_v21, %s10789_s25  ;;  %v9362_v19 = vpop.f32.mrb[201].mxu0  ;;  %v11953_v54 = vpop.permute.xlu1 %2765 }
 0x28d   : > { %2157 = vrot.lane.b32.xlu0 %v11812_v45, %s10787_s21  ;;  %9557 = vmatmul.mubr.msk.bf16.vlgmr.msra.gmra.mrb[104].mxu1 %vm1445_vm2, %v11574_v53  ;;  %v11924_v4 = vpop.f32.mrb[202].mxu0 }
 0x28e   : > { %15576 = vst [vmem:[#allocation11_spill] sm:$0xff] %v11924_v4  ;;  %9953 = vmatpush3.bf16.msra.mxu1 %v10681_v17  ;;  %v9363_v58 = vpop.f32.mrb[203].mxu0  ;;  %9560 = vmatprep.mubr.msk.bf16.mxu1 %vm10786_vm0, %v15561_v1  ;;  %v11967_v17 = vpop.permute.xlu0 %2787 }
 0x28f   : > { %v11933_v21 = vpop.f32.mrb[0].mxu1  ;;  %9954 = vmatprep.subr.bf16.mxu1 %v15561_v1 }
 0x290   : > { %15577 = vst [vmem:[#allocation12_spill] sm:$0xff] %v11933_v21  ;;  %v9450_v60 = vpop.f32.mrb[1].mxu1  ;;  %9777 = vmatmul.mubr.msk.bf16.gmra.mrb[52].mxu0 %vm1445_vm2, %v11810_v29  ;;  %3497 = vrot.lane.b32.xlu1 %v11812_v45, %s10789_s25 }
 0x291   : > { %2827 = vrot.lane.b32.xlu0 %v11812_v45, %s10788_s24  ;;  %v11942_v53 = vpop.f32.mrb[2].mxu1  ;;  %9780 = vmatprep.mubr.msk.bf16.mxu0 %vm10786_vm0, %v15561_v1 }
 0x292   : > { %15578 = vst [vmem:[#allocation13_spill] sm:$0xff] %v11942_v53  ;;  %v9451_v47 = vpop.f32.mrb[3].mxu1  ;;  %9955 = vmatpush3.bf16.msra.mxu1 %v10682_v63 }
 0x293   : > { %v11951_v29 = vpop.f32.mrb[204].mxu0  ;;  %v11977_v47 = vpop.permute.xlu1 %2769 }
 0x294   : > { %15579 = vst [vmem:[#allocation14_spill] sm:$0xff] %v11951_v29  ;;  %3501 = vrot.lane.b32.xlu1 %v11862_v36, %s10789_s25  ;;  %v9366_v45 = vpop.f32.mrb[205].mxu0 }
 0x295   : > { %2159 = vrot.lane.b32.xlu0 %v11836_v59, %s10787_s21  ;;  %9561 = vmatmul.mubr.msk.bf16.gmra.mrb[108].mxu1 %vm1445_vm2, %v11588_v48  ;;  %v11961_v56 = vpop.f32.mrb[206].mxu0 }
 0x296   : > { %15580 = vst [vmem:[#allocation15_spill] sm:$0xff] %v11961_v56  ;;  %v9367_v2 = vpop.f32.mrb[207].mxu0  ;;  %9564 = vmatprep.mubr.msk.bf16.mxu1 %vm10786_vm0, %v15561_v1 }
 0x297   : > { %v11965_v19 = vpop.f32.mrb[4].mxu1 }
 0x298   : > { %15581 = vst [vmem:[#allocation16_spill] sm:$0xff] %v11965_v19  ;;  %v9454_v58 = vpop.f32.mrb[5].mxu1  ;;  %9781 = vmatmul.mubr.msk.bf16.gmra.mrb[56].mxu0 %vm1445_vm2, %v11826_v43 }
 0x299   : > { %3483 = vrot.lane.b32.xlu0 %v11626_v11, %s10789_s25  ;;  %v11973_v60 = vpop.f32.mrb[6].mxu1  ;;  %9784 = vmatprep.mubr.msk.bf16.mxu0 %vm10786_vm0, %v15561_v1  ;;  %v11987_v11 = vpop.permute.xlu0 %2123 }
 0x29a   : > { %15582 = vst [vmem:[#allocation17_spill] sm:$0xff] %v11973_v60  ;;  %v9455_v48 = vpop.f32.mrb[7].mxu1 }
 0x29b   : > { %v11979_v63 = vpop.f32.mrb[208].mxu0 }
 0x29c   : > { %15583 = vst [vmem:[#allocation18_spill] sm:$0xff] %v11979_v63  ;;  %v9370_v45 = vpop.f32.mrb[209].mxu0 }
 0x29d   : > { %3487 = vrot.lane.b32.xlu0 %v11682_v61, %s10789_s25  ;;  %9565 = vmatmul.mubr.msk.bf16.gmra.mrb[112].mxu1 %vm1445_vm2, %v11548_v20  ;;  %v11985_v43 = vpop.f32.mrb[210].mxu0  ;;  %v11995_v45 = vpop.permute.xlu1 %2773 }
 0x29e   : > { %15584 = vst [vmem:[#allocation19_spill] sm:$0xff] %v11985_v43  ;;  %v9371_v2 = vpop.f32.mrb[211].mxu0  ;;  %9568 = vmatprep.mubr.msk.bf16.mxu1 %vm10786_vm0, %v15561_v1  ;;  %v12005_v60 = vpop.permute.xlu0 %2791 }
 0x29f   : > { %v11991_v58 = vpop.f32.mrb[8].mxu1 }
 0x2a0   : > { %15585 = vst [vmem:[#allocation20_spill] sm:$0xff] %v11991_v58  ;;  %v9458_v48 = vpop.f32.mrb[9].mxu1  ;;  %9785 = vmatmul.mubr.msk.bf16.gmra.mrb[60].mxu0 %vm1445_vm2, %v11734_v55 }
 0x2a1   : > { %3491 = vrot.lane.b32.xlu0 %v11736_v6, %s10789_s25  ;;  %v11999_v20 = vpop.f32.mrb[10].mxu1  ;;  %9788 = vmatprep.mubr.msk.bf16.mxu0 %vm10786_vm0, %v15561_v1  ;;  %v12015_v48 = vpop.permute.xlu1 %2121 }
 0x2a2   : > { %15586 = vst [vmem:[#allocation21_spill] sm:$0xff] %v11999_v20  ;;  %v9459_v61 = vpop.f32.mrb[11].mxu1 }
 0x2a3   : > { %v12003_v2 = vpop.f32.mrb[212].mxu0 }
 0x2a4   : > { %15587 = vst [vmem:[#allocation22_spill] sm:$0xff] %v12003_v2  ;;  %v9374_v58 = vpop.f32.mrb[213].mxu0 }
 0x2a5   : > { %3495 = vrot.lane.b32.xlu0 %v11786_v13, %s10789_s25  ;;  %9569 = vmatmul.mubr.msk.bf16.gmra.mrb[116].mxu1 %vm1445_vm2, %v11560_v30  ;;  %v12011_v55 = vpop.f32.mrb[214].mxu0  ;;  %v10276_v30 = vld [vmem:[%s15553_s1] sm:$0xff]   ;;  %v12030_v58 = vpop.permute.xlu0 %2795 }
 0x2a6   : > { %15588 = vst [vmem:[#allocation23_spill] sm:$0xff] %v12011_v55  ;;  %v9375_v6 = vpop.f32.mrb[215].mxu0  ;;  %9572 = vmatprep.mubr.msk.bf16.mxu1 %vm10786_vm0, %v15561_v1  ;;  %10153 = vmatpush3.bf16.msra.mxu0 %v10276_v30 }
 0x2a7   : > { %v12017_v61 = vpop.f32.mrb[12].mxu1  ;;  %10154 = vmatprep.subr.bf16.mxu0 %v15561_v1 }
 0x2a8   : > { %15589 = vst [vmem:[#allocation24_spill] sm:$0xff] %v12017_v61  ;;  %v9462_v20 = vpop.f32.mrb[13].mxu1  ;;  %9789 = vmatmul.mubr.msk.bf16.gmra.mrb[64].mxu0 %vm1445_vm2, %v11864_v3  ;;  %v12035_v3 = vpop.permute.xlu1 %2777 }
 0x2a9   : > { %3499 = vrot.lane.b32.xlu0 %v11836_v59, %s10789_s25  ;;  %v12023_v13 = vpop.f32.mrb[14].mxu1  ;;  %9792 = vmatprep.mubr.msk.bf16.mxu0 %vm10786_vm0, %v15561_v1 }
 0x2aa   : > { %15590 = vst [vmem:[#allocation25_spill] sm:$0xff] %v12023_v13  ;;  %v9463_v6 = vpop.f32.mrb[15].mxu1  ;;  %v12043_v13 = vpop.permute.xlu0 %2127 }
 0x2ab   : > { %v12032_v61 = vpop.f32.mrb[216].mxu0 }
 0x2ac   : > { %15591 = vst [vmem:[#allocation26_spill] sm:$0xff] %v12032_v61  ;;  %v9378_v20 = vpop.f32.mrb[217].mxu0 }
 0x2ad   : > { %2831 = vrot.lane.b32.xlu0 %v11862_v36, %s10788_s24  ;;  %9573 = vmatmul.mubr.msk.bf16.gmra.mrb[120].mxu1 %vm1445_vm2, %v11602_v57  ;;  %v12041_v59 = vpop.f32.mrb[218].mxu0  ;;  %v12057_v20 = vpop.permute.xlu1 %2781 }
 0x2ae   : > { %15592 = vst [vmem:[#allocation27_spill] sm:$0xff] %v12041_v59  ;;  %v9379_v19 = vpop.f32.mrb[219].mxu0  ;;  %9576 = vmatprep.mubr.msk.bf16.mxu1 %vm10786_vm0, %v15561_v1  ;;  %v12061_v53 = vpop.permute.xlu0 %2797 }
 0x2af   : > { %v12047_v30 = vpop.f32.mrb[16].mxu1 }
 0x2b0   : > { %15593 = vst [vmem:[#allocation28_spill] sm:$0xff] %v12047_v30  ;;  %v9466_v6 = vpop.f32.mrb[17].mxu1  ;;  %9793 = vmatmul.mubr.msk.bf16.gmra.mrb[68].mxu0 %vm1445_vm2, %v11762_v28 }
 0x2b1   : > { %2163 = vrot.lane.b32.xlu0 %v11888_v33, %s10787_s21  ;;  %v12053_v36 = vpop.f32.mrb[18].mxu1  ;;  %9796 = vmatprep.mubr.msk.bf16.mxu0 %vm10786_vm0, %v15561_v1 }
 0x2b2   : > { %15594 = vst [vmem:[#allocation29_spill] sm:$0xff] %v12053_v36  ;;  %v9467_v57 = vpop.f32.mrb[19].mxu1  ;;  %v12073_v36 = vpop.permute.xlu0 %2131 }
 0x2b3   : > { %v12059_v19 = vpop.f32.mrb[220].mxu0 }
 0x2b4   : > { %15595 = vst [vmem:[#allocation30_spill] sm:$0xff] %v12059_v19  ;;  %v9382_v30 = vpop.f32.mrb[221].mxu0 }
 0x2b5   : > { %2833 = vrot.lane.b32.xlu0 %v11888_v33, %s10788_s24  ;;  %9577 = vmatmul.mubr.msk.bf16.gmra.mrb[124].mxu1 %vm1445_vm2, %v11572_v37  ;;  %v12067_v28 = vpop.f32.mrb[222].mxu0  ;;  %v12083_v37 = vpop.permute.xlu1 %2785 }
 0x2b6   : > { %15596 = vst [vmem:[#allocation31_spill] sm:$0xff] %v12067_v28  ;;  %v9383_v6 = vpop.f32.mrb[223].mxu0  ;;  %9580 = vmatprep.mubr.msk.bf16.mxu1 %vm10786_vm0, %v15561_v1 }
 0x2b7   : > { %v12071_v57 = vpop.f32.mrb[20].mxu1 }
 0x2b8   : > { %15597 = vst [vmem:[#allocation32_spill] sm:$0xff] %v12071_v57  ;;  %v9470_v21 = vpop.f32.mrb[21].mxu1  ;;  %9797 = vmatmul.mubr.msk.bf16.gmra.mrb[72].mxu0 %vm1445_vm2, %v11886_v31  ;;  %v12091_v31 = vpop.permute.xlu0 %2801 }
 0x2b9   : > { %3503 = vrot.lane.b32.xlu0 %v11888_v33, %s10789_s25  ;;  %v12079_v30 = vpop.f32.mrb[22].mxu1  ;;  %9800 = vmatprep.mubr.msk.bf16.mxu0 %vm10786_vm0, %v15561_v1 }
 0x2ba   : > { %15598 = vst [vmem:[#allocation33_spill] sm:$0xff] %v12079_v30  ;;  %v9471_v6 = vpop.f32.mrb[23].mxu1  ;;  %v12097_v30 = vpop.permute.xlu1 %2125 }
 0x2bb   : > { %v12085_v28 = vpop.f32.mrb[224].mxu0 }
 0x2bc   : > { %15599 = vst [vmem:[#allocation34_spill] sm:$0xff] %v12085_v28  ;;  %v9386_v57 = vpop.f32.mrb[225].mxu0 }
 0x2bd   : > { %9581 = vmatmul.mubr.msk.bf16.gmra.mrb[128].mxu1 %vm1445_vm2, %v11616_v8  ;;  %v12089_v21 = vpop.f32.mrb[226].mxu0 }
 0x2be   : > { %15600 = vst [vmem:[#allocation35_spill] sm:$0xff] %v12089_v21  ;;  %v9387_v19 = vpop.f32.mrb[227].mxu0  ;;  %9584 = vmatprep.mubr.msk.bf16.mxu1 %vm10786_vm0, %v15561_v1 }
 0x2bf   : > { %v12095_v33 = vpop.f32.mrb[24].mxu1  ;;  %v12107_v19 = vpop.permute.xlu0 %2803 }
 0x2c0   : > { %15601 = vst [vmem:[#allocation36_spill] sm:$0xff] %v12095_v33  ;;  %v9474_v59 = vpop.f32.mrb[25].mxu1  ;;  %9801 = vmatmul.mubr.msk.bf16.gmra.mrb[76].mxu0 %vm1445_vm2, %v11784_v10 }
 0x2c1   : > { %v12101_v57 = vpop.f32.mrb[26].mxu1  ;;  %9804 = vmatprep.mubr.msk.bf16.mxu0 %vm10786_vm0, %v15561_v1  ;;  %v12113_v59 = vpop.permute.xlu1 %2789 }
 0x2c2   : > { %15602 = vst [vmem:[#allocation37_spill] sm:$0xff] %v12101_v57  ;;  %v9475_v8 = vpop.f32.mrb[27].mxu1 }
 0x2c3   : > { %v12105_v6 = vpop.f32.mrb[228].mxu0  ;;  %v12117_v10 = vpop.permute.xlu0 %2135 }
 0x2c4   : > { %15603 = vst [vmem:[#allocation38_spill] sm:$0xff] %v12105_v6  ;;  %v9390_v21 = vpop.f32.mrb[229].mxu0 }
 0x2c5   : > { %9585 = vmatmul.mubr.msk.bf16.gmra.mrb[132].mxu1 %vm1445_vm2, %v11586_v46  ;;  %v12111_v33 = vpop.f32.mrb[230].mxu0 }
 0x2c6   : > { %15604 = vst [vmem:[#allocation39_spill] sm:$0xff] %v12111_v33  ;;  %v9391_v28 = vpop.f32.mrb[231].mxu0  ;;  %9588 = vmatprep.mubr.msk.bf16.mxu1 %vm10786_vm0, %v15561_v1  ;;  %v12127_v33 = vpop.permute.xlu1 %2793 }
 0x2c7   : > { %v12133_v61 = vpop.permute.xlu0 %3423 }
 0x2c8   : > { %v12119_v57 = vpop.f32.mrb[28].mxu1  ;;  %9805 = vmatmul.mubr.msk.bf16.gmra.mrb[80].mxu0 %vm1445_vm2, %v11904_v42  ;;  %15608 = vst [vmem:[#allocation43_spill] sm:$0xff] %v12133_v61 }
 0x2c9   : > { %15605 = vst [vmem:[#allocation40_spill] sm:$0xff] %v12119_v57  ;;  %v9478_v8 = vpop.f32.mrb[29].mxu1  ;;  %9808 = vmatprep.mubr.msk.bf16.mxu0 %vm10786_vm0, %v15561_v1 }
 0x2ca   : > { %v12125_v46 = vpop.f32.mrb[30].mxu1 }
 0x2cb   : > { %15606 = vst [vmem:[#allocation41_spill] sm:$0xff] %v12125_v46  ;;  %v9479_v21 = vpop.f32.mrb[31].mxu1  ;;  %v12129_v28 = vpop.f32.mrb[232].mxu0 }
 0x2cc   : > { %15607 = vst [vmem:[#allocation42_spill] sm:$0xff] %v12129_v28  ;;  %v9394_v6 = vpop.f32.mrb[233].mxu0  ;;  %v12149_v28 = vpop.permute.xlu0 %3427 }
 0x2cd   : > { %9589 = vmatmul.mubr.msk.bf16.gmra.mrb[136].mxu1 %vm1445_vm2, %v11630_v23  ;;  %v12135_v57 = vpop.f32.mrb[234].mxu0  ;;  %v12145_v6 = vpop.permute.xlu1 %3407  ;;  %15612 = vst [vmem:[#allocation47_spill] sm:$0xff] %v12149_v28 }
 0x2ce   : > { %15609 = vst [vmem:[#allocation44_spill] sm:$0xff] %v12135_v57  ;;  %9592 = vmatprep.mubr.msk.bf16.mxu1 %vm10786_vm0, %v15561_v1  ;;  %v9395_v42 = vpop.f32.mrb[235].mxu0 }
 0x2d0   : > { %v12139_v8 = vpop.f32.mrb[32].mxu1  ;;  %9809 = vmatmul.mubr.msk.bf16.gmra.mrb[84].mxu0 %vm1445_vm2, %v11800_v51 }
 0x2d1   : > { %15610 = vst [vmem:[#allocation45_spill] sm:$0xff] %v12139_v8  ;;  %v9482_v21 = vpop.f32.mrb[33].mxu1  ;;  %9812 = vmatprep.mubr.msk.bf16.mxu0 %vm10786_vm0, %v15561_v1 }
 0x2d2   : > { %v12147_v23 = vpop.f32.mrb[34].mxu1  ;;  %v12159_v21 = vpop.permute.xlu1 %2129 }
 0x2d3   : > { %15611 = vst [vmem:[#allocation46_spill] sm:$0xff] %v12147_v23  ;;  %v9483_v46 = vpop.f32.mrb[35].mxu1  ;;  %v12151_v57 = vpop.f32.mrb[236].mxu0 }
 0x2d4   : > { %15613 = vst [vmem:[#allocation48_spill] sm:$0xff] %v12151_v57  ;;  %v9398_v55 = vpop.f32.mrb[237].mxu0 }
 0x2d5   : > { %9593 = vmatmul.mubr.msk.bf16.gmra.mrb[140].mxu1 %vm1445_vm2, %v11600_v52  ;;  %v12155_v42 = vpop.f32.mrb[238].mxu0  ;;  %v12167_v55 = vpop.permute.xlu0 %3431 }
 0x2d6   : > { %15614 = vst [vmem:[#allocation49_spill] sm:$0xff] %v12155_v42  ;;  %9596 = vmatprep.mubr.msk.bf16.mxu1 %vm10786_vm0, %v15561_v1  ;;  %v9399_v51 = vpop.f32.mrb[239].mxu0  ;;  %15616 = vst [vmem:[#allocation51_spill] sm:$0xff] %v12167_v55 }
 0x2d7   : > { %v12175_v51 = vpop.permute.xlu1 %3409 }
 0x2d8   : > { %v12161_v8 = vpop.f32.mrb[36].mxu1  ;;  %9813 = vmatmul.mubr.msk.bf16.gmra.mrb[88].mxu0 %vm1445_vm2, %v11953_v54 }
 0x2d9   : > { %15615 = vst [vmem:[#allocation50_spill] sm:$0xff] %v12161_v8  ;;  %v9486_v46 = vpop.f32.mrb[37].mxu1  ;;  %9816 = vmatprep.mubr.msk.bf16.mxu0 %vm10786_vm0, %v15561_v1 }
 0x2da   : > { %v12169_v52 = vpop.f32.mrb[38].mxu1  ;;  %v12181_v46 = vpop.permute.xlu0 %3435 }
 0x2db   : > { %15617 = vst [vmem:[#allocation52_spill] sm:$0xff] %v12169_v52  ;;  %v9487_v23 = vpop.f32.mrb[39].mxu1  ;;  %v12171_v42 = vpop.f32.mrb[240].mxu0  ;;  %15620 = vst [vmem:[#allocation55_spill] sm:$0xff] %v12181_v46  ;;  %v12607_v46 = vld [vmem:[%s10909_s10 + $0x34] ss:$24 sps:$4 sm:$0xff]  }
 0x2dc   : > { %15618 = vst [vmem:[#allocation53_spill] sm:$0xff] %v12171_v42  ;;  %v9402_v57 = vpop.f32.mrb[241].mxu0  ;;  %v12191_v52 = vpop.permute.xlu1 %3411  ;;  %v6729_v28 = vunpack.c.l.bf16 %v12607_v46 }
 0x2dd   : > { %9597 = vmatmul.mubr.msk.bf16.gmra.mrb[144].mxu1 %vm1445_vm2, %v11644_v26  ;;  %v12177_v8 = vpop.f32.mrb[242].mxu0 }
 0x2de   : > { %15619 = vst [vmem:[#allocation54_spill] sm:$0xff] %v12177_v8  ;;  %9600 = vmatprep.mubr.msk.bf16.mxu1 %vm10786_vm0, %v15561_v1  ;;  %v9403_v54 = vpop.f32.mrb[243].mxu0 }
 0x2df   : > { %v12197_v54 = vpop.permute.xlu0 %3439 }
 0x2e0   : > { %v12183_v2 = vpop.f32.mrb[40].mxu1  ;;  %9817 = vmatmul.mubr.msk.bf16.gmra.mrb[92].mxu0 %vm1445_vm2, %v11838_v18  ;;  %15624 = vst [vmem:[#allocation59_spill] sm:$0xff] %v12197_v54 }
 0x2e1   : > { %15621 = vst [vmem:[#allocation56_spill] sm:$0xff] %v12183_v2  ;;  %v9490_v23 = vpop.f32.mrb[41].mxu1  ;;  %9820 = vmatprep.mubr.msk.bf16.mxu0 %vm10786_vm0, %v15561_v1 }
 0x2e2   : > { %v12189_v26 = vpop.f32.mrb[42].mxu1 }
 0x2e3   : > { %15622 = vst [vmem:[#allocation57_spill] sm:$0xff] %v12189_v26  ;;  %v9491_v57 = vpop.f32.mrb[43].mxu1  ;;  %v12193_v8 = vpop.f32.mrb[244].mxu0 }
 0x2e4   : > { %15623 = vst [vmem:[#allocation58_spill] sm:$0xff] %v12193_v8  ;;  %v9406_v42 = vpop.f32.mrb[245].mxu0  ;;  %v12213_v8 = vpop.permute.xlu0 %3443 }
 0x2e5   : > { %9601 = vmatmul.mubr.msk.bf16.gmra.mrb[148].mxu1 %vm1445_vm2, %v11614_v12  ;;  %v12199_v2 = vpop.f32.mrb[246].mxu0  ;;  %v12209_v42 = vpop.permute.xlu1 %2799  ;;  %15628 = vst [vmem:[#allocation63_spill] sm:$0xff] %v12213_v8 }
 0x2e6   : > { %15625 = vst [vmem:[#allocation60_spill] sm:$0xff] %v12199_v2  ;;  %9604 = vmatprep.mubr.msk.bf16.mxu1 %vm10786_vm0, %v15561_v1  ;;  %v9407_v18 = vpop.f32.mrb[247].mxu0 }
 0x2e8   : > { %v12203_v23 = vpop.f32.mrb[44].mxu1  ;;  %9821 = vmatmul.mubr.msk.bf16.gmra.mrb[96].mxu0 %vm1445_vm2, %v11977_v47 }
 0x2e9   : > { %15626 = vst [vmem:[#allocation61_spill] sm:$0xff] %v12203_v23  ;;  %v9494_v57 = vpop.f32.mrb[45].mxu1  ;;  %9824 = vmatprep.mubr.msk.bf16.mxu0 %vm10786_vm0, %v15561_v1 }
 0x2ea   : > { %v12211_v12 = vpop.f32.mrb[46].mxu1  ;;  %v12223_v57 = vpop.permute.xlu1 %2133 }
 0x2eb   : > { %15627 = vst [vmem:[#allocation62_spill] sm:$0xff] %v12211_v12  ;;  %v9495_v26 = vpop.f32.mrb[47].mxu1  ;;  %v12215_v2 = vpop.f32.mrb[248].mxu0 }
 0x2ec   : > { %15629 = vst [vmem:[#allocation64_spill] sm:$0xff] %v12215_v2  ;;  %v9410_v43 = vpop.f32.mrb[249].mxu0 }
 0x2ed   : > { %9605 = vmatmul.mubr.msk.bf16.gmra.mrb[152].mxu1 %vm1445_vm2, %v11658_v40  ;;  %v12219_v18 = vpop.f32.mrb[250].mxu0  ;;  %v12231_v43 = vpop.permute.xlu0 %3447 }
 0x2ee   : > { %15630 = vst [vmem:[#allocation65_spill] sm:$0xff] %v12219_v18  ;;  %9608 = vmatprep.mubr.msk.bf16.mxu1 %vm10786_vm0, %v15561_v1  ;;  %v9411_v47 = vpop.f32.mrb[251].mxu0  ;;  %15632 = vst [vmem:[#allocation67_spill] sm:$0xff] %v12231_v43  ;;  %v8851_v43 = vld [vmem:[%s10909_s10 + $0x8] sm:$0xff]  }
 0x2ef   : > { %v12239_v47 = vpop.permute.xlu1 %3413 }
 0x2f0   : > { %v12225_v23 = vpop.f32.mrb[48].mxu1  ;;  %9825 = vmatmul.mubr.msk.bf16.gmra.mrb[100].mxu0 %vm1445_vm2, %v11860_v22 }
 0x2f1   : > { %15631 = vst [vmem:[#allocation66_spill] sm:$0xff] %v12225_v23  ;;  %v9498_v26 = vpop.f32.mrb[49].mxu1  ;;  %9828 = vmatprep.mubr.msk.bf16.mxu0 %vm10786_vm0, %v15561_v1 }
 0x2f2   : > { %v12233_v40 = vpop.f32.mrb[50].mxu1  ;;  %v12245_v26 = vpop.permute.xlu0 %2807 }
 0x2f3   : > { %15633 = vst [vmem:[#allocation68_spill] sm:$0xff] %v12233_v40  ;;  %v9499_v12 = vpop.f32.mrb[51].mxu1  ;;  %v12235_v18 = vpop.f32.mrb[252].mxu0 }
 0x2f4   : > { %15634 = vst [vmem:[#allocation69_spill] sm:$0xff] %v12235_v18  ;;  %v9414_v2 = vpop.f32.mrb[253].mxu0  ;;  %v12255_v40 = vpop.permute.xlu1 %3415 }
 0x2f5   : > { %9609 = vmatmul.mubr.msk.bf16.gmra.mrb[156].mxu1 %vm1445_vm2, %v11628_v14  ;;  %v12241_v23 = vpop.f32.mrb[254].mxu0 }
 0x2f6   : > { %15635 = vst [vmem:[#allocation70_spill] sm:$0xff] %v12241_v23  ;;  %9612 = vmatprep.mubr.msk.bf16.mxu1 %vm10786_vm0, %v15561_v1  ;;  %v9415_v22 = vpop.f32.mrb[255].mxu0 }
 0x2f7   : > { %v12261_v22 = vpop.permute.xlu0 %2139 }
 0x2f8   : > { %v12247_v63 = vpop.f32.mrb[52].mxu1  ;;  %9829 = vmatmul.mubr.msk.bf16.gmra.mrb[104].mxu0 %vm1445_vm2, %v11995_v45 }
 0x2f9   : > { %15636 = vst [vmem:[#allocation71_spill] sm:$0xff] %v12247_v63  ;;  %v9502_v12 = vpop.f32.mrb[53].mxu1  ;;  %9832 = vmatprep.mubr.msk.bf16.mxu0 %vm10786_vm0, %v15561_v1 }
 0x2fa   : > { %v12253_v14 = vpop.f32.mrb[54].mxu1 }
 0x2fb   : > { %15637 = vst [vmem:[#allocation72_spill] sm:$0xff] %v12253_v14  ;;  %v9503_v2 = vpop.f32.mrb[55].mxu1  ;;  %v12257_v23 = vpop.f32.mrb[0].mxu0 }
 0x2fc   : > { %15638 = vst [vmem:[#allocation73_spill] sm:$0xff] %v12257_v23  ;;  %v9418_v18 = vpop.f32.mrb[1].mxu0  ;;  %v12277_v23 = vpop.permute.xlu0 %2809 }
 0x2fd   : > { %9613 = vmatmul.mubr.msk.bf16.gmra.mrb[160].mxu1 %vm1445_vm2, %v11670_v44  ;;  %v12263_v63 = vpop.f32.mrb[2].mxu0  ;;  %v12273_v18 = vpop.permute.xlu1 %2805 }
 0x2fe   : > { %15639 = vst [vmem:[#allocation74_spill] sm:$0xff] %v12263_v63  ;;  %9616 = vmatprep.mubr.msk.bf16.mxu1 %vm10786_vm0, %v15561_v1  ;;  %v9419_v45 = vpop.f32.mrb[3].mxu0 }
 0x300   : > { %v12267_v12 = vpop.f32.mrb[56].mxu1  ;;  %9833 = vmatmul.mubr.msk.bf16.gmra.mrb[108].mxu0 %vm1445_vm2, %v11876_v34 }
 0x301   : > { %15640 = vst [vmem:[#allocation75_spill] sm:$0xff] %v12267_v12  ;;  %v9506_v2 = vpop.f32.mrb[57].mxu1  ;;  %9836 = vmatprep.mubr.msk.bf16.mxu0 %vm10786_vm0, %v15561_v1 }
 0x302   : > { %v12275_v44 = vpop.f32.mrb[58].mxu1  ;;  %v12287_v2 = vpop.permute.xlu1 %2137 }
 0x303   : > { %15641 = vst [vmem:[#allocation76_spill] sm:$0xff] %v12275_v44  ;;  %v9507_v14 = vpop.f32.mrb[59].mxu1  ;;  %v12279_v63 = vpop.f32.mrb[4].mxu0 }
 0x304   : > { %15642 = vst [vmem:[#allocation77_spill] sm:$0xff] %v12279_v63  ;;  %v9422_v56 = vpop.f32.mrb[5].mxu0 }
 0x305   : > { %9617 = vmatmul.mubr.msk.bf16.gmra.mrb[164].mxu1 %vm1445_vm2, %v11642_v25  ;;  %v12283_v45 = vpop.f32.mrb[6].mxu0  ;;  %v12295_v56 = vpop.permute.xlu0 %2141 }
 0x306   : > { %15643 = vst [vmem:[#allocation78_spill] sm:$0xff] %v12283_v45  ;;  %9620 = vmatprep.mubr.msk.bf16.mxu1 %vm10786_vm0, %v15561_v1  ;;  %v9423_v34 = vpop.f32.mrb[7].mxu0 }
 0x307   : > { %v10277_v34 = vld [vmem:[%s15553_s1 + $0x8] sm:$0xff]  }
 0x308   : > { %v12289_v12 = vpop.f32.mrb[60].mxu1  ;;  %9837 = vmatmul.mubr.msk.bf16.gmra.mrb[112].mxu0 %vm1445_vm2, %v12035_v3  ;;  %v12306_v3 = vpop.permute.xlu1 %3417 }
 0x309   : > { %15644 = vst [vmem:[#allocation79_spill] sm:$0xff] %v12289_v12  ;;  %v9510_v14 = vpop.f32.mrb[61].mxu1  ;;  %9840 = vmatprep.mubr.msk.bf16.mxu0 %vm10786_vm0, %v15561_v1  ;;  %10155 = vmatpush3.bf16.msra.mxu0 %v10277_v34 }
 0x30a   : > { %v12297_v25 = vpop.f32.mrb[62].mxu1  ;;  %10156 = vmatprep.subr.bf16.mxu0 %v15561_v1 }
 0x30b   : > { %15645 = vst [vmem:[#allocation80_spill] sm:$0xff] %v12297_v25  ;;  %v9511_v44 = vpop.f32.mrb[63].mxu1  ;;  %v12302_v45 = vpop.f32.mrb[8].mxu0 }
 0x30c   : > { %15646 = vst [vmem:[#allocation81_spill] sm:$0xff] %v12302_v45  ;;  %v9426_v63 = vpop.f32.mrb[9].mxu0  ;;  %v12313_v25 = vpop.permute.xlu0 %2143 }
 0x30d   : > { %9621 = vmatmul.mubr.msk.bf16.gmra.mrb[168].mxu1 %vm1445_vm2, %v11684_v5  ;;  %v12308_v14 = vpop.f32.mrb[10].mxu0 }
 0x30e   : > { %15647 = vst [vmem:[#allocation82_spill] sm:$0xff] %v12308_v14  ;;  %9624 = vmatprep.mubr.msk.bf16.mxu1 %vm10786_vm0, %v15561_v1  ;;  %v9427_v44 = vpop.f32.mrb[11].mxu0  ;;  %v12323_v14 = vpop.permute.xlu1 %3419 }
 0x30f   : > { %15650 = vst [vmem:[#allocation85_spill] sm:$0xff] %v12323_v14 }
 0x310   : > { %v12315_v12 = vpop.f32.mrb[64].mxu1  ;;  %9841 = vmatmul.mubr.msk.bf16.gmra.mrb[116].mxu0 %vm1445_vm2, %v11916_v35  ;;  %v12329_v44 = vpop.permute.xlu0 %2813 }
 0x311   : > { %15648 = vst [vmem:[#allocation83_spill] sm:$0xff] %v12315_v12  ;;  %v9514_v63 = vpop.f32.mrb[65].mxu1  ;;  %9844 = vmatprep.mubr.msk.bf16.mxu0 %vm10786_vm0, %v15561_v1 }
 0x312   : > { %v12321_v5 = vpop.f32.mrb[66].mxu1 }
 0x313   : > { %15649 = vst [vmem:[#allocation84_spill] sm:$0xff] %v12321_v5  ;;  %v9515_v34 = vpop.f32.mrb[67].mxu1  ;;  %v12325_v45 = vpop.f32.mrb[12].mxu0 }
 0x314   : > { %15651 = vst [vmem:[#allocation86_spill] sm:$0xff] %v12325_v45  ;;  %v9430_v29 = vpop.f32.mrb[13].mxu0  ;;  %v12345_v45 = vpop.permute.xlu0 %2145 }
 0x315   : > { %9625 = vmatmul.mubr.msk.bf16.gmra.mrb[172].mxu1 %vm1445_vm2, %v11656_v0  ;;  %v12331_v12 = vpop.f32.mrb[14].mxu0  ;;  %v12341_v29 = vpop.permute.xlu1 %3421 }
 0x316   : > { %15652 = vst [vmem:[#allocation87_spill] sm:$0xff] %v12331_v12  ;;  %9628 = vmatprep.mubr.msk.bf16.mxu1 %vm10786_vm0, %v15561_v1  ;;  %v9431_v35 = vpop.f32.mrb[15].mxu0  ;;  %15654 = vst [vmem:[#allocation89_spill] sm:$0xff] %v12341_v29  ;;  %v6744_v29 = vrot.slane %v6729_v28, 2 }
 0x318   : > { %v12335_v63 = vpop.f32.mrb[68].mxu1  ;;  %9845 = vmatmul.mubr.msk.bf16.gmra.mrb[120].mxu0 %vm1445_vm2, %v12057_v20 }
 0x319   : > { %15653 = vst [vmem:[#allocation88_spill] sm:$0xff] %v12335_v63  ;;  %v9518_v34 = vpop.f32.mrb[69].mxu1  ;;  %9848 = vmatprep.mubr.msk.bf16.mxu0 %vm10786_vm0, %v15561_v1 }
 0x31a   : > { %v12343_v0 = vpop.f32.mrb[70].mxu1  ;;  %v12355_v34 = vpop.permute.xlu1 %3425 }
 0x31b   : > { %15655 = vst [vmem:[#allocation90_spill] sm:$0xff] %v12343_v0  ;;  %v9519_v5 = vpop.f32.mrb[71].mxu1  ;;  %v12347_v12 = vpop.f32.mrb[16].mxu0  ;;  %15658 = vst [vmem:[#allocation93_spill] sm:$0xff] %v12355_v34 }
 0x31c   : > { %15656 = vst [vmem:[#allocation91_spill] sm:$0xff] %v12347_v12  ;;  %v9434_v4 = vpop.f32.mrb[17].mxu0 }
 0x31d   : > { %9629 = vmatmul.mubr.msk.bf16.gmra.mrb[176].mxu1 %vm1445_vm2, %v11698_v41  ;;  %v12351_v35 = vpop.f32.mrb[18].mxu0  ;;  %v12363_v4 = vpop.permute.xlu0 %2815 }
 0x31e   : > { %15657 = vst [vmem:[#allocation92_spill] sm:$0xff] %v12351_v35  ;;  %9632 = vmatprep.mubr.msk.bf16.mxu1 %vm10786_vm0, %v15561_v1  ;;  %v9435_v20 = vpop.f32.mrb[19].mxu0 }
 0x31f   : > { %v12371_v20 = vpop.permute.xlu1 %3429 }
 0x320   : > { %v12357_v63 = vpop.f32.mrb[72].mxu1  ;;  %9849 = vmatmul.mubr.msk.bf16.gmra.mrb[124].mxu0 %vm1445_vm2, %v11946_v32  ;;  %15662 = vst [vmem:[#allocation97_spill] sm:$0xff] %v12371_v20 }
 0x321   : > { %15659 = vst [vmem:[#allocation94_spill] sm:$0xff] %v12357_v63  ;;  %v9522_v5 = vpop.f32.mrb[73].mxu1  ;;  %9852 = vmatprep.mubr.msk.bf16.mxu0 %vm10786_vm0, %v15561_v1 }
 0x322   : > { %v12365_v41 = vpop.f32.mrb[74].mxu1  ;;  %v12377_v5 = vpop.permute.xlu0 %2147 }
 0x323   : > { %15660 = vst [vmem:[#allocation95_spill] sm:$0xff] %v12365_v41  ;;  %v9523_v0 = vpop.f32.mrb[75].mxu1  ;;  %v12367_v35 = vpop.f32.mrb[20].mxu0 }
 0x324   : > { %15661 = vst [vmem:[#allocation96_spill] sm:$0xff] %v12367_v35  ;;  %v9438_v12 = vpop.f32.mrb[21].mxu0  ;;  %v12387_v41 = vpop.permute.xlu1 %3433 }
 0x325   : > { %9633 = vmatmul.mubr.msk.bf16.gmra.mrb[180].mxu1 %vm1445_vm2, %v11689_v9  ;;  %v12373_v63 = vpop.f32.mrb[22].mxu0  ;;  %15666 = vst [vmem:[#allocation101_spill] sm:$0xff] %v12387_v41 }
 0x326   : > { %15663 = vst [vmem:[#allocation98_spill] sm:$0xff] %v12373_v63  ;;  %9636 = vmatprep.mubr.msk.bf16.mxu1 %vm10786_vm0, %v15561_v1  ;;  %v9439_v32 = vpop.f32.mrb[23].mxu0 }
 0x327   : > { %v12393_v32 = vpop.permute.xlu0 %3451 }
 0x328   : > { %v12379_v27 = vpop.f32.mrb[76].mxu1  ;;  %9853 = vmatmul.mubr.msk.bf16.gmra.mrb[128].mxu0 %vm1445_vm2, %v12083_v37  ;;  %15668 = vst [vmem:[#allocation103_spill] sm:$0xff] %v12393_v32 }
 0x329   : > { %15664 = vst [vmem:[#allocation99_spill] sm:$0xff] %v12379_v27  ;;  %v9526_v0 = vpop.f32.mrb[77].mxu1  ;;  %9856 = vmatprep.mubr.msk.bf16.mxu0 %vm10786_vm0, %v15561_v1 }
 0x32a   : > { %v12385_v9 = vpop.f32.mrb[78].mxu1 }
 0x32b   : > { %15665 = vst [vmem:[#allocation100_spill] sm:$0xff] %v12385_v9  ;;  %v9527_v12 = vpop.f32.mrb[79].mxu1  ;;  %v12389_v63 = vpop.f32.mrb[24].mxu0 }
 0x32c   : > { %15667 = vst [vmem:[#allocation102_spill] sm:$0xff] %v12389_v63  ;;  %v9442_v35 = vpop.f32.mrb[25].mxu0 }
 0x32d   : > { %9637 = vmatmul.mubr.msk.bf16.gmra.mrb[184].mxu1 %vm1445_vm2, %v11712_v38  ;;  %v12395_v27 = vpop.f32.mrb[26].mxu0  ;;  %v12405_v35 = vpop.permute.xlu1 %3437 }
 0x32e   : > { %15669 = vst [vmem:[#allocation104_spill] sm:$0xff] %v12395_v27  ;;  %9640 = vmatprep.mubr.msk.bf16.mxu1 %vm10786_vm0, %v15561_v1  ;;  %v9443_v37 = vpop.f32.mrb[27].mxu0  ;;  %15671 = vst [vmem:[#allocation106_spill] sm:$0xff] %v12405_v35  ;;  %v12411_v27 = vpop.permute.xlu0 %3455 }
 0x32f   : > { %15674 = vst [vmem:[#allocation109_spill] sm:$0xff] %v12411_v27 }
 0x330   : > { %v12399_v0 = vpop.f32.mrb[80].mxu1  ;;  %9857 = vmatmul.mubr.msk.bf16.gmra.mrb[132].mxu0 %vm1445_vm2, %v11967_v17 }
 0x331   : > { %15670 = vst [vmem:[#allocation105_spill] sm:$0xff] %v12399_v0  ;;  %v9530_v12 = vpop.f32.mrb[81].mxu1  ;;  %9860 = vmatprep.mubr.msk.bf16.mxu0 %vm10786_vm0, %v15561_v1 }
 0x332   : > { %v12407_v38 = vpop.f32.mrb[82].mxu1  ;;  %v12419_v12 = vpop.permute.xlu1 %3441 }
 0x333   : > { %15672 = vst [vmem:[#allocation107_spill] sm:$0xff] %v12407_v38  ;;  %v9531_v9 = vpop.f32.mrb[83].mxu1  ;;  %v12409_v63 = vpop.f32.mrb[28].mxu0  ;;  %15676 = vst [vmem:[#allocation111_spill] sm:$0xff] %v12419_v12  ;;  %v12573_v12 = vld [vmem:[%s10909_s10 + $0x28] sm:$0xff]  }
 0x334   : > { %15673 = vst [vmem:[#allocation108_spill] sm:$0xff] %v12409_v63  ;;  %v9446_v7 = vpop.f32.mrb[29].mxu0 }
 0x335   : > { %9641 = vmatmul.mubr.msk.bf16.gmra.mrb[188].mxu1 %vm1445_vm2, %v11771_v49  ;;  %v12415_v37 = vpop.f32.mrb[30].mxu0  ;;  %v12427_v7 = vpop.permute.xlu0 %3459 }
 0x336   : > { %15675 = vst [vmem:[#allocation110_spill] sm:$0xff] %v12415_v37  ;;  %v9447_v17 = vpop.f32.mrb[31].mxu0  ;;  %9644 = vmatprep.mubr.msk.bf16.mxu1 %vm10786_vm0, %v15561_v1  ;;  %15678 = vst [vmem:[#allocation113_spill] sm:$0xff] %v12427_v7 }
 0x337   : > { %v12434_v17 = vld [vmem:[%s15558_s6] ss:$0 sm:$0xff] }
 0x338   : > { %v12421_v0 = vpop.f32.mrb[84].mxu1  ;;  %9861 = vmatmul.mubr.msk.bf16.gmra.mrb[136].mxu0 %vm1445_vm2, %v12113_v59 }
 0x339   : > { %15677 = vst [vmem:[#allocation112_spill] sm:$0xff] %v12421_v0  ;;  %v9534_v9 = vpop.f32.mrb[85].mxu1  ;;  %9864 = vmatprep.mubr.msk.bf16.mxu0 %vm10786_vm0, %v15561_v1  ;;  %v12445_v7 = vpop.permute.xlu0 %3463 }
 0x33a   : > { %v12429_v49 = vpop.f32.mrb[86].mxu1  ;;  %v12439_v9 = vpop.permute.xlu1 %3445  ;;  %15682 = vst [vmem:[#allocation116_spill] sm:$0xff] %v12445_v7 }
 0x33b   : > { %15679 = vst [vmem:[#allocation114_spill] sm:$0xff] %v12429_v49  ;;  %v9535_v38 = vpop.f32.mrb[87].mxu1  ;;  %v3016_v37 = vpop.f32.mrb[32].mxu0  ;;  %15680 = vst [vmem:[#allocation115_spill] sm:$0xff] %v12439_v9 }
 0x33c   : > { %v3017_v0 = vadd.f32 %v12434_v17, %v3016_v37  ;;  %v9758_v63 = vpop.f32.mrb[33].mxu0 }
 0x33d   : > { %9645 = vmatmul.mubr.msk.bf16.gmra.mrb[192].mxu1 %vm1445_vm2, %v11745_v24  ;;  %v3019_v59 = vpop.f32.mrb[34].mxu0 }
 0x33e   : > { %v3020_v1 = vadd.f32 %v12434_v17, %v3019_v59  ;;  %4567 = vrot.lane.b32.xlu1 %v3017_v0, %s10788_s24  ;;  %v9759_v49 = vpop.f32.mrb[35].mxu0  ;;  %9648 = vmatprep.mubr.msk.bf16.mxu1 %vm10786_vm0, %v15681_v62 }
 0x33f   : > { %v12456_v49 = vpop.permute.xlu1 %2811 }
 0x340   : > { %v12447_v38 = vpop.f32.mrb[88].mxu1  ;;  %9865 = vmatmul.mubr.msk.bf16.gmra.mrb[140].mxu0 %vm1445_vm2, %v12005_v60  ;;  %4569 = vrot.lane.b32.xlu0 %v3020_v1, %s10788_s24  ;;  %v12461_v60 = vpop.permute.xlu0 %2819 }
 0x341   : > { %15683 = vst [vmem:[#allocation117_spill] sm:$0xff] %v12447_v38  ;;  %v9538_v24 = vpop.f32.mrb[89].mxu1  ;;  %9868 = vmatprep.mubr.msk.bf16.mxu0 %vm10786_vm0, %v15681_v62 }
 0x342   : > { %v12454_v63 = vpop.f32.mrb[90].mxu1 }
 0x343   : > { %15684 = vst [vmem:[#allocation118_spill] sm:$0xff] %v12454_v63  ;;  %v9539_v0 = vpop.f32.mrb[91].mxu1  ;;  %v3024_v37 = vpop.f32.mrb[36].mxu0 }
 0x344   : > { %v3025_v59 = vadd.f32 %v12434_v17, %v3024_v37  ;;  %v9762_v7 = vpop.f32.mrb[37].mxu0 }
 0x345   : > { %9649 = vmatmul.mubr.msk.bf16.gmra.mrb[196].mxu1 %vm1445_vm2, %v11847_v50  ;;  %v3027_v38 = vpop.f32.mrb[38].mxu0  ;;  %v12474_v50 = vpop.permute.xlu1 %2817 }
 0x346   : > { %v3028_v1 = vadd.f32 %v12434_v17, %v3027_v38  ;;  %4571 = vrot.lane.b32.xlu1 %v3025_v59, %s10788_s24  ;;  %v9763_v24 = vpop.f32.mrb[39].mxu0  ;;  %9652 = vmatprep.mubr.msk.bf16.mxu1 %vm10786_vm0, %v15681_v62 }
 0x347   : > { %v12478_v24 = vpop.permute.xlu0 %2151 }
 0x348   : > { %v12467_v0 = vpop.f32.mrb[92].mxu1  ;;  %9869 = vmatmul.mubr.msk.bf16.gmra.mrb[144].mxu0 %vm1445_vm2, %v12127_v33  ;;  %4573 = vrot.lane.b32.xlu0 %v3028_v1, %s10788_s24 }
 0x349   : > { %15685 = vst [vmem:[#allocation119_spill] sm:$0xff] %v12467_v0  ;;  %v9542_v7 = vpop.f32.mrb[93].mxu1  ;;  %9872 = vmatprep.mubr.msk.bf16.mxu0 %vm10786_vm0, %v15681_v62 }
 0x34a   : > { %v12476_v38 = vpop.f32.mrb[94].mxu1 }
 0x34b   : > { %15686 = vst [vmem:[#allocation120_spill] sm:$0xff] %v12476_v38  ;;  %v9543_v37 = vpop.f32.mrb[95].mxu1  ;;  %v3032_v59 = vpop.f32.mrb[40].mxu0 }
 0x34c   : > { %v3033_v63 = vadd.f32 %v12434_v17, %v3032_v59  ;;  %v9766_v0 = vpop.f32.mrb[41].mxu0  ;;  %v12487_v38 = vpop.permute.xlu1 %2149 }
 0x34d   : > { %9653 = vmatmul.mubr.msk.bf16.gmra.mrb[200].mxu1 %vm1445_vm2, %v11821_v16  ;;  %v3035_v33 = vpop.f32.mrb[42].mxu0  ;;  %v12496_v16 = vpop.permute.xlu0 %2821 }
 0x34e   : > { %v3036_v1 = vadd.f32 %v12434_v17, %v3035_v33  ;;  %4575 = vrot.lane.b32.xlu1 %v3033_v63, %s10788_s24  ;;  %v9767_v7 = vpop.f32.mrb[43].mxu0  ;;  %9656 = vmatprep.mubr.msk.bf16.mxu1 %vm10786_vm0, %v15681_v62 }
 0x350   : > { %v12489_v37 = vpop.f32.mrb[96].mxu1  ;;  %9873 = vmatmul.mubr.msk.bf16.gmra.mrb[148].mxu0 %vm1445_vm2, %v12030_v58  ;;  %4577 = vrot.lane.b32.xlu0 %v3036_v1, %s10788_s24  ;;  %v12503_v58 = vpop.permute.xlu1 %3449 }
 0x351   : > { %15687 = vst [vmem:[#allocation121_spill] sm:$0xff] %v12489_v37  ;;  %v9546_v0 = vpop.f32.mrb[97].mxu1  ;;  %9876 = vmatprep.mubr.msk.bf16.mxu0 %vm10786_vm0, %v15681_v62  ;;  %15689 = vst [vmem:[#allocation123_spill] sm:$0xff] %v12503_v58 }
 0x352   : > { %v12498_v63 = vpop.f32.mrb[98].mxu1 }
 0x353   : > { %15688 = vst [vmem:[#allocation122_spill] sm:$0xff] %v12498_v63  ;;  %v9547_v59 = vpop.f32.mrb[99].mxu1  ;;  %v3040_v33 = vpop.f32.mrb[44].mxu0 }
 0x354   : > { %v3041_v7 = vadd.f32 %v12434_v17, %v3040_v33  ;;  %v9770_v27 = vpop.f32.mrb[45].mxu0  ;;  %v12509_v63 = vpop.permute.xlu0 %2153 }
 0x355   : > { %9657 = vmatmul.mubr.msk.bf16.gmra.mrb[204].mxu1 %vm1445_vm2, %v11926_v39  ;;  %v3043_v37 = vpop.f32.mrb[46].mxu0 }
 0x356   : > { %v3044_v1 = vadd.f32 %v12434_v17, %v3043_v37  ;;  %4579 = vrot.lane.b32.xlu1 %v3041_v7, %s10788_s24  ;;  %v9771_v0 = vpop.f32.mrb[47].mxu0  ;;  %9660 = vmatprep.mubr.msk.bf16.mxu1 %vm10786_vm0, %v15681_v62  ;;  %v12520_v7 = vpop.permute.xlu1 %3453 }
 0x357   : > { %15692 = vst [vmem:[#allocation126_spill] sm:$0xff] %v12520_v7 }
 0x358   : > { %v12511_v59 = vpop.f32.mrb[100].mxu1  ;;  %9877 = vmatmul.mubr.msk.bf16.gmra.mrb[152].mxu0 %vm1445_vm2, %v12061_v53  ;;  %4581 = vrot.lane.b32.xlu0 %v3044_v1, %s10788_s24  ;;  %v12525_v53 = vpop.permute.xlu0 %3467 }
 0x359   : > { %15690 = vst [vmem:[#allocation124_spill] sm:$0xff] %v12511_v59  ;;  %v9550_v27 = vpop.f32.mrb[101].mxu1  ;;  %9880 = vmatprep.mubr.msk.bf16.mxu0 %vm10786_vm0, %v15681_v62  ;;  %15693 = vst [vmem:[#allocation127_spill] sm:$0xff] %v12525_v53  ;;  %v8853_v53 = vld [vmem:[%s10909_s10 + $0x18] sm:$0xff]  }
 0x35a   : > { %v12518_v39 = vpop.f32.mrb[102].mxu1 }
 0x35b   : > { %15691 = vst [vmem:[#allocation125_spill] sm:$0xff] %v12518_v39  ;;  %v9551_v37 = vpop.f32.mrb[103].mxu1  ;;  %v3048_v33 = vpop.f32.mrb[48].mxu0 }
 0x35c   : > { %v3049_v0 = vadd.f32 %v12434_v17, %v3048_v33  ;;  %v9774_v32 = vpop.f32.mrb[49].mxu0 }
 0x35d   : > { %9661 = vmatmul.mubr.msk.bf16.gmra.mrb[208].mxu1 %vm1445_vm2, %v11900_v15  ;;  %v3051_v59 = vpop.f32.mrb[50].mxu0 }
 0x35e   : > { %v3052_v1 = vadd.f32 %v12434_v17, %v3051_v59  ;;  %4583 = vrot.lane.b32.xlu1 %v3049_v0, %s10788_s24  ;;  %v9775_v27 = vpop.f32.mrb[51].mxu0  ;;  %9664 = vmatprep.mubr.msk.bf16.mxu1 %vm10786_vm0, %v15681_v62  ;;  %v12537_v59 = vpop.permute.xlu1 %3457 }
 0x35f   : > { %15694 = vst [vmem:[#allocation128_spill] sm:$0xff] %v12537_v59  ;;  %v12549_v59 = vld [vmem:[%s10909_s10 + $0x20] sm:$0xff]  }
 0x360   : > { %v2346_v37 = vpop.f32.mrb[104].mxu1  ;;  %9881 = vmatmul.mubr.msk.bf16.gmra.mrb[156].mxu0 %vm1445_vm2, %v12209_v42  ;;  %4585 = vrot.lane.b32.xlu0 %v3052_v1, %s10788_s24  ;;  %v12541_v42 = vpop.permute.xlu0 %3471 }
 0x361   : > { %v2347_v15 = vadd.f32 %v12434_v17, %v2346_v37  ;;  %v9558_v32 = vpop.f32.mrb[105].mxu1  ;;  %9884 = vmatprep.mubr.msk.bf16.mxu0 %vm10786_vm0, %v15681_v62  ;;  %15695 = vst [vmem:[#allocation129_spill] sm:$0xff] %v12541_v42  ;;  %v8677_v42 = vunpack.c.l.bf16 %v12549_v59 }
 0x362   : > { %v2349_v33 = vpop.f32.mrb[106].mxu1 }
 0x363   : > { %v2350_v0 = vadd.f32 %v12434_v17, %v2349_v33  ;;  %v9559_v27 = vpop.f32.mrb[107].mxu1  ;;  %4175 = vrot.lane.b32.xlu1 %v2347_v15, %s10789_s25  ;;  %v3056_v39 = vpop.f32.mrb[52].mxu0  ;;  %v8673_v15 = vunpack.c.l.bf16 %v8853_v53 }
 0x364   : > { %v3057_v1 = vadd.f32 %v12434_v17, %v3056_v39  ;;  %v9778_v37 = vpop.f32.mrb[53].mxu0  ;;  %v12555_v39 = vpop.permute.xlu1 %3461 }
 0x365   : > { %9665 = vmatmul.mubr.msk.bf16.gmra.mrb[212].mxu1 %vm1445_vm2, %v12015_v48  ;;  %4177 = vrot.lane.b32.xlu0 %v2350_v0, %s10789_s25  ;;  %v3059_v32 = vpop.f32.mrb[54].mxu0  ;;  %15696 = vst [vmem:[#allocation130_spill] sm:$0xff] %v12555_v39  ;;  %v8660_v48 = vld [vmem:[%s10909_s10] sm:$0xff]   ;;  %v8674_v0 = vunpack.c.h.bf16 %v8853_v53  ;;  %v12565_v39 = vpop.permute.xlu0 %3475 }
 0x366   : > { %v3060_v33 = vadd.f32 %v12434_v17, %v3059_v32  ;;  %v9779_v27 = vpop.f32.mrb[55].mxu0  ;;  %9668 = vmatprep.mubr.msk.bf16.mxu1 %vm10786_vm0, %v15681_v62  ;;  %v8662_v7 = vunpack.c.h.bf16 %v8660_v48  ;;  %15697 = vst [vmem:[#allocation131_spill] sm:$0xff] %v12565_v39 }
 0x367   : > { %4587 = vrot.lane.b32.xlu1 %v3057_v1, %s10788_s24  ;;  %v8661_v1 = vunpack.c.l.bf16 %v8660_v48  ;;  %v6683_v35 = vrot.slane %v8674_v0, 1  ;;  %v12590_v0 = vld [vmem:[%s10909_s10 + $0x10] sm:$0xff]  }
 0x368   : > { %v2354_v37 = vpop.f32.mrb[108].mxu1  ;;  %9885 = vmatmul.mubr.msk.bf16.gmra.mrb[160].mxu0 %vm1445_vm2, %v12091_v31  ;;  %v6682_v31 = vrot.slane %v8673_v15, 1  ;;  %v6685_v15 = vrot.slane %v8677_v42, 1 }
 0x369   : > { %v2355_v32 = vadd.f32 %v12434_v17, %v2354_v37  ;;  %v9562_v27 = vpop.f32.mrb[109].mxu1  ;;  %4589 = vrot.lane.b32.xlu0 %v3060_v33, %s10788_s24  ;;  %9888 = vmatprep.mubr.msk.bf16.mxu0 %vm10786_vm0, %v15681_v62  ;;  %v6640_v8 = vsel %vm702_vm1, %v8661_v1, 0.0  ;;  %v6641_v33 = vsel %vm702_vm1, %v8662_v7, 0.0  ;;  %v8666_v7 = vunpack.c.h.bf16 %v8851_v43 }
 0x36a   : > { %v2357_v58 = vpop.f32.mrb[110].mxu1  ;;  %v8665_v27 = vunpack.c.l.bf16 %v8851_v43  ;;  %v6642_v39 = vadd.f32 %v6641_v33, %v6640_v8  ;;  %v12584_v8 = vpop.permute.xlu1 %2823  ;;  %v8681_v1 = vunpack.c.l.bf16 %v12573_v12  ;;  %v6721_v43 = vld [vmem:[%s10909_s10 + $0x30] sm:$0xe]  ;;  %v6666_v33 = vld [vmem:[%s10909_s10 + $0x30] sm:$0x1] }
 0x36b   : > { %v2358_v53 = vadd.f32 %v12434_v17, %v2357_v58  ;;  %v9563_v9 = vpop.f32.mrb[111].mxu1  ;;  %4179 = vrot.lane.b32.xlu1 %v2355_v32, %s10789_s25  ;;  %v3064_v37 = vpop.f32.mrb[56].mxu0  ;;  %v10278_v58 = vld [vmem:[%s15553_s1 + $0x10] sm:$0xff]   ;;  %v6673_v55 = vunpack.c.l.bf16 %v6666_v33  ;;  %v6728_v20 = vunpack.c.l.bf16 %v6721_v43  ;;  %v8670_v33 = vunpack.c.h.bf16 %v12590_v0 }
 0x36c   : > { %v3065_v48 = vadd.f32 %v12434_v17, %v3064_v37  ;;  %v9782_v54 = vpop.f32.mrb[57].mxu0  ;;  %v6643_v32 = vsel %vm702_vm1, %v8665_v27, 0.0  ;;  %10157 = vmatpush3.bf16.msra.mxu0 %v10278_v58  ;;  %v12616_v41 = vrot.slane %v8681_v1, 1 }
 0x36d   : > { %9669 = vmatmul.mubr.msk.bf16.gmra.mrb[216].mxu1 %vm1445_vm2, %v11987_v11  ;;  %4181 = vrot.lane.b32.xlu0 %v2358_v53, %s10789_s25  ;;  %v3067_v9 = vpop.f32.mrb[58].mxu0  ;;  %v8678_v54 = vunpack.c.h.bf16 %v12549_v59  ;;  %v12596_v59 = vld [vmem:[%s10909_s10 + $0x38] sm:$0xff]   ;;  %v12598_v53 = vpop.permute.xlu0 %3479  ;;  %v6644_v27 = vadd.f32 %v6643_v32, %v6642_v39 }
 0x36e   : > { %v3068_v11 = vadd.f32 %v12434_v17, %v3067_v9  ;;  %v9783_v42 = vpop.f32.mrb[59].mxu0  ;;  %9672 = vmatprep.mubr.msk.bf16.mxu1 %vm10786_vm0, %v15681_v62  ;;  %15698 = vst [vmem:[#allocation132_spill] sm:$0xff] %v12598_v53  ;;  %10158 = vmatprep.subr.bf16.mxu0 %v15681_v62  ;;  %v6684_v9 = vsel %vm6681_vm3, %v6682_v31, %v6683_v35  ;;  %v6645_v53 = vsel %vm702_vm1, %v8666_v7, 0.0  ;;  %v8682_v31 = vunpack.c.h.bf16 %v12573_v12  ;;  %v12622_v34 = vpop.permute.xlu1 %2155 }
 0x36f   : > { %4591 = vrot.lane.b32.xlu1 %v3065_v48, %s10788_s24  ;;  %v6686_v42 = vsel %vm6681_vm3, %v6683_v35, %v6685_v15  ;;  %v6687_v39 = vrot.slane %v8678_v54, 1  ;;  %v8685_v35 = vunpack.c.l.bf16 %v12596_v59  ;;  %v6646_v54 = vadd.f32 %v6645_v53, %v6644_v27 }
 0x370   : > { %v2362_v37 = vpop.f32.mrb[112].mxu1  ;;  %9889 = vmatmul.mubr.msk.bf16.gmra.mrb[164].mxu0 %vm1445_vm2, %v12107_v19  ;;  %v8669_v19 = vunpack.c.l.bf16 %v12590_v0  ;;  %v6702_v1 = vsel %vm702_vm1, %v6684_v9, 0.0  ;;  %v6703_v61 = vsel %vm702_vm1, %v6686_v42, 0.0  ;;  %v6632_v9 = vld [vmem:[%s10909_s10 + $0x18] sm:$0x1]  ;;  %v6691_v42 = vrot.slane %v8682_v31, 1 }
 0x371   : > { %v2363_v48 = vadd.f32 %v12434_v17, %v2362_v37  ;;  %v9566_v58 = vpop.f32.mrb[113].mxu1  ;;  %4593 = vrot.lane.b32.xlu0 %v3068_v11, %s10788_s24  ;;  %9892 = vmatprep.mubr.msk.bf16.mxu0 %vm10786_vm0, %v15681_v62  ;;  %v12643_v0 = vrot.slane %v6673_v55, 1  ;;  %v6649_v55 = vsel %vm702_vm1, %v8670_v33, 0.0 }
 0x372   : > { %v2365_v32 = vpop.f32.mrb[114].mxu1 }
 0x373   : > { %v2366_v37 = vadd.f32 %v12434_v17, %v2365_v32  ;;  %v9567_v58 = vpop.f32.mrb[115].mxu1  ;;  %4183 = vrot.lane.b32.xlu1 %v2363_v48, %s10789_s25  ;;  %v3072_v11 = vpop.f32.mrb[60].mxu0  ;;  %v6647_v48 = vsel %vm702_vm1, %v8669_v19, 0.0  ;;  %v6688_v32 = vsel %vm6681_vm3, %v6685_v15, %v6687_v39  ;;  %v6704_v15 = vadd.f32 %v6703_v61, %v6702_v1  ;;  %v8857_v19 = vld [vmem:[%s10909_s10 + $0x40] sm:$0xff]  }
 0x374   : > { %v3073_v7 = vadd.f32 %v12434_v17, %v3072_v11  ;;  %v9786_v12 = vpop.f32.mrb[61].mxu0  ;;  %v12633_v58 = vpop.permute.xlu0 %2825  ;;  %v6743_v11 = vrot.slane %v6728_v20, 2  ;;  %v6639_v61 = vunpack.c.l.bf16 %v6632_v9  ;;  %v8690_v9 = vunpack.c.h.bf16 %v8857_v19 }
 0x375   : > { %9673 = vmatmul.mubr.msk.bf16.gmra.mrb[220].mxu1 %vm1445_vm2, %v12097_v30  ;;  %4185 = vrot.lane.b32.xlu0 %v2366_v37, %s10789_s25  ;;  %v3075_v43 = vpop.f32.mrb[62].mxu0  ;;  %v6690_v30 = vsel %vm6681_vm3, %v6687_v39, %v12616_v41  ;;  %v8686_v37 = vunpack.c.h.bf16 %v12596_v59  ;;  %v6746_v39 = vrot.slane %v8685_v35, 2  ;;  %v12654_v20 = vpop.permute.xlu1 %3465 }
 0x376   : > { %v3076_v53 = vadd.f32 %v12434_v17, %v3075_v43  ;;  %v9787_v27 = vpop.f32.mrb[63].mxu0  ;;  %9676 = vmatprep.mubr.msk.bf16.mxu1 %vm10786_vm0, %v15681_v62  ;;  %v6648_v43 = vadd.f32 %v6647_v48, %v6646_v54  ;;  %15699 = vst [vmem:[#allocation133_spill] sm:$0xff] %v12654_v20  ;;  %v6745_v54 = vsel %vm6742_vm4, %v6743_v11, %v6744_v29 }
 0x377   : > { %4595 = vrot.lane.b32.xlu1 %v3073_v7, %s10788_s24  ;;  %v6705_v27 = vsel %vm702_vm1, %v6688_v32, 0.0  ;;  %v8689_v7 = vunpack.c.l.bf16 %v8857_v19  ;;  %v6747_v28 = vsel %vm6742_vm4, %v6744_v29, %v6746_v39  ;;  %v6748_v35 = vrot.slane %v8686_v37, 2 }
 0x378   : > { %v2370_v12 = vpop.f32.mrb[116].mxu1  ;;  %9893 = vmatmul.mubr.msk.bf16.gmra.mrb[168].mxu0 %vm1445_vm2, %v12273_v18  ;;  %v6650_v20 = vadd.f32 %v6649_v55, %v6648_v43  ;;  %v6692_v11 = vsel %vm6681_vm3, %v12616_v41, %v6691_v42  ;;  %v6707_v29 = vsel %vm702_vm1, %v6690_v30, 0.0  ;;  %v6694_v19 = vsel %vm6681_vm3, %v6691_v42, %v12643_v0  ;;  %v8858_v55 = vld [vmem:[%s10909_s10 + $0x50] sm:$0xff]   ;;  %v6782_v42 = vld [vmem:[%s10909_s10 + $0x48] sm:$0xe] }
 0x379   : > { %v2371_v31 = vadd.f32 %v12434_v17, %v2370_v12  ;;  %v9570_v59 = vpop.f32.mrb[117].mxu1  ;;  %4597 = vrot.lane.b32.xlu0 %v3076_v53, %s10788_s24  ;;  %9896 = vmatprep.mubr.msk.bf16.mxu0 %vm10786_vm0, %v15681_v62  ;;  %v6706_v53 = vadd.f32 %v6705_v27, %v6704_v15  ;;  %v12660_v12 = vpop.permute.xlu0 %2157  ;;  %v6652_v15 = vsel %vm6651_vm5, %v6639_v61, 0.0  ;;  %v6763_v43 = vsel %vm702_vm1, %v6745_v54, 0.0 }
 0x37a   : > { %v2373_v18 = vpop.f32.mrb[118].mxu1  ;;  %v6764_v27 = vsel %vm702_vm1, %v6747_v28, 0.0  ;;  %v12684_v54 = vpop.permute.xlu1 %3469 }
 0x37b   : > { %v2374_v1 = vadd.f32 %v12434_v17, %v2373_v18  ;;  %v9571_v48 = vpop.f32.mrb[119].mxu1  ;;  %4187 = vrot.lane.b32.xlu1 %v2371_v31, %s10789_s25  ;;  %v3080_v32 = vpop.f32.mrb[64].mxu0  ;;  %v6750_v31 = vrot.slane %v8689_v7, 2  ;;  %v6708_v61 = vadd.f32 %v6707_v29, %v6706_v53  ;;  %v6727_v18 = vld [vmem:[%s10909_s10 + $0x48] sm:$0x3]  ;;  %15700 = vst [vmem:[#allocation134_spill] sm:$0xff] %v12684_v54 }
 0x37c   : > { %v3081_v33 = vadd.f32 %v12434_v17, %v3080_v32  ;;  %v9790_v59 = vpop.f32.mrb[65].mxu0  ;;  %v12688_v48 = vadd.f32 %v6652_v15, %v6650_v20  ;;  %v6711_v7 = vsel %vm702_vm1, %v6694_v19, 0.0  ;;  %v6765_v32 = vadd.f32 %v6764_v27, %v6763_v43  ;;  %v12701_v15 = vld [vmem:[%s10909_s10 + $0x58] sm:$0xff]  }
 0x37d   : > { %9677 = vmatmul.mubr.msk.bf16.gmra.mrb[224].mxu1 %vm1445_vm2, %v12043_v13  ;;  %4189 = vrot.lane.b32.xlu0 %v2374_v1, %s10789_s25  ;;  %v3083_v37 = vpop.f32.mrb[66].mxu0  ;;  %v6749_v13 = vsel %vm6742_vm4, %v6746_v39, %v6748_v35  ;;  %v12681_v1 = vrot.slane %v8690_v9, 2  ;;  %v6709_v39 = vsel %vm702_vm1, %v6692_v11, 0.0  ;;  %v8693_v59 = vunpack.c.l.bf16 %v8858_v55  ;;  %v12697_v29 = vpop.permute.xlu0 %2827 }
 0x37e   : > { %v3084_v41 = vadd.f32 %v12434_v17, %v3083_v37  ;;  %v9791_v30 = vpop.f32.mrb[67].mxu0  ;;  %9680 = vmatprep.mubr.msk.bf16.mxu1 %vm10786_vm0, %v15681_v62  ;;  %v6766_v9 = vsel %vm702_vm1, %v6749_v13, 0.0  ;;  %v6734_v37 = vunpack.c.l.bf16 %v6727_v18  ;;  %v6751_v11 = vsel %vm6742_vm4, %v6748_v35, %v6750_v31 }
 0x37f   : > { %4599 = vrot.lane.b32.xlu1 %v3081_v33, %s10788_s24  ;;  %v6789_v19 = vunpack.c.l.bf16 %v6782_v42  ;;  %v6790_v43 = vunpack.c.h.bf16 %v12607_v46  ;;  %v6710_v13 = vadd.f32 %v6709_v39, %v6708_v61  ;;  %v6767_v35 = vadd.f32 %v6766_v9, %v6765_v32 }
 0x380   : > { %v2378_v28 = vpop.f32.mrb[120].mxu1  ;;  %9897 = vmatmul.mubr.msk.bf16.gmra.mrb[172].mxu0 %vm1445_vm2, %v12245_v26  ;;  %v8694_v26 = vunpack.c.h.bf16 %v8858_v55  ;;  %v6753_v55 = vsel %vm6742_vm4, %v6750_v31, %v12681_v1  ;;  %v6768_v42 = vsel %vm702_vm1, %v6751_v11, 0.0  ;;  %v8697_v61 = vunpack.c.l.bf16 %v12701_v15  ;;  %v12714_v31 = vpop.permute.xlu1 %3473 }
 0x381   : > { %v2379_v53 = vadd.f32 %v12434_v17, %v2378_v28  ;;  %v9574_v33 = vpop.f32.mrb[121].mxu1  ;;  %4601 = vrot.lane.b32.xlu0 %v3084_v41, %s10788_s24  ;;  %9900 = vmatprep.mubr.msk.bf16.mxu0 %vm10786_vm0, %v15681_v62  ;;  %v6805_v54 = vrot.slane %v6790_v43, 3  ;;  %v6807_v39 = vrot.slane %v8693_v59, 3  ;;  %15701 = vst [vmem:[#allocation135_spill] sm:$0xff] %v12714_v31  ;;  %v12719_v32 = vrot.slane %v6734_v37, 2  ;;  %v10279_v37 = vld [vmem:[%s15553_s1 + $0x18] sm:$0xff]  }
 0x382   : > { %v2381_v20 = vpop.f32.mrb[122].mxu1  ;;  %v6804_v33 = vrot.slane %v6789_v19, 3  ;;  %v6654_v9 = vrot.slane %v12688_v48, 4  ;;  %v6712_v11 = vadd.f32 %v6711_v7, %v6710_v13  ;;  %v6713_v59 = vsel %vm6651_vm5, %v12643_v0, 0.0  ;;  %v12727_v19 = vpop.permute.xlu0 %2159  ;;  %10159 = vmatpush3.bf16.msra.mxu0 %v10279_v37 }
 0x383   : > { %v2382_v27 = vadd.f32 %v12434_v17, %v2381_v20  ;;  %v9575_v41 = vpop.f32.mrb[123].mxu1  ;;  %4191 = vrot.lane.b32.xlu1 %v2379_v53, %s10789_s25  ;;  %v3088_v30 = vpop.f32.mrb[68].mxu0  ;;  %v6809_v53 = vrot.slane %v8694_v26, 3  ;;  %v6808_v26 = vsel %vm6803_vm6, %v6805_v54, %v6807_v39  ;;  %v6770_v7 = vsel %vm702_vm1, %v6753_v55, 0.0 }
 0x384   : > { %v3089_v18 = vadd.f32 %v12434_v17, %v3088_v30  ;;  %v9794_v28 = vpop.f32.mrb[69].mxu0  ;;  %v8698_v30 = vunpack.c.h.bf16 %v12701_v15  ;;  %v6755_v15 = vsel %vm6742_vm4, %v12681_v1, %v12719_v32  ;;  %v12760_v1 = vadd.f32 %v6654_v9, %v12688_v48 }
 0x385   : > { %9681 = vmatmul.mubr.msk.bf16.gmra.mrb[228].mxu1 %vm1445_vm2, %v12159_v21  ;;  %4193 = vrot.lane.b32.xlu0 %v2382_v27, %s10789_s25  ;;  %v3091_v46 = vpop.f32.mrb[70].mxu0  ;;  %v6806_v21 = vsel %vm6803_vm6, %v6804_v33, %v6805_v54  ;;  %v6769_v27 = vadd.f32 %v6768_v42, %v6767_v35  ;;  %v6825_v28 = vsel %vm702_vm1, %v6808_v26, 0.0  ;;  %v6788_v35 = vld [vmem:[%s10909_s10 + $0x60] sm:$0x3]  ;;  %v12748_v33 = vld [vmem:[%s10909_s10 + $0x68] sm:$0xff]   ;;  %v12756_v26 = vpop.permute.xlu1 %3477 }
 0x386   : > { %v3092_v20 = vadd.f32 %v12434_v17, %v3091_v46  ;;  %v9795_v41 = vpop.f32.mrb[71].mxu0  ;;  %9684 = vmatprep.mubr.msk.bf16.mxu1 %vm10786_vm0, %v15681_v62  ;;  %v6824_v0 = vsel %vm702_vm1, %v6806_v21, 0.0  ;;  %v12754_v21 = vld [vmem:[%s10909_s10 + $0x64] ss:$24 sps:$4 sm:$0xff]   ;;  %15702 = vst [vmem:[#allocation136_spill] sm:$0xff] %v12756_v26 }
 0x387   : > { %4603 = vrot.lane.b32.xlu1 %v3089_v18, %s10788_s24  ;;  %v6811_v18 = vrot.slane %v8697_v61, 3  ;;  %v6714_v41 = vadd.f32 %v6713_v59, %v6712_v11  ;;  %v6843_v61 = vld [vmem:[%s10909_s10 + $0x60] sm:$0xc]  ;;  %v6772_v59 = vsel %vm702_vm1, %v6755_v15, 0.0 }
 0x388   : > { %v2386_v43 = vpop.f32.mrb[124].mxu1  ;;  %9901 = vmatmul.mubr.msk.bf16.gmra.mrb[176].mxu0 %vm1445_vm2, %v12277_v23  ;;  %v6810_v23 = vsel %vm6803_vm6, %v6807_v39, %v6809_v53  ;;  %v6826_v39 = vadd.f32 %v6825_v28, %v6824_v0  ;;  %v6795_v0 = vunpack.c.l.bf16 %v6788_v35  ;;  %v6813_v28 = vrot.slane %v8698_v30, 3 }
 0x389   : > { %v2387_v54 = vadd.f32 %v12434_v17, %v2386_v43  ;;  %v9578_v13 = vpop.f32.mrb[125].mxu1  ;;  %4605 = vrot.lane.b32.xlu0 %v3092_v20, %s10788_s24  ;;  %9904 = vmatprep.mubr.msk.bf16.mxu0 %vm10786_vm0, %v15681_v62  ;;  %v6656_v30 = vrot.slane %v12760_v1, 2 }
 0x38a   : > { %v2389_v55 = vpop.f32.mrb[126].mxu1  ;;  %v6771_v13 = vadd.f32 %v6770_v7, %v6769_v27  ;;  %v8701_v27 = vunpack.c.l.bf16 %v12748_v33  ;;  %v6851_v7 = vunpack.c.l.bf16 %v12754_v21 }
 0x38b   : > { %v2390_v46 = vadd.f32 %v12434_v17, %v2389_v55  ;;  %v9579_v42 = vpop.f32.mrb[127].mxu1  ;;  %4195 = vrot.lane.b32.xlu1 %v2387_v54, %s10789_s25  ;;  %v3096_v20 = vpop.f32.mrb[72].mxu0  ;;  %v6827_v55 = vsel %vm702_vm1, %v6810_v23, 0.0  ;;  %v6812_v54 = vsel %vm6803_vm6, %v6809_v53, %v6811_v18  ;;  %v6715_v23 = vrot.slane %v6714_v41, 4 }
 0x38c   : > { %v3097_v43 = vadd.f32 %v12434_v17, %v3096_v20  ;;  %v9798_v37 = vpop.f32.mrb[73].mxu0  ;;  %v12768_v42 = vpop.permute.xlu0 %3483  ;;  %v6828_v15 = vadd.f32 %v6827_v55, %v6826_v39  ;;  %v6773_v35 = vadd.f32 %v6772_v59, %v6771_v13  ;;  %v6774_v39 = vsel %vm6651_vm5, %v12719_v32, 0.0 }
 0x38d   : > { %9685 = vmatmul.mubr.msk.bf16.gmra.mrb[232].mxu1 %vm1445_vm2, %v12073_v36  ;;  %4197 = vrot.lane.b32.xlu0 %v2390_v46, %s10789_s25  ;;  %v3099_v11 = vpop.f32.mrb[74].mxu0  ;;  %15703 = vst [vmem:[#allocation137_spill] sm:$0xff] %v12768_v42  ;;  %v6850_v36 = vunpack.c.l.bf16 %v6843_v61  ;;  %v6829_v46 = vsel %vm702_vm1, %v6812_v54, 0.0  ;;  %v6814_v61 = vsel %vm6803_vm6, %v6811_v18, %v6813_v28  ;;  %v8702_v55 = vunpack.c.h.bf16 %v12748_v33 }
 0x38e   : > { %v3100_v48 = vadd.f32 %v12434_v17, %v3099_v11  ;;  %v9799_v9 = vpop.f32.mrb[75].mxu0  ;;  %9688 = vmatprep.mubr.msk.bf16.mxu1 %vm10786_vm0, %v15681_v62  ;;  %v12793_v11 = vld [vmem:[%s10909_s10 + $0x70] sm:$0xff]   ;;  %v6866_v54 = vrot.slane %v6851_v7, 4  ;;  %v6716_v18 = vadd.f32 %v6715_v23, %v6714_v41  ;;  %v6775_v26 = vadd.f32 %v6774_v39, %v6773_v35  ;;  %v6849_v23 = vld [vmem:[%s10909_s10 + $0x78] sm:$0x7] }
 0x38f   : > { %4607 = vrot.lane.b32.xlu1 %v3097_v43, %s10788_s24  ;;  %v12787_v43 = vrot.slane %v6795_v0, 3  ;;  %v6865_v59 = vrot.slane %v6850_v36, 4  ;;  %v6830_v0 = vadd.f32 %v6829_v46, %v6828_v15  ;;  %v6831_v36 = vsel %vm702_vm1, %v6814_v61, 0.0 }
 0x390   : > { %v2394_v53 = vpop.f32.mrb[128].mxu1  ;;  %9905 = vmatmul.mubr.msk.bf16.gmra.mrb[180].mxu0 %vm1445_vm2, %v12456_v49  ;;  %v12789_v49 = vpop.permute.xlu1 %2829  ;;  %v8705_v7 = vunpack.c.l.bf16 %v12793_v11  ;;  %v12815_v39 = vadd.f32 %v6656_v30, %v12760_v1 }
 0x391   : > { %v2395_v20 = vadd.f32 %v12434_v17, %v2394_v53  ;;  %v9582_v37 = vpop.f32.mrb[129].mxu1  ;;  %4609 = vrot.lane.b32.xlu0 %v3100_v48, %s10788_s24  ;;  %9908 = vmatprep.mubr.msk.bf16.mxu0 %vm10786_vm0, %v15681_v62  ;;  %v6868_v48 = vrot.slane %v8701_v27, 4  ;;  %v6816_v41 = vsel %vm6803_vm6, %v6813_v28, %v12787_v43  ;;  %v6867_v35 = vsel %vm6864_vm7, %v6865_v59, %v6866_v54 }
 0x392   : > { %v2397_v13 = vpop.f32.mrb[130].mxu1  ;;  %v12797_v37 = vpop.permute.xlu0 %3487  ;;  %v6717_v28 = vrot.slane %v6716_v18, 2  ;;  %v6832_v61 = vadd.f32 %v6831_v36, %v6830_v0  ;;  %v6776_v59 = vrot.slane %v6775_v26, 4  ;;  %v6872_v0 = vrot.slane %v8705_v7, 4 }
 0x393   : > { %v2398_v9 = vadd.f32 %v12434_v17, %v2397_v13  ;;  %v9583_v53 = vpop.f32.mrb[131].mxu1  ;;  %4199 = vrot.lane.b32.xlu1 %v2395_v20, %s10789_s25  ;;  %v3104_v32 = vpop.f32.mrb[76].mxu0  ;;  %15704 = vst [vmem:[#allocation138_spill] sm:$0xff] %v12797_v37  ;;  %v6870_v20 = vrot.slane %v8702_v55, 4  ;;  %v6904_v13 = vld [vmem:[%s10909_s10 + $0x78] sm:$0xc]  ;;  %v8706_v55 = vunpack.c.h.bf16 %v12793_v11 }
 0x394   : > { %v3105_v42 = vadd.f32 %v12434_v17, %v3104_v32  ;;  %v9802_v33 = vpop.f32.mrb[77].mxu0  ;;  %v12821_v53 = vpop.permute.xlu1 %2161  ;;  %v12845_v37 = vadd.f32 %v6776_v59, %v6775_v26 }
 0x395   : > { %9689 = vmatmul.mubr.msk.bf16.gmra.mrb[236].mxu1 %vm1445_vm2, %v12223_v57  ;;  %4201 = vrot.lane.b32.xlu0 %v2398_v9, %s10789_s25  ;;  %v3107_v27 = vpop.f32.mrb[78].mxu0  ;;  %v6869_v57 = vsel %vm6864_vm7, %v6866_v54, %v6868_v48  ;;  %v12819_v9 = vld [vmem:[%s10909_s10 + $0x80] sm:$0xff]   ;;  %v6833_v54 = vsel %vm702_vm1, %v6816_v41, 0.0  ;;  %v6885_v33 = vsel %vm702_vm1, %v6867_v35, 0.0  ;;  %v6871_v41 = vsel %vm6864_vm7, %v6868_v48, %v6870_v20 }
 0x396   : > { %v3108_v15 = vadd.f32 %v12434_v17, %v3107_v27  ;;  %v9803_v46 = vpop.f32.mrb[79].mxu0  ;;  %9692 = vmatprep.mubr.msk.bf16.mxu1 %vm10786_vm0, %v15681_v62  ;;  %v6886_v36 = vsel %vm702_vm1, %v6869_v57, 0.0  ;;  %v8709_v11 = vunpack.c.l.bf16 %v12819_v9  ;;  %v12840_v35 = vadd.f32 %v6717_v28, %v6716_v18 }
 0x397   : > { %4611 = vrot.lane.b32.xlu1 %v3105_v42, %s10788_s24  ;;  %v6856_v42 = vunpack.c.l.bf16 %v6849_v23  ;;  %v6911_v23 = vunpack.c.l.bf16 %v6904_v13  ;;  %v6912_v46 = vunpack.c.h.bf16 %v12754_v21  ;;  %v6834_v57 = vadd.f32 %v6833_v54, %v6832_v61  ;;  %v12848_v21 = vld [vmem:[%s10909_s10 + $0xd8] sm:$0xff]  }
 0x398   : > { %v2402_v32 = vpop.f32.mrb[132].mxu1  ;;  %9909 = vmatmul.mubr.msk.bf16.gmra.mrb[184].mxu0 %vm1445_vm2, %v12329_v44  ;;  %v12833_v44 = vpop.permute.xlu0 %3491  ;;  %v6874_v13 = vrot.slane %v8706_v55, 4  ;;  %v6887_v31 = vadd.f32 %v6886_v36, %v6885_v33  ;;  %v6873_v28 = vsel %vm6864_vm7, %v6870_v20, %v6872_v0  ;;  %v8710_v26 = vunpack.c.h.bf16 %v12819_v9 }
 0x399   : > { %v2403_v1 = vadd.f32 %v12434_v17, %v2402_v32  ;;  %v9586_v30 = vpop.f32.mrb[133].mxu1  ;;  %4613 = vrot.lane.b32.xlu0 %v3108_v15, %s10788_s24  ;;  %9912 = vmatprep.mubr.msk.bf16.mxu0 %vm10786_vm0, %v15681_v62  ;;  %15705 = vst [vmem:[#allocation139_spill] sm:$0xff] %v12833_v44  ;;  %v12854_v61 = vrot.slane %v6856_v42, 4  ;;  %v12858_v59 = vpop.permute.xlu1 %3481  ;;  %v6929_v33 = vrot.slane %v8709_v11, 5  ;;  %v12865_v42 = vld [vmem:[%s10909_s10 + $0x98] sm:$0xff]  }
 0x39a   : > { %v2405_v27 = vpop.f32.mrb[134].mxu1  ;;  %v6835_v30 = vsel %vm6651_vm5, %v12787_v43, 0.0  ;;  %v6888_v43 = vsel %vm702_vm1, %v6871_v41, 0.0  ;;  %15706 = vst [vmem:[#allocation140_spill] sm:$0xff] %v12858_v59  ;;  %v6719_v41 = vrot.slane %v12840_v35, 1  ;;  %v6875_v11 = vsel %vm6864_vm7, %v6872_v0, %v6874_v13 }
 0x39b   : > { %v2406_v15 = vadd.f32 %v12434_v17, %v2405_v27  ;;  %v9587_v32 = vpop.f32.mrb[135].mxu1  ;;  %4203 = vrot.lane.b32.xlu1 %v2403_v1, %s10789_s25  ;;  %v3112_v7 = vpop.f32.mrb[80].mxu0  ;;  %v6927_v1 = vrot.slane %v6912_v46, 5  ;;  %v6836_v20 = vadd.f32 %v6835_v30, %v6834_v57  ;;  %v6658_v27 = vrot.slane %v12815_v39, 1  ;;  %v12876_v46 = vld [vmem:[%s10909_s10 + $0x88] sm:$0xff]  }
 0x39c   : > { %v3113_v48 = vadd.f32 %v12434_v17, %v3112_v7  ;;  %v9806_v44 = vpop.f32.mrb[81].mxu0  ;;  %v12868_v36 = vpop.permute.xlu0 %3495  ;;  %v6890_v57 = vsel %vm702_vm1, %v6873_v28, 0.0  ;;  %v12885_v30 = vrot.slane %v8710_v26, 5  ;;  %v6877_v0 = vsel %vm6864_vm7, %v6874_v13, %v12854_v61 }
 0x39d   : > { %9693 = vmatmul.mubr.msk.bf16.gmra.mrb[240].mxu1 %vm1445_vm2, %v12117_v10  ;;  %4205 = vrot.lane.b32.xlu0 %v2406_v15, %s10789_s25  ;;  %v3115_v18 = vpop.f32.mrb[82].mxu0  ;;  %v6926_v10 = vrot.slane %v6911_v23, 5  ;;  %15707 = vst [vmem:[#allocation141_spill] sm:$0xff] %v12868_v36  ;;  %v6889_v23 = vadd.f32 %v6888_v43, %v6887_v31  ;;  %v6965_v15 = vld [vmem:[%s10909_s10 + $0x90] sm:$0x8]  ;;  %v6930_v43 = vsel %vm6925_vm8, %v6927_v1, %v6929_v33  ;;  %v6837_v26 = vrot.slane %v6836_v20, 4  ;;  %v12899_v36 = vpop.permute.xlu1 %3485 }
 0x39e   : > { %v3116_v54 = vadd.f32 %v12434_v17, %v3115_v18  ;;  %v9807_v55 = vpop.f32.mrb[83].mxu0  ;;  %9696 = vmatprep.mubr.msk.bf16.mxu1 %vm10786_vm0, %v15681_v62  ;;  %v8713_v9 = vunpack.c.l.bf16 %v12876_v46 }
 0x39f   : > { %4615 = vrot.lane.b32.xlu1 %v3113_v48, %s10788_s24  ;;  %v12888_v48 = vld [vmem:[%s10909_s10 + $0x94] ss:$92 sps:$4 sm:$0xff]   ;;  %v6928_v18 = vsel %vm6925_vm8, %v6926_v10, %v6927_v1  ;;  %v6891_v59 = vadd.f32 %v6890_v57, %v6889_v23  ;;  %v6972_v1 = vunpack.c.l.bf16 %v6965_v15 }
 0x3a0   : > { %v2410_v44 = vpop.f32.mrb[136].mxu1  ;;  %9913 = vmatmul.mubr.msk.bf16.gmra.mrb[188].mxu0 %vm1445_vm2, %v12363_v4  ;;  %v6778_v4 = vrot.slane %v12845_v37, 2  ;;  %v6973_v14 = vunpack.c.l.bf16 %v12888_v48  ;;  %v12911_v23 = vpop.permute.xlu0 %3499 }
 0x3a1   : > { %v2411_v32 = vadd.f32 %v12434_v17, %v2410_v44  ;;  %v9590_v7 = vpop.f32.mrb[137].mxu1  ;;  %4617 = vrot.lane.b32.xlu0 %v3116_v54, %s10788_s24  ;;  %9916 = vmatprep.mubr.msk.bf16.mxu0 %vm10786_vm0, %v15681_v62  ;;  %v8717_v54 = vunpack.c.l.bf16 %v12865_v42  ;;  %15708 = vst [vmem:[#allocation142_spill] sm:$0xff] %v12911_v23  ;;  %v6971_v23 = vld [vmem:[%s10909_s10 + $0xa8] sm:$0xff]  }
 0x3a2   : > { %v2413_v31 = vpop.f32.mrb[138].mxu1  ;;  %v6892_v7 = vsel %vm702_vm1, %v6875_v11, 0.0  ;;  %v6932_v11 = vsel %vm6925_vm8, %v6929_v33, %v12885_v30  ;;  %v12918_v33 = vadd.f32 %v6658_v27, %v12815_v39  ;;  %v6933_v39 = vrot.slane %v8713_v9, 5  ;;  %v12944_v9 = vpop.permute.xlu1 %3489 }
 0x3a3   : > { %v2414_v55 = vadd.f32 %v12434_v17, %v2413_v31  ;;  %v9591_v44 = vpop.f32.mrb[139].mxu1  ;;  %4207 = vrot.lane.b32.xlu1 %v2411_v32, %s10789_s25  ;;  %v3120_v28 = vpop.f32.mrb[84].mxu0  ;;  %v6946_v31 = vsel %vm702_vm1, %v6928_v18, 0.0  ;;  %v12921_v18 = vadd.f32 %v6778_v4, %v12845_v37  ;;  %v12935_v37 = vld [vmem:[%s15558_s6] ss:$0 sm:$0xff]  ;;  %15709 = vst [vmem:[#allocation143_spill] sm:$0xff] %v12944_v9 }
 0x3a4   : > { %v3121_v13 = vadd.f32 %v12434_v17, %v3120_v28  ;;  %v9810_v10 = vpop.f32.mrb[85].mxu0  ;;  %v6947_v44 = vsel %vm702_vm1, %v6930_v43, 0.0  ;;  %v8718_v28 = vunpack.c.h.bf16 %v12865_v42  ;;  %v6838_v42 = vadd.f32 %v6837_v26, %v6836_v20  ;;  %v12924_v43 = vld [vmem:[%s10909_s10 + $0xa0] sm:$0xff]  }
 0x3a5   : > { %9697 = vmatmul.mubr.msk.bf16.gmra.mrb[244].mxu1 %vm1445_vm2, %v12287_v2  ;;  %4209 = vrot.lane.b32.xlu0 %v2414_v55, %s10789_s25  ;;  %v3123_v32 = vpop.f32.mrb[86].mxu0  ;;  %v6987_v2 = vrot.slane %v6972_v1, 6  ;;  %v6988_v55 = vrot.slane %v6973_v14, 6  ;;  %v6990_v10 = vrot.slane %v8717_v54, 6  ;;  %v12929_v14 = vadd.f32 %v6719_v41, %v12840_v35  ;;  %v6910_v35 = vld [vmem:[%s10909_s10 + $0x90] sm:$0x7] }
 0x3a6   : > { %v3124_v15 = vadd.f32 %v12434_v17, %v3123_v32  ;;  %v9811_v57 = vpop.f32.mrb[87].mxu0  ;;  %9700 = vmatprep.mubr.msk.bf16.mxu1 %vm10786_vm0, %v15681_v62  ;;  %v6893_v54 = vadd.f32 %v6892_v7, %v6891_v59  ;;  %v6948_v59 = vadd.f32 %v6947_v44, %v6946_v31  ;;  %v6949_v41 = vsel %vm702_vm1, %v6932_v11, 0.0 }
 0x3a7   : > { %4619 = vrot.lane.b32.xlu1 %v3121_v13, %s10788_s24  ;;  %v6894_v13 = vsel %vm702_vm1, %v6877_v0, 0.0  ;;  %v8721_v0 = vunpack.c.l.bf16 %v12924_v43  ;;  %v6989_v26 = vsel %vm6986_vm9, %v6987_v2, %v6988_v55  ;;  %v6991_v7 = vsel %vm6986_vm9, %v6988_v55, %v6990_v10  ;;  %v12954_v57 = vpop.permute.xlu0 %2831 }
 0x3a8   : > { %v2418_v17 = vpop.f32.mrb[140].mxu1  ;;  %9917 = vmatmul.mubr.msk.bf16.gmra.mrb[192].mxu0 %vm1445_vm2, %v12474_v50  ;;  %v8714_v50 = vunpack.c.h.bf16 %v12876_v46  ;;  %v6992_v1 = vrot.slane %v8718_v28, 6  ;;  %v6839_v31 = vrot.slane %v6838_v42, 2  ;;  %v6896_v44 = vsel %vm6651_vm5, %v12854_v61, 0.0 }
 0x3a9   : > { %v2419_v20 = vadd.f32 %v12935_v37, %v2418_v17  ;;  %v9594_v27 = vpop.f32.mrb[141].mxu1  ;;  %4621 = vrot.lane.b32.xlu0 %v3124_v15, %s10788_s24  ;;  %9920 = vmatprep.mubr.msk.bf16.mxu0 %vm10786_vm0, %v15681_v62  ;;  %v6895_v17 = vadd.f32 %v6894_v13, %v6893_v54  ;;  %v6917_v28 = vunpack.c.l.bf16 %v6910_v35  ;;  %v6950_v11 = vadd.f32 %v6949_v41, %v6948_v59 }
 0x3aa   : > { %v2421_v4 = vpop.f32.mrb[142].mxu1  ;;  %v6934_v27 = vsel %vm6925_vm8, %v12885_v30, %v6933_v39  ;;  %v6935_v61 = vrot.slane %v8714_v50, 5  ;;  %v7008_v54 = vsel %vm702_vm1, %v6991_v7, 0.0  ;;  %v8722_v30 = vunpack.c.h.bf16 %v12924_v43  ;;  %v12979_v7 = vpop.permute.xlu1 %3493 }
 0x3ab   : > { %v2422_v32 = vadd.f32 %v12935_v37, %v2421_v4  ;;  %v9595_v15 = vpop.f32.mrb[143].mxu1  ;;  %4211 = vrot.lane.b32.xlu1 %v2419_v20, %s10789_s25  ;;  %v3128_v46 = vpop.f32.mrb[88].mxu0  ;;  %v7026_v4 = vld [vmem:[%s10909_s10 + $0xa8] sm:$0x8]  ;;  %v12961_v20 = vld [vmem:[%s10909_s10 + $0xb0] sm:$0xff]   ;;  %v12975_v50 = vadd.f32 %v6839_v31, %v6838_v42  ;;  %v6951_v59 = vsel %vm702_vm1, %v6934_v27, 0.0  ;;  %v6978_v27 = vunpack.c.l.bf16 %v6971_v23 }
 0x3ac   : > { %v3129_v2 = vadd.f32 %v12935_v37, %v3128_v46  ;;  %v9814_v55 = vpop.f32.mrb[89].mxu0  ;;  %v7007_v46 = vsel %vm702_vm1, %v6989_v26, 0.0  ;;  %v8725_v41 = vunpack.c.l.bf16 %v12961_v20  ;;  %v7033_v26 = vunpack.c.l.bf16 %v7026_v4  ;;  %15710 = vst [vmem:[#allocation144_spill] sm:$0xff] %v12979_v7 }
 0x3ad   : > { %9701 = vmatmul.mubr.msk.bf16.gmra.mrb[248].mxu1 %vm1445_vm2, %v12261_v22  ;;  %4213 = vrot.lane.b32.xlu0 %v2422_v32, %s10789_s25  ;;  %v3131_v15 = vpop.f32.mrb[90].mxu0  ;;  %v6993_v22 = vsel %vm6986_vm9, %v6990_v10, %v6992_v1  ;;  %v6994_v55 = vrot.slane %v8721_v0, 6  ;;  %v12983_v43 = vrot.slane %v6917_v28, 5  ;;  %v7009_v10 = vadd.f32 %v7008_v54, %v7007_v46 }
 0x3ae   : > { %v3132_v13 = vadd.f32 %v12935_v37, %v3131_v15  ;;  %v9815_v35 = vpop.f32.mrb[91].mxu0  ;;  %9704 = vmatprep.mubr.msk.bf16.mxu1 %vm10786_vm0, %v15681_v62  ;;  %v6897_v15 = vadd.f32 %v6896_v44, %v6895_v17  ;;  %v7034_v0 = vunpack.c.h.bf16 %v6971_v23  ;;  %v6936_v31 = vsel %vm6925_vm8, %v6933_v39, %v6935_v61 }
 0x3af   : > { %4623 = vrot.lane.b32.xlu1 %v3129_v2, %s10788_s24  ;;  %v7010_v4 = vsel %vm702_vm1, %v6993_v22, 0.0  ;;  %v12991_v35 = vpop.permute.xlu0 %2163  ;;  %v6952_v44 = vadd.f32 %v6951_v59, %v6950_v11  ;;  %v6995_v17 = vsel %vm6986_vm9, %v6992_v1, %v6994_v55  ;;  %v6996_v28 = vrot.slane %v8722_v30, 6  ;;  %v8867_v59 = vld [vmem:[%s10909_s10 + $0xb8] sm:$0xff]  }
 0x3b0   : > { %v2426_v32 = vpop.f32.mrb[144].mxu1  ;;  %9921 = vmatmul.mubr.msk.bf16.gmra.mrb[196].mxu0 %vm1445_vm2, %v12461_v60  ;;  %v8726_v46 = vunpack.c.h.bf16 %v12961_v20  ;;  %v7048_v39 = vrot.slane %v7033_v26, 7  ;;  %v7049_v23 = vrot.slane %v7034_v0, 7  ;;  %v6953_v9 = vsel %vm702_vm1, %v6936_v31, 0.0 }
 0x3b1   : > { %v2427_v2 = vadd.f32 %v12935_v37, %v2426_v32  ;;  %v9598_v42 = vpop.f32.mrb[145].mxu1  ;;  %4625 = vrot.lane.b32.xlu0 %v3132_v13, %s10788_s24  ;;  %9924 = vmatprep.mubr.msk.bf16.mxu0 %vm10786_vm0, %v15681_v62  ;;  %v7011_v11 = vadd.f32 %v7010_v4, %v7009_v10  ;;  %v6898_v20 = vrot.slane %v6897_v15, 4  ;;  %v6938_v30 = vsel %vm6925_vm8, %v6935_v61, %v12983_v43 }
 0x3b2   : > { %v2429_v60 = vpop.f32.mrb[146].mxu1  ;;  %v7051_v42 = vrot.slane %v8725_v41, 7  ;;  %v13005_v41 = vrot.slane %v6978_v27, 6  ;;  %v7012_v26 = vsel %vm702_vm1, %v6995_v17, 0.0  ;;  %v6997_v61 = vsel %vm6986_vm9, %v6994_v55, %v6996_v28 }
 0x3b3   : > { %v2430_v54 = vadd.f32 %v12935_v37, %v2429_v60  ;;  %v9599_v13 = vpop.f32.mrb[147].mxu1  ;;  %4215 = vrot.lane.b32.xlu1 %v2427_v2, %s10789_s25  ;;  %v3136_v32 = vpop.f32.mrb[92].mxu0  ;;  %v7053_v31 = vrot.slane %v8726_v46, 7  ;;  %v6954_v27 = vadd.f32 %v6953_v9, %v6952_v44  ;;  %v8729_v4 = vunpack.c.l.bf16 %v8867_v59  ;;  %v7032_v9 = vld [vmem:[%s10909_s10 + $0xc0] sm:$0xff]  }
 0x3b4   : > { %v3137_v22 = vadd.f32 %v12935_v37, %v3136_v32  ;;  %v9818_v7 = vpop.f32.mrb[93].mxu0  ;;  %v7050_v60 = vsel %vm7047_vm10, %v7048_v39, %v7049_v23  ;;  %v7052_v17 = vsel %vm7047_vm10, %v7049_v23, %v7051_v42  ;;  %v13025_v13 = vpop.permute.xlu0 %2833  ;;  %v6955_v55 = vsel %vm702_vm1, %v6938_v30, 0.0 }
 0x3b5   : > { %9705 = vmatmul.mubr.msk.bf16.gmra.mrb[252].mxu1 %vm1445_vm2, %v12295_v56  ;;  %4217 = vrot.lane.b32.xlu0 %v2430_v54, %s10789_s25  ;;  %v3139_v1 = vpop.f32.mrb[94].mxu0  ;;  %v13008_v7 = vpop.permute.xlu1 %3497  ;;  %v15712_v56 = vrot.slane %v12921_v18, 1  ;;  %v13023_v54 = vld [vmem:[%s10909_s10 + $0xc8] sm:$0xff]   ;;  %v7013_v46 = vadd.f32 %v7012_v26, %v7011_v11  ;;  %v13036_v23 = vadd.f32 %v6898_v20, %v6897_v15  ;;  %v7054_v11 = vsel %vm7047_vm10, %v7051_v42, %v7053_v31 }
 0x3b6   : > { %15711 = vst [vmem:[#allocation145_spill] sm:$0xff] %v13008_v7  ;;  %v3140_v10 = vadd.f32 %v12935_v37, %v3139_v1  ;;  %v9819_v0 = vpop.f32.mrb[95].mxu0  ;;  %9708 = vmatprep.mubr.msk.bf16.mxu1 %vm10786_vm0, %v15681_v62  ;;  %v7014_v1 = vsel %vm702_vm1, %v6997_v61, 0.0  ;;  %v7069_v30 = vsel %vm702_vm1, %v7052_v17, 0.0  ;;  %v8733_v26 = vunpack.c.l.bf16 %v13023_v54  ;;  %v8870_v17 = vld [vmem:[%s10909_s10 + $0xe0] sm:$0xff]  }
 0x3b7   : > { %v13016_v2 = vadd.f32 %v15712_v56, %v12921_v18  ;;  %4627 = vrot.lane.b32.xlu1 %v3137_v22, %s10788_s24  ;;  %v8730_v22 = vunpack.c.h.bf16 %v8867_v59  ;;  %v7068_v59 = vsel %vm702_vm1, %v7050_v60, 0.0  ;;  %v6956_v20 = vadd.f32 %v6955_v55, %v6954_v27 }
 0x3b8   : > { %v2434_v32 = vpop.f32.mrb[148].mxu1  ;;  %9925 = vmatmul.mubr.msk.bf16.gmra.mrb[200].mxu0 %vm1445_vm2, %v12496_v16  ;;  %v6999_v16 = vsel %vm6986_vm9, %v6996_v28, %v13005_v41  ;;  %v7055_v28 = vrot.slane %v8729_v4, 7  ;;  %v7015_v60 = vadd.f32 %v7014_v1, %v7013_v46  ;;  %v7039_v18 = vunpack.c.l.bf16 %v7032_v9 }
 0x3b9   : > { %v2435_v44 = vadd.f32 %v12935_v37, %v2434_v32  ;;  %v9602_v39 = vpop.f32.mrb[149].mxu1  ;;  %4629 = vrot.lane.b32.xlu0 %v3140_v10, %s10788_s24  ;;  %9928 = vmatprep.mubr.msk.bf16.mxu0 %vm10786_vm0, %v15681_v62  ;;  %v7094_v32 = vunpack.c.h.bf16 %v7032_v9  ;;  %v13047_v61 = vpop.permute.xlu1 %3501  ;;  %v7057_v7 = vrot.slane %v8730_v22, 7  ;;  %v6957_v27 = vsel %vm6651_vm5, %v12983_v43, 0.0 }
 0x3ba   : > { %v2437_v0 = vpop.f32.mrb[150].mxu1  ;;  %v7016_v4 = vsel %vm702_vm1, %v6999_v16, 0.0  ;;  %v7070_v55 = vadd.f32 %v7069_v30, %v7068_v59  ;;  %v7102_v43 = vsel %vm702_vm1, %v8733_v26, 0.0  ;;  %v6900_v16 = vrot.slane %v13036_v23, 2  ;;  %v13070_v30 = vld [vmem:[%s10909_s10 + $0xe8] sm:$0xff]  }
 0x3bb   : > { %v2438_v10 = vadd.f32 %v12935_v37, %v2437_v0  ;;  %v9603_v56 = vpop.f32.mrb[151].mxu1  ;;  %4219 = vrot.lane.b32.xlu1 %v2435_v44, %s10789_s25  ;;  %v3144_v15 = vpop.f32.mrb[96].mxu0  ;;  %v7071_v44 = vsel %vm702_vm1, %v7054_v11, 0.0  ;;  %v7101_v9 = vsel %vm702_vm1, %v7094_v32, 0.0  ;;  %v7056_v1 = vsel %vm7047_vm10, %v7053_v31, %v7055_v28 }
 0x3bc   : > { %v3145_v42 = vadd.f32 %v12935_v37, %v3144_v15  ;;  %v9822_v39 = vpop.f32.mrb[97].mxu0  ;;  %v13058_v56 = vpop.permute.xlu0 %3503  ;;  %v8741_v11 = vunpack.c.l.bf16 %v8870_v17  ;;  %v8742_v59 = vunpack.c.h.bf16 %v8870_v17  ;;  %v7017_v32 = vadd.f32 %v7016_v4, %v7015_v60 }
 0x3bd   : > { %9709 = vmatmul.mubr.msk.bf16.gmra.mrb[0].mxu1 %vm1445_vm2, %v12313_v25  ;;  %4221 = vrot.lane.b32.xlu0 %v2438_v10, %s10789_s25  ;;  %v3147_v0 = vpop.f32.mrb[98].mxu0  ;;  %v8734_v25 = vunpack.c.h.bf16 %v13023_v54  ;;  %v13072_v10 = vpop.permute.xlu1 %4567  ;;  %v6958_v54 = vadd.f32 %v6957_v27, %v6956_v20  ;;  %v7058_v26 = vsel %vm7047_vm10, %v7055_v28, %v7057_v7  ;;  %v13077_v39 = vrot.slane %v7039_v18, 7 }
 0x3be   : > { %v3148_v46 = vadd.f32 %v12935_v37, %v3147_v0  ;;  %v9823_v22 = vpop.f32.mrb[99].mxu0  ;;  %9712 = vmatprep.mubr.msk.bf16.mxu1 %vm10786_vm0, %v15681_v62  ;;  %15713 = vst [vmem:[#allocation146_spill] sm:$0xff] %v13072_v10  ;;  %v7018_v17 = vsel %vm6651_vm5, %v13005_v41, 0.0  ;;  %v7103_v20 = vadd.f32 %v7102_v43, %v7101_v9  ;;  %v7073_v18 = vsel %vm702_vm1, %v7056_v1, 0.0 }
 0x3bf   : > { %4631 = vrot.lane.b32.xlu1 %v3145_v42, %s10788_s24  ;;  %v13080_v42 = vld [vmem:[%s10909_s10 + $0xd0] sm:$0xff]   ;;  %v7104_v27 = vsel %vm702_vm1, %v8734_v25, 0.0  ;;  %v8745_v4 = vunpack.c.l.bf16 %v13070_v30  ;;  %v15715_v22 = vunpack.c.h.bf16 %v12848_v21  ;;  %v7144_v9 = vrot.slane %v8742_v59, 1 }
 0x3c0   : > { %v2442_v15 = vpop.f32.mrb[152].mxu1  ;;  %9929 = vmatmul.mubr.msk.bf16.gmra.mrb[204].mxu0 %vm1445_vm2, %v12584_v8  ;;  %v7072_v8 = vadd.f32 %v7071_v44, %v7070_v55  ;;  %v13088_v60 = vpop.permute.xlu0 %4569  ;;  %v8737_v55 = vunpack.c.l.bf16 %v13080_v42  ;;  %v7142_v44 = vrot.slane %v8741_v11, 1  ;;  %v6959_v10 = vrot.slane %v6958_v54, 4 }
 0x3c1   : > { %v2443_v31 = vadd.f32 %v12935_v37, %v2442_v15  ;;  %v9606_v0 = vpop.f32.mrb[153].mxu1  ;;  %4633 = vrot.lane.b32.xlu0 %v3148_v46, %s10788_s24  ;;  %9932 = vmatprep.mubr.msk.bf16.mxu0 %vm10786_vm0, %v15681_v62  ;;  %15714 = vst [vmem:[#allocation147_spill] sm:$0xff] %v13088_v60  ;;  %v7141_v46 = vrot.slane %v15715_v22, 1  ;;  %v13098_v43 = vpop.permute.xlu1 %4571  ;;  %v13101_v60 = vadd.f32 %v7018_v17, %v7017_v32  ;;  %v7075_v11 = vsel %vm702_vm1, %v7058_v26, 0.0 }
 0x3c2   : > { %v2445_v28 = vpop.f32.mrb[154].mxu1  ;;  %15716 = vst [vmem:[#allocation148_spill] sm:$0xff] %v13098_v43  ;;  %v7060_v22 = vsel %vm7047_vm10, %v7057_v7, %v13077_v39  ;;  %v7105_v59 = vadd.f32 %v7104_v27, %v7103_v20  ;;  %v7145_v7 = vsel %vm6681_vm3, %v7142_v44, %v7144_v9  ;;  %v15717_v26 = vrot.slane %v12975_v50, 1 }
 0x3c3   : > { %v2446_v15 = vadd.f32 %v12935_v37, %v2445_v28  ;;  %v9607_v0 = vpop.f32.mrb[155].mxu1  ;;  %4223 = vrot.lane.b32.xlu1 %v2443_v31, %s10789_s25  ;;  %v3152_v41 = vpop.f32.mrb[100].mxu0  ;;  %v7074_v28 = vadd.f32 %v7073_v18, %v7072_v8  ;;  %v13124_v8 = vadd.f32 %v6900_v16, %v13036_v23  ;;  %v8738_v20 = vunpack.c.h.bf16 %v13080_v42  ;;  %v8872_v16 = vld [vmem:[%s10909_s10 + $0xf8] sm:$0xff]  }
 0x3c4   : > { %v3153_v1 = vadd.f32 %v12935_v37, %v3152_v41  ;;  %v9826_v25 = vpop.f32.mrb[101].mxu0  ;;  %v8746_v0 = vunpack.c.h.bf16 %v13070_v30  ;;  %v13110_v41 = vpop.permute.xlu0 %4573  ;;  %v13121_v30 = vadd.f32 %v15717_v26, %v12975_v50  ;;  %v7106_v18 = vsel %vm702_vm1, %v8737_v55, 0.0 }
 0x3c5   : > { %9713 = vmatmul.mubr.msk.bf16.gmra.mrb[4].mxu1 %vm1445_vm2, %v12345_v45  ;;  %4225 = vrot.lane.b32.xlu0 %v2446_v15, %s10789_s25  ;;  %v3155_v31 = vpop.f32.mrb[102].mxu0  ;;  %v7143_v45 = vsel %vm6681_vm3, %v7141_v46, %v7142_v44  ;;  %v7146_v15 = vrot.slane %v8745_v4, 1  ;;  %v13128_v27 = vpop.permute.xlu1 %4575  ;;  %v13132_v4 = vadd.f32 %v6959_v10, %v6958_v54  ;;  %v7077_v50 = vsel %vm702_vm1, %v7060_v22, 0.0 }
 0x3c6   : > { %v3156_v32 = vadd.f32 %v12935_v37, %v3155_v31  ;;  %v9827_v17 = vpop.f32.mrb[103].mxu0  ;;  %9716 = vmatprep.mubr.msk.bf16.mxu1 %vm10786_vm0, %v15681_v62  ;;  %15718 = vst [vmem:[#allocation149_spill] sm:$0xff] %v13128_v27  ;;  %v7099_v23 = vunpack.c.l.bf16 %v12848_v21  ;;  %v7161_v10 = vsel %vm702_vm1, %v7143_v45, 0.0  ;;  %v7162_v54 = vsel %vm702_vm1, %v7145_v7, 0.0  ;;  %v7126_v21 = vld [vmem:[%s10909_s10 + $0xf4] sm:$0x1] }
 0x3c7   : > { %4635 = vrot.lane.b32.xlu1 %v3153_v1, %s10788_s24  ;;  %v7107_v22 = vadd.f32 %v7106_v18, %v7105_v59  ;;  %v7132_v31 = vunpack.c.h.bf16 %v12888_v48  ;;  %v7147_v17 = vsel %vm6681_vm3, %v7144_v9, %v7146_v15  ;;  %v7148_v26 = vrot.slane %v8746_v0, 1 }
 0x3c8   : > { %v2450_v46 = vpop.f32.mrb[156].mxu1  ;;  %9933 = vmatmul.mubr.msk.bf16.gmra.mrb[208].mxu0 %vm1445_vm2, %v12633_v58  ;;  %v7076_v58 = vadd.f32 %v7075_v11, %v7074_v28  ;;  %v13144_v1 = vpop.permute.xlu0 %4577  ;;  %v7108_v11 = vsel %vm702_vm1, %v8738_v20, 0.0  ;;  %v8749_v45 = vunpack.c.l.bf16 %v8872_v16  ;;  %v8750_v7 = vunpack.c.h.bf16 %v8872_v16 }
 0x3c9   : > { %v2451_v42 = vadd.f32 %v12935_v37, %v2450_v46  ;;  %v9610_v55 = vpop.f32.mrb[157].mxu1  ;;  %4637 = vrot.lane.b32.xlu0 %v3156_v32, %s10788_s24  ;;  %9936 = vmatprep.mubr.msk.bf16.mxu0 %vm10786_vm0, %v15681_v62  ;;  %15719 = vst [vmem:[#allocation150_spill] sm:$0xff] %v13144_v1  ;;  %v7180_v32 = vld [vmem:[%s10909_s10 + $0xf4] sm:$0xe]  ;;  %v13153_v59 = vpop.permute.xlu1 %4579  ;;  %v7079_v9 = vsel %vm6651_vm5, %v13077_v39, 0.0  ;;  %v7110_v0 = vsel %vm702_vm1, %v7099_v23, 0.0  ;;  %v7133_v44 = vunpack.c.l.bf16 %v7126_v21 }
 0x3ca   : > { %v2453_v25 = vpop.f32.mrb[158].mxu1  ;;  %15720 = vst [vmem:[#allocation151_spill] sm:$0xff] %v13153_v59  ;;  %v7078_v16 = vadd.f32 %v7077_v50, %v7076_v58  ;;  %v7202_v21 = vrot.slane %v8749_v45, 2 }
 0x3cb   : > { %v2454_v46 = vadd.f32 %v12935_v37, %v2453_v25  ;;  %v9611_v55 = vpop.f32.mrb[159].mxu1  ;;  %4227 = vrot.lane.b32.xlu1 %v2451_v42, %s10789_s25  ;;  %v3160_v28 = vpop.f32.mrb[104].mxu0  ;;  %v7163_v25 = vadd.f32 %v7162_v54, %v7161_v10  ;;  %v7093_v42 = vld [vmem:[%s10909_s10 + $0xdc] sm:$0x1]  ;;  %v7109_v10 = vadd.f32 %v7108_v11, %v7107_v22  ;;  %v7150_v54 = vrot.slane %v7132_v31, 1 }
 0x3cc   : > { %v3161_v48 = vadd.f32 %v12935_v37, %v3160_v28  ;;  %v9830_v18 = vpop.f32.mrb[105].mxu0  ;;  %v13160_v55 = vld [vmem:[%s10909_s10 + $0x100] sm:$0xff]   ;;  %v7164_v28 = vsel %vm702_vm1, %v7147_v17, 0.0  ;;  %v13167_v59 = vpop.permute.xlu0 %4581  ;;  %v7204_v17 = vrot.slane %v8750_v7, 2  ;;  %v6961_v22 = vrot.slane %v13132_v4, 2 }
 0x3cd   : > { %9717 = vmatmul.mubr.msk.bf16.gmra.mrb[8].mxu1 %vm1445_vm2, %v12377_v5  ;;  %4229 = vrot.lane.b32.xlu0 %v2454_v46, %s10789_s25  ;;  %v3163_v20 = vpop.f32.mrb[106].mxu0  ;;  %v7187_v18 = vunpack.c.l.bf16 %v7180_v32  ;;  %15721 = vst [vmem:[#allocation152_spill] sm:$0xff] %v13167_v59  ;;  %v7149_v5 = vsel %vm6681_vm3, %v7146_v15, %v7148_v26  ;;  %v8753_v50 = vunpack.c.l.bf16 %v13160_v55  ;;  %v7100_v15 = vunpack.c.l.bf16 %v7093_v42 }
 0x3ce   : > { %v3164_v39 = vadd.f32 %v12935_v37, %v3163_v20  ;;  %v9831_v23 = vpop.f32.mrb[107].mxu0  ;;  %9720 = vmatprep.mubr.msk.bf16.mxu1 %vm10786_vm0, %v15681_v62  ;;  %v7165_v31 = vadd.f32 %v7164_v28, %v7163_v25  ;;  %v13190_v7 = vrot.slane %v7133_v44, 1  ;;  %v13195_v25 = vadd.f32 %v7079_v9, %v7078_v16  ;;  %v7240_v20 = vld [vmem:[%s10909_s10 + $0x10c] sm:$0xe] }
 0x3cf   : > { %4639 = vrot.lane.b32.xlu1 %v3161_v48, %s10788_s24  ;;  %v7201_v58 = vrot.slane %v7187_v18, 2  ;;  %v7166_v18 = vsel %vm702_vm1, %v7149_v5, 0.0  ;;  %v7111_v28 = vadd.f32 %v7110_v0, %v7109_v10  ;;  %v7205_v9 = vsel %vm6742_vm4, %v7202_v21, %v7204_v17 }
 0x3d0   : > { %v2458_v32 = vpop.f32.mrb[160].mxu1  ;;  %9937 = vmatmul.mubr.msk.bf16.gmra.mrb[212].mxu0 %vm1445_vm2, %v12697_v29  ;;  %v13177_v46 = vpop.permute.xlu1 %4583  ;;  %v15723_v29 = vrot.slane %v13101_v60, 4  ;;  %v7206_v16 = vrot.slane %v8753_v50, 2  ;;  %v7112_v10 = vsel %vm6651_vm5, %v7100_v15, 0.0 }
 0x3d1   : > { %15722 = vst [vmem:[#allocation153_spill] sm:$0xff] %v13177_v46  ;;  %v2459_v11 = vadd.f32 %v12935_v37, %v2458_v32  ;;  %v9614_v48 = vpop.f32.mrb[161].mxu1  ;;  %4641 = vrot.lane.b32.xlu0 %v3164_v39, %s10788_s24  ;;  %9940 = vmatprep.mubr.msk.bf16.mxu0 %vm10786_vm0, %v15681_v62  ;;  %v7151_v39 = vsel %vm6681_vm3, %v7148_v26, %v7150_v54  ;;  %v8754_v32 = vunpack.c.h.bf16 %v13160_v55 }
 0x3d2   : > { %v13188_v45 = vadd.f32 %v15723_v29, %v13101_v60  ;;  %v2461_v23 = vpop.f32.mrb[162].mxu1  ;;  %v13193_v42 = vpop.permute.xlu0 %4585  ;;  %v13200_v48 = vld [vmem:[%s10909_s10 + $0x108] ss:$24 sps:$4 sm:$0xff]   ;;  %v7203_v5 = vsel %vm6742_vm4, %v7201_v58, %v7202_v21  ;;  %v13208_v55 = vadd.f32 %v6961_v22, %v13132_v4  ;;  %v7168_v4 = vsel %vm702_vm1, %v7151_v39, 0.0  ;;  %v7186_v22 = vld [vmem:[%s10909_s10 + $0x10c] sm:$0x3] }
 0x3d3   : > { %15724 = vst [vmem:[#allocation154_spill] sm:$0xff] %v13193_v42  ;;  %v2462_v60 = vadd.f32 %v12935_v37, %v2461_v23  ;;  %v9615_v29 = vpop.f32.mrb[163].mxu1  ;;  %4231 = vrot.lane.b32.xlu1 %v2459_v11, %s10789_s25  ;;  %v3168_v44 = vpop.f32.mrb[108].mxu0  ;;  %v7167_v23 = vadd.f32 %v7166_v18, %v7165_v31  ;;  %v7153_v11 = vsel %vm6681_vm3, %v7150_v54, %v13190_v7  ;;  %v7192_v15 = vunpack.c.l.bf16 %v13200_v48  ;;  %v13224_v31 = vld [vmem:[%s10909_s10 + $0x118] sm:$0xff]  }
 0x3d4   : > { %v3169_v0 = vadd.f32 %v12935_v37, %v3168_v44  ;;  %v9834_v26 = vpop.f32.mrb[109].mxu0  ;;  %v8874_v29 = vld [vmem:[%s10909_s10 + $0x110] sm:$0xff]   ;;  %v7022_v21 = vrot.slane %v13188_v45, 2  ;;  %v7221_v44 = vsel %vm702_vm1, %v7203_v5, 0.0  ;;  %v7081_v39 = vrot.slane %v13195_v25, 4 }
 0x3d5   : > { %9721 = vmatmul.mubr.msk.bf16.gmra.mrb[12].mxu1 %vm1445_vm2, %v12487_v38  ;;  %v13214_v58 = vpop.permute.xlu1 %4175  ;;  %4233 = vrot.lane.b32.xlu0 %v2462_v60, %s10789_s25  ;;  %v3171_v50 = vpop.f32.mrb[110].mxu0  ;;  %v7208_v60 = vrot.slane %v8754_v32, 2  ;;  %v7222_v26 = vsel %vm702_vm1, %v7205_v9, 0.0  ;;  %v7113_v46 = vadd.f32 %v7112_v10, %v7111_v28  ;;  %v7207_v42 = vsel %vm6742_vm4, %v7204_v17, %v7206_v16 }
 0x3d6   : > { %v3172_v38 = vadd.f32 %v12935_v37, %v3171_v50  ;;  %v9835_v18 = vpop.f32.mrb[111].mxu0  ;;  %9724 = vmatprep.mubr.msk.bf16.mxu1 %vm10786_vm0, %v15681_v62  ;;  %v8757_v50 = vunpack.c.l.bf16 %v8874_v29  ;;  %v7169_v32 = vadd.f32 %v7168_v4, %v7167_v23  ;;  %v7170_v5 = vsel %vm702_vm1, %v7153_v11, 0.0 }
 0x3d7   : > { %v13232_v54 = vpop.permute.xlu0 %4177  ;;  %4643 = vrot.lane.b32.xlu1 %v3169_v0, %s10788_s24  ;;  %v8758_v59 = vunpack.c.h.bf16 %v8874_v29  ;;  %v8761_v9 = vunpack.c.l.bf16 %v13224_v31  ;;  %v7193_v17 = vunpack.c.l.bf16 %v7186_v22  ;;  %v7223_v28 = vadd.f32 %v7222_v26, %v7221_v44 }
 0x3d8   : > { %v2466_v18 = vpop.f32.mrb[164].mxu1  ;;  %9941 = vmatmul.mubr.msk.bf16.gmra.mrb[216].mxu0 %vm1445_vm2, %v12789_v49  ;;  %v7247_v10 = vunpack.c.l.bf16 %v7240_v20  ;;  %v7209_v23 = vsel %vm6742_vm4, %v7206_v16, %v7208_v60  ;;  %v7210_v11 = vrot.slane %v7192_v15, 2  ;;  %v7224_v29 = vsel %vm702_vm1, %v7207_v42, 0.0 }
 0x3d9   : > { %v2467_v27 = vadd.f32 %v12935_v37, %v2466_v18  ;;  %v9618_v1 = vpop.f32.mrb[165].mxu1  ;;  %v13242_v0 = vpop.permute.xlu1 %4587  ;;  %4645 = vrot.lane.b32.xlu0 %v3172_v38, %s10788_s24  ;;  %9944 = vmatprep.mubr.msk.bf16.mxu0 %vm10786_vm0, %v15681_v62  ;;  %v7262_v4 = vrot.slane %v8757_v50, 3  ;;  %v8762_v38 = vunpack.c.h.bf16 %v13224_v31  ;;  %v7264_v22 = vrot.slane %v8758_v59, 3 }
 0x3da   : > { %15725 = vst [vmem:[#allocation155_spill] sm:$0xff] %v13242_v0  ;;  %v2469_v49 = vpop.f32.mrb[166].mxu1  ;;  %v7261_v0 = vrot.slane %v7247_v10, 3  ;;  %v13255_v20 = vadd.f32 %v7022_v21, %v13188_v45  ;;  %v7114_v16 = vrot.slane %v7113_v46, 4  ;;  %v7171_v15 = vadd.f32 %v7170_v5, %v7169_v32 }
 0x3db   : > { %v2470_v18 = vadd.f32 %v12935_v37, %v2469_v49  ;;  %v9619_v1 = vpop.f32.mrb[167].mxu1  ;;  %v13250_v43 = vpop.permute.xlu0 %4589  ;;  %4235 = vrot.lane.b32.xlu1 %v2467_v27, %s10789_s25  ;;  %v7266_v42 = vrot.slane %v8761_v9, 3  ;;  %v7172_v59 = vsel %vm6651_vm5, %v13190_v7, 0.0  ;;  %v7225_v31 = vadd.f32 %v7224_v29, %v7223_v28 }
 0x3dc   : > { %15726 = vst [vmem:[#allocation156_spill] sm:$0xff] %v13250_v43  ;;  %v3176_v44 = vpop.f32.mrb[112].mxu0  ;;  %v7263_v45 = vsel %vm6803_vm6, %v7261_v0, %v7262_v4  ;;  %v13268_v32 = vrot.slane %v7193_v17, 2  ;;  %v7226_v5 = vsel %vm702_vm1, %v7209_v23, 0.0  ;;  %v7252_v9 = vunpack.c.h.bf16 %v13200_v48 }
 0x3dd   : > { %v3177_v26 = vadd.f32 %v12935_v37, %v3176_v44  ;;  %9725 = vmatmul.mubr.msk.bf16.gmra.mrb[16].mxu1 %vm1445_vm2, %v12478_v24  ;;  %v13260_v50 = vpop.permute.xlu1 %4179  ;;  %4237 = vrot.lane.b32.xlu0 %v2470_v18, %s10789_s25  ;;  %v9838_v27 = vpop.f32.mrb[113].mxu0  ;;  %v7246_v24 = vld [vmem:[%s10909_s10 + $0x124] sm:$0x3]  ;;  %v7265_v10 = vsel %vm6803_vm6, %v7262_v4, %v7264_v22  ;;  %v13279_v28 = vadd.f32 %v7081_v39, %v13195_v25  ;;  %v7268_v29 = vrot.slane %v8762_v38, 3  ;;  %v8876_v44 = vld [vmem:[%s10909_s10 + $0x128] sm:$0xff]  }
 0x3de   : > { %v3179_v21 = vpop.f32.mrb[114].mxu0  ;;  %9728 = vmatprep.mubr.msk.bf16.mxu1 %vm10786_vm0, %v15681_v62  ;;  %v7211_v17 = vsel %vm6742_vm4, %v7208_v60, %v7210_v11  ;;  %v13284_v48 = vadd.f32 %v7114_v16, %v7113_v46  ;;  %v7267_v4 = vsel %vm6803_vm6, %v7264_v22, %v7266_v42  ;;  %v7281_v18 = vsel %vm702_vm1, %v7263_v45, 0.0  ;;  %v7300_v22 = vld [vmem:[%s10909_s10 + $0x124] sm:$0xc]  ;;  %v8877_v16 = vld [vmem:[%s10909_s10 + $0x130] sm:$0xff]  }
 0x3df   : > { %v3180_v49 = vadd.f32 %v12935_v37, %v3179_v21  ;;  %v13275_v7 = vpop.permute.xlu0 %4181  ;;  %4647 = vrot.lane.b32.xlu1 %v3177_v26, %s10788_s24  ;;  %v9839_v0 = vpop.f32.mrb[115].mxu0  ;;  %v7282_v1 = vsel %vm702_vm1, %v7265_v10, 0.0  ;;  %v7227_v46 = vadd.f32 %v7226_v5, %v7225_v31  ;;  %v7253_v38 = vunpack.c.l.bf16 %v7246_v24  ;;  %v13310_v5 = vld [vmem:[%s10909_s10 + $0x138] ss:$24 sps:$4 sm:$0xff]  }
 0x3e0   : > { %v2474_v23 = vpop.f32.mrb[168].mxu1  ;;  %9945 = vmatmul.mubr.msk.bf16.gmra.mrb[220].mxu0 %vm1445_vm2, %v12954_v57  ;;  %v13296_v57 = vadd.f32 %v7172_v59, %v7171_v15  ;;  %v7213_v27 = vsel %vm6742_vm4, %v7210_v11, %v13268_v32  ;;  %v7228_v45 = vsel %vm702_vm1, %v7211_v17, 0.0  ;;  %v7270_v21 = vrot.slane %v7252_v9, 3 }
 0x3e1   : > { %v2475_v25 = vadd.f32 %v12935_v37, %v2474_v23  ;;  %v9622_v39 = vpop.f32.mrb[169].mxu1  ;;  %v13291_v60 = vpop.permute.xlu1 %4591  ;;  %4649 = vrot.lane.b32.xlu0 %v3180_v49, %s10788_s24  ;;  %9948 = vmatprep.mubr.msk.bf16.mxu0 %vm10786_vm0, %v15681_v62  ;;  %v7283_v10 = vadd.f32 %v7282_v1, %v7281_v18  ;;  %v7269_v15 = vsel %vm6803_vm6, %v7266_v42, %v7268_v29  ;;  %v7284_v59 = vsel %vm702_vm1, %v7267_v4, 0.0 }
 0x3e2   : > { %15727 = vst [vmem:[#allocation157_spill] sm:$0xff] %v13291_v60  ;;  %v2477_v26 = vpop.f32.mrb[170].mxu1  ;;  %v8765_v31 = vunpack.c.l.bf16 %v8876_v44  ;;  %v8766_v11 = vunpack.c.h.bf16 %v8876_v44  ;;  %v8769_v17 = vunpack.c.l.bf16 %v8877_v16  ;;  %v8770_v9 = vunpack.c.h.bf16 %v8877_v16 }
 0x3e3   : > { %v2478_v49 = vadd.f32 %v12935_v37, %v2477_v26  ;;  %v9623_v0 = vpop.f32.mrb[171].mxu1  ;;  %v13304_v23 = vpop.permute.xlu0 %4593  ;;  %4239 = vrot.lane.b32.xlu1 %v2475_v25, %s10789_s25  ;;  %v7307_v18 = vunpack.c.l.bf16 %v7300_v22  ;;  %v7229_v4 = vadd.f32 %v7228_v45, %v7227_v46  ;;  %v7230_v25 = vsel %vm702_vm1, %v7213_v27, 0.0  ;;  %v7306_v22 = vld [vmem:[%s10909_s10 + $0x13c] sm:$0x7] }
 0x3e4   : > { %15728 = vst [vmem:[#allocation158_spill] sm:$0xff] %v13304_v23  ;;  %v3184_v24 = vpop.f32.mrb[116].mxu0  ;;  %v13319_v26 = vrot.slane %v7253_v38, 3  ;;  %v7285_v44 = vadd.f32 %v7284_v59, %v7283_v10  ;;  %v7312_v16 = vunpack.c.l.bf16 %v13310_v5  ;;  %v7232_v38 = vsel %vm6651_vm5, %v13268_v32, 0.0 }
 0x3e5   : > { %v3185_v1 = vadd.f32 %v12935_v37, %v3184_v24  ;;  %9729 = vmatmul.mubr.msk.bf16.gmra.mrb[20].mxu1 %vm1445_vm2, %v12509_v63  ;;  %v13315_v39 = vpop.permute.xlu1 %4183  ;;  %4241 = vrot.lane.b32.xlu0 %v2478_v49, %s10789_s25  ;;  %v9842_v42 = vpop.f32.mrb[117].mxu0  ;;  %v7321_v24 = vrot.slane %v7307_v18, 4  ;;  %v7322_v63 = vrot.slane %v8765_v31, 4  ;;  %v7286_v27 = vsel %vm702_vm1, %v7269_v15, 0.0 }
 0x3e6   : > { %15729 = vst [vmem:[#allocation159_spill] sm:$0xff] %v13315_v39  ;;  %v3187_v0 = vpop.f32.mrb[118].mxu0  ;;  %9732 = vmatprep.mubr.msk.bf16.mxu1 %vm10786_vm0, %v15681_v62  ;;  %v7324_v45 = vrot.slane %v8766_v11, 4  ;;  %v7271_v10 = vsel %vm6803_vm6, %v7268_v29, %v7270_v21  ;;  %v7326_v31 = vrot.slane %v8769_v17, 4  ;;  %v7328_v18 = vrot.slane %v8770_v9, 4 }
 0x3e7   : > { %v3188_v60 = vadd.f32 %v12935_v37, %v3187_v0  ;;  %v13326_v23 = vpop.permute.xlu0 %4185  ;;  %4651 = vrot.lane.b32.xlu1 %v3185_v1, %s10788_s24  ;;  %v9843_v46 = vpop.f32.mrb[119].mxu0  ;;  %v7323_v59 = vsel %vm6864_vm7, %v7321_v24, %v7322_v63  ;;  %v7231_v32 = vadd.f32 %v7230_v25, %v7229_v4  ;;  %v7313_v15 = vunpack.c.l.bf16 %v7306_v22 }
 0x3e8   : > { %v2482_v49 = vpop.f32.mrb[172].mxu1  ;;  %9949 = vmatmul.mubr.msk.bf16.gmra.mrb[224].mxu0 %vm1445_vm2, %v13025_v13  ;;  %v7325_v13 = vsel %vm6864_vm7, %v7322_v63, %v7324_v45  ;;  %v7273_v29 = vsel %vm6803_vm6, %v7270_v21, %v13319_v26  ;;  %v7287_v17 = vadd.f32 %v7286_v27, %v7285_v44  ;;  %v7327_v9 = vsel %vm6864_vm7, %v7324_v45, %v7326_v31  ;;  %v8878_v45 = vld [vmem:[%s10909_s10 + $0x140] sm:$0xff]  }
 0x3e9   : > { %v2483_v42 = vadd.f32 %v12935_v37, %v2482_v49  ;;  %v9626_v1 = vpop.f32.mrb[173].mxu1  ;;  %v13337_v0 = vpop.permute.xlu1 %4595  ;;  %4653 = vrot.lane.b32.xlu0 %v3188_v60, %s10788_s24  ;;  %10160 = vmatprep.mubr.msk.bf16.mxu0 %vm10786_vm0, %v15681_v62  ;;  %v7330_v24 = vrot.slane %v7312_v16, 4  ;;  %v7288_v4 = vsel %vm702_vm1, %v7271_v10, 0.0  ;;  %v7329_v25 = vsel %vm6864_vm7, %v7326_v31, %v7328_v18 }
 0x3ea   : > { %15730 = vst [vmem:[#allocation160_spill] sm:$0xff] %v13337_v0  ;;  %v2485_v11 = vpop.f32.mrb[174].mxu1  ;;  %v7341_v22 = vsel %vm702_vm1, %v7323_v59, 0.0  ;;  %v7174_v63 = vrot.slane %v13296_v57, 4  ;;  %v7342_v16 = vsel %vm702_vm1, %v7325_v13, 0.0  ;;  %v7344_v27 = vsel %vm702_vm1, %v7327_v9, 0.0 }
 0x3eb   : > { %v2486_v46 = vadd.f32 %v12935_v37, %v2485_v11  ;;  %v9627_v49 = vpop.f32.mrb[175].mxu1  ;;  %v13347_v60 = vpop.permute.xlu0 %4597  ;;  %4243 = vrot.lane.b32.xlu1 %v2483_v42, %s10789_s25  ;;  %v7331_v31 = vsel %vm6864_vm7, %v7328_v18, %v7330_v24  ;;  %v13365_v1 = vrot.slane %v7313_v15, 4  ;;  %v7343_v11 = vadd.f32 %v7342_v16, %v7341_v22  ;;  %v8879_v13 = vld [vmem:[%s10909_s10 + $0x148] sm:$0xff]  }
 0x3ec   : > { %15731 = vst [vmem:[#allocation161_spill] sm:$0xff] %v13347_v60  ;;  %v3192_v21 = vpop.f32.mrb[120].mxu0  ;;  %v13370_v9 = vadd.f32 %v7232_v38, %v7231_v32  ;;  %v7346_v44 = vsel %vm702_vm1, %v7329_v25, 0.0  ;;  %v7292_v22 = vsel %vm6651_vm5, %v13319_v26, 0.0  ;;  %v8773_v38 = vunpack.c.l.bf16 %v8878_v45  ;;  %v7366_v25 = vld [vmem:[%s10909_s10 + $0x154] sm:$0x7] }
 0x3ed   : > { %v3193_v42 = vadd.f32 %v12935_v37, %v3192_v21  ;;  %9733 = vmatmul.mubr.msk.bf16.gmra.mrb[24].mxu1 %vm1445_vm2, %v12622_v34  ;;  %v13361_v10 = vpop.permute.xlu1 %4187  ;;  %4245 = vrot.lane.b32.xlu0 %v2486_v46, %s10789_s25  ;;  %v9846_v59 = vpop.f32.mrb[121].mxu0  ;;  %v7289_v21 = vadd.f32 %v7288_v4, %v7287_v17  ;;  %v7290_v34 = vsel %vm702_vm1, %v7273_v29, 0.0  ;;  %v7360_v46 = vld [vmem:[%s10909_s10 + $0x13c] sm:$0xc]  ;;  %v7345_v16 = vadd.f32 %v7344_v27, %v7343_v11 }
 0x3ee   : > { %15732 = vst [vmem:[#allocation162_spill] sm:$0xff] %v13361_v10  ;;  %v3195_v49 = vpop.f32.mrb[122].mxu0  ;;  %9736 = vmatprep.mubr.msk.bf16.mxu1 %vm10786_vm0, %v15681_v62  ;;  %v7348_v17 = vsel %vm702_vm1, %v7331_v31, 0.0  ;;  %v8774_v4 = vunpack.c.h.bf16 %v8878_v45  ;;  %v8777_v29 = vunpack.c.l.bf16 %v8879_v13  ;;  %v8778_v0 = vunpack.c.h.bf16 %v8879_v13 }
 0x3ef   : > { %v3196_v59 = vadd.f32 %v12935_v37, %v3195_v49  ;;  %v13376_v18 = vpop.permute.xlu0 %4189  ;;  %4655 = vrot.lane.b32.xlu1 %v3193_v42, %s10788_s24  ;;  %v9847_v15 = vpop.f32.mrb[123].mxu0  ;;  %v7333_v42 = vsel %vm6864_vm7, %v7330_v24, %v13365_v1  ;;  %v7347_v26 = vadd.f32 %v7346_v44, %v7345_v16  ;;  %v7367_v27 = vunpack.c.l.bf16 %v7360_v46 }
 0x3f0   : > { %15733 = vst [vmem:[#allocation163_spill] sm:$0xff] %v13376_v18  ;;  %v2490_v32 = vpop.f32.mrb[176].mxu1  ;;  %v7291_v15 = vadd.f32 %v7290_v34, %v7289_v21  ;;  %v7372_v31 = vunpack.c.h.bf16 %v13310_v5  ;;  %v7382_v45 = vrot.slane %v8773_v38, 5  ;;  %v7384_v10 = vrot.slane %v8774_v4, 5 }
 0x3f1   : > { %v2491_v60 = vadd.f32 %v12935_v37, %v2490_v32  ;;  %v9630_v49 = vpop.f32.mrb[177].mxu1  ;;  %v13384_v43 = vpop.permute.xlu1 %4599  ;;  %4657 = vrot.lane.b32.xlu0 %v3196_v59, %s10788_s24  ;;  %v7373_v59 = vunpack.c.l.bf16 %v7366_v25  ;;  %v13395_v24 = vadd.f32 %v7174_v63, %v13296_v57  ;;  %v7350_v44 = vsel %vm702_vm1, %v7333_v42, 0.0 }
 0x3f2   : > { %15734 = vst [vmem:[#allocation164_spill] sm:$0xff] %v13384_v43  ;;  %v2493_v11 = vpop.f32.mrb[178].mxu1  ;;  %v7349_v49 = vadd.f32 %v7348_v17, %v7347_v26  ;;  %v7381_v43 = vrot.slane %v7367_v27, 5  ;;  %v7386_v21 = vrot.slane %v8777_v29, 5  ;;  %v7388_v5 = vrot.slane %v8778_v0, 5 }
 0x3f3   : > { %v2494_v13 = vadd.f32 %v12935_v37, %v2493_v11  ;;  %v9631_v18 = vpop.f32.mrb[179].mxu1  ;;  %v13391_v32 = vpop.permute.xlu0 %4601  ;;  %4247 = vrot.lane.b32.xlu1 %v2491_v60, %s10789_s25  ;;  %v13401_v37 = vld [vmem:[%s15558_s6] ss:$0 sm:$0xff]  ;;  %v7385_v46 = vsel %vm6925_vm8, %v7382_v45, %v7384_v10  ;;  %v7390_v0 = vrot.slane %v7372_v31, 5  ;;  %v13419_v38 = vadd.f32 %v7292_v22, %v7291_v15  ;;  %v8880_v15 = vld [vmem:[%s10909_s10 + $0x158] sm:$0xff]  }
 0x3f4   : > { %15735 = vst [vmem:[#allocation165_spill] sm:$0xff] %v13391_v32  ;;  %v3200_v39 = vpop.f32.mrb[124].mxu0  ;;  %v7383_v63 = vsel %vm6925_vm8, %v7381_v43, %v7382_v45  ;;  %v7387_v17 = vsel %vm6925_vm8, %v7384_v10, %v7386_v21  ;;  %v7351_v25 = vadd.f32 %v7350_v44, %v7349_v49  ;;  %v7389_v42 = vsel %vm6925_vm8, %v7386_v21, %v7388_v5  ;;  %v8881_v44 = vld [vmem:[%s10909_s10 + $0x160] sm:$0xff]  }
 0x3f5   : > { %v3201_v34 = vadd.f32 %v13401_v37, %v3200_v39  ;;  %9737 = vmatmul.mubr.msk.bf16.gmra.mrb[28].mxu1 %vm1445_vm2, %v12660_v12  ;;  %v13406_v60 = vpop.permute.xlu1 %4191  ;;  %4249 = vrot.lane.b32.xlu0 %v2494_v13, %s10789_s25  ;;  %v9850_v57 = vpop.f32.mrb[125].mxu0  ;;  %v15736_v39 = vrot.slane %v13284_v48, 2  ;;  %v7234_v12 = vrot.slane %v13370_v9, 4  ;;  %v7352_v27 = vsel %vm6651_vm5, %v13365_v1, 0.0 }
 0x3f6   : > { %v3203_v18 = vpop.f32.mrb[126].mxu0  ;;  %9740 = vmatprep.mubr.msk.bf16.mxu1 %vm10786_vm0, %v15681_v62  ;;  %v7401_v22 = vsel %vm702_vm1, %v7383_v63, 0.0  ;;  %v7402_v10 = vsel %vm702_vm1, %v7385_v46, 0.0  ;;  %v7404_v11 = vsel %vm702_vm1, %v7387_v17, 0.0  ;;  %v7391_v1 = vsel %vm6925_vm8, %v7388_v5, %v7390_v0 }
 0x3f7   : > { %v13416_v16 = vadd.f32 %v15736_v39, %v13284_v48  ;;  %v3204_v43 = vadd.f32 %v13401_v37, %v3203_v18  ;;  %v13423_v4 = vpop.permute.xlu0 %4193  ;;  %4659 = vrot.lane.b32.xlu1 %v3201_v34, %s10788_s24  ;;  %v9851_v29 = vpop.f32.mrb[127].mxu0  ;;  %v7392_v48 = vrot.slane %v7373_v59, 5  ;;  %v7403_v59 = vadd.f32 %v7402_v10, %v7401_v22  ;;  %v8882_v18 = vld [vmem:[%s10909_s10 + $0x168] sm:$0xff]  }
 0x3f8   : > { %v2498_v26 = vpop.f32.mrb[180].mxu1  ;;  %v13441_v34 = vadd.f32 %v7234_v12, %v13370_v9  ;;  %v7294_v57 = vrot.slane %v13419_v38, 4  ;;  %v7406_v46 = vsel %vm702_vm1, %v7389_v42, 0.0  ;;  %v13451_v5 = vadd.f32 %v7352_v27, %v7351_v25 }
 0x3f9   : > { %v2499_v31 = vadd.f32 %v13401_v37, %v2498_v26  ;;  %v9634_v45 = vpop.f32.mrb[181].mxu1  ;;  %v13434_v13 = vpop.permute.xlu1 %4603  ;;  %4661 = vrot.lane.b32.xlu0 %v3204_v43, %s10788_s24  ;;  %v7393_v63 = vsel %vm6925_vm8, %v7390_v0, %v7392_v48  ;;  %v7405_v29 = vadd.f32 %v7404_v11, %v7403_v59  ;;  %v7420_v26 = vld [vmem:[%s10909_s10 + $0x154] sm:$0x8]  ;;  %v8781_v9 = vunpack.c.l.bf16 %v8880_v15 }
 0x3fa   : > { %15737 = vst [vmem:[#allocation166_spill] sm:$0xff] %v13434_v13  ;;  %v2501_v21 = vpop.f32.mrb[182].mxu1  ;;  %v7408_v22 = vsel %vm702_vm1, %v7391_v1, 0.0  ;;  %v8782_v10 = vunpack.c.h.bf16 %v8880_v15  ;;  %v8785_v0 = vunpack.c.l.bf16 %v8881_v44  ;;  %v8786_v45 = vunpack.c.h.bf16 %v8881_v44 }
 0x3fb   : > { %v2502_v39 = vadd.f32 %v13401_v37, %v2501_v21  ;;  %v9635_v17 = vpop.f32.mrb[183].mxu1  ;;  %v13448_v43 = vpop.permute.xlu0 %4605  ;;  %4251 = vrot.lane.b32.xlu1 %v2499_v31, %s10789_s25  ;;  %v7407_v27 = vadd.f32 %v7406_v46, %v7405_v29  ;;  %v7410_v11 = vsel %vm702_vm1, %v7393_v63, 0.0  ;;  %v8789_v31 = vunpack.c.l.bf16 %v8882_v18 }
 0x3fc   : > { %15738 = vst [vmem:[#allocation167_spill] sm:$0xff] %v13448_v43  ;;  %v3208_v12 = vpop.f32.mrb[128].mxu0  ;;  %v8790_v15 = vunpack.c.h.bf16 %v8882_v18  ;;  %v7427_v1 = vunpack.c.l.bf16 %v7420_v26  ;;  %v7442_v44 = vrot.slane %v8781_v9, 6  ;;  %v7444_v17 = vrot.slane %v8782_v10, 6 }
 0x3fd   : > { %v3209_v42 = vadd.f32 %v13401_v37, %v3208_v12  ;;  %9741 = vmatmul.mubr.msk.bf16.gmra.mrb[32].mxu1 %vm1445_vm2, %v12727_v19  ;;  %v13458_v21 = vpop.permute.xlu1 %4195  ;;  %4253 = vrot.lane.b32.xlu0 %v2502_v39, %s10789_s25  ;;  %v9854_v25 = vpop.f32.mrb[129].mxu0  ;;  %v7236_v46 = vrot.slane %v13441_v34, 2  ;;  %v7409_v29 = vadd.f32 %v7408_v22, %v7407_v27  ;;  %v7446_v63 = vrot.slane %v8785_v0, 6 }
 0x3fe   : > { %v3211_v59 = vpop.f32.mrb[130].mxu0  ;;  %9744 = vmatprep.mubr.msk.bf16.mxu1 %vm10786_vm0, %v15681_v62  ;;  %v13470_v49 = vadd.f32 %v7294_v57, %v13419_v38  ;;  %v7412_v18 = vsel %vm6651_vm5, %v7392_v48, 0.0  ;;  %v7441_v26 = vrot.slane %v7427_v1, 6  ;;  %v7448_v9 = vrot.slane %v8786_v45, 6 }
 0x3ff   : > { %v3212_v12 = vadd.f32 %v13401_v37, %v3211_v59  ;;  %v13465_v19 = vpop.permute.xlu0 %4197  ;;  %4663 = vrot.lane.b32.xlu1 %v3209_v42, %s10788_s24  ;;  %v9855_v39 = vpop.f32.mrb[131].mxu0  ;;  %v7411_v42 = vadd.f32 %v7410_v11, %v7409_v29  ;;  %v7447_v22 = vsel %vm6986_vm9, %v7444_v17, %v7446_v63  ;;  %v7354_v38 = vrot.slane %v13451_v5, 4 }
 0x400   : > { %v2506_v25 = vpop.f32.mrb[184].mxu1  ;;  %v7445_v39 = vsel %vm6986_vm9, %v7442_v44, %v7444_v17  ;;  %v7443_v48 = vsel %vm6986_vm9, %v7441_v26, %v7442_v44  ;;  %v7450_v57 = vrot.slane %v8789_v31, 6  ;;  %v7452_v45 = vrot.slane %v8790_v15, 6 }
 0x401   : > { %v2507_v10 = vadd.f32 %v13401_v37, %v2506_v25  ;;  %v9638_v59 = vpop.f32.mrb[185].mxu1  ;;  %v13474_v13 = vpop.permute.xlu1 %4607  ;;  %4665 = vrot.lane.b32.xlu0 %v3212_v12, %s10788_s24  ;;  %v13485_v11 = vadd.f32 %v7412_v18, %v7411_v42  ;;  %v7449_v12 = vsel %vm6986_vm9, %v7446_v63, %v7448_v9  ;;  %v7461_v17 = vsel %vm702_vm1, %v7443_v48, 0.0  ;;  %v8883_v18 = vld [vmem:[%s10909_s10 + $0x170] sm:$0xff]  }
 0x402   : > { %15739 = vst [vmem:[#allocation168_spill] sm:$0xff] %v13474_v13  ;;  %v2509_v0 = vpop.f32.mrb[186].mxu1  ;;  %v15741_v44 = vrot.slane %v13395_v24, 2  ;;  %v13495_v15 = vadd.f32 %v7236_v46, %v13441_v34  ;;  %v7462_v26 = vsel %vm702_vm1, %v7445_v39, 0.0  ;;  %v7451_v34 = vsel %vm6986_vm9, %v7448_v9, %v7450_v57  ;;  %v8884_v39 = vld [vmem:[%s10909_s10 + $0x178] sm:$0xff]  }
 0x403   : > { %v2510_v27 = vadd.f32 %v13401_v37, %v2509_v0  ;;  %v9639_v1 = vpop.f32.mrb[187].mxu1  ;;  %v13482_v25 = vpop.permute.xlu0 %4609  ;;  %4255 = vrot.lane.b32.xlu1 %v2507_v10, %s10789_s25  ;;  %v7464_v10 = vsel %vm702_vm1, %v7447_v22, 0.0  ;;  %v7463_v46 = vadd.f32 %v7462_v26, %v7461_v17  ;;  %v7453_v48 = vsel %vm6986_vm9, %v7450_v57, %v7452_v45 }
 0x404   : > { %15740 = vst [vmem:[#allocation169_spill] sm:$0xff] %v13482_v25  ;;  %v3216_v29 = vpop.f32.mrb[132].mxu0  ;;  %v13492_v31 = vadd.f32 %v15741_v44, %v13395_v24  ;;  %v8885_v1 = vld [vmem:[%s10909_s10 + $0x180] sm:$0xff]   ;;  %v7414_v44 = vrot.slane %v13485_v11, 4  ;;  %v8793_v42 = vunpack.c.l.bf16 %v8883_v18  ;;  %v8797_v57 = vunpack.c.l.bf16 %v8884_v39 }
 0x405   : > { %v3217_v63 = vadd.f32 %v13401_v37, %v3216_v29  ;;  %9745 = vmatmul.mubr.msk.bf16.gmra.mrb[36].mxu1 %vm1445_vm2, %v12821_v53  ;;  %v13503_v59 = vpop.permute.xlu1 %4199  ;;  %4257 = vrot.lane.b32.xlu0 %v2510_v27, %s10789_s25  ;;  %v9858_v24 = vpop.f32.mrb[133].mxu0  ;;  %v13513_v53 = vadd.f32 %v7354_v38, %v13451_v5  ;;  %v7466_v27 = vsel %vm702_vm1, %v7449_v12, 0.0  ;;  %v7465_v26 = vadd.f32 %v7464_v10, %v7463_v46 }
 0x406   : > { %15742 = vst [vmem:[#allocation170_spill] sm:$0xff] %v13503_v59  ;;  %v3219_v22 = vpop.f32.mrb[134].mxu0  ;;  %9748 = vmatprep.mubr.msk.bf16.mxu1 %vm10786_vm0, %v15681_v62  ;;  %v7480_v24 = vld [vmem:[%s10909_s10 + $0x16c] sm:$0x8]  ;;  %v7468_v5 = vsel %vm702_vm1, %v7451_v34, 0.0  ;;  %v8794_v38 = vunpack.c.h.bf16 %v8883_v18  ;;  %v8798_v13 = vunpack.c.h.bf16 %v8884_v39  ;;  %v8801_v43 = vunpack.c.l.bf16 %v8885_v1  ;;  %s10693_s10 = sshll.u32 %s10790_s12, 4  ;;  %s10694_s10 = int_to_ptr.vmem [resolvable:$false] %s10693_s10 }
 0x407   : > { %v3220_v29 = vadd.f32 %v13401_v37, %v3219_v22  ;;  %v13519_v9 = vpop.permute.xlu0 %4201  ;;  %4667 = vrot.lane.b32.xlu1 %v3217_v63, %s10788_s24  ;;  %v9859_v17 = vpop.f32.mrb[135].mxu0  ;;  %v7467_v63 = vadd.f32 %v7466_v27, %v7465_v26  ;;  %v8802_v46 = vunpack.c.h.bf16 %v8885_v1  ;;  %v7487_v32 = vunpack.c.l.bf16 %v7480_v24  ;;  %s10695_s13 = scalar_lea.vmem %s10694_s10, 12544  ;;  %p10696_p0 = scmp.lt.s32.totalorder %s15460_s17, %s10694_s10 }
 0x408   : > { %15743 = vst [vmem:[#allocation171_spill] sm:$0xff] %v13519_v9  ;;  %v2514_v0 = vpop.f32.mrb[188].mxu1  ;;  %v7470_v17 = vsel %vm702_vm1, %v7453_v48, 0.0  ;;  %v7502_v59 = vrot.slane %v8793_v42, 7  ;;  %v7504_v9 = vrot.slane %v8794_v38, 7  ;;  %v7510_v1 = vrot.slane %v8801_v43, 7  ;;  %p10697_p1 = scmp.lt.s32.totalorder %s10695_s13, %s10689_s26 }
 0x409   : > { %v2515_v12 = vadd.f32 %v13401_v37, %v2514_v0  ;;  %v9642_v25 = vpop.f32.mrb[189].mxu1  ;;  %v13526_v22 = vpop.permute.xlu1 %4611  ;;  %4669 = vrot.lane.b32.xlu0 %v3220_v29, %s10788_s24  ;;  %v7472_v0 = vsel %vm6651_vm5, %v7452_v45, 0.0  ;;  %v7506_v29 = vrot.slane %v8797_v57, 7  ;;  %v7501_v26 = vrot.slane %v7487_v32, 7 }
 0x40a   : > { %15744 = vst [vmem:[#allocation172_spill] sm:$0xff] %v13526_v22  ;;  %v2517_v10 = vpop.f32.mrb[190].mxu1  ;;  %v7469_v25 = vadd.f32 %v7468_v5, %v7467_v63  ;;  %v7505_v48 = vsel %vm7047_vm10, %v7502_v59, %v7504_v9  ;;  %v7508_v22 = vrot.slane %v8798_v13, 7  ;;  %v7178_v24 = vrot.slane %v13492_v31, 1  ;;  %p10698_p2 = por %p10697_p1, %p10696_p0 }
 0x40b   : > { %v2518_v18 = vadd.f32 %v13401_v37, %v2517_v10  ;;  %v9643_v34 = vpop.f32.mrb[191].mxu1  ;;  %v13531_v39 = vpop.permute.xlu0 %4613  ;;  %4259 = vrot.lane.b32.xlu1 %v2515_v12, %s10789_s25  ;;  %v7507_v12 = vsel %vm7047_vm10, %v7504_v9, %v7506_v29  ;;  %v7415_v32 = vadd.f32 %v7414_v44, %v13485_v11  ;;  %v7503_v13 = vsel %vm7047_vm10, %v7501_v26, %v7502_v59 }
 0x40c   : > { %15745 = vst [vmem:[#allocation173_spill] sm:$0xff] %v13531_v39  ;;  %v3224_v27 = vpop.f32.mrb[136].mxu0  ;;  %v7471_v38 = vadd.f32 %v7470_v17, %v7469_v25  ;;  %v7509_v43 = vsel %vm7047_vm10, %v7506_v29, %v7508_v22  ;;  %v7512_v57 = vrot.slane %v8802_v46, 7  ;;  %v7521_v9 = vsel %vm702_vm1, %v7503_v13, 0.0  ;;  %p10699_p3 = pnand %p10698_p2, %p10692_p13 }
 0x40d   : > { %v3225_v42 = vadd.f32 %v13401_v37, %v3224_v27  ;;  %9749 = vmatmul.mubr.msk.bf16.gmra.mrb[40].mxu1 %vm1445_vm2, %v12991_v35  ;;  %v13541_v5 = vpop.permute.xlu1 %4203  ;;  %4261 = vrot.lane.b32.xlu0 %v2518_v18, %s10789_s25  ;;  %v9862_v45 = vpop.f32.mrb[137].mxu0  ;;  %v7356_v35 = vrot.slane %v13513_v53, 2  ;;  %v7522_v10 = vsel %vm702_vm1, %v7505_v48, 0.0  ;;  %v15746_v59 = vrot.slane %v13470_v49, 2 }
 0x40e   : > { %v3227_v63 = vpop.f32.mrb[138].mxu0  ;;  %9956 = vmatprep.mubr.msk.bf16.mxu1 %vm10786_vm0, %v15681_v62  ;;  %v7473_v17 = vadd.f32 %v7472_v0, %v7471_v38  ;;  %v7511_v46 = vsel %vm7047_vm10, %v7508_v22, %v7510_v1  ;;  %v7523_v34 = vadd.f32 %v7522_v10, %v7521_v9  ;;  %v7524_v25 = vsel %vm702_vm1, %v7507_v12, 0.0 }
 0x40f   : > { %v13552_v18 = vpop.permute.xlu0 %4205  ;;  %4671 = vrot.lane.b32.xlu1 %v3225_v42, %s10788_s24  ;;  %v9863_v11 = vpop.f32.mrb[139].mxu0  ;;  %v7297_v44 = vadd.f32 %v15746_v59, %v13470_v49  ;;  %v15747_v0 = vrot.slane %v13416_v16, 1  ;;  %v7238_v26 = vrot.slane %v13495_v15, 1  ;;  %v7526_v42 = vsel %vm702_vm1, %v7509_v43, 0.0 }
 0x410   : > { %v2522_v29 = vpop.f32.mrb[192].mxu1  ;;  %v7474_v48 = vrot.slane %v7473_v17, 4  ;;  %v7179_v49 = vadd.f32 %v7178_v24, %v13492_v31  ;;  %v7416_v13 = vrot.slane %v7415_v32, 2  ;;  %v7513_v22 = vsel %vm7047_vm10, %v7510_v1, %v7512_v57 }
 0x411   : > { %v7119_v27 = vadd.f32 %v15747_v0, %v13416_v16  ;;  %v9646_v38 = vpop.f32.mrb[193].mxu1  ;;  %v13565_v45 = vpop.permute.xlu1 %4615  ;;  %v7525_v9 = vadd.f32 %v7524_v25, %v7523_v34  ;;  %v7357_v10 = vadd.f32 %v7356_v35, %v13513_v53  ;;  %v7528_v16 = vsel %vm702_vm1, %v7511_v46, 0.0 }
 0x412   : > { %15748 = vst [vmem:[#allocation174_spill] sm:$0xff] %v13565_v45  ;;  %v2525_v12 = vpop.f32.mrb[194].mxu1  ;;  %v7475_v11 = vadd.f32 %v7474_v48, %v7473_v17  ;;  %v3228_v59 = vadd.f32 %v13401_v37, %v3227_v63  ;;  %v7083_v43 = vrot.slane %v13279_v28, 2  ;;  %v7298_v38 = vrot.slane %v7297_v44, 1 }
 0x413   : > { %v9647_v0 = vpop.f32.mrb[195].mxu1  ;;  %v13572_v39 = vpop.permute.xlu0 %4617  ;;  %v7527_v45 = vadd.f32 %v7526_v42, %v7525_v9  ;;  %v7540_v31 = vsel %vm7047_vm10, %v12918_v33, %v12929_v14  ;;  %v7239_v24 = vadd.f32 %v7238_v26, %v13495_v15  ;;  %v7530_v35 = vsel %vm702_vm1, %v7513_v22, 0.0 }
 0x414   : > { %v3232_v1 = vpop.f32.mrb[140].mxu0  ;;  %v7476_v53 = vrot.slane %v7475_v11, 2  ;;  %v2523_v17 = vadd.f32 %v13401_v37, %v2522_v29  ;;  %4673 = vrot.lane.b32.xlu0 %v3228_v59, %s10788_s24  ;;  %v7417_v34 = vadd.f32 %v7416_v13, %v7415_v32  ;;  %v7547_v33 = vsel %vm7047_vm10, %v7119_v27, %v7179_v49 }
 0x415   : > { %9957 = vmatmul.mubr.msk.bf16.vlgmr.msra.gmra.mrb[44].mxu1 %vm1445_vm2, %v12145_v6  ;;  %v13584_v63 = vpop.permute.xlu1 %4207  ;;  %v9866_v46 = vpop.f32.mrb[141].mxu0  ;;  %v7529_v25 = vadd.f32 %v7528_v16, %v7527_v45  ;;  %v2526_v14 = vadd.f32 %v13401_v37, %v2525_v12  ;;  %v7358_v26 = vrot.slane %v7357_v10, 1  ;;  %v7532_v29 = vsel %vm6651_vm5, %v7512_v57, 0.0 }
 0x416   : > { %v3235_v15 = vpop.f32.mrb[142].mxu0  ;;  %9960 = vmatprep.mubr.msk.bf16.mxu1 %vm10786_vm0, %v15681_v62  ;;  %v7541_v48 = vsel %vm6986_vm9, %v7540_v31, %v13016_v2  ;;  %4263 = vrot.lane.b32.xlu1 %v2523_v17, %s10789_s25  ;;  %v3233_v6 = vadd.f32 %v13401_v37, %v3232_v1  ;;  %v6963_v27 = vrot.slane %v13208_v55, 1  ;;  %v7299_v45 = vadd.f32 %v7298_v38, %v7297_v44 }
 0x417   : > { %v13595_v32 = vpop.permute.xlu0 %4209  ;;  %v9867_v42 = vpop.f32.mrb[143].mxu0  ;;  %v7531_v49 = vadd.f32 %v7530_v35, %v7529_v25  ;;  %v15749_v22 = vrot.slane %v13124_v8, 1  ;;  %v7477_v57 = vadd.f32 %v7476_v53, %v7475_v11  ;;  %v7548_v12 = vsel %vm6986_vm9, %v7547_v33, %v7239_v24 }
 0x418   : > { %v2530_v13 = vpop.f32.mrb[196].mxu1  ;;  %4265 = vrot.lane.b32.xlu0 %v2526_v14, %s10789_s25  ;;  %v3236_v2 = vadd.f32 %v13401_v37, %v3235_v15  ;;  %v7084_v0 = vadd.f32 %v7083_v43, %v13279_v28  ;;  %v7418_v31 = vrot.slane %v7417_v34, 1  ;;  %v7542_v38 = vsel %vm6925_vm8, %v7541_v48, %v13121_v30 }
 0x419   : > { %v6903_v9 = vadd.f32 %v15749_v22, %v13124_v8  ;;  %v9650_v16 = vpop.f32.mrb[197].mxu1  ;;  %v13604_v59 = vpop.permute.xlu1 %4619  ;;  %v7533_v44 = vadd.f32 %v7532_v29, %v7531_v49  ;;  %v7024_v8 = vrot.slane %v13255_v20, 1  ;;  %v7359_v11 = vadd.f32 %v7358_v26, %v7357_v10 }
 0x41a   : > { %v2533_v1 = vpop.f32.mrb[198].mxu1  ;;  %4675 = vrot.lane.b32.xlu1 %v3233_v6, %s10788_s24  ;;  %v2531_v24 = vadd.f32 %v13401_v37, %v2530_v13  ;;  %v6964_v17 = vadd.f32 %v6963_v27, %v13208_v55  ;;  %v7549_v28 = vsel %vm6925_vm8, %v7548_v12, %v7299_v45  ;;  %v7478_v25 = vrot.slane %v7477_v57, 1 }
 0x41b   : > { %v9651_v53 = vpop.f32.mrb[199].mxu1  ;;  %v13612_v35 = vpop.permute.xlu0 %4621  ;;  %v7534_v46 = vrot.slane %v7533_v44, 4  ;;  %v7543_v30 = vsel %vm6864_vm7, %v7542_v38, %v6903_v9  ;;  %v2534_v10 = vadd.f32 %v13401_v37, %v2533_v1  ;;  %v7085_v15 = vrot.slane %v7084_v0, 1 }
 0x41c   : > { %v3240_v43 = vpop.f32.mrb[144].mxu0  ;;  %4677 = vrot.lane.b32.xlu0 %v3236_v2, %s10788_s24  ;;  %v7419_v26 = vadd.f32 %v7418_v31, %v7417_v34  ;;  %v7025_v48 = vadd.f32 %v7024_v8, %v13255_v20  ;;  %v7550_v6 = vsel %vm6864_vm7, %v7549_v28, %v7359_v11  ;;  %v7544_v49 = vsel %vm6803_vm6, %v7543_v30, %v6964_v17 }
 0x41d   : > { %9961 = vmatmul.mubr.msk.bf16.gmra.mrb[48].mxu1 %vm1445_vm2, %v12175_v51  ;;  %v13621_v33 = vpop.permute.xlu1 %4211  ;;  %v9870_v14 = vpop.f32.mrb[145].mxu0  ;;  %v7535_v55 = vadd.f32 %v7534_v46, %v7533_v44  ;;  %v3241_v42 = vadd.f32 %v13401_v37, %v3240_v43  ;;  %v7479_v13 = vadd.f32 %v7478_v25, %v7477_v57  ;;  %v7086_v12 = vadd.f32 %v7085_v15, %v7084_v0 }
 0x41e   : > { %v3243_v29 = vpop.f32.mrb[146].mxu0  ;;  %9964 = vmatprep.mubr.msk.bf16.mxu1 %vm10786_vm0, %v15681_v62  ;;  %4267 = vrot.lane.b32.xlu1 %v2531_v24, %s10789_s25  ;;  %v7551_v16 = vsel %vm6803_vm6, %v7550_v6, %v7419_v26  ;;  %v7545_v44 = vsel %vm6742_vm4, %v7544_v49, %v7025_v48 }
 0x41f   : > { %v13629_v27 = vpop.permute.xlu0 %4213  ;;  %v9871_v51 = vpop.f32.mrb[147].mxu0  ;;  %v7536_v45 = vrot.slane %v7535_v55, 2  ;;  %v3244_v22 = vadd.f32 %v13401_v37, %v3243_v29  ;;  %v7552_v24 = vsel %vm6742_vm4, %v7551_v16, %v7479_v13  ;;  %v7546_v28 = vsel %vm6681_vm3, %v7545_v44, %v7086_v12 }
 0x420   : > { %v2538_v34 = vpop.f32.mrb[200].mxu1  ;;  %4269 = vrot.lane.b32.xlu0 %v2534_v10, %s10789_s25 }
 0x421   : > { %v9654_v9 = vpop.f32.mrb[201].mxu1  ;;  %v13634_v20 = vpop.permute.xlu1 %4623  ;;  %v7537_v2 = vadd.f32 %v7536_v45, %v7535_v55  ;;  %v2539_v38 = vadd.f32 %v13401_v37, %v2538_v34 }
 0x422   : > { %15750 = vst [vmem:[#allocation175_spill] sm:$0xff] %v13634_v20  ;;  %v2541_v31 = vpop.f32.mrb[202].mxu1  ;;  %4679 = vrot.lane.b32.xlu1 %v3241_v42, %s10788_s24 }
 0x423   : > { %v9655_v1 = vpop.f32.mrb[203].mxu1  ;;  %v13640_v57 = vpop.permute.xlu0 %4625  ;;  %v7538_v8 = vrot.slane %v7537_v2, 1  ;;  %v2542_v0 = vadd.f32 %v13401_v37, %v2541_v31 }
 0x424   : > { %15751 = vst [vmem:[#allocation176_spill] sm:$0xff] %v13640_v57  ;;  %v3248_v11 = vpop.f32.mrb[148].mxu0  ;;  %4681 = vrot.lane.b32.xlu0 %v3244_v22, %s10788_s24 }
 0x425   : > { %9965 = vmatmul.mubr.msk.bf16.gmra.mrb[52].mxu1 %vm1445_vm2, %v12191_v52  ;;  %v13647_v53 = vpop.permute.xlu1 %4215  ;;  %v9874_v17 = vpop.f32.mrb[149].mxu0  ;;  %v7539_v46 = vadd.f32 %v7538_v8, %v7537_v2  ;;  %v3249_v25 = vadd.f32 %v13401_v37, %v3248_v11 }
 0x426   : > { %v3251_v43 = vpop.f32.mrb[150].mxu0  ;;  %9968 = vmatprep.mubr.msk.bf16.mxu1 %vm10786_vm0, %v15681_v62  ;;  %4271 = vrot.lane.b32.xlu1 %v2539_v38, %s10789_s25 }
 0x427   : > { %v13654_v30 = vpop.permute.xlu0 %4217  ;;  %v9875_v10 = vpop.f32.mrb[151].mxu0  ;;  %v7553_v14 = vsel %vm6681_vm3, %v7552_v24, %v7539_v46  ;;  %v3252_v26 = vadd.f32 %v13401_v37, %v3251_v43 }
 0x428   : > { %v2546_v52 = vpop.f32.mrb[204].mxu1  ;;  %v7554_v15 = vpack.c.bf16 %v7553_v14, %v7546_v28  ;;  %4273 = vrot.lane.b32.xlu0 %v2542_v0, %s10789_s25 }
 0x429   : > { %v9658_v55 = vpop.f32.mrb[205].mxu1  ;;  %v13659_v29 = vpop.permute.xlu1 %4627  ;;  %v2547_v6 = vadd.f32 %v13401_v37, %v2546_v52 }
 0x42a   : > { %15752 = vst [vmem:[#allocation177_spill] sm:$0xff] %v13659_v29  ;;  %v2549_v48 = vpop.f32.mrb[206].mxu1  ;;  %10161 = vmatmul.mubr.msk.bf16.vlgmr.msra.gmra.mrb[228].mxu0 %vm702_vm1, %v7554_v15  ;;  %4683 = vrot.lane.b32.xlu1 %v3249_v25, %s10788_s24 }
 0x42b   : > { %v9659_v42 = vpop.f32.mrb[207].mxu1  ;;  %v13664_v51 = vpop.permute.xlu0 %4629  ;;  %v2550_v49 = vadd.f32 %v13401_v37, %v2549_v48 }
 0x42c   : > { %15753 = vst [vmem:[#allocation178_spill] sm:$0xff] %v13664_v51  ;;  %v3256_v45 = vpop.f32.mrb[152].mxu0  ;;  %4685 = vrot.lane.b32.xlu0 %v3252_v26, %s10788_s24 }
 0x42d   : > { %9969 = vmatmul.mubr.msk.bf16.gmra.mrb[56].mxu1 %vm1445_vm2, %v12239_v47  ;;  %v13670_v34 = vpop.permute.xlu1 %4219  ;;  %v9878_v13 = vpop.f32.mrb[153].mxu0  ;;  %v3257_v9 = vadd.f32 %v13401_v37, %v3256_v45 }
 0x42e   : > { %v3259_v22 = vpop.f32.mrb[154].mxu0  ;;  %9972 = vmatprep.mubr.msk.bf16.mxu1 %vm10786_vm0, %v15681_v62  ;;  %4275 = vrot.lane.b32.xlu1 %v2547_v6, %s10789_s25 }
 0x42f   : > { %v13676_v12 = vpop.permute.xlu0 %4221  ;;  %v9879_v2 = vpop.f32.mrb[155].mxu0  ;;  %v3260_v31 = vadd.f32 %v13401_v37, %v3259_v22 }
 0x430   : > { %v2554_v16 = vpop.f32.mrb[208].mxu1  ;;  %4277 = vrot.lane.b32.xlu0 %v2550_v49, %s10789_s25 }
 0x431   : > { %v9662_v47 = vpop.f32.mrb[209].mxu1  ;;  %v13680_v44 = vpop.permute.xlu1 %4631  ;;  %v2555_v1 = vadd.f32 %v13401_v37, %v2554_v16 }
 0x432   : > { %15754 = vst [vmem:[#allocation179_spill] sm:$0xff] %v13680_v44  ;;  %v2557_v38 = vpop.f32.mrb[210].mxu1  ;;  %4687 = vrot.lane.b32.xlu1 %v3257_v9, %s10788_s24 }
 0x433   : > { %v9663_v8 = vpop.f32.mrb[211].mxu1  ;;  %v13684_v11 = vpop.permute.xlu0 %4633  ;;  %v2558_v0 = vadd.f32 %v13401_v37, %v2557_v38 }
 0x434   : > { %15755 = vst [vmem:[#allocation180_spill] sm:$0xff] %v13684_v11  ;;  %v3264_v24 = vpop.f32.mrb[156].mxu0  ;;  %4689 = vrot.lane.b32.xlu0 %v3260_v31, %s10788_s24 }
 0x435   : > { %9973 = vmatmul.mubr.msk.bf16.gmra.mrb[60].mxu1 %vm1445_vm2, %v12255_v40  ;;  %v13690_v17 = vpop.permute.xlu1 %4223  ;;  %v9882_v46 = vpop.f32.mrb[157].mxu0  ;;  %v3265_v43 = vadd.f32 %v13401_v37, %v3264_v24 }
 0x436   : > { %v3267_v28 = vpop.f32.mrb[158].mxu0  ;;  %9976 = vmatprep.mubr.msk.bf16.mxu1 %vm10786_vm0, %v15681_v62  ;;  %4279 = vrot.lane.b32.xlu1 %v2555_v1, %s10789_s25 }
 0x437   : > { %v13696_v25 = vpop.permute.xlu0 %4225  ;;  %v9883_v10 = vpop.f32.mrb[159].mxu0  ;;  %v3268_v52 = vadd.f32 %v13401_v37, %v3267_v28 }
 0x438   : > { %v2562_v14 = vpop.f32.mrb[212].mxu1  ;;  %4281 = vrot.lane.b32.xlu0 %v2558_v0, %s10789_s25 }
 0x439   : > { %v9666_v40 = vpop.f32.mrb[213].mxu1  ;;  %v13700_v15 = vpop.permute.xlu1 %4635  ;;  %v2563_v55 = vadd.f32 %v13401_v37, %v2562_v14 }
 0x43a   : > { %15756 = vst [vmem:[#allocation181_spill] sm:$0xff] %v13700_v15  ;;  %v2565_v26 = vpop.f32.mrb[214].mxu1  ;;  %4691 = vrot.lane.b32.xlu1 %v3265_v43, %s10788_s24  ;;  %v15760_v43 = vld [vmem:[#allocation85_spill] sm:$0xff] }
 0x43b   : > { %v9667_v48 = vpop.f32.mrb[215].mxu1  ;;  %v13704_v6 = vpop.permute.xlu0 %4637  ;;  %v2566_v45 = vadd.f32 %v13401_v37, %v2565_v26 }
 0x43c   : > { %15757 = vst [vmem:[#allocation182_spill] sm:$0xff] %v13704_v6  ;;  %v3272_v42 = vpop.f32.mrb[160].mxu0  ;;  %4693 = vrot.lane.b32.xlu0 %v3268_v52, %s10788_s24 }
 0x43d   : > { %9977 = vmatmul.mubr.msk.bf16.gmra.mrb[64].mxu1 %vm1445_vm2, %v12306_v3  ;;  %v13710_v49 = vpop.permute.xlu1 %4227  ;;  %v9886_v13 = vpop.f32.mrb[161].mxu0  ;;  %v3273_v9 = vadd.f32 %v13401_v37, %v3272_v42 }
 0x43e   : > { %v3275_v22 = vpop.f32.mrb[162].mxu0  ;;  %9980 = vmatprep.mubr.msk.bf16.mxu1 %vm10786_vm0, %v15681_v62  ;;  %4283 = vrot.lane.b32.xlu1 %v2563_v55, %s10789_s25 }
 0x43f   : > { %v13716_v2 = vpop.permute.xlu0 %4229  ;;  %v9887_v16 = vpop.f32.mrb[163].mxu0  ;;  %v3276_v47 = vadd.f32 %v13401_v37, %v3275_v22 }
 0x440   : > { %v2570_v31 = vpop.f32.mrb[216].mxu1  ;;  %4285 = vrot.lane.b32.xlu0 %v2566_v45, %s10789_s25 }
 0x441   : > { %v9670_v3 = vpop.f32.mrb[217].mxu1  ;;  %v13720_v38 = vpop.permute.xlu1 %4639  ;;  %v2571_v8 = vadd.f32 %v13401_v37, %v2570_v31 }
 0x442   : > { %15758 = vst [vmem:[#allocation183_spill] sm:$0xff] %v13720_v38  ;;  %v2573_v1 = vpop.f32.mrb[218].mxu1  ;;  %4695 = vrot.lane.b32.xlu1 %v3273_v9, %s10788_s24  ;;  %v15783_v38 = vld [vmem:[#allocation97_spill] sm:$0xff] }
 0x443   : > { %v9671_v24 = vpop.f32.mrb[219].mxu1  ;;  %v13724_v0 = vpop.permute.xlu0 %4641  ;;  %v2574_v28 = vadd.f32 %v13401_v37, %v2573_v1  ;;  %v15763_v1 = vld [vmem:[#allocation89_spill] sm:$0xff] }
 0x444   : > { %15759 = vst [vmem:[#allocation184_spill] sm:$0xff] %v13724_v0  ;;  %v3280_v46 = vpop.f32.mrb[164].mxu0  ;;  %4697 = vrot.lane.b32.xlu0 %v3276_v47, %s10788_s24 }
 0x445   : > { %9981 = vmatmul.mubr.msk.bf16.gmra.mrb[68].mxu1 %vm1445_vm2, %v15760_v43  ;;  %v13730_v10 = vpop.permute.xlu1 %4231  ;;  %v9890_v14 = vpop.f32.mrb[165].mxu0  ;;  %v3281_v40 = vadd.f32 %v13401_v37, %v3280_v46 }
 0x446   : > { %v3283_v52 = vpop.f32.mrb[166].mxu0  ;;  %9984 = vmatprep.mubr.msk.bf16.mxu1 %vm10786_vm0, %v15681_v62  ;;  %4287 = vrot.lane.b32.xlu1 %v2571_v8, %s10789_s25 }
 0x447   : > { %v13736_v26 = vpop.permute.xlu0 %4233  ;;  %v9891_v55 = vpop.f32.mrb[167].mxu0  ;;  %v3284_v42 = vadd.f32 %v13401_v37, %v3283_v52 }
 0x448   : > { %v2578_v48 = vpop.f32.mrb[220].mxu1  ;;  %4289 = vrot.lane.b32.xlu0 %v2574_v28, %s10789_s25 }
 0x449   : > { %v9674_v45 = vpop.f32.mrb[221].mxu1  ;;  %v13740_v13 = vpop.permute.xlu1 %4643  ;;  %v2579_v9 = vadd.f32 %v13401_v37, %v2578_v48 }
 0x44a   : > { %15761 = vst [vmem:[#allocation85_spill] sm:$0xff] %v13740_v13  ;;  %v2581_v22 = vpop.f32.mrb[222].mxu1  ;;  %4699 = vrot.lane.b32.xlu1 %v3281_v40, %s10788_s24  ;;  %v15778_v13 = vld [vmem:[#allocation47_spill] sm:$0xff] }
 0x44b   : > { %v9675_v16 = vpop.f32.mrb[223].mxu1  ;;  %v13744_v31 = vpop.permute.xlu0 %4645  ;;  %v2582_v3 = vadd.f32 %v13401_v37, %v2581_v22 }
 0x44c   : > { %15762 = vst [vmem:[#allocation185_spill] sm:$0xff] %v13744_v31  ;;  %v3288_v47 = vpop.f32.mrb[168].mxu0  ;;  %4701 = vrot.lane.b32.xlu0 %v3284_v42, %s10788_s24 }
 0x44d   : > { %9985 = vmatmul.mubr.msk.bf16.gmra.mrb[72].mxu1 %vm1445_vm2, %v15763_v1  ;;  %v13750_v8 = vpop.permute.xlu1 %4235  ;;  %v9894_v24 = vpop.f32.mrb[169].mxu0  ;;  %v3289_v28 = vadd.f32 %v13401_v37, %v3288_v47  ;;  %v15768_v1 = vld [vmem:[#allocation43_spill] sm:$0xff] }
 0x44e   : > { %15764 = vst [vmem:[#allocation89_spill] sm:$0xff] %v13750_v8  ;;  %v3291_v46 = vpop.f32.mrb[170].mxu0  ;;  %9988 = vmatprep.mubr.msk.bf16.mxu1 %vm10786_vm0, %v15681_v62  ;;  %4291 = vrot.lane.b32.xlu1 %v2579_v9, %s10789_s25  ;;  %v15975_v8 = vld [vmem:[#allocation77_spill] sm:$0xff] }
 0x44f   : > { %v13756_v43 = vpop.permute.xlu0 %4237  ;;  %v9895_v14 = vpop.f32.mrb[171].mxu0  ;;  %v3292_v40 = vadd.f32 %v13401_v37, %v3291_v46 }
 0x450   : > { %15765 = vst [vmem:[#allocation186_spill] sm:$0xff] %v13756_v43  ;;  %v2586_v52 = vpop.f32.mrb[224].mxu1  ;;  %4293 = vrot.lane.b32.xlu0 %v2582_v3, %s10789_s25 }
 0x451   : > { %v9678_v55 = vpop.f32.mrb[225].mxu1  ;;  %v13760_v48 = vpop.permute.xlu1 %4647  ;;  %v2587_v45 = vadd.f32 %v13401_v37, %v2586_v52 }
 0x452   : > { %15766 = vst [vmem:[#allocation187_spill] sm:$0xff] %v13760_v48  ;;  %v2589_v42 = vpop.f32.mrb[226].mxu1  ;;  %4703 = vrot.lane.b32.xlu1 %v3289_v28, %s10788_s24  ;;  %v15773_v48 = vld [vmem:[#allocation93_spill] sm:$0xff] }
 0x453   : > { %v9679_v22 = vpop.f32.mrb[227].mxu1  ;;  %v13764_v9 = vpop.permute.xlu0 %4649  ;;  %v2590_v47 = vadd.f32 %v13401_v37, %v2589_v42 }
 0x454   : > { %15767 = vst [vmem:[#allocation188_spill] sm:$0xff] %v13764_v9  ;;  %v3296_v16 = vpop.f32.mrb[172].mxu0  ;;  %4705 = vrot.lane.b32.xlu0 %v3292_v40, %s10788_s24 }
 0x455   : > { %9989 = vmatmul.mubr.msk.bf16.gmra.mrb[76].mxu1 %vm1445_vm2, %v15768_v1  ;;  %v13770_v3 = vpop.permute.xlu1 %4239  ;;  %v9898_v24 = vpop.f32.mrb[173].mxu0  ;;  %v3297_v28 = vadd.f32 %v13401_v37, %v3296_v16 }
 0x456   : > { %15769 = vst [vmem:[#allocation43_spill] sm:$0xff] %v13770_v3  ;;  %v3299_v46 = vpop.f32.mrb[174].mxu0  ;;  %9992 = vmatprep.mubr.msk.bf16.mxu1 %vm10786_vm0, %v15681_v62  ;;  %4295 = vrot.lane.b32.xlu1 %v2587_v45, %s10789_s25 }
 0x457   : > { %v13776_v14 = vpop.permute.xlu0 %4241  ;;  %v9899_v52 = vpop.f32.mrb[175].mxu0  ;;  %v3300_v55 = vadd.f32 %v13401_v37, %v3299_v46 }
 0x458   : > { %15770 = vst [vmem:[#allocation189_spill] sm:$0xff] %v13776_v14  ;;  %v2594_v40 = vpop.f32.mrb[228].mxu1  ;;  %4297 = vrot.lane.b32.xlu0 %v2590_v47, %s10789_s25  ;;  %v15856_v14 = vld [vmem:[#allocation133_spill] sm:$0xff] }
 0x459   : > { %v9682_v42 = vpop.f32.mrb[229].mxu1  ;;  %v13780_v22 = vpop.permute.xlu1 %4651  ;;  %v2595_v24 = vadd.f32 %v13401_v37, %v2594_v40 }
 0x45a   : > { %15771 = vst [vmem:[#allocation190_spill] sm:$0xff] %v13780_v22  ;;  %v2597_v1 = vpop.f32.mrb[230].mxu1  ;;  %4707 = vrot.lane.b32.xlu1 %v3297_v28, %s10788_s24 }
 0x45b   : > { %v9683_v9 = vpop.f32.mrb[231].mxu1  ;;  %v13784_v45 = vpop.permute.xlu0 %4653  ;;  %v2598_v52 = vadd.f32 %v13401_v37, %v2597_v1 }
 0x45c   : > { %15772 = vst [vmem:[#allocation191_spill] sm:$0xff] %v13784_v45  ;;  %v3304_v16 = vpop.f32.mrb[176].mxu0  ;;  %4709 = vrot.lane.b32.xlu0 %v3300_v55, %s10788_s24 }
 0x45d   : > { %9993 = vmatmul.mubr.msk.bf16.gmra.mrb[80].mxu1 %vm1445_vm2, %v15773_v48  ;;  %v13790_v47 = vpop.permute.xlu1 %4243  ;;  %v9902_v46 = vpop.f32.mrb[177].mxu0  ;;  %v3305_v9 = vadd.f32 %v13401_v37, %v3304_v16 }
 0x45e   : > { %15774 = vst [vmem:[#allocation93_spill] sm:$0xff] %v13790_v47  ;;  %v3307_v42 = vpop.f32.mrb[178].mxu0  ;;  %9996 = vmatprep.mubr.msk.bf16.mxu1 %vm10786_vm0, %v15681_v62  ;;  %4299 = vrot.lane.b32.xlu1 %v2595_v24, %s10789_s25 }
 0x45f   : > { %v13796_v28 = vpop.permute.xlu0 %4245  ;;  %v9903_v40 = vpop.f32.mrb[179].mxu0  ;;  %v3308_v1 = vadd.f32 %v13401_v37, %v3307_v42 }
 0x460   : > { %15775 = vst [vmem:[#allocation192_spill] sm:$0xff] %v13796_v28  ;;  %v2602_v55 = vpop.f32.mrb[232].mxu1  ;;  %4301 = vrot.lane.b32.xlu0 %v2598_v52, %s10789_s25 }
 0x461   : > { %v9686_v48 = vpop.f32.mrb[233].mxu1  ;;  %v13800_v45 = vpop.permute.xlu1 %4655  ;;  %v2603_v22 = vadd.f32 %v13401_v37, %v2602_v55 }
 0x462   : > { %15776 = vst [vmem:[#allocation193_spill] sm:$0xff] %v13800_v45  ;;  %v2605_v46 = vpop.f32.mrb[234].mxu1  ;;  %4711 = vrot.lane.b32.xlu1 %v3305_v9, %s10788_s24 }
 0x463   : > { %v9687_v31 = vpop.f32.mrb[235].mxu1  ;;  %v13804_v24 = vpop.permute.xlu0 %4657  ;;  %v2606_v40 = vadd.f32 %v13401_v37, %v2605_v46 }
 0x464   : > { %15777 = vst [vmem:[#allocation194_spill] sm:$0xff] %v13804_v24  ;;  %v3312_v16 = vpop.f32.mrb[180].mxu0  ;;  %4713 = vrot.lane.b32.xlu0 %v3308_v1, %s10788_s24 }
 0x465   : > { %9997 = vmatmul.mubr.msk.bf16.gmra.mrb[84].mxu1 %vm1445_vm2, %v15778_v13  ;;  %v13810_v52 = vpop.permute.xlu1 %4247  ;;  %v9906_v42 = vpop.f32.mrb[181].mxu0  ;;  %v3313_v31 = vadd.f32 %v13401_v37, %v3312_v16 }
 0x466   : > { %15779 = vst [vmem:[#allocation47_spill] sm:$0xff] %v13810_v52  ;;  %v3315_v48 = vpop.f32.mrb[182].mxu0  ;;  %10000 = vmatprep.mubr.msk.bf16.mxu1 %vm10786_vm0, %v15681_v62  ;;  %4303 = vrot.lane.b32.xlu1 %v2603_v22, %s10789_s25 }
 0x467   : > { %v13816_v9 = vpop.permute.xlu0 %4249  ;;  %v9907_v55 = vpop.f32.mrb[183].mxu0  ;;  %v3316_v46 = vadd.f32 %v13401_v37, %v3315_v48 }
 0x468   : > { %15780 = vst [vmem:[#allocation195_spill] sm:$0xff] %v13816_v9  ;;  %v2610_v1 = vpop.f32.mrb[236].mxu1  ;;  %4305 = vrot.lane.b32.xlu0 %v2606_v40, %s10789_s25 }
 0x469   : > { %v9690_v13 = vpop.f32.mrb[237].mxu1  ;;  %v13820_v24 = vpop.permute.xlu1 %4659  ;;  %v2611_v45 = vadd.f32 %v13401_v37, %v2610_v1 }
 0x46a   : > { %15781 = vst [vmem:[#allocation196_spill] sm:$0xff] %v13820_v24  ;;  %v2613_v42 = vpop.f32.mrb[238].mxu1  ;;  %4715 = vrot.lane.b32.xlu1 %v3313_v31, %s10788_s24 }
 0x46b   : > { %v9691_v0 = vpop.f32.mrb[239].mxu1  ;;  %v13824_v22 = vpop.permute.xlu0 %4661  ;;  %v2614_v55 = vadd.f32 %v13401_v37, %v2613_v42 }
 0x46c   : > { %15782 = vst [vmem:[#allocation197_spill] sm:$0xff] %v13824_v22  ;;  %v3320_v16 = vpop.f32.mrb[184].mxu0  ;;  %4717 = vrot.lane.b32.xlu0 %v3316_v46, %s10788_s24 }
 0x46d   : > { %10001 = vmatmul.mubr.msk.bf16.gmra.mrb[88].mxu1 %vm1445_vm2, %v15783_v38  ;;  %v13830_v40 = vpop.permute.xlu1 %4251  ;;  %v9910_v48 = vpop.f32.mrb[185].mxu0  ;;  %v3321_v0 = vadd.f32 %v13401_v37, %v3320_v16 }
 0x46e   : > { %15784 = vst [vmem:[#allocation97_spill] sm:$0xff] %v13830_v40  ;;  %v3323_v13 = vpop.f32.mrb[186].mxu0  ;;  %10004 = vmatprep.mubr.msk.bf16.mxu1 %vm10786_vm0, %v15681_v62  ;;  %4307 = vrot.lane.b32.xlu1 %v2611_v45, %s10789_s25  ;;  %v13846_v45 = vld [vmem:[%s15558_s6] ss:$0 sm:$0xff] }
 0x46f   : > { %v13836_v31 = vpop.permute.xlu0 %4253  ;;  %v9911_v1 = vpop.f32.mrb[187].mxu0  ;;  %v3324_v42 = vadd.f32 %v13401_v37, %v3323_v13 }
 0x470   : > { %15785 = vst [vmem:[#allocation198_spill] sm:$0xff] %v13836_v31  ;;  %v2618_v46 = vpop.f32.mrb[240].mxu1  ;;  %4309 = vrot.lane.b32.xlu0 %v2614_v55, %s10789_s25  ;;  %v15788_v55 = vld [vmem:[#allocation51_spill] sm:$0xff] }
 0x471   : > { %v9694_v38 = vpop.f32.mrb[241].mxu1  ;;  %v13840_v22 = vpop.permute.xlu1 %4663  ;;  %v2619_v16 = vadd.f32 %v13846_v45, %v2618_v46 }
 0x472   : > { %15786 = vst [vmem:[#allocation199_spill] sm:$0xff] %v13840_v22  ;;  %v2621_v48 = vpop.f32.mrb[242].mxu1  ;;  %4719 = vrot.lane.b32.xlu1 %v3321_v0, %s10788_s24 }
 0x473   : > { %v9695_v24 = vpop.f32.mrb[243].mxu1  ;;  %v13849_v1 = vpop.permute.xlu0 %4665  ;;  %v2622_v37 = vadd.f32 %v13846_v45, %v2621_v48 }
 0x474   : > { %15787 = vst [vmem:[#allocation200_spill] sm:$0xff] %v13849_v1  ;;  %v3328_v31 = vpop.f32.mrb[188].mxu0  ;;  %4721 = vrot.lane.b32.xlu0 %v3324_v42, %s10788_s24 }
 0x475   : > { %10005 = vmatmul.mubr.msk.bf16.gmra.mrb[92].mxu1 %vm1445_vm2, %v15788_v55  ;;  %v13855_v13 = vpop.permute.xlu1 %4255  ;;  %v9914_v0 = vpop.f32.mrb[189].mxu0  ;;  %v3329_v24 = vadd.f32 %v13846_v45, %v3328_v31 }
 0x476   : > { %15789 = vst [vmem:[#allocation51_spill] sm:$0xff] %v13855_v13  ;;  %v3331_v38 = vpop.f32.mrb[190].mxu0  ;;  %10008 = vmatprep.mubr.msk.bf16.mxu1 %vm10786_vm0, %v15681_v62  ;;  %4311 = vrot.lane.b32.xlu1 %v2619_v16, %s10789_s25 }
 0x477   : > { %v13861_v46 = vpop.permute.xlu0 %4257  ;;  %v9915_v1 = vpop.f32.mrb[191].mxu0  ;;  %v3332_v48 = vadd.f32 %v13846_v45, %v3331_v38 }
 0x478   : > { %15790 = vst [vmem:[#allocation201_spill] sm:$0xff] %v13861_v46  ;;  %v2626_v42 = vpop.f32.mrb[244].mxu1  ;;  %4313 = vrot.lane.b32.xlu0 %v2622_v37, %s10789_s25  ;;  %v15793_v46 = vld [vmem:[#allocation101_spill] sm:$0xff] }
 0x479   : > { %v9698_v55 = vpop.f32.mrb[245].mxu1  ;;  %v13865_v22 = vpop.permute.xlu1 %4667  ;;  %v2627_v13 = vadd.f32 %v13846_v45, %v2626_v42 }
 0x47a   : > { %15791 = vst [vmem:[#allocation202_spill] sm:$0xff] %v13865_v22  ;;  %v2629_v0 = vpop.f32.mrb[246].mxu1  ;;  %4723 = vrot.lane.b32.xlu1 %v3329_v24, %s10788_s24 }
 0x47b   : > { %v9699_v40 = vpop.f32.mrb[247].mxu1  ;;  %v13869_v16 = vpop.permute.xlu0 %4669  ;;  %v2630_v1 = vadd.f32 %v13846_v45, %v2629_v0 }
 0x47c   : > { %15792 = vst [vmem:[#allocation203_spill] sm:$0xff] %v13869_v16  ;;  %v3336_v31 = vpop.f32.mrb[192].mxu0  ;;  %4725 = vrot.lane.b32.xlu0 %v3332_v48, %s10788_s24 }
 0x47d   : > { %10009 = vmatmul.mubr.msk.bf16.gmra.mrb[96].mxu1 %vm1445_vm2, %v15793_v46  ;;  %v13875_v37 = vpop.permute.xlu1 %4259  ;;  %v9918_v38 = vpop.f32.mrb[193].mxu0  ;;  %v3337_v40 = vadd.f32 %v13846_v45, %v3336_v31 }
 0x47e   : > { %15794 = vst [vmem:[#allocation101_spill] sm:$0xff] %v13875_v37  ;;  %v3339_v55 = vpop.f32.mrb[194].mxu0  ;;  %10012 = vmatprep.mubr.msk.bf16.mxu1 %vm10786_vm0, %v15681_v62  ;;  %4315 = vrot.lane.b32.xlu1 %v2627_v13, %s10789_s25 }
 0x47f   : > { %v9919_v24 = vpop.f32.mrb[195].mxu0  ;;  %v3340_v48 = vadd.f32 %v13846_v45, %v3339_v55  ;;  %v13883_v0 = vpop.permute.xlu0 %4261 }
 0x480   : > { %v2634_v42 = vpop.f32.mrb[248].mxu1  ;;  %4317 = vrot.lane.b32.xlu0 %v2630_v1, %s10789_s25  ;;  %15795 = vst [vmem:[#allocation204_spill] sm:$0xff] %v13883_v0  ;;  %v15797_v1 = vld [vmem:[#allocation55_spill] sm:$0xff] }
 0x481   : > { %v9702_v46 = vpop.f32.mrb[249].mxu1  ;;  %v13885_v16 = vpop.permute.xlu1 %4671  ;;  %v2635_v22 = vadd.f32 %v13846_v45, %v2634_v42 }
 0x482   : > { %15796 = vst [vmem:[#allocation205_spill] sm:$0xff] %v13885_v16  ;;  %v2637_v38 = vpop.f32.mrb[250].mxu1  ;;  %4727 = vrot.lane.b32.xlu1 %v3337_v40, %s10788_s24 }
 0x483   : > { %v9703_v37 = vpop.f32.mrb[251].mxu1  ;;  %v3344_v13 = vpop.f32.mrb[196].mxu0  ;;  %v2638_v31 = vadd.f32 %v13846_v45, %v2637_v38 }
 0x484   : > { %v9922_v9 = vpop.f32.mrb[197].mxu0  ;;  %4729 = vrot.lane.b32.xlu0 %v3340_v48, %s10788_s24  ;;  %v3345_v37 = vadd.f32 %v13846_v45, %v3344_v13 }
 0x485   : > { %10013 = vmatmul.mubr.msk.bf16.gmra.mrb[100].mxu1 %vm1445_vm2, %v15797_v1  ;;  %v3347_v55 = vpop.f32.mrb[198].mxu0 }
 0x486   : > { %v9923_v24 = vpop.f32.mrb[199].mxu0  ;;  %10016 = vmatprep.mubr.msk.bf16.mxu1 %vm10786_vm0, %v15681_v62  ;;  %v13895_v46 = vpop.permute.xlu0 %4673  ;;  %4319 = vrot.lane.b32.xlu1 %v2635_v22, %s10789_s25  ;;  %v3348_v42 = vadd.f32 %v13846_v45, %v3347_v55 }
 0x487   : > { %15798 = vst [vmem:[#allocation55_spill] sm:$0xff] %v13895_v46 }
 0x488   : > { %v2642_v40 = vpop.f32.mrb[252].mxu1  ;;  %v13899_v9 = vpop.permute.xlu1 %4263  ;;  %4321 = vrot.lane.b32.xlu0 %v2638_v31, %s10789_s25 }
 0x489   : > { %15799 = vst [vmem:[#allocation206_spill] sm:$0xff] %v13899_v9  ;;  %v9706_v48 = vpop.f32.mrb[253].mxu1  ;;  %v2643_v24 = vadd.f32 %v13846_v45, %v2642_v40  ;;  %v15802_v9 = vld [vmem:[#allocation106_spill] sm:$0xff] }
 0x48a   : > { %v2645_v38 = vpop.f32.mrb[254].mxu1  ;;  %v13903_v1 = vpop.permute.xlu0 %4265  ;;  %4731 = vrot.lane.b32.xlu1 %v3345_v37, %s10788_s24 }
 0x48b   : > { %15800 = vst [vmem:[#allocation207_spill] sm:$0xff] %v13903_v1  ;;  %v9707_v46 = vpop.f32.mrb[255].mxu1  ;;  %v3352_v16 = vpop.f32.mrb[200].mxu0  ;;  %v2646_v13 = vadd.f32 %v13846_v45, %v2645_v38 }
 0x48c   : > { %v13907_v22 = vpop.permute.xlu1 %4675  ;;  %4733 = vrot.lane.b32.xlu0 %v3348_v42, %s10788_s24  ;;  %v9926_v31 = vpop.f32.mrb[201].mxu0  ;;  %v3353_v46 = vadd.f32 %v13846_v45, %v3352_v16 }
 0x48d   : > { %15801 = vst [vmem:[#allocation208_spill] sm:$0xff] %v13907_v22  ;;  %10017 = vmatmul.mubr.msk.bf16.gmra.mrb[104].mxu1 %vm1445_vm2, %v15802_v9  ;;  %v3355_v55 = vpop.f32.mrb[202].mxu0 }
 0x48e   : > { %10020 = vmatprep.mubr.msk.bf16.mxu1 %vm10786_vm0, %v15681_v62  ;;  %v13915_v48 = vpop.permute.xlu0 %4677  ;;  %4323 = vrot.lane.b32.xlu1 %v2643_v24, %s10789_s25  ;;  %v9927_v37 = vpop.f32.mrb[203].mxu0  ;;  %v3356_v42 = vadd.f32 %v13846_v45, %v3355_v55 }
 0x48f   : > { %15803 = vst [vmem:[#allocation106_spill] sm:$0xff] %v13915_v48  ;;  %v15806_v37 = vld [vmem:[#allocation59_spill] sm:$0xff] }
 0x490   : > { %v2650_v40 = vpop.f32.mrb[0].mxu1  ;;  %v13919_v22 = vpop.permute.xlu1 %4267  ;;  %4325 = vrot.lane.b32.xlu0 %v2646_v13, %s10789_s25 }
 0x491   : > { %15804 = vst [vmem:[#allocation209_spill] sm:$0xff] %v13919_v22  ;;  %v9710_v9 = vpop.f32.mrb[1].mxu1  ;;  %v2651_v48 = vadd.f32 %v13846_v45, %v2650_v40 }
 0x492   : > { %v2653_v38 = vpop.f32.mrb[2].mxu1  ;;  %v13923_v31 = vpop.permute.xlu0 %4269  ;;  %4735 = vrot.lane.b32.xlu1 %v3353_v46, %s10788_s24 }
 0x493   : > { %15805 = vst [vmem:[#allocation210_spill] sm:$0xff] %v13923_v31  ;;  %v9711_v1 = vpop.f32.mrb[3].mxu1  ;;  %v3360_v24 = vpop.f32.mrb[204].mxu0  ;;  %v2654_v16 = vadd.f32 %v13846_v45, %v2653_v38 }
 0x494   : > { %4737 = vrot.lane.b32.xlu0 %v3356_v42, %s10788_s24  ;;  %v9930_v13 = vpop.f32.mrb[205].mxu0  ;;  %v13931_v22 = vpop.permute.xlu1 %4679  ;;  %v3361_v1 = vadd.f32 %v13846_v45, %v3360_v24  ;;  %v15811_v24 = vld [vmem:[#allocation111_spill] sm:$0xff] }
 0x495   : > { %10021 = vmatmul.mubr.msk.bf16.gmra.mrb[108].mxu1 %vm1445_vm2, %v15806_v37  ;;  %15807 = vst [vmem:[#allocation59_spill] sm:$0xff] %v13931_v22  ;;  %v3363_v55 = vpop.f32.mrb[206].mxu0 }
 0x496   : > { %10024 = vmatprep.mubr.msk.bf16.mxu1 %vm10786_vm0, %v15681_v62  ;;  %v13935_v9 = vpop.permute.xlu0 %4681  ;;  %4327 = vrot.lane.b32.xlu1 %v2651_v48, %s10789_s25  ;;  %v9931_v46 = vpop.f32.mrb[207].mxu0  ;;  %v3364_v42 = vadd.f32 %v13846_v45, %v3363_v55 }
 0x497   : > { %15808 = vst [vmem:[#allocation211_spill] sm:$0xff] %v13935_v9 }
 0x498   : > { %v2658_v40 = vpop.f32.mrb[4].mxu1  ;;  %4329 = vrot.lane.b32.xlu0 %v2654_v16, %s10789_s25  ;;  %v13945_v0 = vpop.permute.xlu1 %4271 }
 0x499   : > { %v9714_v38 = vpop.f32.mrb[5].mxu1  ;;  %v2659_v22 = vadd.f32 %v13846_v45, %v2658_v40  ;;  %15810 = vst [vmem:[#allocation213_spill] sm:$0xff] %v13945_v0 }
 0x49a   : > { %v2661_v37 = vpop.f32.mrb[6].mxu1  ;;  %v13941_v13 = vpop.permute.xlu0 %4273  ;;  %4739 = vrot.lane.b32.xlu1 %v3361_v1, %s10788_s24 }
 0x49b   : > { %15809 = vst [vmem:[#allocation212_spill] sm:$0xff] %v13941_v13  ;;  %v9715_v31 = vpop.f32.mrb[7].mxu1  ;;  %v3368_v9 = vpop.f32.mrb[208].mxu0  ;;  %v2662_v48 = vadd.f32 %v13846_v45, %v2661_v37 }
 0x49c   : > { %4741 = vrot.lane.b32.xlu0 %v3364_v42, %s10788_s24  ;;  %v9934_v16 = vpop.f32.mrb[209].mxu0  ;;  %v3369_v1 = vadd.f32 %v13846_v45, %v3368_v9 }
 0x49d   : > { %10025 = vmatmul.mubr.msk.bf16.gmra.mrb[112].mxu1 %vm1445_vm2, %v15811_v24  ;;  %v3371_v55 = vpop.f32.mrb[210].mxu0  ;;  %v13959_v24 = vpop.permute.xlu1 %4683 }
 0x49e   : > { %10028 = vmatprep.mubr.msk.bf16.mxu1 %vm10786_vm0, %v15681_v62  ;;  %4331 = vrot.lane.b32.xlu1 %v2659_v22, %s10789_s25  ;;  %v9935_v31 = vpop.f32.mrb[211].mxu0  ;;  %v13955_v40 = vpop.permute.xlu0 %4685  ;;  %v3372_v42 = vadd.f32 %v13846_v45, %v3371_v55  ;;  %15813 = vst [vmem:[#allocation214_spill] sm:$0xff] %v13959_v24 }
 0x49f   : > { %15812 = vst [vmem:[#allocation111_spill] sm:$0xff] %v13955_v40  ;;  %v15814_v31 = vld [vmem:[#allocation63_spill] sm:$0xff] }
 0x4a0   : > { %v2666_v46 = vpop.f32.mrb[8].mxu1  ;;  %4333 = vrot.lane.b32.xlu0 %v2662_v48, %s10789_s25 }
 0x4a1   : > { %v9718_v38 = vpop.f32.mrb[9].mxu1  ;;  %v2667_v16 = vadd.f32 %v13846_v45, %v2666_v46 }
 0x4a2   : > { %v2669_v37 = vpop.f32.mrb[10].mxu1  ;;  %4743 = vrot.lane.b32.xlu1 %v3369_v1, %s10788_s24  ;;  %v13969_v55 = vpop.permute.xlu0 %4277 }
 0x4a3   : > { %v9719_v13 = vpop.f32.mrb[11].mxu1  ;;  %v3376_v22 = vpop.f32.mrb[212].mxu0  ;;  %v2670_v9 = vadd.f32 %v13846_v45, %v2669_v37  ;;  %15815 = vst [vmem:[#allocation63_spill] sm:$0xff] %v13969_v55 }
 0x4a4   : > { %4745 = vrot.lane.b32.xlu0 %v3372_v42, %s10788_s24  ;;  %v9938_v48 = vpop.f32.mrb[213].mxu0  ;;  %v3377_v1 = vadd.f32 %v13846_v45, %v3376_v22  ;;  %v13973_v38 = vpop.permute.xlu1 %4275  ;;  %v15818_v22 = vld [vmem:[#allocation115_spill] sm:$0xff] }
 0x4a5   : > { %10029 = vmatmul.mubr.msk.bf16.gmra.mrb[116].mxu1 %vm1445_vm2, %v15814_v31  ;;  %v3379_v40 = vpop.f32.mrb[214].mxu0  ;;  %15816 = vst [vmem:[#allocation215_spill] sm:$0xff] %v13973_v38 }
 0x4a6   : > { %10032 = vmatprep.mubr.msk.bf16.mxu1 %vm10786_vm0, %v15681_v62  ;;  %4335 = vrot.lane.b32.xlu1 %v2667_v16, %s10789_s25  ;;  %v9939_v13 = vpop.f32.mrb[215].mxu0  ;;  %v3380_v42 = vadd.f32 %v13846_v45, %v3379_v40  ;;  %v13979_v0 = vpop.permute.xlu0 %4689 }
 0x4a7   : > { %15817 = vst [vmem:[#allocation216_spill] sm:$0xff] %v13979_v0 }
 0x4a8   : > { %v2674_v46 = vpop.f32.mrb[12].mxu1  ;;  %4337 = vrot.lane.b32.xlu0 %v2670_v9, %s10789_s25  ;;  %v13987_v40 = vpop.permute.xlu1 %4687 }
 0x4a9   : > { %v9722_v37 = vpop.f32.mrb[13].mxu1  ;;  %v2675_v48 = vadd.f32 %v13846_v45, %v2674_v46  ;;  %15819 = vst [vmem:[#allocation115_spill] sm:$0xff] %v13987_v40 }
 0x4aa   : > { %v2677_v31 = vpop.f32.mrb[14].mxu1  ;;  %4747 = vrot.lane.b32.xlu1 %v3377_v1, %s10788_s24 }
 0x4ab   : > { %v9723_v24 = vpop.f32.mrb[15].mxu1  ;;  %v3384_v55 = vpop.f32.mrb[216].mxu0  ;;  %v2678_v16 = vadd.f32 %v13846_v45, %v2677_v31 }
 0x4ac   : > { %4749 = vrot.lane.b32.xlu0 %v3380_v42, %s10788_s24  ;;  %v9942_v9 = vpop.f32.mrb[217].mxu0  ;;  %v3385_v24 = vadd.f32 %v13846_v45, %v3384_v55  ;;  %v13997_v38 = vpop.permute.xlu1 %4279 }
 0x4ad   : > { %10033 = vmatmul.mubr.msk.bf16.gmra.mrb[120].mxu1 %vm1445_vm2, %v15818_v22  ;;  %v3387_v13 = vpop.f32.mrb[218].mxu0  ;;  %v13993_v22 = vpop.permute.xlu0 %4281  ;;  %15821 = vst [vmem:[#allocation218_spill] sm:$0xff] %v13997_v38 }
 0x4ae   : > { %10036 = vmatprep.mubr.msk.bf16.mxu1 %vm10786_vm0, %v15681_v62  ;;  %4339 = vrot.lane.b32.xlu1 %v2675_v48, %s10789_s25  ;;  %v9943_v1 = vpop.f32.mrb[219].mxu0  ;;  %v3388_v42 = vadd.f32 %v13846_v45, %v3387_v13  ;;  %15820 = vst [vmem:[#allocation217_spill] sm:$0xff] %v13993_v22  ;;  %v15822_v48 = vld [vmem:[#allocation67_spill] sm:$0xff] }
 0x4b0   : > { %v2682_v46 = vpop.f32.mrb[16].mxu1  ;;  %4341 = vrot.lane.b32.xlu0 %v2678_v16, %s10789_s25 }
 0x4b1   : > { %v9726_v37 = vpop.f32.mrb[17].mxu1  ;;  %v2683_v9 = vadd.f32 %v13846_v45, %v2682_v46  ;;  %v14007_v46 = vpop.permute.xlu0 %4693 }
 0x4b2   : > { %v2685_v31 = vpop.f32.mrb[18].mxu1  ;;  %4751 = vrot.lane.b32.xlu1 %v3385_v24, %s10788_s24  ;;  %15823 = vst [vmem:[#allocation67_spill] sm:$0xff] %v14007_v46 }
 0x4b3   : > { %v9727_v0 = vpop.f32.mrb[19].mxu1  ;;  %v3392_v40 = vpop.f32.mrb[220].mxu0  ;;  %v2686_v55 = vadd.f32 %v13846_v45, %v2685_v31 }
 0x4b4   : > { %4753 = vrot.lane.b32.xlu0 %v3388_v42, %s10788_s24  ;;  %v9946_v16 = vpop.f32.mrb[221].mxu0  ;;  %v3393_v24 = vadd.f32 %v13846_v45, %v3392_v40 }
 0x4b5   : > { %10037 = vmatmul.mubr.msk.bf16.gmra.mrb[124].mxu1 %vm1445_vm2, %v15822_v48  ;;  %v3395_v13 = vpop.f32.mrb[222].mxu0  ;;  %v14011_v48 = vpop.permute.xlu1 %4691 }
 0x4b6   : > { %10040 = vmatprep.mubr.msk.bf16.mxu1 %vm10786_vm0, %v15681_v62  ;;  %4343 = vrot.lane.b32.xlu1 %v2683_v9, %s10789_s25  ;;  %v9947_v0 = vpop.f32.mrb[223].mxu0  ;;  %v3396_v42 = vadd.f32 %v13846_v45, %v3395_v13  ;;  %15824 = vst [vmem:[#allocation219_spill] sm:$0xff] %v14011_v48  ;;  %v14021_v13 = vpop.permute.xlu0 %4285 }
 0x4b7   : > { %v15825_v0 = vld [vmem:[#allocation123_spill] sm:$0xff] }
 0x4b8   : > { %v2690_v1 = vpop.f32.mrb[20].mxu1  ;;  %4345 = vrot.lane.b32.xlu0 %v2686_v55, %s10789_s25  ;;  %15826 = vst [vmem:[#allocation123_spill] sm:$0xff] %v14021_v13 }
 0x4b9   : > { %v9730_v37 = vpop.f32.mrb[21].mxu1  ;;  %v2691_v16 = vadd.f32 %v13846_v45, %v2690_v1 }
 0x4ba   : > { %v2693_v31 = vpop.f32.mrb[22].mxu1  ;;  %4755 = vrot.lane.b32.xlu1 %v3393_v24, %s10788_s24  ;;  %v14025_v37 = vpop.permute.xlu1 %4283 }
 0x4bb   : > { %v9731_v22 = vpop.f32.mrb[23].mxu1  ;;  %v3400_v9 = vpop.f32.mrb[224].mxu0  ;;  %v2694_v40 = vadd.f32 %v13846_v45, %v2693_v31  ;;  %15827 = vst [vmem:[#allocation220_spill] sm:$0xff] %v14025_v37 }
 0x4bc   : > { %4757 = vrot.lane.b32.xlu0 %v3396_v42, %s10788_s24  ;;  %v9950_v55 = vpop.f32.mrb[225].mxu0  ;;  %v3401_v24 = vadd.f32 %v13846_v45, %v3400_v9  ;;  %v14031_v13 = vpop.permute.xlu0 %4697  ;;  %v15829_v9 = vld [vmem:[#allocation103_spill] sm:$0xff] }
 0x4bd   : > { %10041 = vmatmul.mubr.msk.bf16.gmra.mrb[128].mxu1 %vm1445_vm2, %v15825_v0  ;;  %v3403_v46 = vpop.f32.mrb[226].mxu0  ;;  %15828 = vst [vmem:[#allocation221_spill] sm:$0xff] %v14031_v13 }
 0x4be   : > { %10044 = vmatprep.mubr.msk.bf16.mxu1 %vm10786_vm0, %v15681_v62  ;;  %4347 = vrot.lane.b32.xlu1 %v2691_v16, %s10789_s25  ;;  %v9951_v22 = vpop.f32.mrb[227].mxu0  ;;  %v3404_v42 = vadd.f32 %v13846_v45, %v3403_v46  ;;  %v14039_v46 = vpop.permute.xlu1 %4695 }
 0x4bf   : > { %15830 = vst [vmem:[#allocation103_spill] sm:$0xff] %v14039_v46  ;;  %v15836_v46 = vld [vmem:[#allocation109_spill] sm:$0xff] }
 0x4c0   : > { %v2698_v1 = vpop.f32.mrb[24].mxu1  ;;  %4349 = vrot.lane.b32.xlu0 %v2694_v40, %s10789_s25  ;;  %v14047_v22 = vpop.permute.xlu0 %4289 }
 0x4c1   : > { %v9734_v31 = vpop.f32.mrb[25].mxu1  ;;  %v2699_v55 = vadd.f32 %v13846_v45, %v2698_v1  ;;  %15831 = vst [vmem:[#allocation222_spill] sm:$0xff] %v14047_v22 }
 0x4c2   : > { %v2701_v0 = vpop.f32.mrb[26].mxu1  ;;  %4759 = vrot.lane.b32.xlu1 %v3401_v24, %s10788_s24  ;;  %v15833_v31 = vld [vmem:[#allocation126_spill] sm:$0xff] }
 0x4c3   : > { %v9735_v48 = vpop.f32.mrb[27].mxu1  ;;  %v2702_v16 = vadd.f32 %v13846_v45, %v2701_v0 }
 0x4c4   : > { %4761 = vrot.lane.b32.xlu0 %v3404_v42, %s10788_s24  ;;  %v14049_v42 = vpop.permute.xlu1 %4287 }
 0x4c5   : > { %10045 = vmatmul.mubr.msk.bf16.gmra.mrb[132].mxu1 %vm1445_vm2, %v15829_v9  ;;  %15832 = vst [vmem:[#allocation223_spill] sm:$0xff] %v14049_v42 }
 0x4c6   : > { %10048 = vmatprep.mubr.msk.bf16.mxu1 %vm10786_vm0, %v15681_v62  ;;  %4351 = vrot.lane.b32.xlu1 %v2699_v55, %s10789_s25  ;;  %v14057_v55 = vpop.permute.xlu0 %4701 }
 0x4c7   : > { %15834 = vst [vmem:[#allocation126_spill] sm:$0xff] %v14057_v55 }
 0x4c8   : > { %v14042_v40 = vpop.f32.mrb[28].mxu1  ;;  %4353 = vrot.lane.b32.xlu0 %v2702_v16, %s10789_s25 }
 0x4c9   : > { %v9738_v48 = vpop.f32.mrb[29].mxu1 }
 0x4ca   : > { %v14045_v24 = vpop.f32.mrb[30].mxu1  ;;  %v14061_v48 = vpop.permute.xlu1 %4699 }
 0x4cb   : > { %v9739_v1 = vpop.f32.mrb[31].mxu1  ;;  %15835 = vst [vmem:[#allocation224_spill] sm:$0xff] %v14061_v48  ;;  %v15840_v48 = vld [vmem:[#allocation128_spill] sm:$0xff] }
 0x4cc   : > { %v14067_v1 = vpop.permute.xlu0 %4293 }
 0x4cd   : > { %10049 = vmatmul.mubr.msk.bf16.gmra.mrb[136].mxu1 %vm1445_vm2, %v15833_v31  ;;  %15837 = vst [vmem:[#allocation109_spill] sm:$0xff] %v14067_v1 }
 0x4ce   : > { %10052 = vmatprep.mubr.msk.bf16.mxu1 %vm10786_vm0, %v15681_v62  ;;  %v14071_v22 = vpop.permute.xlu1 %4291 }
 0x4cf   : > { %15838 = vst [vmem:[#allocation225_spill] sm:$0xff] %v14071_v22 }
 0x4d0   : > { %v14055_v0 = vpop.f32.mrb[32].mxu1  ;;  %v14075_v37 = vpop.permute.xlu0 %4705 }
 0x4d1   : > { %v9742_v9 = vpop.f32.mrb[33].mxu1  ;;  %15839 = vst [vmem:[#allocation226_spill] sm:$0xff] %v14075_v37 }
 0x4d2   : > { %v14059_v16 = vpop.f32.mrb[34].mxu1 }
 0x4d3   : > { %v9743_v13 = vpop.f32.mrb[35].mxu1 }
 0x4d4   : > { %v14081_v13 = vpop.permute.xlu1 %4703  ;;  %v14087_v22 = vpop.permute.xlu0 %4297 }
 0x4d5   : > { %10053 = vmatmul.mubr.msk.bf16.gmra.mrb[140].mxu1 %vm1445_vm2, %v15836_v46  ;;  %15841 = vst [vmem:[#allocation128_spill] sm:$0xff] %v14081_v13  ;;  %15842 = vst [vmem:[#allocation227_spill] sm:$0xff] %v14087_v22  ;;  %v15847_v22 = vld [vmem:[#allocation130_spill] sm:$0xff] }
 0x4d6   : > { %10056 = vmatprep.mubr.msk.bf16.mxu1 %vm10786_vm0, %v15681_v62 }
 0x4d8   : > { %v14069_v31 = vpop.f32.mrb[36].mxu1  ;;  %v14089_v52 = vpop.permute.xlu1 %4295 }
 0x4d9   : > { %v9746_v42 = vpop.f32.mrb[37].mxu1  ;;  %15843 = vst [vmem:[#allocation228_spill] sm:$0xff] %v14089_v52  ;;  %v14097_v37 = vpop.permute.xlu0 %4709 }
 0x4da   : > { %v14073_v55 = vpop.f32.mrb[38].mxu1 }
 0x4db   : > { %v9747_v9 = vpop.f32.mrb[39].mxu1 }
 0x4dc   : > { %v15844_v9 = vld [vmem:[#allocation113_spill] sm:$0xff] }
 0x4dd   : > { %10057 = vmatmul.mubr.msk.bf16.gmra.mrb[144].mxu1 %vm1445_vm2, %v15840_v48  ;;  %15845 = vst [vmem:[#allocation113_spill] sm:$0xff] %v14097_v37 }
 0x4de   : > { %10060 = vmatprep.mubr.msk.bf16.mxu1 %vm10786_vm0, %v15681_v62 }
 0x4e0   : > { %v14083_v46 = vpop.f32.mrb[40].mxu1 }
 0x4e1   : > { %v9750_v1 = vpop.f32.mrb[41].mxu1 }
 0x4e2   : > { %v14085_v38 = vpop.f32.mrb[42].mxu1  ;;  %v14101_v1 = vpop.permute.xlu1 %4707 }
 0x4e3   : > { %v9751_v42 = vpop.f32.mrb[43].mxu1  ;;  %15846 = vst [vmem:[#allocation229_spill] sm:$0xff] %v14101_v1  ;;  %v15851_v1 = vld [vmem:[#allocation116_spill] sm:$0xff] }
 0x4e4   : > { %v14107_v42 = vpop.permute.xlu0 %4301 }
 0x4e5   : > { %10061 = vmatmul.mubr.msk.bf16.gmra.mrb[148].mxu1 %vm1445_vm2, %v15844_v9  ;;  %15848 = vst [vmem:[#allocation130_spill] sm:$0xff] %v14107_v42 }
 0x4e6   : > { %10064 = vmatprep.mubr.msk.bf16.mxu1 %vm10786_vm0, %v15681_v62  ;;  %v14111_v52 = vpop.permute.xlu1 %4299 }
 0x4e7   : > { %15849 = vst [vmem:[#allocation230_spill] sm:$0xff] %v14111_v52 }
 0x4e8   : > { %v14095_v48 = vpop.f32.mrb[44].mxu1  ;;  %v14115_v28 = vpop.permute.xlu0 %4713 }
 0x4e9   : > { %v9958_v13 = vpop.f32.mrb[45].mxu1  ;;  %15850 = vst [vmem:[#allocation231_spill] sm:$0xff] %v14115_v28 }
 0x4ea   : > { %v14099_v15 = vpop.f32.mrb[46].mxu1 }
 0x4eb   : > { %v9959_v6 = vpop.f32.mrb[47].mxu1 }
 0x4ec   : > { %v7638_v6 = vlaneseq  ;;  %v14129_v52 = vpop.permute.xlu0 %4305 }
 0x4ed   : > { %10065 = vmatmul.mubr.msk.bf16.gmra.mrb[152].mxu1 %vm1445_vm2, %v15847_v22  ;;  %v14121_v22 = vpop.permute.xlu1 %4711  ;;  %15854 = vst [vmem:[#allocation233_spill] sm:$0xff] %v14129_v52 }
 0x4ee   : > { %10068 = vmatprep.mubr.msk.bf16.mxu1 %vm10786_vm0, %v15681_v62  ;;  %15852 = vst [vmem:[#allocation116_spill] sm:$0xff] %v14121_v22  ;;  %v14125_v44 = vand.u32 127, %v7638_v6 }
 0x4f0   : > { %v14109_v9 = vpop.f32.mrb[48].mxu1  ;;  %15853 = vst [vmem:[#allocation232_spill] sm:$0xff] %v14125_v44  ;;  %vm7640_vm11 = vcmp.lt.s32.totalorder %v14125_v44, 8  ;;  %v14145_v51 = vpop.permute.xlu0 %4717 }
 0x4f1   : > { %v9962_v47 = vpop.f32.mrb[49].mxu1  ;;  %v14134_v28 = vpop.permute.xlu1 %4303  ;;  %15858 = vst [vmem:[#allocation235_spill] sm:$0xff] %v14145_v51  ;;  %v15861_v51 = vld [vmem:[#allocation127_spill] sm:$0xff] }
 0x4f2   : > { %v14113_v37 = vpop.f32.mrb[50].mxu1  ;;  %15855 = vst [vmem:[#allocation234_spill] sm:$0xff] %v14134_v28 }
 0x4f3   : > { %v9963_v13 = vpop.f32.mrb[51].mxu1 }
 0x4f5   : > { %10069 = vmatmul.mubr.msk.bf16.gmra.mrb[156].mxu1 %vm1445_vm2, %v15851_v1  ;;  %v8302_v1 = vld [vmem:[%s15554_s2] ss:$0 sm:$0xff]  ;;  %v14154_v43 = vpop.permute.xlu1 %4715 }
 0x4f6   : > { %10072 = vmatprep.mubr.msk.bf16.mxu1 %vm10786_vm0, %v15681_v62  ;;  %15860 = vst [vmem:[#allocation237_spill] sm:$0xff] %v14154_v43 }
 0x4f8   : > { %v14123_v42 = vpop.f32.mrb[52].mxu1 }
 0x4f9   : > { %v9966_v11 = vpop.f32.mrb[53].mxu1 }
 0x4fa   : > { %v14127_v47 = vpop.f32.mrb[54].mxu1 }
 0x4fb   : > { %v9967_v13 = vpop.f32.mrb[55].mxu1 }
 0x4fd   : > { %10073 = vmatmul.mubr.msk.bf16.gmra.mrb[160].mxu1 %vm1445_vm2, %v15856_v14  ;;  %v7631_v22 = vpop.f32.mrb[228].mxu0 }
 0x4fe   : > { %10076 = vmatprep.mubr.msk.bf16.mxu1 %vm10786_vm0, %v15681_v62  ;;  %v14141_v11 = vadd.f32 %v8302_v1, %v7631_v22  ;;  %v10162_v6 = vpop.f32.mrb[229].mxu0 }
 0x4ff   : > { %v7634_v52 = vpop.f32.mrb[230].mxu0 }
 0x500   : > { %15857 = vst [vmem:[#allocation133_spill] sm:$0xff] %v14141_v11  ;;  %v14143_v13 = vpop.f32.mrb[56].mxu1  ;;  %v14147_v3 = vadd.f32 %v8302_v1, %v7634_v52  ;;  %v7641_v14 = vsel %vm7640_vm11, %v14141_v11, -inf  ;;  %v10163_v20 = vpop.f32.mrb[231].mxu0 }
 0x501   : > { %v9970_v28 = vpop.f32.mrb[57].mxu1  ;;  %7643 = vmax.xlane.f32.xlu0 %v7641_v14  ;;  %v14163_v52 = vpop.permute.xlu0 %4309 }
 0x502   : > { %15859 = vst [vmem:[#allocation236_spill] sm:$0xff] %v14147_v3  ;;  %v14152_v29 = vpop.f32.mrb[58].mxu1  ;;  %v7642_v22 = vsel %vm7640_vm11, %v14147_v3, -inf  ;;  %15862 = vst [vmem:[#allocation127_spill] sm:$0xff] %v14163_v52  ;;  %v14167_v1 = vpop.permute.xlu1 %4307 }
 0x503   : > { %v9971_v6 = vpop.f32.mrb[59].mxu1  ;;  %7645 = vmax.xlane.f32.xlu1 %v7642_v22  ;;  %15863 = vst [vmem:[#allocation238_spill] sm:$0xff] %v14167_v1  ;;  %v15964_v1 = vld [vmem:[#allocation64_spill] sm:$0xff] }
 0x504   : > { %v15865_v6 = vld [vmem:[#allocation134_spill] sm:$0xff] }
 0x505   : > { %10077 = vmatmul.mubr.msk.bf16.gmra.mrb[164].mxu1 %vm1445_vm2, %v15861_v51  ;;  %v14171_v44 = vpop.permute.xlu0 %4721 }
 0x506   : > { %10080 = vmatprep.mubr.msk.bf16.mxu1 %vm10786_vm0, %v15681_v62  ;;  %15864 = vst [vmem:[#allocation239_spill] sm:$0xff] %v14171_v44  ;;  %v14177_v51 = vpop.permute.xlu1 %4719 }
 0x507   : > { %15866 = vst [vmem:[#allocation134_spill] sm:$0xff] %v14177_v51  ;;  %v2710_v51 = vadd.f32 %v13846_v45, %v14045_v24  ;;  %v2723_v24 = vadd.f32 %v13846_v45, %v14069_v31 }
 0x508   : > { %v14165_v28 = vpop.f32.mrb[60].mxu1 }
 0x509   : > { %v9974_v20 = vpop.f32.mrb[61].mxu1  ;;  %v14185_v52 = vpop.permute.xlu0 %4313 }
 0x50a   : > { %v14169_v14 = vpop.f32.mrb[62].mxu1  ;;  %v2707_v20 = vadd.f32 %v13846_v45, %v14042_v40  ;;  %15867 = vst [vmem:[#allocation240_spill] sm:$0xff] %v14185_v52  ;;  %v14187_v44 = vpop.permute.xlu1 %4311 }
 0x50b   : > { %v9975_v43 = vpop.f32.mrb[63].mxu1  ;;  %15868 = vst [vmem:[#allocation241_spill] sm:$0xff] %v14187_v44 }
 0x50d   : > { %10081 = vmatmul.mubr.msk.bf16.gmra.mrb[168].mxu1 %vm1445_vm2, %v15865_v6  ;;  %v15869_v6 = vld [vmem:[#allocation129_spill] sm:$0xff] }
 0x50e   : > { %10084 = vmatprep.mubr.msk.bf16.mxu1 %vm10786_vm0, %v15681_v62  ;;  %v14210_v44 = vpop.permute.xlu1 %4723 }
 0x50f   : > { %15871 = vst [vmem:[#allocation242_spill] sm:$0xff] %v14210_v44 }
 0x510   : > { %v14179_v22 = vpop.f32.mrb[64].mxu1 }
 0x511   : > { %v9978_v3 = vpop.f32.mrb[65].mxu1 }
 0x512   : > { %v14181_v11 = vpop.f32.mrb[66].mxu1  ;;  %v2715_v3 = vadd.f32 %v13846_v45, %v14055_v0 }
 0x513   : > { %v9979_v43 = vpop.f32.mrb[67].mxu1 }
 0x514   : > { %4355 = vrot.lane.b32.xlu1 %v2707_v20, %s10789_s25  ;;  %v14201_v43 = vpop.permute.xlu0 %4725 }
 0x515   : > { %10085 = vmatmul.mubr.msk.bf16.gmra.mrb[172].mxu1 %vm1445_vm2, %v15869_v6  ;;  %15870 = vst [vmem:[#allocation129_spill] sm:$0xff] %v14201_v43  ;;  %v2718_v6 = vadd.f32 %v13846_v45, %v14059_v16  ;;  %v2731_v16 = vadd.f32 %v13846_v45, %v14083_v46 }
 0x516   : > { %10088 = vmatprep.mubr.msk.bf16.mxu1 %vm10786_vm0, %v15681_v62 }
 0x517   : > { %4357 = vrot.lane.b32.xlu0 %v2710_v51, %s10789_s25  ;;  %v15872_v51 = vld [vmem:[#allocation135_spill] sm:$0xff] }
 0x518   : > { %v14199_v40 = vpop.f32.mrb[68].mxu1  ;;  %4359 = vrot.lane.b32.xlu1 %v2715_v3, %s10789_s25  ;;  %v2726_v3 = vadd.f32 %v13846_v45, %v14073_v55  ;;  %v14222_v31 = vpop.permute.xlu0 %4317 }
 0x519   : > { %v9982_v20 = vpop.f32.mrb[69].mxu1  ;;  %15873 = vst [vmem:[#allocation135_spill] sm:$0xff] %v14222_v31 }
 0x51a   : > { %v14206_v52 = vpop.f32.mrb[70].mxu1 }
 0x51b   : > { %v9983_v0 = vpop.f32.mrb[71].mxu1  ;;  %4361 = vrot.lane.b32.xlu0 %v2718_v6, %s10789_s25  ;;  %v14225_v6 = vpop.permute.xlu1 %4315 }
 0x51c   : > { %4363 = vrot.lane.b32.xlu1 %v2723_v24, %s10789_s25  ;;  %15874 = vst [vmem:[#allocation243_spill] sm:$0xff] %v14225_v6  ;;  %v2734_v0 = vadd.f32 %v13846_v45, %v14085_v38  ;;  %v14233_v46 = vpop.permute.xlu0 %4729  ;;  %v3695_v38 = vadd.f32 %v13846_v45, %v14109_v9 }
 0x51d   : > { %10089 = vmatmul.mubr.msk.bf16.gmra.mrb[176].mxu1 %vm1445_vm2, %v15872_v51  ;;  %v3687_v51 = vadd.f32 %v13846_v45, %v14095_v48  ;;  %15875 = vst [vmem:[#allocation244_spill] sm:$0xff] %v14233_v46 }
 0x51e   : > { %10092 = vmatprep.mubr.msk.bf16.mxu1 %vm10786_vm0, %v15681_v62 }
 0x51f   : > { %4365 = vrot.lane.b32.xlu0 %v2726_v3, %s10789_s25  ;;  %v15876_v3 = vld [vmem:[#allocation131_spill] sm:$0xff]  ;;  %v14244_v48 = vpop.permute.xlu1 %4727 }
 0x520   : > { %v3742_v20 = vpop.f32.mrb[72].mxu1  ;;  %4367 = vrot.lane.b32.xlu1 %v2731_v16, %s10789_s25  ;;  %v3690_v16 = vadd.f32 %v13846_v45, %v14099_v15  ;;  %15877 = vst [vmem:[#allocation131_spill] sm:$0xff] %v14244_v48  ;;  %v3703_v15 = vadd.f32 %v13846_v45, %v14123_v42 }
 0x521   : > { %v9986_v24 = vpop.f32.mrb[73].mxu1 }
 0x522   : > { %v3745_v55 = vpop.f32.mrb[74].mxu1 }
 0x523   : > { %v9987_v43 = vpop.f32.mrb[75].mxu1  ;;  %4369 = vrot.lane.b32.xlu0 %v2734_v0, %s10789_s25  ;;  %v3698_v0 = vadd.f32 %v13846_v45, %v14113_v37  ;;  %v14255_v9 = vpop.permute.xlu1 %4319  ;;  %v3711_v37 = vadd.f32 %v13846_v45, %v14143_v13  ;;  %v15883_v13 = vld [vmem:[#allocation132_spill] sm:$0xff] }
 0x524   : > { %4959 = vrot.lane.b32.xlu1 %v3687_v51, %s10787_s21  ;;  %15879 = vst [vmem:[#allocation246_spill] sm:$0xff] %v14255_v9 }
 0x525   : > { %10093 = vmatmul.mubr.msk.bf16.gmra.mrb[180].mxu1 %vm1445_vm2, %v15876_v3  ;;  %v14250_v3 = vpop.permute.xlu0 %4321 }
 0x526   : > { %10096 = vmatprep.mubr.msk.bf16.mxu1 %vm10786_vm0, %v15681_v62  ;;  %15878 = vst [vmem:[#allocation245_spill] sm:$0xff] %v14250_v3 }
 0x527   : > { %4961 = vrot.lane.b32.xlu0 %v3690_v16, %s10787_s21  ;;  %v15880_v16 = vld [vmem:[#allocation136_spill] sm:$0xff] }
 0x528   : > { %v3750_v43 = vpop.f32.mrb[76].mxu1  ;;  %4963 = vrot.lane.b32.xlu1 %v3695_v38, %s10787_s21  ;;  %v3706_v38 = vadd.f32 %v13846_v45, %v14127_v47  ;;  %v3719_v47 = vadd.f32 %v13846_v45, %v14165_v28 }
 0x529   : > { %v9990_v24 = vpop.f32.mrb[77].mxu1 }
 0x52a   : > { %v3753_v51 = vpop.f32.mrb[78].mxu1 }
 0x52b   : > { %v9991_v46 = vpop.f32.mrb[79].mxu1  ;;  %4965 = vrot.lane.b32.xlu0 %v3698_v0, %s10787_s21  ;;  %v3714_v0 = vadd.f32 %v13846_v45, %v14152_v29 }
 0x52c   : > { %4967 = vrot.lane.b32.xlu1 %v3703_v15, %s10787_s21  ;;  %v14267_v46 = vpop.permute.xlu0 %4733 }
 0x52d   : > { %10097 = vmatmul.mubr.msk.bf16.gmra.mrb[184].mxu1 %vm1445_vm2, %v15880_v16  ;;  %15881 = vst [vmem:[#allocation136_spill] sm:$0xff] %v14267_v46  ;;  %v14272_v16 = vpop.permute.xlu1 %4731 }
 0x52e   : > { %10100 = vmatprep.mubr.msk.bf16.mxu1 %vm10786_vm0, %v15681_v62  ;;  %15882 = vst [vmem:[#allocation247_spill] sm:$0xff] %v14272_v16  ;;  %v15938_v16 = vld [vmem:[#allocation18_spill] sm:$0xff] }
 0x52f   : > { %4969 = vrot.lane.b32.xlu0 %v3706_v38, %s10787_s21  ;;  %v3722_v38 = vadd.f32 %v13846_v45, %v14169_v14 }
 0x530   : > { %v3758_v42 = vpop.f32.mrb[80].mxu1  ;;  %4971 = vrot.lane.b32.xlu1 %v3711_v37, %s10787_s21  ;;  %v14284_v29 = vpop.permute.xlu0 %4325  ;;  %v3727_v37 = vadd.f32 %v13846_v45, %v14179_v22  ;;  %v3743_v22 = vadd.f32 %v13846_v45, %v3742_v20  ;;  %v3751_v20 = vadd.f32 %v13846_v45, %v3750_v43 }
 0x531   : > { %v9994_v24 = vpop.f32.mrb[81].mxu1  ;;  %15884 = vst [vmem:[#allocation132_spill] sm:$0xff] %v14284_v29  ;;  %v15948_v29 = vld [vmem:[#allocation34_spill] sm:$0xff] }
 0x532   : > { %v3761_v15 = vpop.f32.mrb[82].mxu1 }
 0x533   : > { %v9995_v48 = vpop.f32.mrb[83].mxu1  ;;  %4973 = vrot.lane.b32.xlu0 %v3714_v0, %s10787_s21  ;;  %v3730_v0 = vadd.f32 %v13846_v45, %v14181_v11  ;;  %v3762_v43 = vadd.f32 %v13846_v45, %v3761_v15 }
 0x534   : > { %4975 = vrot.lane.b32.xlu1 %v3719_v47, %s10787_s21  ;;  %v14289_v48 = vpop.permute.xlu1 %4323  ;;  %v3735_v47 = vadd.f32 %v13846_v45, %v14199_v40  ;;  %v14297_v46 = vpop.permute.xlu0 %4737  ;;  %v3746_v40 = vadd.f32 %v13846_v45, %v3745_v55  ;;  %v3759_v55 = vadd.f32 %v13846_v45, %v3758_v42 }
 0x535   : > { %10101 = vmatmul.mubr.msk.bf16.gmra.mrb[188].mxu1 %vm1445_vm2, %v15883_v13  ;;  %15885 = vst [vmem:[#allocation248_spill] sm:$0xff] %v14289_v48  ;;  %15886 = vst [vmem:[#allocation249_spill] sm:$0xff] %v14297_v46 }
 0x536   : > { %10104 = vmatprep.mubr.msk.bf16.mxu1 %vm10786_vm0, %v15681_v62 }
 0x537   : > { %4977 = vrot.lane.b32.xlu0 %v3722_v38, %s10787_s21  ;;  %v15887_v38 = vld [vmem:[#allocation140_spill] sm:$0xff] }
 0x538   : > { %v3766_v28 = vpop.f32.mrb[84].mxu1  ;;  %4979 = vrot.lane.b32.xlu1 %v3727_v37, %s10787_s21  ;;  %v3738_v37 = vadd.f32 %v13846_v45, %v14206_v52  ;;  %v14307_v11 = vpop.permute.xlu1 %4735  ;;  %v3754_v52 = vadd.f32 %v13846_v45, %v3753_v51 }
 0x539   : > { %v9998_v24 = vpop.f32.mrb[85].mxu1  ;;  %15888 = vst [vmem:[#allocation140_spill] sm:$0xff] %v14307_v11  ;;  %v3767_v51 = vadd.f32 %v13846_v45, %v3766_v28 }
 0x53a   : > { %v3769_v14 = vpop.f32.mrb[86].mxu1 }
 0x53b   : > { %v9999_v13 = vpop.f32.mrb[87].mxu1  ;;  %4981 = vrot.lane.b32.xlu0 %v3730_v0, %s10787_s21 }
 0x53c   : > { %4983 = vrot.lane.b32.xlu1 %v3735_v47, %s10787_s21  ;;  %v14313_v13 = vpop.permute.xlu0 %4329  ;;  %v14317_v46 = vpop.permute.xlu1 %4327 }
 0x53d   : > { %10105 = vmatmul.mubr.msk.bf16.gmra.mrb[192].mxu1 %vm1445_vm2, %v15887_v38  ;;  %15889 = vst [vmem:[#allocation250_spill] sm:$0xff] %v14313_v13  ;;  %15890 = vst [vmem:[#allocation251_spill] sm:$0xff] %v14317_v46 }
 0x53e   : > { %10108 = vmatprep.mubr.msk.bf16.mxu1 %vm10786_vm0, %v15681_v62 }
 0x53f   : > { %4985 = vrot.lane.b32.xlu0 %v3738_v37, %s10787_s21  ;;  %v15891_v37 = vld [vmem:[#allocation137_spill] sm:$0xff] }
 0x540   : > { %v3774_v24 = vpop.f32.mrb[88].mxu1  ;;  %4987 = vrot.lane.b32.xlu1 %v3743_v22, %s10787_s21  ;;  %v14331_v42 = vpop.permute.xlu1 %4739 }
 0x541   : > { %v10002_v0 = vpop.f32.mrb[89].mxu1  ;;  %15893 = vst [vmem:[#allocation252_spill] sm:$0xff] %v14331_v42  ;;  %v3775_v15 = vadd.f32 %v13846_v45, %v3774_v24  ;;  %v15915_v42 = vld [vmem:[#allocation145_spill] sm:$0xff] }
 0x542   : > { %v3777_v47 = vpop.f32.mrb[90].mxu1 }
 0x543   : > { %v10003_v38 = vpop.f32.mrb[91].mxu1  ;;  %4989 = vrot.lane.b32.xlu0 %v3746_v40, %s10787_s21  ;;  %v14327_v40 = vpop.permute.xlu0 %4741 }
 0x544   : > { %4991 = vrot.lane.b32.xlu1 %v3751_v20, %s10787_s21  ;;  %15892 = vst [vmem:[#allocation137_spill] sm:$0xff] %v14327_v40 }
 0x545   : > { %10109 = vmatmul.mubr.msk.bf16.gmra.mrb[196].mxu1 %vm1445_vm2, %v15891_v37  ;;  %v3770_v37 = vadd.f32 %v13846_v45, %v3769_v14 }
 0x546   : > { %10112 = vmatprep.mubr.msk.bf16.mxu1 %vm10786_vm0, %v15681_v62 }
 0x547   : > { %4993 = vrot.lane.b32.xlu0 %v3754_v52, %s10787_s21  ;;  %v14341_v28 = vpop.permute.xlu0 %4333  ;;  %v3778_v52 = vadd.f32 %v13846_v45, %v3777_v47 }
 0x548   : > { %v3782_v22 = vpop.f32.mrb[92].mxu1  ;;  %4995 = vrot.lane.b32.xlu1 %v3759_v55, %s10787_s21  ;;  %15894 = vst [vmem:[#allocation253_spill] sm:$0xff] %v14341_v28  ;;  %v15945_v28 = vld [vmem:[#allocation30_spill] sm:$0xff] }
 0x549   : > { %v10006_v20 = vpop.f32.mrb[93].mxu1  ;;  %v3783_v14 = vadd.f32 %v13846_v45, %v3782_v22 }
 0x54a   : > { %v3785_v0 = vpop.f32.mrb[94].mxu1 }
 0x54b   : > { %v10007_v38 = vpop.f32.mrb[95].mxu1  ;;  %4997 = vrot.lane.b32.xlu0 %v3762_v43, %s10787_s21  ;;  %v14345_v43 = vpop.permute.xlu1 %4331 }
 0x54c   : > { %4999 = vrot.lane.b32.xlu1 %v3767_v51, %s10787_s21  ;;  %15895 = vst [vmem:[#allocation254_spill] sm:$0xff] %v14345_v43  ;;  %v14351_v38 = vpop.permute.xlu0 %4745  ;;  %v15947_v43 = vld [vmem:[#allocation147_spill] sm:$0xff] }
 0x54d   : > { %10113 = vmatmul.mubr.msk.bf16.gmra.mrb[200].mxu1 %vm1445_vm2, %v12899_v36  ;;  %v3786_v36 = vadd.f32 %v13846_v45, %v3785_v0  ;;  %15896 = vst [vmem:[#allocation255_spill] sm:$0xff] %v14351_v38 }
 0x54e   : > { %10116 = vmatprep.mubr.msk.bf16.mxu1 %vm10786_vm0, %v15681_v62 }
 0x54f   : > { %5001 = vrot.lane.b32.xlu0 %v3770_v37, %s10787_s21  ;;  %v15897_v37 = vld [vmem:[#allocation138_spill] sm:$0xff]  ;;  %v14359_v22 = vpop.permute.xlu1 %4743 }
 0x550   : > { %v3790_v55 = vpop.f32.mrb[96].mxu1  ;;  %5003 = vrot.lane.b32.xlu1 %v3775_v15, %s10787_s21  ;;  %15898 = vst [vmem:[#allocation138_spill] sm:$0xff] %v14359_v22 }
 0x551   : > { %v10010_v24 = vpop.f32.mrb[97].mxu1  ;;  %v3791_v47 = vadd.f32 %v13846_v45, %v3790_v55  ;;  %v14365_v55 = vpop.permute.xlu0 %4337 }
 0x552   : > { %v3793_v51 = vpop.f32.mrb[98].mxu1  ;;  %15899 = vst [vmem:[#allocation256_spill] sm:$0xff] %v14365_v55 }
 0x553   : > { %v10011_v20 = vpop.f32.mrb[99].mxu1  ;;  %5005 = vrot.lane.b32.xlu0 %v3778_v52, %s10787_s21  ;;  %v3794_v15 = vadd.f32 %v13846_v45, %v3793_v51  ;;  %v14369_v38 = vpop.permute.xlu1 %4335 }
 0x554   : > { %5007 = vrot.lane.b32.xlu1 %v3783_v14, %s10787_s21  ;;  %15900 = vst [vmem:[#allocation257_spill] sm:$0xff] %v14369_v38 }
 0x555   : > { %10117 = vmatmul.mubr.msk.bf16.gmra.mrb[204].mxu1 %vm1445_vm2, %v15897_v37 }
 0x556   : > { %10120 = vmatprep.mubr.msk.bf16.mxu1 %vm10786_vm0, %v15681_v62 }
 0x557   : > { %5009 = vrot.lane.b32.xlu0 %v3786_v36, %s10787_s21  ;;  %v15901_v36 = vld [vmem:[#allocation143_spill] sm:$0xff] }
 0x558   : > { %v3798_v52 = vpop.f32.mrb[100].mxu1  ;;  %5011 = vrot.lane.b32.xlu1 %v3791_v47, %s10787_s21  ;;  %v14377_v47 = vpop.permute.xlu0 %4749 }
 0x559   : > { %v3799_v0 = vadd.f32 %v13846_v45, %v3798_v52  ;;  %v10014_v14 = vpop.f32.mrb[101].mxu1  ;;  %15902 = vst [vmem:[#allocation143_spill] sm:$0xff] %v14377_v47 }
 0x55a   : > { %v3801_v24 = vpop.f32.mrb[102].mxu1 }
 0x55b   : > { %v10015_v20 = vpop.f32.mrb[103].mxu1  ;;  %5013 = vrot.lane.b32.xlu0 %v3794_v15, %s10787_s21  ;;  %v3802_v37 = vadd.f32 %v13846_v45, %v3801_v24  ;;  %v14380_v24 = vpop.permute.xlu1 %4747 }
 0x55c   : > { %5015 = vrot.lane.b32.xlu1 %v3799_v0, %s10787_s21  ;;  %15903 = vst [vmem:[#allocation258_spill] sm:$0xff] %v14380_v24 }
 0x55d   : > { %10121 = vmatmul.mubr.msk.bf16.gmra.mrb[208].mxu1 %vm1445_vm2, %v15901_v36  ;;  %v15904_v36 = vld [vmem:[#allocation139_spill] sm:$0xff] }
 0x55e   : > { %10124 = vmatprep.mubr.msk.bf16.mxu1 %vm10786_vm0, %v15681_v62 }
 0x55f   : > { %5017 = vrot.lane.b32.xlu0 %v3802_v37, %s10787_s21  ;;  %v14389_v37 = vpop.permute.xlu0 %4341 }
 0x560   : > { %v3806_v51 = vpop.f32.mrb[104].mxu1  ;;  %15905 = vst [vmem:[#allocation139_spill] sm:$0xff] %v14389_v37 }
 0x561   : > { %v3807_v52 = vadd.f32 %v13846_v45, %v3806_v51  ;;  %v10018_v15 = vpop.f32.mrb[105].mxu1 }
 0x562   : > { %v3809_v14 = vpop.f32.mrb[106].mxu1  ;;  %v14391_v15 = vpop.permute.xlu1 %4339 }
 0x563   : > { %v3810_v20 = vadd.f32 %v13846_v45, %v3809_v14  ;;  %v10019_v0 = vpop.f32.mrb[107].mxu1  ;;  %5019 = vrot.lane.b32.xlu1 %v3807_v52, %s10787_s21  ;;  %15906 = vst [vmem:[#allocation259_spill] sm:$0xff] %v14391_v15 }
 0x565   : > { %10125 = vmatmul.mubr.msk.bf16.gmra.mrb[212].mxu1 %vm1445_vm2, %v15904_v36  ;;  %5021 = vrot.lane.b32.xlu0 %v3810_v20, %s10787_s21  ;;  %v14396_v36 = vpop.permute.xlu0 %4753  ;;  %v15908_v20 = vld [vmem:[#allocation144_spill] sm:$0xff] }
 0x566   : > { %10128 = vmatprep.mubr.msk.bf16.mxu1 %vm10786_vm0, %v15681_v62  ;;  %15907 = vst [vmem:[#allocation260_spill] sm:$0xff] %v14396_v36  ;;  %v14403_v22 = vpop.permute.xlu1 %4751 }
 0x567   : > { %15909 = vst [vmem:[#allocation144_spill] sm:$0xff] %v14403_v22 }
 0x568   : > { %v3814_v51 = vpop.f32.mrb[108].mxu1 }
 0x569   : > { %v3815_v47 = vadd.f32 %v13846_v45, %v3814_v51  ;;  %v10022_v24 = vpop.f32.mrb[109].mxu1 }
 0x56a   : > { %v3817_v14 = vpop.f32.mrb[110].mxu1 }
 0x56b   : > { %v3818_v0 = vadd.f32 %v13846_v45, %v3817_v14  ;;  %v10023_v52 = vpop.f32.mrb[111].mxu1  ;;  %5023 = vrot.lane.b32.xlu1 %v3815_v47, %s10787_s21 }
 0x56c   : > { %v14406_v52 = vpop.permute.xlu0 %4345 }
 0x56d   : > { %10129 = vmatmul.mubr.msk.bf16.gmra.mrb[216].mxu1 %vm1445_vm2, %v15908_v20  ;;  %5025 = vrot.lane.b32.xlu0 %v3818_v0, %s10787_s21  ;;  %15910 = vst [vmem:[#allocation261_spill] sm:$0xff] %v14406_v52  ;;  %v14410_v20 = vpop.permute.xlu1 %4343  ;;  %v15912_v0 = vld [vmem:[#allocation141_spill] sm:$0xff] }
 0x56e   : > { %10132 = vmatprep.mubr.msk.bf16.mxu1 %vm10786_vm0, %v15681_v62  ;;  %15911 = vst [vmem:[#allocation262_spill] sm:$0xff] %v14410_v20  ;;  %v15934_v20 = vld [vmem:[#allocation11_spill] sm:$0xff] }
 0x570   : > { %v3822_v51 = vpop.f32.mrb[112].mxu1 }
 0x571   : > { %v3823_v24 = vadd.f32 %v13846_v45, %v3822_v51  ;;  %v10026_v40 = vpop.f32.mrb[113].mxu1  ;;  %v14425_v22 = vpop.permute.xlu1 %4755 }
 0x572   : > { %v3825_v14 = vpop.f32.mrb[114].mxu1  ;;  %v14417_v40 = vpop.permute.xlu0 %4757  ;;  %15914 = vst [vmem:[#allocation263_spill] sm:$0xff] %v14425_v22 }
 0x573   : > { %v3826_v47 = vadd.f32 %v13846_v45, %v3825_v14  ;;  %v10027_v36 = vpop.f32.mrb[115].mxu1  ;;  %5027 = vrot.lane.b32.xlu1 %v3823_v24, %s10787_s21  ;;  %15913 = vst [vmem:[#allocation141_spill] sm:$0xff] %v14417_v40  ;;  %v14422_v45 = vld [vmem:[%s15558_s6] ss:$0 sm:$0xff] }
 0x574   : > { %v14656_v57 = vadd.f32 %v14422_v45, %v15975_v8 }
 0x575   : > { %10133 = vmatmul.mubr.msk.bf16.gmra.mrb[220].mxu1 %vm1445_vm2, %v15912_v0  ;;  %5029 = vrot.lane.b32.xlu0 %v3826_v47, %s10787_s21 }
 0x576   : > { %10136 = vmatprep.mubr.msk.bf16.mxu1 %vm10786_vm0, %v15681_v62  ;;  %v14434_v40 = vpop.permute.xlu0 %4349  ;;  %15976 = vst [vmem:[#allocation11_spill] sm:$0xff] %v14656_v57 }
 0x577   : > { %15916 = vst [vmem:[#allocation145_spill] sm:$0xff] %v14434_v40 }
 0x578   : > { %v3830_v51 = vpop.f32.mrb[116].mxu1 }
 0x579   : > { %v3831_v36 = vadd.f32 %v14422_v45, %v3830_v51  ;;  %v10030_v24 = vpop.f32.mrb[117].mxu1 }
 0x57a   : > { %v3833_v14 = vpop.f32.mrb[118].mxu1  ;;  %v14436_v24 = vpop.permute.xlu1 %4347 }
 0x57b   : > { %v3834_v0 = vadd.f32 %v14422_v45, %v3833_v14  ;;  %v10031_v47 = vpop.f32.mrb[119].mxu1  ;;  %5031 = vrot.lane.b32.xlu1 %v3831_v36, %s10787_s21  ;;  %15917 = vst [vmem:[#allocation264_spill] sm:$0xff] %v14436_v24 }
 0x57d   : > { %10137 = vmatmul.mubr.msk.bf16.gmra.mrb[224].mxu1 %vm1445_vm2, %v15915_v42  ;;  %5033 = vrot.lane.b32.xlu0 %v3834_v0, %s10787_s21  ;;  %v14441_v42 = vpop.permute.xlu0 %4761  ;;  %v15919_v0 = vld [vmem:[#allocation142_spill] sm:$0xff] }
 0x57e   : > { %10140 = vmatprep.mubr.msk.bf16.mxu1 %vm10786_vm0, %v15681_v62  ;;  %15918 = vst [vmem:[#allocation265_spill] sm:$0xff] %v14441_v42  ;;  %v14448_v40 = vpop.permute.xlu1 %4759 }
 0x57f   : > { %15920 = vst [vmem:[#allocation142_spill] sm:$0xff] %v14448_v40 }
 0x580   : > { %v3838_v51 = vpop.f32.mrb[120].mxu1 }
 0x581   : > { %v3839_v22 = vadd.f32 %v14422_v45, %v3838_v51  ;;  %v10034_v11 = vpop.f32.mrb[121].mxu1 }
 0x582   : > { %v3841_v14 = vpop.f32.mrb[122].mxu1 }
 0x583   : > { %v3842_v47 = vadd.f32 %v14422_v45, %v3841_v14  ;;  %v10035_v36 = vpop.f32.mrb[123].mxu1  ;;  %5035 = vrot.lane.b32.xlu1 %v3839_v22, %s10787_s21 }
 0x584   : > { %v14451_v36 = vpop.permute.xlu0 %4353 }
 0x585   : > { %10141 = vmatmul.mubr.msk.bf16.gmra.mrb[228].mxu1 %vm1445_vm2, %v15919_v0  ;;  %5037 = vrot.lane.b32.xlu0 %v3842_v47, %s10787_s21  ;;  %15921 = vst [vmem:[#allocation266_spill] sm:$0xff] %v14451_v36  ;;  %v14455_v0 = vpop.permute.xlu1 %4351 }
 0x586   : > { %10144 = vmatprep.mubr.msk.bf16.mxu1 %vm10786_vm0, %v15681_v62  ;;  %15922 = vst [vmem:[#allocation267_spill] sm:$0xff] %v14455_v0 }
 0x588   : > { %v3846_v51 = vpop.f32.mrb[124].mxu1 }
 0x589   : > { %v3847_v11 = vadd.f32 %v14422_v45, %v3846_v51  ;;  %v10038_v24 = vpop.f32.mrb[125].mxu1 }
 0x58a   : > { %v3849_v14 = vpop.f32.mrb[126].mxu1 }
 0x58b   : > { %v3850_v22 = vadd.f32 %v14422_v45, %v3849_v14  ;;  %v10039_v42 = vpop.f32.mrb[127].mxu1  ;;  %5039 = vrot.lane.b32.xlu1 %v3847_v11, %s10787_s21 }
 0x58d   : > { %10145 = vmatmul.mubr.msk.bf16.gmra.mrb[232].mxu1 %vm1445_vm2, %v13047_v61  ;;  %5041 = vrot.lane.b32.xlu0 %v3850_v22, %s10787_s21 }
 0x58e   : > { %10148 = vmatprep.mubr.msk.bf16.mxu1 %vm10786_vm0, %v15681_v62  ;;  %v14462_v47 = vpop.xlane.xlu0 %7643 }
 0x58f   : > { %15923 = vst [vmem:[#allocation268_spill] sm:$0xff] %v14462_v47 }
 0x590   : > { %v3854_v24 = vpop.f32.mrb[128].mxu1  ;;  %v14464_v51 = vpop.xlane.xlu1 %7645 }
 0x591   : > { %15924 = vst [vmem:[#allocation269_spill] sm:$0xff] %v14464_v51  ;;  %v3855_v14 = vadd.f32 %v14422_v45, %v3854_v24  ;;  %v10042_v42 = vpop.f32.mrb[129].mxu1 }
 0x592   : > { %v3857_v40 = vpop.f32.mrb[130].mxu1  ;;  %v14467_v11 = vpop.permute.xlu0 %4357 }
 0x593   : > { %15925 = vst [vmem:[#allocation270_spill] sm:$0xff] %v14467_v11  ;;  %v3858_v36 = vadd.f32 %v14422_v45, %v3857_v40  ;;  %v10043_v0 = vpop.f32.mrb[131].mxu1  ;;  %5043 = vrot.lane.b32.xlu1 %v3855_v14, %s10787_s21 }
 0x594   : > { %v14471_v61 = vpop.permute.xlu1 %4355 }
 0x595   : > { %15926 = vst [vmem:[#allocation271_spill] sm:$0xff] %v14471_v61  ;;  %10149 = vmatmul.mubr.msk.bf16.gmra.mrb[236].mxu1 %vm1445_vm2, %v13058_v56  ;;  %5045 = vrot.lane.b32.xlu0 %v3858_v36, %s10787_s21  ;;  %v15931_v56 = vld [vmem:[#allocation9_spill] sm:$0xff] }
 0x596   : > { %v14476_v62 = vpop.permute.xlu0 %4361  ;;  %v1631_v36 = vadd.f32 %v14422_v45, %v15931_v56  ;;  %v14504_v56 = vadd.f32 %v14422_v45, %v15938_v16  ;;  %v15942_v16 = vld [vmem:[#allocation23_spill] sm:$0xff] }
 0x597   : > { %15927 = vst [vmem:[#allocation272_spill] sm:$0xff] %v14476_v62  ;;  %v15932_v62 = vld [vmem:[#allocation8_spill] sm:$0xff]  ;;  %v14521_v38 = vadd.f32 %v14422_v45, %v15942_v16 }
 0x598   : > { %v3862_v22 = vpop.f32.mrb[132].mxu1  ;;  %v14478_v24 = vpop.permute.xlu1 %4359 }
 0x599   : > { %15928 = vst [vmem:[#allocation273_spill] sm:$0xff] %v14478_v24  ;;  %v3863_v42 = vadd.f32 %v14422_v45, %v3862_v22  ;;  %v10046_v11 = vpop.f32.mrb[133].mxu1  ;;  %v1628_v24 = vadd.f32 %v14422_v45, %v15932_v62  ;;  %v15933_v22 = vld [vmem:[#allocation10_spill] sm:$0xff]  ;;  %v5254_v62 = vsel %vm1445_vm2, %v1631_v36, %v13232_v54 }
 0x59a   : > { %v3865_v52 = vpop.f32.mrb[134].mxu1  ;;  %v14481_v40 = vpop.permute.xlu0 %4365  ;;  %v1636_v11 = vadd.f32 %v14422_v45, %v15933_v22  ;;  %v15939_v22 = vld [vmem:[#allocation19_spill] sm:$0xff]  ;;  %v15943_v54 = vld [vmem:[#allocation26_spill] sm:$0xff] }
 0x59b   : > { %15929 = vst [vmem:[#allocation274_spill] sm:$0xff] %v14481_v40  ;;  %v3866_v0 = vadd.f32 %v14422_v45, %v3865_v52  ;;  %v10047_v14 = vpop.f32.mrb[135].mxu1  ;;  %5047 = vrot.lane.b32.xlu1 %v3863_v42, %s10787_s21  ;;  %v1639_v40 = vadd.f32 %v14422_v45, %v15934_v20  ;;  %v14510_v15 = vadd.f32 %v14422_v45, %v15939_v22  ;;  %v15940_v20 = vld [vmem:[#allocation22_spill] sm:$0xff]  ;;  %v15944_v22 = vld [vmem:[#allocation27_spill] sm:$0xff] }
 0x59c   : > { %v14485_v61 = vpop.permute.xlu1 %4363  ;;  %v15936_v14 = vld [vmem:[#allocation14_spill] sm:$0xff]  ;;  %v14525_v36 = vadd.f32 %v14422_v45, %v15943_v54  ;;  %v14529_v44 = vadd.f32 %v14422_v45, %v15944_v22  ;;  %v5352_v54 = vsel %vm702_vm1, %v5254_v62, %v15947_v43 }
 0x59d   : > { %15930 = vst [vmem:[#allocation275_spill] sm:$0xff] %v14485_v61  ;;  %5049 = vrot.lane.b32.xlu0 %v3866_v0, %s10787_s21  ;;  %v1644_v42 = vadd.f32 %v14422_v45, %v15936_v14  ;;  %v15937_v61 = vld [vmem:[#allocation15_spill] sm:$0xff]  ;;  %v15950_v43 = vld [vmem:[#allocation38_spill] sm:$0xff] }
 0x59e   : > { %v14496_v52 = vpop.permute.xlu0 %4369  ;;  %v1647_v0 = vadd.f32 %v14422_v45, %v15937_v61  ;;  %v14558_v62 = vadd.f32 %v14422_v45, %v15950_v43 }
 0x59f   : > { %15935 = vst [vmem:[#allocation9_spill] sm:$0xff] %v14496_v52  ;;  %v14514_v52 = vadd.f32 %v14422_v45, %v15940_v20  ;;  %v5253_v20 = vsel %vm1445_vm2, %v1628_v24, %v13214_v58  ;;  %v14547_v58 = vadd.f32 %v14422_v45, %v15948_v29  ;;  %v15949_v24 = vld [vmem:[#allocation35_spill] sm:$0xff]  ;;  %v15952_v29 = vld [vmem:[#allocation146_spill] sm:$0xff] }
 0x5a0   : > { %v3870_v37 = vpop.f32.mrb[136].mxu1  ;;  %v14516_v14 = vpop.permute.xlu1 %4367  ;;  %v5351_v3 = vsel %vm702_vm1, %v5253_v20, %v15952_v29 }
 0x5a1   : > { %15941 = vst [vmem:[#allocation8_spill] sm:$0xff] %v14516_v14  ;;  %v3871_v61 = vadd.f32 %v14422_v45, %v3870_v37  ;;  %v10050_v55 = vpop.f32.mrb[137].mxu1  ;;  %v14535_v37 = vadd.f32 %v14422_v45, %v15945_v28  ;;  %v14551_v28 = vadd.f32 %v14422_v45, %v15949_v24  ;;  %v15953_v24 = vld [vmem:[#allocation42_spill] sm:$0xff] }
 0x5a2   : > { %v3873_v14 = vpop.f32.mrb[138].mxu1  ;;  %v15946_v55 = vld [vmem:[#allocation31_spill] sm:$0xff]  ;;  %v4962_v13 = vpop.permute.xlu0 %4961 }
 0x5a3   : > { %v14539_v16 = vadd.f32 %v14422_v45, %v15946_v55  ;;  %v3874_v46 = vadd.f32 %v14422_v45, %v3873_v14  ;;  %v10051_v22 = vpop.f32.mrb[139].mxu1  ;;  %5051 = vrot.lane.b32.xlu1 %v3871_v61, %s10787_s21  ;;  %v5256_v55 = vsel %vm1445_vm2, %v1639_v40, %v13275_v7  ;;  %v5451_v48 = vsel %vm5449_vm12, %v5352_v54, %v4962_v13  ;;  %v15951_v14 = vld [vmem:[#allocation39_spill] sm:$0xff]  ;;  %v15954_v13 = vld [vmem:[#allocation44_spill] sm:$0xff] }
 0x5a4   : > { %v14562_v61 = vadd.f32 %v14422_v45, %v15951_v14  ;;  %v8107_v22 = vmul.f32 -1.442695, %v5451_v48  ;;  %v4960_v9 = vpop.permute.xlu1 %4959  ;;  %v14569_v7 = vadd.f32 %v14422_v45, %v15953_v24  ;;  %v14573_v40 = vadd.f32 %v14422_v45, %v15954_v13  ;;  %v15955_v48 = vld [vmem:[#allocation48_spill] sm:$0xff]  ;;  %v15956_v24 = vld [vmem:[#allocation49_spill] sm:$0xff] }
 0x5a5   : > { %5053 = vrot.lane.b32.xlu0 %v3874_v46, %s10787_s21  ;;  %v5255_v54 = vsel %vm1445_vm2, %v1636_v11, %v13260_v50  ;;  %v5450_v43 = vsel %vm5449_vm12, %v5351_v3, %v4960_v9  ;;  %v14580_v14 = vadd.f32 %v14422_v45, %v15955_v48  ;;  %v5354_v46 = vsel %vm702_vm1, %v5256_v55, %v13110_v41  ;;  %v15957_v13 = vld [vmem:[#allocation53_spill] sm:$0xff] }
 0x5a6   : > { %10280 = vpow2.f32 %v8107_v22  ;;  %v8106_v20 = vmul.f32 -1.442695, %v5450_v43  ;;  %v4966_v29 = vpop.permute.xlu0 %4965  ;;  %v14586_v31 = vadd.f32 %v14422_v45, %v15956_v24  ;;  %v14590_v51 = vadd.f32 %v14422_v45, %v15957_v13  ;;  %v15958_v22 = vld [vmem:[#allocation148_spill] sm:$0xff]  ;;  %v15959_v24 = vld [vmem:[#allocation54_spill] sm:$0xff] }
 0x5a7   : > { %v5258_v50 = vsel %vm1445_vm2, %v1647_v0, %v13326_v23  ;;  %v5453_v3 = vsel %vm5449_vm12, %v5354_v46, %v4966_v29  ;;  %v5353_v41 = vsel %vm702_vm1, %v5255_v54, %v15958_v22  ;;  %v14600_v47 = vadd.f32 %v14422_v45, %v15959_v24  ;;  %v15960_v13 = vld [vmem:[#allocation58_spill] sm:$0xff]  ;;  %v15961_v23 = vld [vmem:[#allocation159_spill] sm:$0xff]  ;;  %v15963_v24 = vld [vmem:[#allocation60_spill] sm:$0xff] }
 0x5a8   : > { %v3878_v9 = vpop.f32.mrb[140].mxu1  ;;  %10282 = vpow2.f32 %v8106_v20  ;;  %v8109_v11 = vmul.f32 -1.442695, %v5453_v3  ;;  %v4964_v55 = vpop.permute.xlu1 %4963  ;;  %v14604_v6 = vadd.f32 %v14422_v45, %v15960_v13  ;;  %v5257_v0 = vsel %vm1445_vm2, %v1644_v42, %v15961_v23  ;;  %v15962_v29 = vld [vmem:[#allocation150_spill] sm:$0xff] }
 0x5a9   : > { %v3879_v43 = vadd.f32 %v14422_v45, %v3878_v9  ;;  %v10054_v48 = vpop.f32.mrb[141].mxu1  ;;  %v5452_v20 = vsel %vm5449_vm12, %v5353_v41, %v4964_v55  ;;  %v5356_v3 = vsel %vm702_vm1, %v5258_v50, %v15962_v29  ;;  %v14615_v13 = vadd.f32 %v14422_v45, %v15963_v24  ;;  %v15965_v41 = vld [vmem:[#allocation163_spill] sm:$0xff]  ;;  %v15966_v55 = vld [vmem:[#allocation65_spill] sm:$0xff]  ;;  %v15969_v24 = vld [vmem:[#allocation70_spill] sm:$0xff] }
 0x5aa   : > { %v3881_v46 = vpop.f32.mrb[142].mxu1  ;;  %10284 = vpow2.f32 %v8109_v11  ;;  %v8108_v54 = vmul.f32 -1.442695, %v5452_v20  ;;  %v4970_v9 = vpop.permute.xlu0 %4969  ;;  %v14619_v42 = vadd.f32 %v14422_v45, %v15964_v1  ;;  %v5260_v11 = vsel %vm1445_vm2, %v14510_v15, %v15965_v41  ;;  %v15967_v20 = vld [vmem:[#allocation149_spill] sm:$0xff] }
 0x5ab   : > { %v3882_v22 = vadd.f32 %v14422_v45, %v3881_v46  ;;  %v10055_v48 = vpop.f32.mrb[143].mxu1  ;;  %5055 = vrot.lane.b32.xlu1 %v3879_v43, %s10787_s21  ;;  %v5455_v50 = vsel %vm5449_vm12, %v5356_v3, %v4970_v9  ;;  %v14627_v23 = vadd.f32 %v14422_v45, %v15966_v55  ;;  %v5355_v46 = vsel %vm702_vm1, %v5257_v0, %v15967_v20  ;;  %v15968_v1 = vld [vmem:[#allocation69_spill] sm:$0xff]  ;;  %v15970_v3 = vld [vmem:[#allocation162_spill] sm:$0xff] }
 0x5ac   : > { %10286 = vpow2.f32 %v8108_v54  ;;  %v8111_v43 = vmul.f32 -1.442695, %v5455_v50  ;;  %v4968_v29 = vpop.permute.xlu1 %4967  ;;  %v14634_v48 = vadd.f32 %v14422_v45, %v15968_v1  ;;  %v14638_v15 = vadd.f32 %v14422_v45, %v15969_v24  ;;  %v15971_v41 = vld [vmem:[#allocation73_spill] sm:$0xff]  ;;  %v15972_v50 = vld [vmem:[#allocation152_spill] sm:$0xff]  ;;  %v15973_v1 = vld [vmem:[#allocation74_spill] sm:$0xff] }
 0x5ad   : > { %5057 = vrot.lane.b32.xlu0 %v3882_v22, %s10787_s21  ;;  %v5259_v9 = vsel %vm1445_vm2, %v14504_v56, %v15970_v3  ;;  %v5454_v54 = vsel %vm5449_vm12, %v5355_v46, %v4968_v29  ;;  %v14646_v0 = vadd.f32 %v14422_v45, %v15971_v41  ;;  %v5358_v55 = vsel %vm702_vm1, %v5260_v11, %v15972_v50  ;;  %v15977_v11 = vld [vmem:[#allocation151_spill] sm:$0xff] }
 0x5ae   : > { %10288 = vpow2.f32 %v8111_v43  ;;  %v8110_v22 = vmul.f32 -1.442695, %v5454_v54  ;;  %v4974_v20 = vpop.permute.xlu0 %4973  ;;  %v14652_v24 = vadd.f32 %v14422_v45, %v15973_v1  ;;  %v5262_v56 = vsel %vm1445_vm2, %v14521_v38, %v13423_v4 }
 0x5af   : > { %v5457_v46 = vsel %vm5449_vm12, %v5358_v55, %v4974_v20  ;;  %v5357_v54 = vsel %vm702_vm1, %v5259_v9, %v15977_v11  ;;  %v5261_v4 = vsel %vm1445_vm2, %v14514_v52, %v13406_v60  ;;  %v15979_v9 = vld [vmem:[#allocation154_spill] sm:$0xff]  ;;  %v5264_v60 = vsel %vm1445_vm2, %v14529_v44, %v13465_v19 }
 0x5b0   : > { %15974 = vst [vmem:[#allocation10_spill] sm:$0xff] %v14652_v24  ;;  %v3886_v43 = vpop.f32.mrb[144].mxu1  ;;  %v10281_v29 = vpop.eup %10280  ;;  %10290 = vpow2.f32 %v8110_v22  ;;  %v8113_v3 = vmul.f32 -1.442695, %v5457_v46  ;;  %v15978_v24 = vld [vmem:[#allocation78_spill] sm:$0xff]  ;;  %v5360_v11 = vsel %vm702_vm1, %v5262_v56, %v15979_v9  ;;  %v5263_v19 = vsel %vm1445_vm2, %v14525_v36, %v13458_v21 }
 0x5b1   : > { %v4972_v41 = vpop.permute.xlu1 %4971  ;;  %v3887_v50 = vadd.f32 %v14422_v45, %v3886_v43  ;;  %v10058_v1 = vpop.f32.mrb[145].mxu1  ;;  %v14667_v8 = vadd.f32 %v14422_v45, %v15978_v24  ;;  %v5843_v38 = vadd.f32 1.0, %v10281_v29 }
 0x5b2   : > { %v5456_v55 = vsel %vm5449_vm12, %v5357_v54, %v4972_v41  ;;  %v3889_v22 = vpop.f32.mrb[146].mxu1  ;;  %v10283_v20 = vpop.eup %10282  ;;  %10292 = vpow2.f32 %v8113_v3  ;;  %v15980_v3 = vld [vmem:[#allocation81_spill] sm:$0xff] }
 0x5b3   : > { %v8112_v46 = vmul.f32 -1.442695, %v5456_v55  ;;  %v4978_v43 = vpop.permute.xlu0 %4977  ;;  %v3890_v1 = vadd.f32 %v14422_v45, %v3889_v22  ;;  %v10059_v57 = vpop.f32.mrb[147].mxu1  ;;  %5059 = vrot.lane.b32.xlu1 %v3887_v50, %s10787_s21  ;;  %10294 = vrcp.f32 %v5843_v38  ;;  %v5842_v52 = vadd.f32 1.0, %v10283_v20  ;;  %v15981_v41 = vld [vmem:[#allocation153_spill] sm:$0xff]  ;;  %v15982_v22 = vld [vmem:[#allocation82_spill] sm:$0xff] }
 0x5b4   : > { %v5459_v24 = vsel %vm5449_vm12, %v5360_v11, %v4978_v43  ;;  %v10285_v29 = vpop.eup %10284  ;;  %v14683_v54 = vadd.f32 %v14422_v45, %v15980_v3  ;;  %v5359_v57 = vsel %vm702_vm1, %v5261_v4, %v15981_v41  ;;  %v14694_v20 = vadd.f32 %v14422_v45, %v15982_v22  ;;  %v15983_v4 = vld [vmem:[#allocation156_spill] sm:$0xff]  ;;  %v15984_v43 = vld [vmem:[#allocation171_spill] sm:$0xff] }
 0x5b5   : > { %10296 = vpow2.f32 %v8112_v46  ;;  %v8115_v56 = vmul.f32 -1.442695, %v5459_v24  ;;  %v4976_v55 = vpop.permute.xlu1 %4975  ;;  %5061 = vrot.lane.b32.xlu0 %v3890_v1, %s10787_s21  ;;  %v5845_v44 = vadd.f32 1.0, %v10285_v29  ;;  %v5362_v9 = vsel %vm702_vm1, %v5264_v60, %v15983_v4  ;;  %v15985_v3 = vld [vmem:[#allocation155_spill] sm:$0xff]  ;;  %v15987_v4 = vld [vmem:[#allocation158_spill] sm:$0xff] }
 0x5b6   : > { %10298 = vrcp.f32 %v5842_v52  ;;  %v5458_v50 = vsel %vm5449_vm12, %v5359_v57, %v4976_v55  ;;  %v10287_v38 = vpop.eup %10286  ;;  %v5266_v21 = vsel %vm1445_vm2, %v14539_v16, %v15984_v43  ;;  %v15986_v55 = vld [vmem:[#allocation170_spill] sm:$0xff] }
 0x5b7   : > { %10300 = vpow2.f32 %v8115_v56  ;;  %v8114_v46 = vmul.f32 -1.442695, %v5458_v50  ;;  %v4982_v11 = vpop.permute.xlu0 %4981  ;;  %v5844_v36 = vadd.f32 1.0, %v10287_v38  ;;  %v5361_v56 = vsel %vm702_vm1, %v5263_v19, %v15985_v3 }
 0x5b8   : > { %10302 = vrcp.f32 %v5845_v44  ;;  %v5461_v1 = vsel %vm5449_vm12, %v5362_v9, %v4982_v11  ;;  %v3894_v52 = vpop.f32.mrb[148].mxu1  ;;  %v10289_v24 = vpop.eup %10288  ;;  %v5265_v16 = vsel %vm1445_vm2, %v14535_v37, %v15986_v55  ;;  %v5364_v19 = vsel %vm702_vm1, %v5266_v21, %v15987_v4  ;;  %v15989_v55 = vld [vmem:[#allocation161_spill] sm:$0xff] }
 0x5b9   : > { %10304 = vpow2.f32 %v8114_v46  ;;  %v8117_v29 = vmul.f32 -1.442695, %v5461_v1  ;;  %v4980_v41 = vpop.permute.xlu1 %4979  ;;  %v3895_v60 = vadd.f32 %v14422_v45, %v3894_v52  ;;  %v10062_v57 = vpop.f32.mrb[149].mxu1  ;;  %v5847_v44 = vadd.f32 1.0, %v10289_v24 }
 0x5ba   : > { %10306 = vrcp.f32 %v5844_v36  ;;  %v5460_v50 = vsel %vm5449_vm12, %v5361_v56, %v4980_v41  ;;  %v3897_v38 = vpop.f32.mrb[150].mxu1  ;;  %v10291_v22 = vpop.eup %10290  ;;  %v5268_v37 = vsel %vm1445_vm2, %v14551_v28, %v13552_v18  ;;  %v5267_v21 = vsel %vm1445_vm2, %v14547_v58, %v13541_v5 }
 0x5bb   : > { %10308 = vpow2.f32 %v8117_v29  ;;  %v8116_v46 = vmul.f32 -1.442695, %v5460_v50  ;;  %v4986_v9 = vpop.permute.xlu0 %4985  ;;  %v3898_v11 = vadd.f32 %v14422_v45, %v3897_v38  ;;  %v10063_v43 = vpop.f32.mrb[151].mxu1  ;;  %5063 = vrot.lane.b32.xlu1 %v3895_v60, %s10787_s21  ;;  %v5846_v36 = vadd.f32 1.0, %v10291_v22  ;;  %v15988_v29 = vld [vmem:[#allocation157_spill] sm:$0xff] }
 0x5bc   : > { %10310 = vrcp.f32 %v5847_v44  ;;  %v5463_v1 = vsel %vm5449_vm12, %v5364_v19, %v4986_v9  ;;  %v10293_v52 = vpop.eup %10292  ;;  %v5363_v3 = vsel %vm702_vm1, %v5265_v16, %v15988_v29  ;;  %v5269_v18 = vsel %vm1445_vm2, %v14558_v62, %v13584_v63  ;;  %v15990_v62 = vld [vmem:[#allocation160_spill] sm:$0xff]  ;;  %v15991_v29 = vld [vmem:[#allocation165_spill] sm:$0xff] }
 0x5bd   : > { %10312 = vpow2.f32 %v8116_v46  ;;  %v8119_v24 = vmul.f32 -1.442695, %v5463_v1  ;;  %v4984_v56 = vpop.permute.xlu1 %4983  ;;  %5065 = vrot.lane.b32.xlu0 %v3898_v11, %s10787_s21  ;;  %v10295_v41 = vpop.eup %10294  ;;  %v5849_v28 = vadd.f32 1.0, %v10293_v52  ;;  %v5270_v5 = vsel %vm1445_vm2, %v14562_v61, %v13595_v32 }
 0x5be   : > { %10314 = vrcp.f32 %v5846_v36  ;;  %v5462_v60 = vsel %vm5449_vm12, %v5363_v3, %v4984_v56  ;;  %v5366_v16 = vsel %vm702_vm1, %v5268_v37, %v15989_v55  ;;  %v5365_v22 = vsel %vm702_vm1, %v5267_v21, %v15990_v62 }
 0x5bf   : > { %v10297_v57 = vpop.eup %10296  ;;  %10316 = vpow2.f32 %v8119_v24  ;;  %v8118_v58 = vmul.f32 -1.442695, %v5462_v60  ;;  %v4990_v44 = vpop.permute.xlu0 %4989  ;;  %v5272_v37 = vsel %vm1445_vm2, %v14573_v40, %v13629_v27  ;;  %v5368_v3 = vsel %vm702_vm1, %v5270_v5, %v15991_v29 }
 0x5c0   : > { %v10299_v50 = vpop.eup %10298  ;;  %10318 = vrcp.f32 %v5849_v28  ;;  %v5848_v38 = vadd.f32 1.0, %v10297_v57  ;;  %v5465_v63 = vsel %vm5449_vm12, %v5366_v16, %v4990_v44  ;;  %v3902_v46 = vpop.f32.mrb[152].mxu1  ;;  %v5271_v28 = vsel %vm1445_vm2, %v14569_v7, %v13621_v33  ;;  %v15992_v16 = vld [vmem:[#allocation164_spill] sm:$0xff]  ;;  %v15993_v7 = vld [vmem:[#allocation167_spill] sm:$0xff] }
 0x5c1   : > { %v10301_v4 = vpop.eup %10300  ;;  %v8417_v19 = vpack.c.bf16 %v10295_v41, %v10299_v50  ;;  %10320 = vpow2.f32 %v8118_v58  ;;  %v8121_v32 = vmul.f32 -1.442695, %v5465_v63  ;;  %v4988_v61 = vpop.permute.xlu1 %4987  ;;  %v3903_v9 = vadd.f32 %v14422_v45, %v3902_v46 }
 0x5c2   : > { %v10066_v11 = vpop.f32.mrb[153].mxu1  ;;  %v10303_v43 = vpop.eup %10302  ;;  %10322 = vrcp.f32 %v5848_v38  ;;  %v5851_v36 = vadd.f32 1.0, %v10301_v4  ;;  %v5464_v1 = vsel %vm5449_vm12, %v5365_v22, %v4988_v61  ;;  %v5367_v44 = vsel %vm702_vm1, %v5269_v18, %v15992_v16 }
 0x5c3   : > { %v3905_v52 = vpop.f32.mrb[154].mxu1  ;;  %v10305_v21 = vpop.eup %10304  ;;  %8418 = vst [vmem:[%s14746_s23] sm:$0xff] %v8417_v19   ;;  %10324 = vpow2.f32 %v8121_v32  ;;  %v8120_v24 = vmul.f32 -1.442695, %v5464_v1  ;;  %5067 = vrot.lane.b32.xlu1 %v3903_v9, %s10787_s21  ;;  %v5370_v62 = vsel %vm702_vm1, %v5272_v37, %v15993_v7  ;;  %v5274_v46 = vsel %vm1445_vm2, %v14586_v31, %v13654_v30  ;;  %v15994_v19 = vld [vmem:[#allocation166_spill] sm:$0xff] }
 0x5c4   : > { %v4994_v56 = vpop.permute.xlu0 %4993  ;;  %v3906_v41 = vadd.f32 %v14422_v45, %v3905_v52  ;;  %v10067_v27 = vpop.f32.mrb[155].mxu1  ;;  %10326 = vrcp.f32 %v5851_v36  ;;  %v5850_v60 = vadd.f32 1.0, %v10305_v21  ;;  %v5369_v32 = vsel %vm702_vm1, %v5271_v28, %v15994_v19 }
 0x5c5   : > { %v10307_v40 = vpop.eup %10306  ;;  %v5467_v57 = vsel %vm5449_vm12, %v5368_v3, %v4994_v56  ;;  %10328 = vpow2.f32 %v8120_v24  ;;  %v4992_v50 = vpop.permute.xlu1 %4991  ;;  %v5273_v9 = vsel %vm1445_vm2, %v14580_v14, %v13647_v53  ;;  %v15995_v53 = vld [vmem:[#allocation169_spill] sm:$0xff]  ;;  %v5275_v27 = vsel %vm1445_vm2, %v14590_v51, %v13670_v34 }
 0x5c6   : > { %v10309_v58 = vpop.eup %10308  ;;  %v8422_v55 = vpack.c.bf16 %v10303_v43, %v10307_v40  ;;  %v8123_v5 = vmul.f32 -1.442695, %v5467_v57  ;;  %5069 = vrot.lane.b32.xlu0 %v3906_v41, %s10787_s21  ;;  %10330 = vrcp.f32 %v5850_v60  ;;  %v5466_v33 = vsel %vm5449_vm12, %v5367_v44, %v4992_v50  ;;  %v15996_v50 = vld [vmem:[#allocation168_spill] sm:$0xff] }
 0x5c7   : > { %v10311_v38 = vpop.eup %10310  ;;  %v5853_v63 = vadd.f32 1.0, %v10309_v58  ;;  %v8122_v4 = vmul.f32 -1.442695, %v5466_v33  ;;  %v5372_v14 = vsel %vm702_vm1, %v5274_v46, %v15995_v53  ;;  %v5278_v46 = vsel %vm1445_vm2, %v14615_v13, %v13696_v25 }
 0x5c8   : > { %v10313_v22 = vpop.eup %10312  ;;  %8803 = vst [vmem:[%s14746_s23 + $0x8] sm:$0xff] %v8422_v55   ;;  %10332 = vpow2.f32 %v8123_v5  ;;  %v4998_v18 = vpop.permute.xlu0 %4997  ;;  %v5276_v55 = vsel %vm1445_vm2, %v14600_v47, %v13676_v12  ;;  %v15997_v47 = vld [vmem:[#allocation172_spill] sm:$0xff] }
 0x5c9   : > { %v10315_v61 = vpop.eup %10314  ;;  %10334 = vrcp.f32 %v5853_v63  ;;  %v5852_v11 = vadd.f32 1.0, %v10313_v22  ;;  %v5469_v43 = vsel %vm5449_vm12, %v5370_v62, %v4998_v18  ;;  %v3910_v37 = vpop.f32.mrb[156].mxu1  ;;  %v5373_v62 = vsel %vm702_vm1, %v5275_v27, %v15997_v47  ;;  %v15998_v18 = vld [vmem:[#allocation173_spill] sm:$0xff] }
 0x5ca   : > { %v10317_v36 = vpop.eup %10316  ;;  %v8427_v30 = vpack.c.bf16 %v10311_v38, %v10315_v61  ;;  %10336 = vpow2.f32 %v8122_v4  ;;  %v8125_v31 = vmul.f32 -1.442695, %v5469_v43  ;;  %v4996_v1 = vpop.permute.xlu1 %4995  ;;  %v3911_v52 = vadd.f32 %v14422_v45, %v3910_v37 }
 0x5cb   : > { %v10070_v21 = vpop.f32.mrb[157].mxu1  ;;  %v10319_v24 = vpop.eup %10318  ;;  %10338 = vrcp.f32 %v5852_v11  ;;  %v5855_v29 = vadd.f32 1.0, %v10317_v36  ;;  %v5468_v3 = vsel %vm5449_vm12, %v5369_v32, %v4996_v1  ;;  %v5371_v38 = vsel %vm702_vm1, %v5273_v9, %v15996_v50 }
 0x5cc   : > { %v3913_v56 = vpop.f32.mrb[158].mxu1  ;;  %v10321_v41 = vpop.eup %10320  ;;  %8804 = vst [vmem:[%s14746_s23 + $0x10] sm:$0xff] %v8427_v30   ;;  %10340 = vpow2.f32 %v8125_v31  ;;  %v8124_v40 = vmul.f32 -1.442695, %v5468_v3  ;;  %5071 = vrot.lane.b32.xlu1 %v3911_v52, %s10787_s21  ;;  %v5374_v19 = vsel %vm702_vm1, %v5276_v55, %v15998_v18  ;;  %v5277_v9 = vsel %vm1445_vm2, %v14604_v6, %v13690_v17 }
 0x5cd   : > { %v5002_v28 = vpop.permute.xlu0 %5001  ;;  %v3914_v60 = vadd.f32 %v14422_v45, %v3913_v56  ;;  %v10071_v57 = vpop.f32.mrb[159].mxu1  ;;  %10342 = vrcp.f32 %v5855_v29  ;;  %v5854_v5 = vadd.f32 1.0, %v10321_v41  ;;  %v5376_v17 = vsel %vm702_vm1, %v5278_v46, %v13572_v39 }
 0x5ce   : > { %v10323_v58 = vpop.eup %10322  ;;  %v5471_v16 = vsel %vm5449_vm12, %v5372_v14, %v5002_v28  ;;  %10344 = vpow2.f32 %v8124_v40  ;;  %v5000_v63 = vpop.permute.xlu1 %4999  ;;  %v5279_v3 = vsel %vm1445_vm2, %v14619_v42, %v13710_v49  ;;  %v5280_v39 = vsel %vm1445_vm2, %v14627_v23, %v13716_v2 }
 0x5cf   : > { %v10325_v34 = vpop.eup %10324  ;;  %v8432_v51 = vpack.c.bf16 %v10319_v24, %v10323_v58  ;;  %v8127_v44 = vmul.f32 -1.442695, %v5471_v16  ;;  %5073 = vrot.lane.b32.xlu0 %v3914_v60, %s10787_s21  ;;  %10346 = vrcp.f32 %v5854_v5  ;;  %v5470_v12 = vsel %vm5449_vm12, %v5371_v38, %v5000_v63  ;;  %v15999_v60 = vld [vmem:[#allocation174_spill] sm:$0xff] }
 0x5d0   : > { %v10327_v33 = vpop.eup %10326  ;;  %v5857_v7 = vadd.f32 1.0, %v10325_v34  ;;  %v8126_v4 = vmul.f32 -1.442695, %v5470_v12  ;;  %v3918_v37 = vpop.f32.mrb[160].mxu1  ;;  %v5375_v57 = vsel %vm702_vm1, %v5277_v9, %v15999_v60  ;;  %v5377_v23 = vsel %vm702_vm1, %v5279_v3, %v13604_v59 }
 0x5d1   : > { %v10329_v22 = vpop.eup %10328  ;;  %8805 = vst [vmem:[%s14746_s23 + $0x18] sm:$0xff] %v8432_v51   ;;  %10348 = vpow2.f32 %v8127_v44  ;;  %v5006_v32 = vpop.permute.xlu0 %5005  ;;  %v3919_v31 = vadd.f32 %v14422_v45, %v3918_v37  ;;  %v5282_v51 = vsel %vm1445_vm2, %v14638_v15, %v13736_v26  ;;  %v5378_v50 = vsel %vm702_vm1, %v5280_v39, %v13612_v35  ;;  %v16006_v39 = vld [vmem:[#allocation43_spill] sm:$0xff] }
 0x5d2   : > { %v10331_v61 = vpop.eup %10330  ;;  %10350 = vrcp.f32 %v5857_v7  ;;  %v5856_v11 = vadd.f32 1.0, %v10329_v22  ;;  %v5473_v43 = vsel %vm5449_vm12, %v5374_v19, %v5006_v32  ;;  %v5004_v13 = vpop.permute.xlu1 %5003 }
 0x5d3   : > { %v10333_v36 = vpop.eup %10332  ;;  %v8437_v25 = vpack.c.bf16 %v10327_v33, %v10331_v61  ;;  %10352 = vpow2.f32 %v8126_v4  ;;  %v8129_v30 = vmul.f32 -1.442695, %v5473_v43  ;;  %v10074_v1 = vpop.f32.mrb[161].mxu1  ;;  %v5472_v24 = vsel %vm5449_vm12, %v5373_v62, %v5004_v13  ;;  %5075 = vrot.lane.b32.xlu1 %v3919_v31, %s10787_s21  ;;  %v16001_v61 = vld [vmem:[#allocation89_spill] sm:$0xff]  ;;  %v16002_v13 = vld [vmem:[#allocation186_spill] sm:$0xff] }
 0x5d4   : > { %v10335_v52 = vpop.eup %10334  ;;  %10354 = vrcp.f32 %v5856_v11  ;;  %v5859_v21 = vadd.f32 1.0, %v10333_v36  ;;  %v3921_v6 = vpop.f32.mrb[162].mxu1  ;;  %v8128_v53 = vmul.f32 -1.442695, %v5472_v24  ;;  %v5281_v33 = vsel %vm1445_vm2, %v14634_v48, %v13730_v10  ;;  %v16000_v10 = vld [vmem:[#allocation176_spill] sm:$0xff]  ;;  %v16004_v24 = vld [vmem:[#allocation175_spill] sm:$0xff] }
 0x5d5   : > { %v10337_v29 = vpop.eup %10336  ;;  %8806 = vst [vmem:[%s14746_s23 + $0x20] sm:$0xff] %v8437_v25   ;;  %10356 = vpow2.f32 %v8129_v30  ;;  %v5010_v14 = vpop.permute.xlu0 %5009  ;;  %v3922_v56 = vadd.f32 %v14422_v45, %v3921_v6  ;;  %v5380_v48 = vsel %vm702_vm1, %v5282_v51, %v16000_v10  ;;  %v5283_v9 = vsel %vm1445_vm2, %v14646_v0, %v16001_v61  ;;  %v16003_v30 = vld [vmem:[#allocation10_spill] sm:$0xff]  ;;  %v16012_v10 = vld [vmem:[#allocation192_spill] sm:$0xff] }
 0x5d6   : > { %v10075_v41 = vpop.f32.mrb[163].mxu1  ;;  %v10339_v27 = vpop.eup %10338  ;;  %10358 = vrcp.f32 %v5859_v21  ;;  %v5858_v40 = vadd.f32 1.0, %v10337_v29  ;;  %v5475_v28 = vsel %vm5449_vm12, %v5376_v17, %v5010_v14  ;;  %v5284_v31 = vsel %vm1445_vm2, %v16003_v30, %v16002_v13  ;;  %v16014_v13 = vld [vmem:[#allocation86_spill] sm:$0xff] }
 0x5d7   : > { %v10341_v49 = vpop.eup %10340  ;;  %v8442_v42 = vpack.c.bf16 %v10335_v52, %v10339_v27  ;;  %10360 = vpow2.f32 %v8128_v53  ;;  %v5008_v58 = vpop.permute.xlu1 %5007  ;;  %v8131_v55 = vmul.f32 -1.442695, %v5475_v28  ;;  %5077 = vrot.lane.b32.xlu0 %v3922_v56, %s10787_s21  ;;  %v5379_v17 = vsel %vm702_vm1, %v5281_v33, %v16004_v24  ;;  %v16005_v56 = vld [vmem:[#allocation177_spill] sm:$0xff] }
 0x5d8   : > { %v10343_v5 = vpop.eup %10342  ;;  %10362 = vrcp.f32 %v5858_v40  ;;  %v5861_v16 = vadd.f32 1.0, %v10341_v49  ;;  %v5474_v2 = vsel %vm5449_vm12, %v5375_v57, %v5008_v58  ;;  %v3926_v12 = vpop.f32.mrb[164].mxu1  ;;  %v5381_v41 = vsel %vm702_vm1, %v5283_v9, %v16005_v56  ;;  %v16007_v40 = vld [vmem:[#allocation11_spill] sm:$0xff]  ;;  %v16013_v9 = vld [vmem:[#allocation93_spill] sm:$0xff] }
 0x5d9   : > { %v10345_v34 = vpop.eup %10344  ;;  %8807 = vst [vmem:[%s14746_s23 + $0x28] sm:$0xff] %v8442_v42   ;;  %v8130_v44 = vmul.f32 -1.442695, %v5474_v2  ;;  %10364 = vpow2.f32 %v8131_v55  ;;  %v5014_v38 = vpop.permute.xlu0 %5013  ;;  %v3927_v22 = vadd.f32 %v14422_v45, %v3926_v12  ;;  %v5285_v28 = vsel %vm1445_vm2, %v16007_v40, %v16006_v39  ;;  %v16008_v42 = vld [vmem:[#allocation178_spill] sm:$0xff]  ;;  %v16009_v55 = vld [vmem:[#allocation189_spill] sm:$0xff] }
 0x5da   : > { %v10347_v63 = vpop.eup %10346  ;;  %10366 = vrcp.f32 %v5861_v16  ;;  %v5860_v7 = vadd.f32 1.0, %v10345_v34  ;;  %v5477_v59 = vsel %vm5449_vm12, %v5378_v50, %v5014_v38  ;;  %v10078_v35 = vpop.f32.mrb[165].mxu1  ;;  %v5382_v60 = vsel %vm702_vm1, %v5284_v31, %v16008_v42  ;;  %v14894_v40 = vld [vmem:[%s15558_s6] ss:$0 sm:$0xff] }
 0x5db   : > { %v10349_v47 = vpop.eup %10348  ;;  %v8447_v26 = vpack.c.bf16 %v10343_v5, %v10347_v63  ;;  %10368 = vpow2.f32 %v8130_v44  ;;  %v5012_v15 = vpop.permute.xlu1 %5011  ;;  %v8133_v62 = vmul.f32 -1.442695, %v5477_v59  ;;  %5079 = vrot.lane.b32.xlu1 %v3927_v22, %s10787_s21  ;;  %v5286_v5 = vsel %vm1445_vm2, %v14667_v8, %v16009_v55  ;;  %v16010_v8 = vld [vmem:[#allocation179_spill] sm:$0xff] }
 0x5dc   : > { %v10351_v46 = vpop.eup %10350  ;;  %10370 = vrcp.f32 %v5860_v7  ;;  %v5863_v4 = vadd.f32 1.0, %v10349_v47  ;;  %v5476_v18 = vsel %vm5449_vm12, %v5377_v23, %v5012_v15  ;;  %v3929_v19 = vpop.f32.mrb[166].mxu1  ;;  %v5383_v12 = vsel %vm702_vm1, %v5285_v28, %v16010_v8 }
 0x5dd   : > { %v10353_v32 = vpop.eup %10352  ;;  %8808 = vst [vmem:[%s14746_s23 + $0x30] sm:$0xff] %v8447_v26   ;;  %v8132_v11 = vmul.f32 -1.442695, %v5476_v18  ;;  %10372 = vpow2.f32 %v8133_v62  ;;  %v5018_v43 = vpop.permute.xlu0 %5017  ;;  %v3930_v37 = vadd.f32 %v14422_v45, %v3929_v19  ;;  %v16011_v62 = vld [vmem:[#allocation180_spill] sm:$0xff] }
 0x5de   : > { %v10079_v36 = vpop.f32.mrb[167].mxu1  ;;  %v10355_v25 = vpop.eup %10354  ;;  %10374 = vrcp.f32 %v5863_v4  ;;  %v5862_v1 = vadd.f32 1.0, %v10353_v32  ;;  %v5479_v52 = vsel %vm5449_vm12, %v5380_v48, %v5018_v43  ;;  %v5384_v22 = vsel %vm702_vm1, %v5286_v5, %v16011_v62 }
 0x5df   : > { %v10357_v0 = vpop.eup %10356  ;;  %v8452_v21 = vpack.c.bf16 %v10351_v46, %v10355_v25  ;;  %10376 = vpow2.f32 %v8132_v11  ;;  %v5016_v6 = vpop.permute.xlu1 %5015  ;;  %v8135_v29 = vmul.f32 -1.442695, %v5479_v52  ;;  %5081 = vrot.lane.b32.xlu0 %v3930_v37, %s10787_s21  ;;  %v5288_v48 = vsel %vm1445_vm2, %v14694_v20, %v16012_v10  ;;  %v16015_v52 = vld [vmem:[#allocation87_spill] sm:$0xff] }
 0x5e0   : > { %v10359_v3 = vpop.eup %10358  ;;  %10378 = vrcp.f32 %v5862_v1  ;;  %v5865_v53 = vadd.f32 1.0, %v10357_v0  ;;  %v5478_v14 = vsel %vm5449_vm12, %v5379_v17, %v5016_v6  ;;  %v3934_v23 = vpop.f32.mrb[168].mxu1  ;;  %v5287_v11 = vsel %vm1445_vm2, %v14683_v54, %v16013_v9 }
 0x5e1   : > { %v10361_v27 = vpop.eup %10360  ;;  %8809 = vst [vmem:[%s14746_s23 + $0x38] sm:$0xff] %v8452_v21   ;;  %v8134_v49 = vmul.f32 -1.442695, %v5478_v14  ;;  %10380 = vpow2.f32 %v8135_v29  ;;  %v5022_v57 = vpop.permute.xlu0 %5021  ;;  %v3935_v38 = vadd.f32 %v14422_v45, %v3934_v23  ;;  %v1772_v20 = vadd.f32 %v14422_v45, %v16014_v13  ;;  %v16016_v21 = vld [vmem:[#allocation182_spill] sm:$0xff] }
 0x5e2   : > { %v10363_v58 = vpop.eup %10362  ;;  %v5864_v16 = vadd.f32 1.0, %v10361_v27  ;;  %10382 = vrcp.f32 %v5865_v53  ;;  %v5481_v2 = vsel %vm5449_vm12, %v5382_v60, %v5022_v57  ;;  %v10082_v63 = vpop.f32.mrb[169].mxu1  ;;  %v1775_v0 = vadd.f32 %v14422_v45, %v16015_v52  ;;  %v16018_v60 = vld [vmem:[#allocation47_spill] sm:$0xff] }
 0x5e3   : > { %v10365_v34 = vpop.eup %10364  ;;  %v8457_v51 = vpack.c.bf16 %v10359_v3, %v10363_v58  ;;  %10384 = vpow2.f32 %v8134_v49  ;;  %v5020_v44 = vpop.permute.xlu1 %5019  ;;  %v8137_v50 = vmul.f32 -1.442695, %v5481_v2  ;;  %5083 = vrot.lane.b32.xlu1 %v3935_v38, %s10787_s21  ;;  %v5386_v24 = vsel %vm702_vm1, %v5288_v48, %v16016_v21  ;;  %v16017_v3 = vld [vmem:[#allocation181_spill] sm:$0xff] }
 0x5e4   : > { %v10367_v33 = vpop.eup %10366  ;;  %10386 = vrcp.f32 %v5864_v16  ;;  %v5867_v7 = vadd.f32 1.0, %v10365_v34  ;;  %v5480_v59 = vsel %vm5449_vm12, %v5381_v41, %v5020_v44  ;;  %v3937_v47 = vpop.f32.mrb[170].mxu1  ;;  %v5385_v53 = vsel %vm702_vm1, %v5287_v11, %v16017_v3  ;;  %v16019_v44 = vld [vmem:[#allocation195_spill] sm:$0xff] }
 0x5e5   : > { %v10369_v26 = vpop.eup %10368  ;;  %8810 = vst [vmem:[%s14746_s23 + $0x40] sm:$0xff] %v8457_v51   ;;  %v8136_v15 = vmul.f32 -1.442695, %v5480_v59  ;;  %10388 = vpow2.f32 %v8137_v50  ;;  %v5026_v35 = vpop.permute.xlu0 %5025  ;;  %v3938_v46 = vadd.f32 %v14422_v45, %v3937_v47  ;;  %v5289_v57 = vsel %vm1445_vm2, %v1772_v20, %v16018_v60  ;;  %v16024_v20 = vld [vmem:[#allocation97_spill] sm:$0xff] }
 0x5e6   : > { %v10083_v4 = vpop.f32.mrb[171].mxu1  ;;  %v10371_v18 = vpop.eup %10370  ;;  %v5866_v19 = vadd.f32 1.0, %v10369_v26  ;;  %10390 = vrcp.f32 %v5867_v7  ;;  %v5483_v32 = vsel %vm5449_vm12, %v5384_v22, %v5026_v35  ;;  %v5290_v50 = vsel %vm1445_vm2, %v1775_v0, %v16019_v44  ;;  %v16020_v7 = vld [vmem:[#allocation183_spill] sm:$0xff]  ;;  %v16021_v22 = vld [vmem:[#allocation184_spill] sm:$0xff] }
 0x5e7   : > { %v10373_v61 = vpop.eup %10372  ;;  %v8462_v43 = vpack.c.bf16 %v10367_v33, %v10371_v18  ;;  %10392 = vpow2.f32 %v8136_v15  ;;  %v5024_v37 = vpop.permute.xlu1 %5023  ;;  %v8139_v36 = vmul.f32 -1.442695, %v5483_v32  ;;  %5085 = vrot.lane.b32.xlu0 %v3938_v46, %s10787_s21  ;;  %v5387_v59 = vsel %vm702_vm1, %v5289_v57, %v16020_v7  ;;  %v16022_v18 = vld [vmem:[#allocation91_spill] sm:$0xff] }
 0x5e8   : > { %v10375_v25 = vpop.eup %10374  ;;  %10394 = vrcp.f32 %v5866_v19  ;;  %v5869_v30 = vadd.f32 1.0, %v10373_v61  ;;  %v5482_v31 = vsel %vm5449_vm12, %v5383_v12, %v5024_v37  ;;  %v3942_v56 = vpop.f32.mrb[172].mxu1  ;;  %v5388_v35 = vsel %vm702_vm1, %v5290_v50, %v16021_v22 }
 0x5e9   : > { %v10377_v1 = vpop.eup %10376  ;;  %8811 = vst [vmem:[%s14746_s23 + $0x48] sm:$0xff] %v8462_v43   ;;  %v8138_v54 = vmul.f32 -1.442695, %v5482_v31  ;;  %10396 = vpow2.f32 %v8139_v36  ;;  %v5030_v17 = vpop.permute.xlu0 %5029  ;;  %v3943_v28 = vadd.f32 %v14894_v40, %v3942_v56  ;;  %v1780_v10 = vadd.f32 %v14894_v40, %v16022_v18 }
 0x5ea   : > { %v10379_v6 = vpop.eup %10378  ;;  %v5868_v29 = vadd.f32 1.0, %v10377_v1  ;;  %10398 = vrcp.f32 %v5869_v30  ;;  %v5485_v14 = vsel %vm5449_vm12, %v5386_v24, %v5030_v17  ;;  %v10086_v49 = vpop.f32.mrb[173].mxu1  ;;  %v16025_v24 = vld [vmem:[#allocation198_spill] sm:$0xff] }
 0x5eb   : > { %v10381_v41 = vpop.eup %10380  ;;  %v8467_v27 = vpack.c.bf16 %v10375_v25, %v10379_v6  ;;  %10400 = vpow2.f32 %v8138_v54  ;;  %v5028_v45 = vpop.permute.xlu1 %5027  ;;  %v8141_v39 = vmul.f32 -1.442695, %v5485_v14  ;;  %5087 = vrot.lane.b32.xlu1 %v3943_v28, %s10787_s21  ;;  %v16023_v25 = vld [vmem:[#allocation92_spill] sm:$0xff]  ;;  %v5291_v30 = vsel %vm1445_vm2, %v1780_v10, %v16024_v20  ;;  %v16027_v49 = vld [vmem:[#allocation185_spill] sm:$0xff] }
 0x5ec   : > { %v10383_v42 = vpop.eup %10382  ;;  %10402 = vrcp.f32 %v5868_v29  ;;  %v5871_v58 = vadd.f32 1.0, %v10381_v41  ;;  %v5484_v55 = vsel %vm5449_vm12, %v5385_v53, %v5028_v45  ;;  %v3945_v5 = vpop.f32.mrb[174].mxu1  ;;  %v1783_v13 = vadd.f32 %v14894_v40, %v16023_v25  ;;  %v16026_v53 = vld [vmem:[#allocation85_spill] sm:$0xff] }
 0x5ed   : > { %v10385_v16 = vpop.eup %10384  ;;  %8812 = vst [vmem:[%s14746_s23 + $0x50] sm:$0xff] %v8467_v27   ;;  %v8140_v2 = vmul.f32 -1.442695, %v5484_v55  ;;  %10404 = vpow2.f32 %v8141_v39  ;;  %v3946_v23 = vadd.f32 %v14894_v40, %v3945_v5  ;;  %v10087_v34 = vpop.f32.mrb[175].mxu1  ;;  %v5389_v14 = vsel %vm702_vm1, %v5291_v30, %v16026_v53 }
 0x5ee   : > { %v10387_v51 = vpop.eup %10386  ;;  %v5870_v38 = vadd.f32 1.0, %v10385_v16  ;;  %10406 = vrcp.f32 %v5871_v58  ;;  %v5292_v17 = vsel %vm1445_vm2, %v1783_v13, %v16025_v24  ;;  %v16028_v58 = vld [vmem:[#allocation96_spill] sm:$0xff]  ;;  %v16036_v24 = vld [vmem:[#allocation101_spill] sm:$0xff] }
 0x5ef   : > { %v10389_v63 = vpop.eup %10388  ;;  %v8472_v33 = vpack.c.bf16 %v10383_v42, %v10387_v51  ;;  %10408 = vpow2.f32 %v8140_v2  ;;  %5089 = vrot.lane.b32.xlu0 %v3946_v23, %s10787_s21  ;;  %v5032_v8 = vpop.permute.xlu1 %5031  ;;  %v5390_v42 = vsel %vm702_vm1, %v5292_v17, %v16027_v49  ;;  %v1788_v55 = vadd.f32 %v14894_v40, %v16028_v58 }
 0x5f0   : > { %v10391_v12 = vpop.eup %10390  ;;  %10410 = vrcp.f32 %v5870_v38  ;;  %v5873_v47 = vadd.f32 1.0, %v10389_v63  ;;  %v5486_v26 = vsel %vm5449_vm12, %v5387_v59, %v5032_v8  ;;  %v5034_v46 = vpop.permute.xlu0 %5033  ;;  %v16029_v38 = vld [vmem:[#allocation98_spill] sm:$0xff] }
 0x5f1   : > { %v10393_v15 = vpop.eup %10392  ;;  %8813 = vst [vmem:[%s14746_s23 + $0x58] sm:$0xff] %v8472_v33   ;;  %v8142_v62 = vmul.f32 -1.442695, %v5486_v26  ;;  %v5487_v19 = vsel %vm5449_vm12, %v5388_v35, %v5034_v46  ;;  %v3950_v32 = vpop.f32.mrb[176].mxu1  ;;  %v1791_v63 = vadd.f32 %v14894_v40, %v16029_v38  ;;  %v16030_v33 = vld [vmem:[#allocation51_spill] sm:$0xff] }
 0x5f2   : > { %v10395_v4 = vpop.eup %10394  ;;  %v5872_v48 = vadd.f32 1.0, %v10393_v15  ;;  %10412 = vrcp.f32 %v5873_v47  ;;  %v8143_v11 = vmul.f32 -1.442695, %v5487_v19  ;;  %v3951_v43 = vadd.f32 %v14894_v40, %v3950_v32  ;;  %v10090_v37 = vpop.f32.mrb[177].mxu1  ;;  %v16031_v15 = vld [vmem:[#allocation201_spill] sm:$0xff] }
 0x5f3   : > { %v10397_v61 = vpop.eup %10396  ;;  %v8477_v9 = vpack.c.bf16 %v10391_v12, %v10395_v4  ;;  %10414 = vpow2.f32 %v8142_v62  ;;  %v3953_v1 = vpop.f32.mrb[178].mxu1  ;;  %v5293_v7 = vsel %vm1445_vm2, %v1788_v55, %v16030_v33  ;;  %v5294_v62 = vsel %vm1445_vm2, %v1791_v63, %v16031_v15  ;;  %v16032_v4 = vld [vmem:[#allocation187_spill] sm:$0xff] }
 0x5f4   : > { %v10399_v36 = vpop.eup %10398  ;;  %10416 = vrcp.f32 %v5872_v48  ;;  %v5875_v31 = vadd.f32 1.0, %v10397_v61  ;;  %v3954_v0 = vadd.f32 %v14894_v40, %v3953_v1  ;;  %v10091_v54 = vpop.f32.mrb[179].mxu1  ;;  %5091 = vrot.lane.b32.xlu1 %v3951_v43, %s10787_s21  ;;  %v5391_v18 = vsel %vm702_vm1, %v5293_v7, %v16032_v4  ;;  %v16039_v55 = vld [vmem:[#allocation191_spill] sm:$0xff]  ;;  %v16041_v7 = vld [vmem:[#allocation110_spill] sm:$0xff] }
 0x5f5   : > { %v10401_v52 = vpop.eup %10400  ;;  %8814 = vst [vmem:[%s14746_s23 + $0x60] sm:$0xff] %v8477_v9   ;;  %10418 = vpow2.f32 %v8143_v11  ;;  %v5036_v56 = vpop.permute.xlu1 %5035  ;;  %v16033_v9 = vld [vmem:[#allocation188_spill] sm:$0xff] }
 0x5f6   : > { %v10403_v21 = vpop.eup %10402  ;;  %v5874_v6 = vadd.f32 1.0, %v10401_v52  ;;  %10420 = vrcp.f32 %v5875_v31  ;;  %5093 = vrot.lane.b32.xlu0 %v3954_v0, %s10787_s21  ;;  %v5488_v45 = vsel %vm5449_vm12, %v5389_v14, %v5036_v56  ;;  %v5392_v11 = vsel %vm702_vm1, %v5294_v62, %v16033_v9  ;;  %v16035_v54 = vld [vmem:[#allocation104_spill] sm:$0xff] }
 0x5f7   : > { %v10405_v29 = vpop.eup %10404  ;;  %v8482_v3 = vpack.c.bf16 %v10399_v36, %v10403_v21  ;;  %v8144_v28 = vmul.f32 -1.442695, %v5488_v45  ;;  %v5038_v60 = vpop.permute.xlu0 %5037  ;;  %v16034_v36 = vld [vmem:[#allocation102_spill] sm:$0xff]  ;;  %v1799_v21 = vadd.f32 %v14894_v40, %v16035_v54  ;;  %v16037_v56 = vld [vmem:[#allocation204_spill] sm:$0xff]  ;;  %v16047_v54 = vld [vmem:[#allocation13_spill] sm:$0xff] }
 0x5f8   : > { %v10407_v41 = vpop.eup %10406  ;;  %10422 = vrcp.f32 %v5874_v6  ;;  %v5877_v27 = vadd.f32 1.0, %v10405_v29  ;;  %v5489_v16 = vsel %vm5449_vm12, %v5390_v42, %v5038_v60  ;;  %v3958_v2 = vpop.f32.mrb[180].mxu1  ;;  %v1796_v25 = vadd.f32 %v14894_v40, %v16034_v36  ;;  %v16046_v36 = vld [vmem:[#allocation12_spill] sm:$0xff] }
 0x5f9   : > { %v10409_v39 = vpop.eup %10408  ;;  %8815 = vst [vmem:[%s14746_s23 + $0x68] sm:$0xff] %v8482_v3   ;;  %v8145_v34 = vmul.f32 -1.442695, %v5489_v16  ;;  %v3959_v51 = vadd.f32 %v14894_v40, %v3958_v2  ;;  %v10094_v44 = vpop.f32.mrb[181].mxu1  ;;  %v16040_v2 = vld [vmem:[#allocation108_spill] sm:$0xff] }
 0x5fa   : > { %v10411_v57 = vpop.eup %10410  ;;  %v5876_v5 = vadd.f32 1.0, %v10409_v39  ;;  %10424 = vrcp.f32 %v5877_v27  ;;  %v3961_v59 = vpop.f32.mrb[182].mxu1  ;;  %v5295_v17 = vsel %vm1445_vm2, %v1796_v25, %v16036_v24  ;;  %v1812_v25 = vadd.f32 %v14894_v40, %v16046_v36  ;;  %v16048_v24 = vld [vmem:[#allocation209_spill] sm:$0xff] }
 0x5fb   : > { %v8487_v23 = vpack.c.bf16 %v10407_v41, %v10411_v57  ;;  %10426 = vpow2.f32 %v8144_v28  ;;  %v3962_v12 = vadd.f32 %v14894_v40, %v3961_v59  ;;  %v10095_v47 = vpop.f32.mrb[183].mxu1  ;;  %5095 = vrot.lane.b32.xlu1 %v3959_v51, %s10787_s21  ;;  %v5296_v41 = vsel %vm1445_vm2, %v1799_v21, %v16037_v56  ;;  %v16038_v28 = vld [vmem:[#allocation190_spill] sm:$0xff] }
 0x5fc   : > { %v10413_v50 = vpop.eup %10412  ;;  %10428 = vrcp.f32 %v5876_v5  ;;  %v5393_v49 = vsel %vm702_vm1, %v5295_v17, %v16038_v28  ;;  %v5394_v5 = vsel %vm702_vm1, %v5296_v41, %v16039_v55  ;;  %v1807_v59 = vadd.f32 %v14894_v40, %v16041_v7  ;;  %v16049_v56 = vld [vmem:[#allocation210_spill] sm:$0xff] }
 0x5fd   : > { %v10415_v8 = vpop.eup %10414  ;;  %8816 = vst [vmem:[%s14746_s23 + $0x70] sm:$0xff] %v8487_v23   ;;  %10430 = vpow2.f32 %v8145_v34  ;;  %5097 = vrot.lane.b32.xlu0 %v3962_v12, %s10787_s21  ;;  %v5040_v10 = vpop.permute.xlu1 %5039  ;;  %v1804_v23 = vadd.f32 %v14894_v40, %v16040_v2  ;;  %v1815_v21 = vadd.f32 %v14894_v40, %v16047_v54  ;;  %v5299_v17 = vsel %vm1445_vm2, %v1812_v25, %v16048_v24 }
 0x5fe   : > { %v10417_v26 = vpop.eup %10416  ;;  %v5878_v22 = vadd.f32 1.0, %v10415_v8  ;;  %v5490_v32 = vsel %vm5449_vm12, %v5391_v18, %v5040_v10  ;;  %v16042_v8 = vld [vmem:[#allocation206_spill] sm:$0xff]  ;;  %v16044_v10 = vld [vmem:[#allocation193_spill] sm:$0xff] }
 0x5ff   : > { %v10419_v35 = vpop.eup %10418  ;;  %v8492_v46 = vpack.c.bf16 %v10413_v50, %v10417_v26  ;;  %v8146_v61 = vmul.f32 -1.442695, %v5490_v32  ;;  %v5042_v43 = vpop.permute.xlu0 %5041  ;;  %v5297_v12 = vsel %vm1445_vm2, %v1804_v23, %v16042_v8  ;;  %v5300_v41 = vsel %vm1445_vm2, %v1815_v21, %v16049_v56  ;;  %v16060_v21 = vld [vmem:[#allocation215_spill] sm:$0xff] }
 0x600   : > { %v10421_v48 = vpop.eup %10420  ;;  %v5879_v19 = vadd.f32 1.0, %v10419_v35  ;;  %10432 = vrcp.f32 %v5878_v22  ;;  %v5491_v13 = vsel %vm5449_vm12, %v5392_v11, %v5042_v43  ;;  %v3966_v20 = vpop.f32.mrb[184].mxu1  ;;  %v16043_v35 = vld [vmem:[#allocation207_spill] sm:$0xff]  ;;  %v16045_v11 = vld [vmem:[#allocation194_spill] sm:$0xff] }
 0x601   : > { %8817 = vst [vmem:[%s14746_s23 + $0x78] sm:$0xff] %v8492_v46   ;;  %v8147_v31 = vmul.f32 -1.442695, %v5491_v13  ;;  %v3967_v1 = vadd.f32 %v14894_v40, %v3966_v20  ;;  %v10098_v52 = vpop.f32.mrb[185].mxu1  ;;  %v5298_v46 = vsel %vm1445_vm2, %v1807_v59, %v16043_v35  ;;  %v16054_v59 = vld [vmem:[#allocation213_spill] sm:$0xff] }
 0x602   : > { %v10423_v37 = vpop.eup %10422  ;;  %10434 = vrcp.f32 %v5879_v19  ;;  %v3969_v6 = vpop.f32.mrb[186].mxu1  ;;  %v5396_v43 = vsel %vm702_vm1, %v5298_v46, %v16045_v11 }
 0x603   : > { %v8497_v30 = vpack.c.bf16 %v10421_v48, %v10423_v37  ;;  %10436 = vpow2.f32 %v8146_v61  ;;  %v3970_v3 = vadd.f32 %v14894_v40, %v3969_v6  ;;  %v10099_v53 = vpop.f32.mrb[187].mxu1  ;;  %5099 = vrot.lane.b32.xlu1 %v3967_v1, %s10787_s21  ;;  %v5395_v48 = vsel %vm702_vm1, %v5297_v12, %v16044_v10 }
 0x604   : > { %v10425_v0 = vpop.eup %10424  ;;  %10438 = vpow2.f32 %v8147_v31 }
 0x605   : > { %v10427_v29 = vpop.eup %10426  ;;  %8818 = vst [vmem:[%s14746_s23 + $0x80] sm:$0xff] %v8497_v30   ;;  %5101 = vrot.lane.b32.xlu0 %v3970_v3, %s10787_s21  ;;  %v5044_v42 = vpop.permute.xlu1 %5043 }
 0x606   : > { %v10429_v14 = vpop.eup %10428  ;;  %v5880_v27 = vadd.f32 1.0, %v10427_v29  ;;  %v5492_v57 = vsel %vm5449_vm12, %v5393_v49, %v5044_v42 }
 0x607   : > { %v10431_v45 = vpop.eup %10430  ;;  %v8502_v39 = vpack.c.bf16 %v10425_v0, %v10429_v14  ;;  %v8148_v58 = vmul.f32 -1.442695, %v5492_v57  ;;  %v5046_v16 = vpop.permute.xlu0 %5045 }
 0x608   : > { %v5881_v60 = vadd.f32 1.0, %v10431_v45  ;;  %10440 = vrcp.f32 %v5880_v27  ;;  %v5493_v34 = vsel %vm5449_vm12, %v5394_v5, %v5046_v16  ;;  %v3974_v51 = vpop.f32.mrb[188].mxu1  ;;  %v16052_v16 = vld [vmem:[#allocation16_spill] sm:$0xff] }
 0x609   : > { %8819 = vst [vmem:[%s14746_s23 + $0x88] sm:$0xff] %v8502_v39   ;;  %v8149_v50 = vmul.f32 -1.442695, %v5493_v34  ;;  %v3975_v38 = vadd.f32 %v14894_v40, %v3974_v51  ;;  %v10102_v63 = vpop.f32.mrb[189].mxu1  ;;  %v16050_v39 = vld [vmem:[#allocation196_spill] sm:$0xff]  ;;  %v1820_v2 = vadd.f32 %v14894_v40, %v16052_v16 }
 0x60a   : > { %10442 = vrcp.f32 %v5881_v60  ;;  %v10433_v44 = vpop.eup %10432  ;;  %v3977_v47 = vpop.f32.mrb[190].mxu1  ;;  %v5397_v28 = vsel %vm702_vm1, %v5299_v17, %v16050_v39 }
 0x60b   : > { %10444 = vpow2.f32 %v8148_v58  ;;  %v3978_v62 = vadd.f32 %v14894_v40, %v3977_v47  ;;  %v10103_v22 = vpop.f32.mrb[191].mxu1  ;;  %5103 = vrot.lane.b32.xlu1 %v3975_v38, %s10787_s21  ;;  %v16051_v58 = vld [vmem:[#allocation197_spill] sm:$0xff]  ;;  %v5301_v8 = vsel %vm1445_vm2, %v1820_v2, %v16054_v59 }
 0x60c   : > { %v10435_v33 = vpop.eup %10434  ;;  %10446 = vpow2.f32 %v8149_v50  ;;  %v5398_v55 = vsel %vm702_vm1, %v5300_v41, %v16051_v58  ;;  %v16055_v22 = vld [vmem:[#allocation212_spill] sm:$0xff] }
 0x60d   : > { %v10437_v26 = vpop.eup %10436  ;;  %v8507_v15 = vpack.c.bf16 %v10435_v33, %v10433_v44  ;;  %5105 = vrot.lane.b32.xlu0 %v3978_v62, %s10787_s21  ;;  %v5048_v19 = vpop.permute.xlu1 %5047  ;;  %v16053_v33 = vld [vmem:[#allocation17_spill] sm:$0xff] }
 0x60e   : > { %v5882_v4 = vadd.f32 1.0, %v10437_v26  ;;  %v10439_v18 = vpop.eup %10438  ;;  %v5494_v61 = vsel %vm5449_vm12, %v5395_v48, %v5048_v19  ;;  %v1823_v7 = vadd.f32 %v14894_v40, %v16053_v33 }
 0x60f   : > { %8820 = vst [vmem:[%s14746_s23 + $0x90] sm:$0xff] %v8507_v15   ;;  %v5883_v32 = vadd.f32 1.0, %v10439_v18  ;;  %v8150_v9 = vmul.f32 -1.442695, %v5494_v61  ;;  %v5050_v37 = vpop.permute.xlu0 %5049  ;;  %v16056_v18 = vld [vmem:[#allocation199_spill] sm:$0xff] }
 0x610   : > { %10448 = vrcp.f32 %v5882_v4  ;;  %v5495_v13 = vsel %vm5449_vm12, %v5396_v43, %v5050_v37  ;;  %v3982_v20 = vpop.f32.mrb[192].mxu1  ;;  %v5302_v35 = vsel %vm1445_vm2, %v1823_v7, %v16055_v22  ;;  %v5399_v10 = vsel %vm702_vm1, %v5301_v8, %v16056_v18  ;;  %v16058_v37 = vld [vmem:[#allocation20_spill] sm:$0xff]  ;;  %v16066_v7 = vld [vmem:[#allocation218_spill] sm:$0xff] }
 0x611   : > { %10450 = vrcp.f32 %v5883_v32  ;;  %v8151_v31 = vmul.f32 -1.442695, %v5495_v13  ;;  %v3983_v1 = vadd.f32 %v14894_v40, %v3982_v20  ;;  %v10106_v52 = vpop.f32.mrb[193].mxu1  ;;  %v1828_v36 = vadd.f32 %v14894_v40, %v16058_v37 }
 0x612   : > { %v10441_v30 = vpop.eup %10440  ;;  %10452 = vpow2.f32 %v8150_v9  ;;  %v3985_v6 = vpop.f32.mrb[194].mxu1  ;;  %v16057_v9 = vld [vmem:[#allocation200_spill] sm:$0xff] }
 0x613   : > { %10454 = vpow2.f32 %v8151_v31  ;;  %v3986_v53 = vadd.f32 %v14894_v40, %v3985_v6  ;;  %v10107_v14 = vpop.f32.mrb[195].mxu1  ;;  %5107 = vrot.lane.b32.xlu1 %v3983_v1, %s10787_s21  ;;  %v5400_v11 = vsel %vm702_vm1, %v5302_v35, %v16057_v9  ;;  %v5303_v24 = vsel %vm1445_vm2, %v1828_v36, %v16060_v21 }
 0x614   : > { %v10443_v0 = vpop.eup %10442  ;;  %v16061_v14 = vld [vmem:[#allocation63_spill] sm:$0xff] }
 0x615   : > { %v10445_v29 = vpop.eup %10444  ;;  %v8512_v3 = vpack.c.bf16 %v10443_v0, %v10441_v30  ;;  %5109 = vrot.lane.b32.xlu0 %v3986_v53, %s10787_s21  ;;  %v5052_v49 = vpop.permute.xlu1 %5051  ;;  %v16059_v0 = vld [vmem:[#allocation21_spill] sm:$0xff] }
 0x616   : > { %v5884_v27 = vadd.f32 1.0, %v10445_v29  ;;  %v10447_v45 = vpop.eup %10446  ;;  %v5496_v60 = vsel %vm5449_vm12, %v5397_v28, %v5052_v49  ;;  %v1831_v54 = vadd.f32 %v14894_v40, %v16059_v0 }
 0x617   : > { %8821 = vst [vmem:[%s14746_s23 + $0x98] sm:$0xff] %v8512_v3   ;;  %v5885_v42 = vadd.f32 1.0, %v10447_v45  ;;  %v8152_v57 = vmul.f32 -1.442695, %v5496_v60  ;;  %v5054_v5 = vpop.permute.xlu0 %5053  ;;  %v16062_v45 = vld [vmem:[#allocation202_spill] sm:$0xff] }
 0x618   : > { %10456 = vrcp.f32 %v5884_v27  ;;  %v5497_v23 = vsel %vm5449_vm12, %v5398_v55, %v5054_v5  ;;  %v3990_v34 = vpop.f32.mrb[196].mxu1  ;;  %v5304_v56 = vsel %vm1445_vm2, %v1831_v54, %v16061_v14  ;;  %v5401_v39 = vsel %vm702_vm1, %v5303_v24, %v16062_v45  ;;  %v16064_v5 = vld [vmem:[#allocation24_spill] sm:$0xff] }
 0x619   : > { %10458 = vrcp.f32 %v5885_v42  ;;  %v8153_v44 = vmul.f32 -1.442695, %v5497_v23  ;;  %v3991_v50 = vadd.f32 %v14894_v40, %v3990_v34  ;;  %v10110_v38 = vpop.f32.mrb[197].mxu1  ;;  %v1836_v16 = vadd.f32 %v14894_v40, %v16064_v5  ;;  %v16072_v54 = vld [vmem:[#allocation220_spill] sm:$0xff] }
 0x61a   : > { %v10449_v51 = vpop.eup %10448  ;;  %10460 = vpow2.f32 %v8152_v57  ;;  %v3993_v12 = vpop.f32.mrb[198].mxu1  ;;  %v16063_v57 = vld [vmem:[#allocation203_spill] sm:$0xff] }
 0x61b   : > { %v10451_v63 = vpop.eup %10450  ;;  %10462 = vpow2.f32 %v8153_v44  ;;  %v3994_v15 = vadd.f32 %v14894_v40, %v3993_v12  ;;  %v10111_v62 = vpop.f32.mrb[199].mxu1  ;;  %5111 = vrot.lane.b32.xlu1 %v3991_v50, %s10787_s21  ;;  %v5402_v58 = vsel %vm702_vm1, %v5304_v56, %v16063_v57  ;;  %v5305_v59 = vsel %vm1445_vm2, %v1836_v16, %v16066_v7 }
 0x61c   : > { %v10453_v47 = vpop.eup %10452  ;;  %v8517_v26 = vpack.c.bf16 %v10451_v63, %v10449_v51  ;;  %v16065_v63 = vld [vmem:[#allocation25_spill] sm:$0xff] }
 0x61d   : > { %v5886_v46 = vadd.f32 1.0, %v10453_v47  ;;  %v10455_v4 = vpop.eup %10454  ;;  %5113 = vrot.lane.b32.xlu0 %v3994_v15, %s10787_s21  ;;  %v5056_v48 = vpop.permute.xlu1 %5055  ;;  %v1839_v33 = vadd.f32 %v14894_v40, %v16065_v63  ;;  %v16067_v62 = vld [vmem:[#allocation217_spill] sm:$0xff] }
 0x61e   : > { %8822 = vst [vmem:[%s14746_s23 + $0xa0] sm:$0xff] %v8517_v26   ;;  %v5887_v19 = vadd.f32 1.0, %v10455_v4  ;;  %v5498_v32 = vsel %vm5449_vm12, %v5399_v10, %v5056_v48  ;;  %v16068_v4 = vld [vmem:[#allocation205_spill] sm:$0xff] }
 0x61f   : > { %10464 = vrcp.f32 %v5886_v46  ;;  %v8154_v61 = vmul.f32 -1.442695, %v5498_v32  ;;  %v5058_v43 = vpop.permute.xlu0 %5057  ;;  %v5306_v22 = vsel %vm1445_vm2, %v1839_v33, %v16067_v62  ;;  %v5403_v18 = vsel %vm702_vm1, %v5305_v59, %v16068_v4  ;;  %v16078_v33 = vld [vmem:[#allocation223_spill] sm:$0xff] }
 0x620   : > { %10466 = vrcp.f32 %v5887_v19  ;;  %v5499_v25 = vsel %vm5449_vm12, %v5400_v11, %v5058_v43  ;;  %v3998_v13 = vpop.f32.mrb[200].mxu1  ;;  %v16070_v43 = vld [vmem:[#allocation28_spill] sm:$0xff] }
 0x621   : > { %10468 = vpow2.f32 %v8154_v61  ;;  %v8155_v30 = vmul.f32 -1.442695, %v5499_v25  ;;  %v3999_v31 = vadd.f32 %v14894_v40, %v3998_v13  ;;  %v10114_v1 = vpop.f32.mrb[201].mxu1  ;;  %v16069_v61 = vld [vmem:[#allocation55_spill] sm:$0xff]  ;;  %v1844_v37 = vadd.f32 %v14894_v40, %v16070_v43 }
 0x622   : > { %v10457_v20 = vpop.eup %10456  ;;  %v4001_v17 = vpop.f32.mrb[202].mxu1  ;;  %v5404_v9 = vsel %vm702_vm1, %v5306_v22, %v16069_v61 }
 0x623   : > { %v10459_v52 = vpop.eup %10458  ;;  %10470 = vpow2.f32 %v8155_v30  ;;  %v4002_v3 = vadd.f32 %v14894_v40, %v4001_v17  ;;  %v10115_v53 = vpop.f32.mrb[203].mxu1  ;;  %5115 = vrot.lane.b32.xlu1 %v3999_v31, %s10787_s21  ;;  %v5307_v21 = vsel %vm1445_vm2, %v1844_v37, %v16072_v54 }
 0x624   : > { %v10461_v6 = vpop.eup %10460  ;;  %v8522_v29 = vpack.c.bf16 %v10459_v52, %v10457_v20  ;;  %v16071_v52 = vld [vmem:[#allocation29_spill] sm:$0xff]  ;;  %v16073_v53 = vld [vmem:[#allocation123_spill] sm:$0xff] }
 0x625   : > { %v5888_v41 = vadd.f32 1.0, %v10461_v6  ;;  %v10463_v27 = vpop.eup %10462  ;;  %5117 = vrot.lane.b32.xlu0 %v4002_v3, %s10787_s21  ;;  %v5060_v28 = vpop.permute.xlu1 %5059  ;;  %v1847_v0 = vadd.f32 %v14894_v40, %v16071_v52 }
 0x626   : > { %8823 = vst [vmem:[%s14746_s23 + $0xa8] sm:$0xff] %v8522_v29   ;;  %v5889_v49 = vadd.f32 1.0, %v10463_v27  ;;  %v5500_v42 = vsel %vm5449_vm12, %v5401_v39, %v5060_v28  ;;  %v16074_v27 = vld [vmem:[#allocation208_spill] sm:$0xff] }
 0x627   : > { %10472 = vrcp.f32 %v5888_v41  ;;  %v8156_v60 = vmul.f32 -1.442695, %v5500_v42  ;;  %v5062_v55 = vpop.permute.xlu0 %5061  ;;  %v5308_v14 = vsel %vm1445_vm2, %v1847_v0, %v16073_v53  ;;  %v5405_v45 = vsel %vm702_vm1, %v5307_v21, %v16074_v27  ;;  %v16084_v0 = vld [vmem:[#allocation225_spill] sm:$0xff] }
 0x628   : > { %10474 = vrcp.f32 %v5889_v49  ;;  %v5501_v2 = vsel %vm5449_vm12, %v5402_v58, %v5062_v55  ;;  %v4006_v23 = vpop.f32.mrb[204].mxu1  ;;  %v16076_v55 = vld [vmem:[#allocation32_spill] sm:$0xff] }
 0x629   : > { %v10465_v34 = vpop.eup %10464  ;;  %10476 = vpow2.f32 %v8156_v60  ;;  %v8157_v51 = vmul.f32 -1.442695, %v5501_v2  ;;  %v4007_v44 = vadd.f32 %v14894_v40, %v4006_v23  ;;  %v10118_v50 = vpop.f32.mrb[205].mxu1  ;;  %v16075_v60 = vld [vmem:[#allocation106_spill] sm:$0xff]  ;;  %v1852_v5 = vadd.f32 %v14894_v40, %v16076_v55 }
 0x62a   : > { %v10467_v38 = vpop.eup %10466  ;;  %v4009_v8 = vpop.f32.mrb[206].mxu1  ;;  %v5406_v57 = vsel %vm702_vm1, %v5308_v14, %v16075_v60 }
 0x62b   : > { %v10469_v12 = vpop.eup %10468  ;;  %v8527_v47 = vpack.c.bf16 %v10467_v38, %v10465_v34  ;;  %10478 = vpow2.f32 %v8157_v51  ;;  %v4010_v26 = vadd.f32 %v14894_v40, %v4009_v8  ;;  %v10119_v15 = vpop.f32.mrb[207].mxu1  ;;  %5119 = vrot.lane.b32.xlu1 %v4007_v44, %s10787_s21  ;;  %v16077_v38 = vld [vmem:[#allocation33_spill] sm:$0xff]  ;;  %v5309_v7 = vsel %vm1445_vm2, %v1852_v5, %v16078_v33 }
 0x62c   : > { %v5890_v35 = vadd.f32 1.0, %v10469_v12  ;;  %v1855_v63 = vadd.f32 %v14894_v40, %v16077_v38  ;;  %v16079_v15 = vld [vmem:[#allocation222_spill] sm:$0xff] }
 0x62d   : > { %v10471_v46 = vpop.eup %10470  ;;  %8824 = vst [vmem:[%s14746_s23 + $0xb0] sm:$0xff] %v8527_v47   ;;  %5121 = vrot.lane.b32.xlu0 %v4010_v26, %s10787_s21  ;;  %v5064_v10 = vpop.permute.xlu1 %5063 }
 0x62e   : > { %v5891_v48 = vadd.f32 1.0, %v10471_v46  ;;  %v5502_v19 = vsel %vm5449_vm12, %v5403_v18, %v5064_v10  ;;  %10480 = vrcp.f32 %v5890_v35  ;;  %v5310_v62 = vsel %vm1445_vm2, %v1855_v63, %v16079_v15  ;;  %v16080_v46 = vld [vmem:[#allocation59_spill] sm:$0xff]  ;;  %v16090_v63 = vld [vmem:[#allocation228_spill] sm:$0xff] }
 0x62f   : > { %v8158_v32 = vmul.f32 -1.442695, %v5502_v19  ;;  %v5066_v11 = vpop.permute.xlu0 %5065  ;;  %v5407_v4 = vsel %vm702_vm1, %v5309_v7, %v16080_v46 }
 0x630   : > { %10482 = vrcp.f32 %v5891_v48  ;;  %v5503_v36 = vsel %vm5449_vm12, %v5404_v9, %v5066_v11  ;;  %v4014_v25 = vpop.f32.mrb[208].mxu1  ;;  %v16082_v11 = vld [vmem:[#allocation36_spill] sm:$0xff] }
 0x631   : > { %v10473_v13 = vpop.eup %10472  ;;  %10484 = vpow2.f32 %v8158_v32  ;;  %v8159_v20 = vmul.f32 -1.442695, %v5503_v36  ;;  %v4015_v30 = vadd.f32 %v14894_v40, %v4014_v25  ;;  %v10122_v31 = vpop.f32.mrb[209].mxu1  ;;  %v16081_v32 = vld [vmem:[#allocation211_spill] sm:$0xff]  ;;  %v1860_v43 = vadd.f32 %v14894_v40, %v16082_v11 }
 0x632   : > { %v10475_v1 = vpop.eup %10474  ;;  %v4017_v24 = vpop.f32.mrb[210].mxu1  ;;  %v5408_v61 = vsel %vm702_vm1, %v5310_v62, %v16081_v32 }
 0x633   : > { %v10477_v17 = vpop.eup %10476  ;;  %v8532_v6 = vpack.c.bf16 %v10475_v1, %v10473_v13  ;;  %10486 = vpow2.f32 %v8159_v20  ;;  %v4018_v29 = vadd.f32 %v14894_v40, %v4017_v24  ;;  %v10123_v3 = vpop.f32.mrb[211].mxu1  ;;  %5123 = vrot.lane.b32.xlu1 %v4015_v30, %s10787_s21  ;;  %v16083_v1 = vld [vmem:[#allocation37_spill] sm:$0xff]  ;;  %v5311_v54 = vsel %vm1445_vm2, %v1860_v43, %v16084_v0 }
 0x634   : > { %v5892_v56 = vadd.f32 1.0, %v10477_v17  ;;  %v1863_v52 = vadd.f32 %v14894_v40, %v16083_v1  ;;  %v16085_v3 = vld [vmem:[#allocation109_spill] sm:$0xff] }
 0x635   : > { %v10479_v41 = vpop.eup %10478  ;;  %8825 = vst [vmem:[%s14746_s23 + $0xb8] sm:$0xff] %v8532_v6   ;;  %5125 = vrot.lane.b32.xlu0 %v4018_v29, %s10787_s21  ;;  %v5068_v39 = vpop.permute.xlu1 %5067 }
 0x636   : > { %v5893_v28 = vadd.f32 1.0, %v10479_v41  ;;  %v5504_v49 = vsel %vm5449_vm12, %v5405_v45, %v5068_v39  ;;  %10488 = vrcp.f32 %v5892_v56  ;;  %v5312_v53 = vsel %vm1445_vm2, %v1863_v52, %v16085_v3  ;;  %v16086_v41 = vld [vmem:[#allocation214_spill] sm:$0xff] }
 0x637   : > { %v8160_v42 = vmul.f32 -1.442695, %v5504_v49  ;;  %v5409_v27 = vsel %vm702_vm1, %v5311_v54, %v16086_v41  ;;  %v16096_v52 = vld [vmem:[#allocation230_spill] sm:$0xff] }
 0x638   : > { %v5070_v58 = vpop.permute.xlu0 %5069  ;;  %10490 = vrcp.f32 %v5893_v28  ;;  %v4022_v2 = vpop.f32.mrb[212].mxu1 }
 0x639   : > { %v5505_v16 = vsel %vm5449_vm12, %v5406_v57, %v5070_v58  ;;  %v10481_v23 = vpop.eup %10480  ;;  %10492 = vpow2.f32 %v8160_v42  ;;  %v4023_v51 = vadd.f32 %v14894_v40, %v4022_v2  ;;  %v10126_v44 = vpop.f32.mrb[213].mxu1  ;;  %v16087_v42 = vld [vmem:[#allocation111_spill] sm:$0xff]  ;;  %v16088_v58 = vld [vmem:[#allocation40_spill] sm:$0xff] }
 0x63a   : > { %v8161_v34 = vmul.f32 -1.442695, %v5505_v16  ;;  %v10483_v50 = vpop.eup %10482  ;;  %v4025_v59 = vpop.f32.mrb[214].mxu1  ;;  %v5410_v60 = vsel %vm702_vm1, %v5312_v53, %v16087_v42  ;;  %v1868_v55 = vadd.f32 %v14894_v40, %v16088_v58 }
 0x63b   : > { %v10485_v8 = vpop.eup %10484  ;;  %v8537_v12 = vpack.c.bf16 %v10483_v50, %v10481_v23  ;;  %v4026_v47 = vadd.f32 %v14894_v40, %v4025_v59  ;;  %v10127_v26 = vpop.f32.mrb[215].mxu1  ;;  %5127 = vrot.lane.b32.xlu1 %v4023_v51, %s10787_s21  ;;  %v16089_v50 = vld [vmem:[#allocation41_spill] sm:$0xff] }
 0x63c   : > { %10494 = vpow2.f32 %v8161_v34  ;;  %v5894_v22 = vadd.f32 1.0, %v10485_v8  ;;  %v1871_v38 = vadd.f32 %v14894_v40, %v16089_v50  ;;  %v5313_v33 = vsel %vm1445_vm2, %v1868_v55, %v16090_v63  ;;  %v16091_v26 = vld [vmem:[#allocation227_spill] sm:$0xff] }
 0x63d   : > { %v10487_v35 = vpop.eup %10486  ;;  %8826 = vst [vmem:[%s14746_s23 + $0xc0] sm:$0xff] %v8537_v12   ;;  %5129 = vrot.lane.b32.xlu0 %v4026_v47, %s10787_s21 }
 0x63e   : > { %v5072_v18 = vpop.permute.xlu1 %5071  ;;  %v5895_v10 = vadd.f32 1.0, %v10487_v35  ;;  %10496 = vrcp.f32 %v5894_v22  ;;  %v5314_v15 = vsel %vm1445_vm2, %v1871_v38, %v16091_v26  ;;  %v16092_v35 = vld [vmem:[#allocation115_spill] sm:$0xff]  ;;  %v16102_v38 = vld [vmem:[#allocation234_spill] sm:$0xff] }
 0x63f   : > { %v5506_v48 = vsel %vm5449_vm12, %v5407_v4, %v5072_v18  ;;  %v5411_v46 = vsel %vm702_vm1, %v5313_v33, %v16092_v35 }
 0x640   : > { %v8162_v19 = vmul.f32 -1.442695, %v5506_v48  ;;  %10498 = vrcp.f32 %v5895_v10  ;;  %v4030_v36 = vpop.f32.mrb[216].mxu1  ;;  %v10489_v25 = vpop.eup %10488 }
 0x641   : > { %v5074_v9 = vpop.permute.xlu0 %5073  ;;  %v4031_v20 = vadd.f32 %v14894_v40, %v4030_v36  ;;  %v10130_v30 = vpop.f32.mrb[217].mxu1 }
 0x642   : > { %v5507_v37 = vsel %vm5449_vm12, %v5408_v61, %v5074_v9  ;;  %10500 = vpow2.f32 %v8162_v19  ;;  %v10491_v31 = vpop.eup %10490  ;;  %v4033_v21 = vpop.f32.mrb[218].mxu1  ;;  %v16093_v19 = vld [vmem:[#allocation216_spill] sm:$0xff]  ;;  %v16094_v9 = vld [vmem:[#allocation45_spill] sm:$0xff] }
 0x643   : > { %v8163_v13 = vmul.f32 -1.442695, %v5507_v37  ;;  %v10493_v24 = vpop.eup %10492  ;;  %v8542_v17 = vpack.c.bf16 %v10491_v31, %v10489_v25  ;;  %v4034_v6 = vadd.f32 %v14894_v40, %v4033_v21  ;;  %v10131_v29 = vpop.f32.mrb[219].mxu1  ;;  %5131 = vrot.lane.b32.xlu1 %v4031_v20, %s10787_s21  ;;  %v5412_v32 = vsel %vm702_vm1, %v5314_v15, %v16093_v19  ;;  %v16095_v31 = vld [vmem:[#allocation46_spill] sm:$0xff] }
 0x644   : > { %v5896_v14 = vadd.f32 1.0, %v10493_v24  ;;  %v1876_v11 = vadd.f32 %v14894_v40, %v16094_v9  ;;  %v1879_v1 = vadd.f32 %v14894_v40, %v16095_v31  ;;  %v16097_v29 = vld [vmem:[#allocation130_spill] sm:$0xff] }
 0x645   : > { %10502 = vpow2.f32 %v8163_v13  ;;  %8827 = vst [vmem:[%s14746_s23 + $0xc8] sm:$0xff] %v8542_v17   ;;  %5133 = vrot.lane.b32.xlu0 %v4034_v6, %s10787_s21  ;;  %v5076_v45 = vpop.permute.xlu1 %5075 }
 0x646   : > { %v10495_v56 = vpop.eup %10494  ;;  %v5508_v28 = vsel %vm5449_vm12, %v5409_v27, %v5076_v45  ;;  %10504 = vrcp.f32 %v5896_v14  ;;  %v5315_v0 = vsel %vm1445_vm2, %v1876_v11, %v16096_v52  ;;  %v5316_v3 = vsel %vm1445_vm2, %v1879_v1, %v16097_v29  ;;  %v16108_v1 = vld [vmem:[#allocation238_spill] sm:$0xff]  ;;  %v16109_v29 = vld [vmem:[#allocation127_spill] sm:$0xff] }
 0x647   : > { %v5897_v39 = vadd.f32 1.0, %v10495_v56  ;;  %v8164_v49 = vmul.f32 -1.442695, %v5508_v28  ;;  %v16098_v56 = vld [vmem:[#allocation219_spill] sm:$0xff] }
 0x648   : > { %v4038_v16 = vpop.f32.mrb[220].mxu1  ;;  %v10497_v2 = vpop.eup %10496  ;;  %v5413_v41 = vsel %vm702_vm1, %v5315_v0, %v16098_v56 }
 0x649   : > { %v5078_v57 = vpop.permute.xlu0 %5077  ;;  %10506 = vrcp.f32 %v5897_v39  ;;  %v4039_v34 = vadd.f32 %v14894_v40, %v4038_v16  ;;  %v10134_v51 = vpop.f32.mrb[221].mxu1 }
 0x64a   : > { %v5509_v5 = vsel %vm5449_vm12, %v5410_v60, %v5078_v57  ;;  %10508 = vpow2.f32 %v8164_v49  ;;  %v10499_v44 = vpop.eup %10498  ;;  %v4041_v7 = vpop.f32.mrb[222].mxu1  ;;  %v16099_v49 = vld [vmem:[#allocation67_spill] sm:$0xff]  ;;  %v16100_v57 = vld [vmem:[#allocation50_spill] sm:$0xff] }
 0x64b   : > { %v8165_v23 = vmul.f32 -1.442695, %v5509_v5  ;;  %v8547_v8 = vpack.c.bf16 %v10499_v44, %v10497_v2  ;;  %v4042_v12 = vadd.f32 %v14894_v40, %v4041_v7  ;;  %v10135_v47 = vpop.f32.mrb[223].mxu1  ;;  %5135 = vrot.lane.b32.xlu1 %v4039_v34, %s10787_s21  ;;  %v5414_v42 = vsel %vm702_vm1, %v5316_v3, %v16099_v49  ;;  %v16101_v44 = vld [vmem:[#allocation52_spill] sm:$0xff] }
 0x64c   : > { %v10501_v59 = vpop.eup %10500  ;;  %v1884_v58 = vadd.f32 %v14894_v40, %v16100_v57  ;;  %v1887_v50 = vadd.f32 %v14894_v40, %v16101_v44  ;;  %v16103_v47 = vld [vmem:[#allocation233_spill] sm:$0xff] }
 0x64d   : > { %10510 = vpow2.f32 %v8165_v23  ;;  %v5898_v62 = vadd.f32 1.0, %v10501_v59  ;;  %8828 = vst [vmem:[%s14746_s23 + $0xd0] sm:$0xff] %v8547_v8   ;;  %5137 = vrot.lane.b32.xlu0 %v4042_v12, %s10787_s21  ;;  %v5080_v4 = vpop.permute.xlu1 %5079 }
 0x64e   : > { %v5510_v10 = vsel %vm5449_vm12, %v5411_v46, %v5080_v4  ;;  %v5317_v63 = vsel %vm1445_vm2, %v1884_v58, %v16102_v38  ;;  %v5318_v26 = vsel %vm1445_vm2, %v1887_v50, %v16103_v47  ;;  %v16114_v50 = vld [vmem:[#allocation241_spill] sm:$0xff] }
 0x64f   : > { %v10503_v22 = vpop.eup %10502  ;;  %10512 = vrcp.f32 %v5898_v62  ;;  %v8166_v48 = vmul.f32 -1.442695, %v5510_v10 }
 0x650   : > { %v5899_v18 = vadd.f32 1.0, %v10503_v22  ;;  %v4046_v37 = vpop.f32.mrb[224].mxu1  ;;  %v10505_v36 = vpop.eup %10504  ;;  %v16104_v22 = vld [vmem:[#allocation103_spill] sm:$0xff] }
 0x651   : > { %v5082_v61 = vpop.permute.xlu0 %5081  ;;  %v4047_v13 = vadd.f32 %v14894_v40, %v4046_v37  ;;  %v10138_v20 = vpop.f32.mrb[225].mxu1  ;;  %v5415_v35 = vsel %vm702_vm1, %v5317_v63, %v16104_v22 }
 0x652   : > { %10514 = vrcp.f32 %v5899_v18  ;;  %v5511_v43 = vsel %vm5449_vm12, %v5412_v32, %v5082_v61  ;;  %v4049_v54 = vpop.f32.mrb[226].mxu1  ;;  %v16106_v61 = vld [vmem:[#allocation56_spill] sm:$0xff] }
 0x653   : > { %10516 = vpow2.f32 %v8166_v48  ;;  %v8167_v25 = vmul.f32 -1.442695, %v5511_v43  ;;  %v10507_v30 = vpop.eup %10506  ;;  %v4050_v17 = vadd.f32 %v14894_v40, %v4049_v54  ;;  %v10139_v6 = vpop.f32.mrb[227].mxu1  ;;  %5139 = vrot.lane.b32.xlu1 %v4047_v13, %s10787_s21  ;;  %v16105_v48 = vld [vmem:[#allocation221_spill] sm:$0xff]  ;;  %v1892_v9 = vadd.f32 %v14894_v40, %v16106_v61 }
 0x654   : > { %v10509_v21 = vpop.eup %10508  ;;  %v8552_v24 = vpack.c.bf16 %v10507_v30, %v10505_v36  ;;  %v5416_v19 = vsel %vm702_vm1, %v5318_v26, %v16105_v48  ;;  %v16107_v30 = vld [vmem:[#allocation57_spill] sm:$0xff] }
 0x655   : > { %10518 = vpow2.f32 %v8167_v25  ;;  %v5900_v53 = vadd.f32 1.0, %v10509_v21  ;;  %5141 = vrot.lane.b32.xlu0 %v4050_v17, %s10787_s21  ;;  %v5084_v27 = vpop.permute.xlu1 %5083  ;;  %v1895_v31 = vadd.f32 %v14894_v40, %v16107_v30  ;;  %v5319_v52 = vsel %vm1445_vm2, %v1892_v9, %v16108_v1  ;;  %v16121_v30 = vld [vmem:[#allocation268_spill] sm:$0xff] }
 0x656   : > { %8829 = vst [vmem:[%s14746_s23 + $0xd8] sm:$0xff] %v8552_v24   ;;  %v5512_v39 = vsel %vm5449_vm12, %v5413_v41, %v5084_v27  ;;  %v15192_v24 = vld [vmem:[%s15558_s6] ss:$0 sm:$0xff] }
 0x657   : > { %v10511_v14 = vpop.eup %10510  ;;  %10520 = vrcp.f32 %v5900_v53  ;;  %v8168_v28 = vmul.f32 -1.442695, %v5512_v39 }
 0x658   : > { %v5901_v45 = vadd.f32 1.0, %v10511_v14  ;;  %v4054_v5 = vpop.f32.mrb[228].mxu1  ;;  %v16110_v14 = vld [vmem:[#allocation224_spill] sm:$0xff] }
 0x659   : > { %v5086_v60 = vpop.permute.xlu0 %5085  ;;  %v10513_v16 = vpop.eup %10512  ;;  %v4055_v23 = vadd.f32 %v14894_v40, %v4054_v5  ;;  %v5417_v56 = vsel %vm702_vm1, %v5319_v52, %v16110_v14 }
 0x65a   : > { %10522 = vrcp.f32 %v5901_v45  ;;  %v5513_v55 = vsel %vm5449_vm12, %v5414_v42, %v5086_v60  ;;  %v10142_v34 = vpop.f32.mrb[229].mxu1  ;;  %v16112_v60 = vld [vmem:[#allocation61_spill] sm:$0xff] }
 0x65b   : > { %10524 = vpow2.f32 %v8168_v28  ;;  %v8169_v2 = vmul.f32 -1.442695, %v5513_v55  ;;  %v4057_v33 = vpop.f32.mrb[230].mxu1  ;;  %5143 = vrot.lane.b32.xlu1 %v4055_v23, %s10787_s21  ;;  %v16111_v28 = vld [vmem:[#allocation126_spill] sm:$0xff]  ;;  %v1900_v57 = vadd.f32 %v15192_v24, %v16112_v60 }
 0x65c   : > { %v10515_v51 = vpop.eup %10514  ;;  %v4058_v8 = vadd.f32 %v14894_v40, %v4057_v33  ;;  %v10143_v12 = vpop.f32.mrb[231].mxu1 }
 0x65d   : > { %v10517_v7 = vpop.eup %10516  ;;  %v8557_v59 = vpack.c.bf16 %v10515_v51, %v10513_v16  ;;  %10526 = vpow2.f32 %v8169_v2  ;;  %v5088_v46 = vpop.permute.xlu1 %5087  ;;  %v16113_v51 = vld [vmem:[#allocation62_spill] sm:$0xff]  ;;  %v5321_v38 = vsel %vm1445_vm2, %v1900_v57, %v16114_v50  ;;  %v16115_v12 = vld [vmem:[#allocation240_spill] sm:$0xff] }
 0x65e   : > { %v5902_v15 = vadd.f32 1.0, %v10517_v7  ;;  %5145 = vrot.lane.b32.xlu0 %v4058_v8, %s10787_s21  ;;  %v5514_v18 = vsel %vm5449_vm12, %v5415_v35, %v5088_v46  ;;  %v1903_v44 = vadd.f32 %v15192_v24, %v16113_v51  ;;  %v16130_v51 = vld [vmem:[#allocation72_spill] sm:$0xff]  ;;  %v16131_v50 = vld [vmem:[#allocation246_spill] sm:$0xff] }
 0x65f   : > { %v10519_v62 = vpop.eup %10518  ;;  %8830 = vst [vmem:[%s14746_s23 + $0xe0] sm:$0xff] %v8557_v59   ;;  %v8170_v10 = vmul.f32 -1.442695, %v5514_v18 }
 0x660   : > { %v5903_v4 = vadd.f32 1.0, %v10519_v62  ;;  %10528 = vrcp.f32 %v5902_v15  ;;  %v4062_v43 = vpop.f32.mrb[232].mxu1  ;;  %v5322_v47 = vsel %vm1445_vm2, %v1903_v44, %v16115_v12  ;;  %v16116_v62 = vld [vmem:[#allocation128_spill] sm:$0xff]  ;;  %v1919_v44 = vadd.f32 %v15192_v24, %v16130_v51  ;;  %v16144_v51 = vld [vmem:[#allocation250_spill] sm:$0xff] }
 0x661   : > { %v5090_v32 = vpop.permute.xlu0 %5089  ;;  %v10521_v37 = vpop.eup %10520  ;;  %v4063_v25 = vadd.f32 %v14894_v40, %v4062_v43  ;;  %v5320_v40 = vsel %vm1445_vm2, %v1895_v31, %v16109_v29  ;;  %v5419_v22 = vsel %vm702_vm1, %v5321_v38, %v16116_v62  ;;  %v16122_v31 = vld [vmem:[#allocation133_spill] sm:$0xff]  ;;  %v16126_v29 = vld [vmem:[#allocation135_spill] sm:$0xff] }
 0x662   : > { %10530 = vrcp.f32 %v5903_v4  ;;  %v5515_v11 = vsel %vm5449_vm12, %v5416_v19, %v5090_v32  ;;  %v10146_v13 = vpop.f32.mrb[233].mxu1  ;;  %v5418_v49 = vsel %vm702_vm1, %v5320_v40, %v16111_v28  ;;  %v16118_v32 = vld [vmem:[#allocation66_spill] sm:$0xff]  ;;  %v7647_v52 = vsel %vm7640_vm11, %v16122_v31, %v16121_v30 }
 0x663   : > { %10532 = vpow2.f32 %v8170_v10  ;;  %v8171_v36 = vmul.f32 -1.442695, %v5515_v11  ;;  %v4065_v0 = vpop.f32.mrb[234].mxu1  ;;  %5147 = vrot.lane.b32.xlu1 %v4063_v25, %s10787_s21  ;;  %v16117_v10 = vld [vmem:[#allocation226_spill] sm:$0xff]  ;;  %v1908_v61 = vadd.f32 %v15192_v24, %v16118_v32  ;;  %v16120_v13 = vld [vmem:[#allocation243_spill] sm:$0xff]  ;;  %v7649_v14 = vsub.f32 %v7647_v52, %v16121_v30  ;;  %v16138_v30 = vld [vmem:[#allocation132_spill] sm:$0xff] }
 0x664   : > { %v10523_v20 = vpop.eup %10522  ;;  %v4066_v17 = vadd.f32 %v15192_v24, %v4065_v0  ;;  %v10147_v6 = vpop.f32.mrb[235].mxu1  ;;  %v5420_v48 = vsel %vm702_vm1, %v5322_v47, %v16117_v10 }
 0x665   : > { %v10525_v54 = vpop.eup %10524  ;;  %v8562_v21 = vpack.c.bf16 %v10523_v20, %v10521_v37  ;;  %10534 = vpow2.f32 %v8171_v36  ;;  %v16119_v36 = vld [vmem:[#allocation68_spill] sm:$0xff]  ;;  %v5323_v20 = vsel %vm1445_vm2, %v1908_v61, %v16120_v13 }
 0x666   : > { %v5904_v3 = vadd.f32 1.0, %v10525_v54  ;;  %5149 = vrot.lane.b32.xlu0 %v4066_v17, %s10787_s21  ;;  %v5092_v41 = vpop.permute.xlu1 %5091  ;;  %v1911_v25 = vadd.f32 %v15192_v24, %v16119_v36  ;;  %v16124_v54 = vld [vmem:[#allocation269_spill] sm:$0xff]  ;;  %v16137_v36 = vld [vmem:[#allocation248_spill] sm:$0xff] }
 0x667   : > { %v10527_v53 = vpop.eup %10526  ;;  %8831 = vst [vmem:[%s14746_s23 + $0xe8] sm:$0xff] %v8562_v21   ;;  %v5516_v45 = vsel %vm5449_vm12, %v5417_v56, %v5092_v41  ;;  %v16125_v21 = vld [vmem:[#allocation236_spill] sm:$0xff]  ;;  %v16127_v56 = vld [vmem:[#allocation229_spill] sm:$0xff] }
 0x668   : > { %v5905_v27 = vadd.f32 1.0, %v10527_v53  ;;  %10536 = vrcp.f32 %v5904_v3  ;;  %v8172_v39 = vmul.f32 -1.442695, %v5516_v45  ;;  %v5094_v42 = vpop.permute.xlu0 %5093  ;;  %v4070_v55 = vpop.f32.mrb[236].mxu1  ;;  %v7648_v17 = vsel %vm7640_vm11, %v16125_v21, %v16124_v54 }
 0x669   : > { %v5517_v58 = vsel %vm5449_vm12, %v5418_v49, %v5094_v42  ;;  %v4071_v2 = vadd.f32 %v15192_v24, %v4070_v55  ;;  %v10150_v23 = vpop.f32.mrb[237].mxu1  ;;  %v5324_v40 = vsel %vm1445_vm2, %v1911_v25, %v16126_v29  ;;  %v5421_v41 = vsel %vm702_vm1, %v5323_v20, %v16127_v56  ;;  %v16128_v42 = vld [vmem:[#allocation113_spill] sm:$0xff]  ;;  %v16140_v56 = vld [vmem:[#allocation235_spill] sm:$0xff] }
 0x66a   : > { %10538 = vrcp.f32 %v5905_v27  ;;  %v10529_v5 = vpop.eup %10528  ;;  %v8173_v16 = vmul.f32 -1.442695, %v5517_v58  ;;  %v4073_v63 = vpop.f32.mrb[238].mxu1  ;;  %v7650_v45 = vsub.f32 %v7648_v17, %v16124_v54  ;;  %v5422_v60 = vsel %vm702_vm1, %v5324_v40, %v16128_v42  ;;  %v16129_v58 = vld [vmem:[#allocation71_spill] sm:$0xff]  ;;  %v16139_v17 = vld [vmem:[#allocation237_spill] sm:$0xff] }
 0x66b   : > { %10540 = vpow2.f32 %v8172_v39  ;;  %v4074_v59 = vadd.f32 %v15192_v24, %v4073_v63  ;;  %v10151_v8 = vpop.f32.mrb[239].mxu1  ;;  %5151 = vrot.lane.b32.xlu1 %v4071_v2, %s10787_s21  ;;  %v1916_v55 = vadd.f32 %v15192_v24, %v16129_v58  ;;  %v7651_v2 = vmul.f32 1.442695, %v7649_v14  ;;  %v16142_v58 = vld [vmem:[#allocation80_spill] sm:$0xff] }
 0x66c   : > { %v10531_v34 = vpop.eup %10530  ;;  %10542 = vpow2.f32 %v8173_v16  ;;  %v7653_v63 = vmul.f32 1.442695, %v7650_v45 }
 0x66d   : > { %v10533_v33 = vpop.eup %10532  ;;  %v8567_v7 = vpack.c.bf16 %v10531_v34, %v10529_v5  ;;  %5153 = vrot.lane.b32.xlu0 %v4074_v59, %s10787_s21  ;;  %v5096_v35 = vpop.permute.xlu1 %5095  ;;  %v5325_v38 = vsel %vm1445_vm2, %v1916_v55, %v16131_v50  ;;  %v16132_v59 = vld [vmem:[#allocation245_spill] sm:$0xff]  ;;  %v1935_v55 = vadd.f32 %v15192_v24, %v16142_v58  ;;  %s8413_s21 = smul.u32 6272, %s10861_s9 }
 0x66e   : > { %v5906_v26 = vadd.f32 1.0, %v10533_v33  ;;  %v5518_v4 = vsel %vm5449_vm12, %v5419_v22, %v5096_v35  ;;  %v5326_v8 = vsel %vm1445_vm2, %v1919_v44, %v16132_v59 }
 0x66f   : > { %v10535_v15 = vpop.eup %10534  ;;  %8832 = vst [vmem:[%s14746_s23 + $0xf0] sm:$0xff] %v8567_v7   ;;  %v8174_v18 = vmul.f32 -1.442695, %v5518_v4  ;;  %v5098_v19 = vpop.permute.xlu0 %5097  ;;  %v16134_v4 = vld [vmem:[#allocation231_spill] sm:$0xff]  ;;  %v5330_v44 = vsel %vm1445_vm2, %v1935_v55, %v16144_v51  ;;  %s15465_s19 = scalar_lea.hbm %s15560_s8, %s8413_s21 }
 0x670   : > { %v5907_v46 = vadd.f32 1.0, %v10535_v15  ;;  %10544 = vrcp.f32 %v5906_v26  ;;  %v5519_v9 = vsel %vm5449_vm12, %v5420_v48, %v5098_v19  ;;  %v16133_v26 = vld [vmem:[#allocation116_spill] sm:$0xff]  ;;  %v16135_v48 = vld [vmem:[#allocation75_spill] sm:$0xff] }
 0x671   : > { %v8175_v43 = vmul.f32 -1.442695, %v5519_v9  ;;  %v5423_v15 = vsel %vm702_vm1, %v5325_v38, %v16133_v26  ;;  %v1924_v19 = vadd.f32 %v15192_v24, %v16135_v48  ;;  %v16146_v26 = vld [vmem:[#allocation239_spill] sm:$0xff]  ;;  %v16148_v48 = vld [vmem:[#allocation84_spill] sm:$0xff] }
 0x672   : > { %10546 = vrcp.f32 %v5907_v46  ;;  %v10537_v11 = vpop.eup %10536 }
 0x673   : > { %10548 = vpow2.f32 %v8174_v18  ;;  %v5424_v18 = vsel %vm702_vm1, %v5326_v8, %v16134_v4  ;;  %v5327_v25 = vsel %vm1445_vm2, %v1924_v19, %v16137_v36  ;;  %v1943_v19 = vadd.f32 %v15192_v24, %v16148_v48 }
 0x674   : > { %v10539_v37 = vpop.eup %10538  ;;  %10550 = vpow2.f32 %v8175_v43  ;;  %v16136_v43 = vld [vmem:[#allocation76_spill] sm:$0xff] }
 0x675   : > { %v10541_v0 = vpop.eup %10540  ;;  %v8572_v6 = vpack.c.bf16 %v10539_v37, %v10537_v11  ;;  %v5100_v27 = vpop.permute.xlu1 %5099  ;;  %v1927_v37 = vadd.f32 %v15192_v24, %v16136_v43  ;;  %v16150_v43 = vld [vmem:[#allocation253_spill] sm:$0xff] }
 0x676   : > { %v5908_v3 = vadd.f32 1.0, %v10541_v0  ;;  %v10543_v53 = vpop.eup %10542  ;;  %v5520_v28 = vsel %vm5449_vm12, %v5421_v41, %v5100_v27 }
 0x677   : > { %8833 = vst [vmem:[%s14746_s23 + $0xf8] sm:$0xff] %v8572_v6   ;;  %v5909_v39 = vadd.f32 1.0, %v10543_v53  ;;  %v8176_v49 = vmul.f32 -1.442695, %v5520_v28  ;;  %v5102_v57 = vpop.permute.xlu0 %5101  ;;  %v5328_v52 = vsel %vm1445_vm2, %v1927_v37, %v16138_v30  ;;  %v5425_v6 = vsel %vm702_vm1, %v5327_v25, %v16139_v17  ;;  %v16152_v17 = vld [vmem:[#allocation129_spill] sm:$0xff] }
 0x678   : > { %10552 = vrcp.f32 %v5908_v3  ;;  %v5521_v5 = vsel %vm5449_vm12, %v5422_v60, %v5102_v57  ;;  %v5426_v41 = vsel %vm702_vm1, %v5328_v52, %v16140_v56  ;;  %v5332_v37 = vsel %vm1445_vm2, %v1943_v19, %v16150_v43 }
 0x679   : > { %10554 = vrcp.f32 %v5909_v39  ;;  %v8177_v23 = vmul.f32 -1.442695, %v5521_v5  ;;  %v16141_v39 = vld [vmem:[#allocation79_spill] sm:$0xff] }
 0x67a   : > { %v10545_v16 = vpop.eup %10544  ;;  %10556 = vpow2.f32 %v8176_v49  ;;  %v1932_v28 = vadd.f32 %v15192_v24, %v16141_v39  ;;  %v16143_v5 = vld [vmem:[#allocation251_spill] sm:$0xff]  ;;  %v16155_v39 = vld [vmem:[#allocation257_spill] sm:$0xff] }
 0x67b   : > { %10558 = vpow2.f32 %v8177_v23 }
 0x67c   : > { %v10547_v34 = vpop.eup %10546  ;;  %10560 = vpow2.f32 %v7651_v2 }
 0x67d   : > { %v10549_v33 = vpop.eup %10548  ;;  %v8577_v7 = vpack.c.bf16 %v10547_v34, %v10545_v16  ;;  %v5104_v62 = vpop.permute.xlu1 %5103  ;;  %10562 = vpow2.f32 %v7653_v63  ;;  %v5329_v16 = vsel %vm1445_vm2, %v1932_v28, %v16143_v5  ;;  %v16145_v63 = vld [vmem:[#allocation134_spill] sm:$0xff]  ;;  %v16157_v5 = vld [vmem:[#allocation131_spill] sm:$0xff] }
 0x67e   : > { %v5910_v12 = vadd.f32 1.0, %v10549_v33  ;;  %v10551_v47 = vpop.eup %10550  ;;  %v5522_v35 = vsel %vm5449_vm12, %v5423_v15, %v5104_v62  ;;  %v5427_v33 = vsel %vm702_vm1, %v5329_v16, %v16145_v63  ;;  %v5428_v15 = vsel %vm702_vm1, %v5330_v44, %v16146_v26 }
 0x67f   : > { %8834 = vst [vmem:[%s14746_s23 + $0x100] sm:$0xff] %v8577_v7   ;;  %v5911_v22 = vadd.f32 1.0, %v10551_v47  ;;  %v8178_v46 = vmul.f32 -1.442695, %v5522_v35  ;;  %v5106_v10 = vpop.permute.xlu0 %5105 }
 0x680   : > { %10564 = vrcp.f32 %v5910_v12  ;;  %v5523_v32 = vsel %vm5449_vm12, %v5424_v18, %v5106_v10 }
 0x681   : > { %10566 = vrcp.f32 %v5911_v22  ;;  %v8179_v9 = vmul.f32 -1.442695, %v5523_v32  ;;  %v16147_v22 = vld [vmem:[#allocation83_spill] sm:$0xff]  ;;  %v16149_v32 = vld [vmem:[#allocation254_spill] sm:$0xff] }
 0x682   : > { %v10553_v61 = vpop.eup %10552  ;;  %10568 = vpow2.f32 %v8178_v46  ;;  %v1940_v35 = vadd.f32 %v15192_v24, %v16147_v22  ;;  %v16161_v22 = vld [vmem:[#allocation259_spill] sm:$0xff] }
 0x683   : > { %v10555_v11 = vpop.eup %10554  ;;  %10570 = vpow2.f32 %v8179_v9 }
 0x684   : > { %v10557_v13 = vpop.eup %10556  ;;  %v8582_v20 = vpack.c.bf16 %v10555_v11, %v10553_v61  ;;  %v5331_v61 = vsel %vm1445_vm2, %v1940_v35, %v16149_v32  ;;  %v16163_v32 = vld [vmem:[#allocation247_spill] sm:$0xff] }
 0x685   : > { %v5912_v0 = vadd.f32 1.0, %v10557_v13  ;;  %v10559_v54 = vpop.eup %10558  ;;  %v5108_v29 = vpop.permute.xlu1 %5107  ;;  %v16151_v13 = vld [vmem:[#allocation242_spill] sm:$0xff] }
 0x686   : > { %8835 = vst [vmem:[%s14746_s23 + $0x108] sm:$0xff] %v8582_v20   ;;  %v5913_v40 = vadd.f32 1.0, %v10559_v54  ;;  %v5524_v3 = vsel %vm5449_vm12, %v5425_v6, %v5108_v29  ;;  %v10561_v53 = vpop.eup %10560  ;;  %v5429_v20 = vsel %vm702_vm1, %v5331_v61, %v16151_v13  ;;  %v5430_v6 = vsel %vm702_vm1, %v5332_v37, %v16152_v17 }
 0x687   : > { %10572 = vrcp.f32 %v5912_v0  ;;  %v8180_v14 = vmul.f32 -1.442695, %v5524_v3  ;;  %v5110_v27 = vpop.permute.xlu0 %5109  ;;  %v10563_v45 = vpop.eup %10562  ;;  %v15299_v12 = vsel %vm7640_vm11, %v10561_v53, 0.0 }
 0x688   : > { %10574 = vrcp.f32 %v5913_v40  ;;  %v5525_v49 = vsel %vm5449_vm12, %v5426_v41, %v5110_v27  ;;  %v15288_v34 = vsel %vm7640_vm11, %v10563_v45, 0.0  ;;  %v16153_v40 = vld [vmem:[#allocation88_spill] sm:$0xff]  ;;  %v16154_v27 = vld [vmem:[#allocation90_spill] sm:$0xff] }
 0x689   : > { %10576 = vpow2.f32 %v8180_v14  ;;  %v8181_v60 = vmul.f32 -1.442695, %v5525_v49  ;;  %v1948_v3 = vadd.f32 %v15192_v24, %v16153_v40  ;;  %v1951_v45 = vadd.f32 %v15192_v24, %v16154_v27  ;;  %v16167_v40 = vld [vmem:[#allocation262_spill] sm:$0xff] }
 0x68a   : > { %v10565_v42 = vpop.eup %10564 }
 0x68b   : > { %v10567_v57 = vpop.eup %10566  ;;  %10578 = vpow2.f32 %v8181_v60  ;;  %v5333_v28 = vsel %vm1445_vm2, %v1948_v3, %v16155_v39  ;;  %v16156_v60 = vld [vmem:[#allocation256_spill] sm:$0xff] }
 0x68c   : > { %v10569_v2 = vpop.eup %10568  ;;  %v8587_v23 = vpack.c.bf16 %v10567_v57, %v10565_v42  ;;  %7659 = vadd.xlane.f32.xlu0 %v15288_v34  ;;  %v5334_v57 = vsel %vm1445_vm2, %v1951_v45, %v16156_v60  ;;  %v5431_v16 = vsel %vm702_vm1, %v5333_v28, %v16157_v5  ;;  %v16169_v39 = vld [vmem:[#allocation140_spill] sm:$0xff] }
 0x68d   : > { %v5914_v50 = vadd.f32 1.0, %v10569_v2  ;;  %v10571_v38 = vpop.eup %10570  ;;  %v5112_v7 = vpop.permute.xlu1 %5111 }
 0x68e   : > { %8836 = vst [vmem:[%s14746_s23 + $0x110] sm:$0xff] %v8587_v23   ;;  %v5915_v59 = vadd.f32 1.0, %v10571_v38  ;;  %v5526_v8 = vsel %vm5449_vm12, %v5427_v33, %v5112_v7  ;;  %v16159_v33 = vld [vmem:[#allocation94_spill] sm:$0xff] }
 0x68f   : > { %10580 = vrcp.f32 %v5914_v50  ;;  %v8182_v47 = vmul.f32 -1.442695, %v5526_v8  ;;  %v5114_v62 = vpop.permute.xlu0 %5113  ;;  %7657 = vadd.xlane.f32.xlu1 %v15299_v12  ;;  %v16158_v50 = vld [vmem:[#allocation244_spill] sm:$0xff]  ;;  %v1956_v7 = vadd.f32 %v15192_v24, %v16159_v33 }
 0x690   : > { %10582 = vrcp.f32 %v5915_v59  ;;  %v5527_v46 = vsel %vm5449_vm12, %v5428_v15, %v5114_v62  ;;  %v5432_v38 = vsel %vm702_vm1, %v5334_v57, %v16158_v50  ;;  %v16160_v15 = vld [vmem:[#allocation95_spill] sm:$0xff]  ;;  %v16173_v33 = vld [vmem:[#allocation264_spill] sm:$0xff] }
 0x691   : > { %v10573_v4 = vpop.eup %10572  ;;  %10584 = vpow2.f32 %v8182_v47  ;;  %v8183_v18 = vmul.f32 -1.442695, %v5527_v46  ;;  %v1959_v62 = vadd.f32 %v15192_v24, %v16160_v15  ;;  %v5335_v35 = vsel %vm1445_vm2, %v1956_v7, %v16161_v22  ;;  %v16175_v22 = vld [vmem:[#allocation252_spill] sm:$0xff] }
 0x692   : > { %v10575_v10 = vpop.eup %10574  ;;  %v5433_v61 = vsel %vm702_vm1, %v5335_v35, %v16163_v32 }
 0x693   : > { %v10577_v9 = vpop.eup %10576  ;;  %v8592_v11 = vpack.c.bf16 %v10575_v10, %v10573_v4  ;;  %10586 = vpow2.f32 %v8183_v18  ;;  %v16162_v18 = vld [vmem:[#allocation139_spill] sm:$0xff] }
 0x694   : > { %v5916_v36 = vadd.f32 1.0, %v10577_v9  ;;  %v5336_v10 = vsel %vm1445_vm2, %v1959_v62, %v16162_v18 }
 0x695   : > { %v10579_v25 = vpop.eup %10578  ;;  %8837 = vst [vmem:[%s14746_s23 + $0x118] sm:$0xff] %v8592_v11   ;;  %v5116_v30 = vpop.permute.xlu1 %5115 }
 0x696   : > { %v5917_v52 = vadd.f32 1.0, %v10579_v25  ;;  %v5528_v0 = vsel %vm5449_vm12, %v5429_v20, %v5116_v30  ;;  %10588 = vrcp.f32 %v5916_v36  ;;  %v16164_v36 = vld [vmem:[#allocation136_spill] sm:$0xff]  ;;  %v16165_v20 = vld [vmem:[#allocation99_spill] sm:$0xff] }
 0x697   : > { %v8184_v54 = vmul.f32 -1.442695, %v5528_v0  ;;  %v5118_v29 = vpop.permute.xlu0 %5117  ;;  %v5434_v25 = vsel %vm702_vm1, %v5336_v10, %v16164_v36  ;;  %v1964_v30 = vadd.f32 %v15192_v24, %v16165_v20  ;;  %v16179_v20 = vld [vmem:[#allocation267_spill] sm:$0xff] }
 0x698   : > { %10590 = vrcp.f32 %v5917_v52  ;;  %v5529_v53 = vsel %vm5449_vm12, %v5430_v6, %v5118_v29  ;;  %v16166_v6 = vld [vmem:[#allocation100_spill] sm:$0xff] }
 0x699   : > { %v10581_v14 = vpop.eup %10580  ;;  %10592 = vpow2.f32 %v8184_v54  ;;  %v8185_v56 = vmul.f32 -1.442695, %v5529_v53  ;;  %v1967_v29 = vadd.f32 %v15192_v24, %v16166_v6  ;;  %v5337_v3 = vsel %vm1445_vm2, %v1964_v30, %v16167_v40  ;;  %v16181_v40 = vld [vmem:[#allocation138_spill] sm:$0xff] }
 0x69a   : > { %v10583_v41 = vpop.eup %10582  ;;  %v5435_v28 = vsel %vm702_vm1, %v5337_v3, %v16169_v39 }
 0x69b   : > { %v10585_v49 = vpop.eup %10584  ;;  %v8597_v42 = vpack.c.bf16 %v10583_v41, %v10581_v14  ;;  %10594 = vpow2.f32 %v8185_v56  ;;  %v16168_v56 = vld [vmem:[#allocation261_spill] sm:$0xff] }
 0x69c   : > { %v5918_v58 = vadd.f32 1.0, %v10585_v49  ;;  %v5338_v41 = vsel %vm1445_vm2, %v1967_v29, %v16168_v56 }
 0x69d   : > { %v10587_v55 = vpop.eup %10586  ;;  %8838 = vst [vmem:[%s14746_s23 + $0x120] sm:$0xff] %v8597_v42   ;;  %v5120_v2 = vpop.permute.xlu1 %5119 }
 0x69e   : > { %v5919_v23 = vadd.f32 1.0, %v10587_v55  ;;  %v5530_v51 = vsel %vm5449_vm12, %v5431_v16, %v5120_v2  ;;  %10596 = vrcp.f32 %v5918_v58  ;;  %v16170_v58 = vld [vmem:[#allocation249_spill] sm:$0xff] }
 0x69f   : > { %v8186_v44 = vmul.f32 -1.442695, %v5530_v51  ;;  %v5122_v63 = vpop.permute.xlu0 %5121  ;;  %v5436_v55 = vsel %vm702_vm1, %v5338_v41, %v16170_v58  ;;  %v16171_v16 = vld [vmem:[#allocation105_spill] sm:$0xff] }
 0x6a0   : > { %10598 = vrcp.f32 %v5919_v23  ;;  %v5531_v59 = vsel %vm5449_vm12, %v5432_v38, %v5122_v63  ;;  %v10589_v8 = vpop.eup %10588  ;;  %v1972_v2 = vadd.f32 %v15192_v24, %v16171_v16  ;;  %v16172_v38 = vld [vmem:[#allocation107_spill] sm:$0xff] }
 0x6a1   : > { %10600 = vpow2.f32 %v8186_v44  ;;  %v8187_v47 = vmul.f32 -1.442695, %v5531_v59  ;;  %v1975_v63 = vadd.f32 %v15192_v24, %v16172_v38  ;;  %v16185_v16 = vld [vmem:[#allocation271_spill] sm:$0xff] }
 0x6a2   : > { %v10591_v26 = vpop.eup %10590  ;;  %v5339_v7 = vsel %vm1445_vm2, %v1972_v2, %v16173_v33  ;;  %v16187_v33 = vld [vmem:[#allocation258_spill] sm:$0xff] }
 0x6a3   : > { %v10593_v46 = vpop.eup %10592  ;;  %v8602_v4 = vpack.c.bf16 %v10591_v26, %v10589_v8  ;;  %10602 = vpow2.f32 %v8187_v47  ;;  %v16174_v47 = vld [vmem:[#allocation145_spill] sm:$0xff]  ;;  %v5437_v35 = vsel %vm702_vm1, %v5339_v7, %v16175_v22 }
 0x6a4   : > { %v5920_v48 = vadd.f32 1.0, %v10593_v46  ;;  %v5340_v26 = vsel %vm1445_vm2, %v1975_v63, %v16174_v47 }
 0x6a5   : > { %v10595_v19 = vpop.eup %10594  ;;  %8839 = vst [vmem:[%s14746_s23 + $0x128] sm:$0xff] %v8602_v4   ;;  %v5124_v9 = vpop.permute.xlu1 %5123 }
 0x6a6   : > { %v5921_v11 = vadd.f32 1.0, %v10595_v19  ;;  %v5532_v43 = vsel %vm5449_vm12, %v5433_v61, %v5124_v9  ;;  %10604 = vrcp.f32 %v5920_v48  ;;  %v16176_v48 = vld [vmem:[#allocation137_spill] sm:$0xff]  ;;  %v16177_v61 = vld [vmem:[#allocation112_spill] sm:$0xff] }
 0x6a7   : > { %v8188_v37 = vmul.f32 -1.442695, %v5532_v43  ;;  %v5126_v13 = vpop.permute.xlu0 %5125  ;;  %v5438_v19 = vsel %vm702_vm1, %v5340_v26, %v16176_v48  ;;  %v1980_v9 = vadd.f32 %v15192_v24, %v16177_v61  ;;  %v16191_v61 = vld [vmem:[#allocation273_spill] sm:$0xff] }
 0x6a8   : > { %10606 = vrcp.f32 %v5921_v11  ;;  %v5533_v52 = vsel %vm5449_vm12, %v5434_v25, %v5126_v13  ;;  %v10597_v0 = vpop.eup %10596  ;;  %v16178_v25 = vld [vmem:[#allocation114_spill] sm:$0xff] }
 0x6a9   : > { %10608 = vpow2.f32 %v8188_v37  ;;  %v8189_v54 = vmul.f32 -1.442695, %v5533_v52  ;;  %v1983_v13 = vadd.f32 %v15192_v24, %v16178_v25  ;;  %v5341_v30 = vsel %vm1445_vm2, %v1980_v9, %v16179_v20  ;;  %v16193_v20 = vld [vmem:[#allocation144_spill] sm:$0xff] }
 0x6aa   : > { %v10599_v17 = vpop.eup %10598  ;;  %v5439_v3 = vsel %vm702_vm1, %v5341_v30, %v16181_v40 }
 0x6ab   : > { %v10601_v53 = vpop.eup %10600  ;;  %v8607_v14 = vpack.c.bf16 %v10599_v17, %v10597_v0  ;;  %10610 = vpow2.f32 %v8189_v54  ;;  %v16180_v54 = vld [vmem:[#allocation266_spill] sm:$0xff] }
 0x6ac   : > { %v5922_v27 = vadd.f32 1.0, %v10601_v53  ;;  %v5342_v17 = vsel %vm1445_vm2, %v1983_v13, %v16180_v54 }
 0x6ad   : > { %v10603_v45 = vpop.eup %10602  ;;  %8840 = vst [vmem:[%s14746_s23 + $0x130] sm:$0xff] %v8607_v14   ;;  %v5128_v49 = vpop.permute.xlu1 %5127 }
 0x6ae   : > { %v5923_v42 = vadd.f32 1.0, %v10603_v45  ;;  %v5534_v60 = vsel %vm5449_vm12, %v5435_v28, %v5128_v49  ;;  %10612 = vrcp.f32 %v5922_v27  ;;  %v16182_v27 = vld [vmem:[#allocation255_spill] sm:$0xff]  ;;  %v16183_v28 = vld [vmem:[#allocation117_spill] sm:$0xff] }
 0x6af   : > { %v8190_v57 = vmul.f32 -1.442695, %v5534_v60  ;;  %v5130_v5 = vpop.permute.xlu0 %5129  ;;  %v5440_v45 = vsel %vm702_vm1, %v5342_v17, %v16182_v27  ;;  %v1988_v49 = vadd.f32 %v15192_v24, %v16183_v28  ;;  %v16197_v28 = vld [vmem:[#allocation275_spill] sm:$0xff] }
 0x6b0   : > { %10614 = vrcp.f32 %v5923_v42  ;;  %v5535_v23 = vsel %vm5449_vm12, %v5436_v55, %v5130_v5  ;;  %v10605_v51 = vpop.eup %10604  ;;  %v16184_v55 = vld [vmem:[#allocation118_spill] sm:$0xff] }
 0x6b1   : > { %10616 = vpow2.f32 %v8190_v57  ;;  %v8191_v44 = vmul.f32 -1.442695, %v5535_v23  ;;  %v1991_v5 = vadd.f32 %v15192_v24, %v16184_v55  ;;  %v5343_v2 = vsel %vm1445_vm2, %v1988_v49, %v16185_v16  ;;  %v16199_v16 = vld [vmem:[#allocation263_spill] sm:$0xff] }
 0x6b2   : > { %v10607_v50 = vpop.eup %10606  ;;  %v5441_v7 = vsel %vm702_vm1, %v5343_v2, %v16187_v33 }
 0x6b3   : > { %v10609_v59 = vpop.eup %10608  ;;  %v8612_v8 = vpack.c.bf16 %v10607_v50, %v10605_v51  ;;  %10618 = vpow2.f32 %v8191_v44  ;;  %v16186_v44 = vld [vmem:[#allocation270_spill] sm:$0xff] }
 0x6b4   : > { %v5924_v15 = vadd.f32 1.0, %v10609_v59  ;;  %v5344_v50 = vsel %vm1445_vm2, %v1991_v5, %v16186_v44 }
 0x6b5   : > { %v10611_v62 = vpop.eup %10610  ;;  %8841 = vst [vmem:[%s14746_s23 + $0x138] sm:$0xff] %v8612_v8   ;;  %v5132_v46 = vpop.permute.xlu1 %5131 }
 0x6b6   : > { %v5925_v4 = vadd.f32 1.0, %v10611_v62  ;;  %v5536_v18 = vsel %vm5449_vm12, %v5437_v35, %v5132_v46  ;;  %10620 = vrcp.f32 %v5924_v15  ;;  %v16188_v15 = vld [vmem:[#allocation143_spill] sm:$0xff] }
 0x6b7   : > { %v8192_v10 = vmul.f32 -1.442695, %v5536_v18  ;;  %v5134_v32 = vpop.permute.xlu0 %5133  ;;  %v5442_v62 = vsel %vm702_vm1, %v5344_v50, %v16188_v15  ;;  %v16189_v35 = vld [vmem:[#allocation119_spill] sm:$0xff] }
 0x6b8   : > { %10622 = vrcp.f32 %v5925_v4  ;;  %v5537_v11 = vsel %vm5449_vm12, %v5438_v19, %v5134_v32  ;;  %v10613_v43 = vpop.eup %10612  ;;  %v1996_v46 = vadd.f32 %v15192_v24, %v16189_v35  ;;  %v16190_v19 = vld [vmem:[#allocation120_spill] sm:$0xff] }
 0x6b9   : > { %10624 = vpow2.f32 %v8192_v10  ;;  %v8193_v37 = vmul.f32 -1.442695, %v5537_v11  ;;  %v1999_v32 = vadd.f32 %v15192_v24, %v16190_v19  ;;  %v16203_v35 = vld [vmem:[#allocation8_spill] sm:$0xff] }
 0x6ba   : > { %v10615_v36 = vpop.eup %10614  ;;  %v5345_v9 = vsel %vm1445_vm2, %v1996_v46, %v16191_v61  ;;  %v16205_v61 = vld [vmem:[#allocation142_spill] sm:$0xff] }
 0x6bb   : > { %v10617_v52 = vpop.eup %10616  ;;  %v8617_v0 = vpack.c.bf16 %v10615_v36, %v10613_v43  ;;  %10626 = vpow2.f32 %v8193_v37  ;;  %v16192_v37 = vld [vmem:[#allocation272_spill] sm:$0xff]  ;;  %v5443_v30 = vsel %vm702_vm1, %v5345_v9, %v16193_v20 }
 0x6bc   : > { %v5926_v6 = vadd.f32 1.0, %v10617_v52  ;;  %v5346_v36 = vsel %vm1445_vm2, %v1999_v32, %v16192_v37 }
 0x6bd   : > { %v10619_v29 = vpop.eup %10618  ;;  %8842 = vst [vmem:[%s14746_s23 + $0x140] sm:$0xff] %v8617_v0   ;;  %v5136_v53 = vpop.permute.xlu1 %5135 }
 0x6be   : > { %v5927_v14 = vadd.f32 1.0, %v10619_v29  ;;  %v5538_v56 = vsel %vm5449_vm12, %v5439_v3, %v5136_v53  ;;  %10628 = vrcp.f32 %v5926_v6  ;;  %v16194_v6 = vld [vmem:[#allocation260_spill] sm:$0xff]  ;;  %v16195_v3 = vld [vmem:[#allocation121_spill] sm:$0xff] }
 0x6bf   : > { %v8194_v41 = vmul.f32 -1.442695, %v5538_v56  ;;  %v5138_v39 = vpop.permute.xlu0 %5137  ;;  %v5444_v29 = vsel %vm702_vm1, %v5346_v36, %v16194_v6  ;;  %v2004_v53 = vadd.f32 %v15192_v24, %v16195_v3  ;;  %v16206_v36 = vld [vmem:[#allocation265_spill] sm:$0xff] }
 0x6c0   : > { %10630 = vrcp.f32 %v5927_v14  ;;  %v5539_v42 = vsel %vm5449_vm12, %v5440_v45, %v5138_v39  ;;  %v10621_v60 = vpop.eup %10620  ;;  %v16196_v45 = vld [vmem:[#allocation122_spill] sm:$0xff] }
 0x6c1   : > { %10632 = vpow2.f32 %v8194_v41  ;;  %v8195_v57 = vmul.f32 -1.442695, %v5539_v42  ;;  %v2007_v39 = vadd.f32 %v15192_v24, %v16196_v45  ;;  %v5347_v49 = vsel %vm1445_vm2, %v2004_v53, %v16197_v28 }
 0x6c2   : > { %v10623_v58 = vpop.eup %10622  ;;  %v5445_v2 = vsel %vm702_vm1, %v5347_v49, %v16199_v16 }
 0x6c3   : > { %v10625_v23 = vpop.eup %10624  ;;  %v8622_v51 = vpack.c.bf16 %v10623_v58, %v10621_v60  ;;  %10634 = vpow2.f32 %v8195_v57  ;;  %v16198_v57 = vld [vmem:[#allocation274_spill] sm:$0xff] }
 0x6c4   : > { %v5928_v38 = vadd.f32 1.0, %v10625_v23  ;;  %v5348_v58 = vsel %vm1445_vm2, %v2007_v39, %v16198_v57 }
 0x6c5   : > { %v10627_v63 = vpop.eup %10626  ;;  %8843 = vst [vmem:[%s14746_s23 + $0x148] sm:$0xff] %v8622_v51   ;;  %v5140_v59 = vpop.permute.xlu1 %5139 }
 0x6c6   : > { %v5929_v8 = vadd.f32 1.0, %v10627_v63  ;;  %v5540_v47 = vsel %vm5449_vm12, %v5441_v7, %v5140_v59  ;;  %10636 = vrcp.f32 %v5928_v38  ;;  %v16200_v38 = vld [vmem:[#allocation141_spill] sm:$0xff]  ;;  %v16201_v7 = vld [vmem:[#allocation124_spill] sm:$0xff] }
 0x6c7   : > { %v8196_v26 = vmul.f32 -1.442695, %v5540_v47  ;;  %v5142_v22 = vpop.permute.xlu0 %5141  ;;  %v5446_v63 = vsel %vm702_vm1, %v5348_v58, %v16200_v38  ;;  %v2012_v59 = vadd.f32 %v15192_v24, %v16201_v7 }
 0x6c8   : > { %10638 = vrcp.f32 %v5929_v8  ;;  %v5541_v4 = vsel %vm5449_vm12, %v5442_v62, %v5142_v22  ;;  %v10629_v18 = vpop.eup %10628  ;;  %v16202_v62 = vld [vmem:[#allocation125_spill] sm:$0xff] }
 0x6c9   : > { %10640 = vpow2.f32 %v8196_v26  ;;  %v8197_v10 = vmul.f32 -1.442695, %v5541_v4  ;;  %v2015_v22 = vadd.f32 %v15192_v24, %v16202_v62  ;;  %v5349_v46 = vsel %vm1445_vm2, %v2012_v59, %v16203_v35 }
 0x6ca   : > { %v10631_v48 = vpop.eup %10630  ;;  %v5447_v9 = vsel %vm702_vm1, %v5349_v46, %v16205_v61 }
 0x6cb   : > { %v10633_v11 = vpop.eup %10632  ;;  %v8627_v43 = vpack.c.bf16 %v10631_v48, %v10629_v18  ;;  %10642 = vpow2.f32 %v8197_v10  ;;  %v16204_v10 = vld [vmem:[#allocation9_spill] sm:$0xff] }
 0x6cc   : > { %v5930_v25 = vadd.f32 1.0, %v10633_v11  ;;  %v5350_v48 = vsel %vm1445_vm2, %v2015_v22, %v16204_v10 }
 0x6cd   : > { %v10635_v13 = vpop.eup %10634  ;;  %8844 = vst [vmem:[%s14746_s23 + $0x150] sm:$0xff] %v8627_v43   ;;  %v5144_v52 = vpop.permute.xlu1 %5143 }
 0x6ce   : > { %v5931_v0 = vadd.f32 1.0, %v10635_v13  ;;  %v5542_v54 = vsel %vm5449_vm12, %v5443_v30, %v5144_v52  ;;  %10644 = vrcp.f32 %v5930_v25  ;;  %v5448_v25 = vsel %vm702_vm1, %v5350_v48, %v16206_v36 }
 0x6cf   : > { %v8198_v17 = vmul.f32 -1.442695, %v5542_v54 }
 0x6d0   : > { %v5146_v40 = vpop.permute.xlu0 %5145  ;;  %10646 = vrcp.f32 %v5931_v0  ;;  %v10637_v56 = vpop.eup %10636 }
 0x6d1   : > { %v5543_v14 = vsel %vm5449_vm12, %v5444_v29, %v5146_v40  ;;  %10648 = vpow2.f32 %v8198_v17 }
 0x6d2   : > { %v8199_v41 = vmul.f32 -1.442695, %v5543_v14  ;;  %v10639_v27 = vpop.eup %10638 }
 0x6d3   : > { %v10641_v42 = vpop.eup %10640  ;;  %v8632_v60 = vpack.c.bf16 %v10639_v27, %v10637_v56 }
 0x6d4   : > { %10650 = vpow2.f32 %v8199_v41  ;;  %v5932_v55 = vadd.f32 1.0, %v10641_v42 }
 0x6d5   : > { %v10643_v5 = vpop.eup %10642  ;;  %8845 = vst [vmem:[%s14746_s23 + $0x158] sm:$0xff] %v8632_v60   ;;  %v5148_v23 = vpop.permute.xlu1 %5147 }
 0x6d6   : > { %v5933_v51 = vadd.f32 1.0, %v10643_v5  ;;  %v5544_v44 = vsel %vm5449_vm12, %v5445_v2, %v5148_v23  ;;  %10652 = vrcp.f32 %v5932_v55 }
 0x6d7   : > { %v8200_v50 = vmul.f32 -1.442695, %v5544_v44 }
 0x6d8   : > { %v5150_v33 = vpop.permute.xlu0 %5149  ;;  %10654 = vrcp.f32 %v5933_v51  ;;  %v10645_v47 = vpop.eup %10644 }
 0x6d9   : > { %v5545_v8 = vsel %vm5449_vm12, %v5446_v63, %v5150_v33  ;;  %10656 = vpow2.f32 %v8200_v50 }
 0x6da   : > { %v8201_v26 = vmul.f32 -1.442695, %v5545_v8  ;;  %v10647_v15 = vpop.eup %10646 }
 0x6db   : > { %v10649_v4 = vpop.eup %10648  ;;  %v8637_v18 = vpack.c.bf16 %v10647_v15, %v10645_v47 }
 0x6dc   : > { %10658 = vpow2.f32 %v8201_v26  ;;  %v5934_v19 = vadd.f32 1.0, %v10649_v4 }
 0x6dd   : > { %8846 = vst [vmem:[%s14746_s23 + $0x160] sm:$0xff] %v8637_v18   ;;  %v5152_v11 = vpop.permute.xlu1 %5151 }
 0x6de   : > { %v10651_v32 = vpop.eup %10650  ;;  %v5546_v37 = vsel %vm5449_vm12, %v5447_v9, %v5152_v11  ;;  %10660 = vrcp.f32 %v5934_v19 }
 0x6df   : > { %v5935_v43 = vadd.f32 1.0, %v10651_v32  ;;  %v8202_v24 = vmul.f32 -1.442695, %v5546_v37  ;;  %v5154_v13 = vpop.permute.xlu0 %5153 }
 0x6e0   : > { %v5547_v20 = vsel %vm5449_vm12, %v5448_v25, %v5154_v13  ;;  %v10653_v30 = vpop.eup %10652 }
 0x6e1   : > { %10662 = vrcp.f32 %v5935_v43  ;;  %v8203_v52 = vmul.f32 -1.442695, %v5547_v20 }
 0x6e2   : > { %10664 = vpow2.f32 %v8202_v24  ;;  %v10655_v0 = vpop.eup %10654 }
 0x6e3   : > { %v10657_v54 = vpop.eup %10656  ;;  %v8642_v17 = vpack.c.bf16 %v10655_v0, %v10653_v30  ;;  %10666 = vpow2.f32 %v8203_v52 }
 0x6e4   : > { %v5936_v6 = vadd.f32 1.0, %v10657_v54 }
 0x6e5   : > { %8847 = vst [vmem:[%s14746_s23 + $0x168] sm:$0xff] %v8642_v17  }
 0x6e6   : > { %v10659_v29 = vpop.eup %10658  ;;  %10668 = vrcp.f32 %v5936_v6 }
 0x6e7   : > { %v5937_v40 = vadd.f32 1.0, %v10659_v29 }
 0x6e8   : > { %v10661_v3 = vpop.eup %10660 }
 0x6e9   : > { %10670 = vrcp.f32 %v5937_v40 }
 0x6eb   : > { %v10663_v53 = vpop.eup %10662 }
 0x6ec   : > { %v10665_v14 = vpop.eup %10664  ;;  %v8647_v56 = vpack.c.bf16 %v10663_v53, %v10661_v3 }
 0x6ed   : > { %v5938_v41 = vadd.f32 1.0, %v10665_v14  ;;  %v10667_v27 = vpop.eup %10666 }
 0x6ee   : > { %8848 = vst [vmem:[%s14746_s23 + $0x170] sm:$0xff] %v8647_v56   ;;  %v5939_v45 = vadd.f32 1.0, %v10667_v27 }
 0x6ef   : > { %10672 = vrcp.f32 %v5938_v41 }
 0x6f0   : > { %10674 = vrcp.f32 %v5939_v45  ;;  %v10669_v39 = vpop.eup %10668 }
 0x6f3   : > { %v10671_v28 = vpop.eup %10670 }
 0x6f4   : > { %v8652_v49 = vpack.c.bf16 %v10671_v28, %v10669_v39 }
 0x6f6   : > { %8849 = vst [vmem:[%s14746_s23 + $0x178] sm:$0xff] %v8652_v49  }
 0x6f9   : > { %v10673_v42 = vpop.eup %10672 }
 0x6fa   : > { %v10675_v60 = vpop.eup %10674 }
 0x6fb   : > { %v8657_v57 = vpack.c.bf16 %v10675_v60, %v10673_v42 }
 0x6fd   : > { %8850 = vst [vmem:[%s14746_s23 + $0x180] sm:$0xff] %v8657_v57  }
 0x6fe   : > { %10702 = shalt.err (!%p10699_p3)
}
 0x6ff   : > { %s10703_s23 = scalar_lea.hbm %s15465_s19, 6272  ;;  %s10707_s25 = scalar_lea.hbm %s15560_s8, 12544 }
 0x700   : > { %p10704_p4 = scmp.ne.s32.totalorder %s15465_s19, %s10703_s23  ;;  %p10708_p9 = scmp.lt.u32.totalorder %s15465_s19, %s15560_s8 }
 0x701   : > { %p10709_p10 = scmp.lt.u32.totalorder %s10707_s25, %s10703_s23  ;;  %p10711_p12 = scmp.lt.u32.totalorder %s10703_s23, %s15465_s19 }
 0x702   : > { %p10705_p7 = pnand %p10704_p4, %p10878_p5 }
 0x703   : > { %p10710_p11 = por %p10709_p10, %p10708_p9 }
 0x704   : > { %p10706_p8 = pneg %p10705_p7 }
 0x705   : > { %p10712_p13 = por %p10711_p12, %p10710_p11 }
 0x707   : > { %p10713_p0 = pnand %p10712_p13, %p10706_p8 }
 0x709   : > { %10716 = shalt.err (!%p10713_p0)
}
 0x70a   : > { %s10791_s26 = smov 4   ;;  %s7802_s13 = sshll.u32 %s14703_s20, 4 }
 0x70b   : > { %10170 = dma.vmem_to_hbm [thread:$0]  (%p10878_p5), %s15460_s17, 6272, %s15465_s19, %s7675_s22, %s10788_s24, %s10788_s24, %s10791_s26  }
 0x70c   : > { %s8412_s23 = sshll.u32 %s10861_s9, 8  ;;  %s303_s21 = scalar_lea.vmem [#allocation2], %s7802_s13 }
 0x70d   : > { %s7688_s18 = sshll.u32 %s303_s21, 4  ;;  %s15504_s19 = scalar_lea.hbm %s15559_s7, %s8412_s23  ;;  %s15506_s18 = int_to_ptr.vmem [resolvable:$true] %s7688_s18 }
 0x70e   : > { %s7670_s9 = scalar_lea.sflag [#allocation3], %s14703_s20  ;;  %s10717_s22 = scalar_lea.vmem %s15506_s18, 256 }
 0x70f   : > { %p10718_p1 = scmp.ne.s32.totalorder %s15506_s18, %s10717_s22  ;;  %s10792_s25 = smov [#allocation2]  }
 0x710   : > { %s10721_s12 = sshll.u32 %s10792_s25, 4  ;;  %s10722_s12 = int_to_ptr.vmem [resolvable:$false] %s10721_s12 }
 0x711   : > { %p10719_p2 = pnand %p10718_p1, %p10878_p5  ;;  %s10723_s10 = scalar_lea.vmem %s10722_s12, 512 }
 0x712   : > { %p10724_p4 = scmp.lt.s32.totalorder %s15506_s18, %s10722_s12  ;;  %p10725_p7 = scmp.lt.s32.totalorder %s10723_s10, %s10717_s22 }
 0x713   : > { %p10720_p3 = pneg %p10719_p2 }
 0x714   : > { %p10726_p8 = por %p10725_p7, %p10724_p4 }
 0x716   : > { %p10727_p9 = pnand %p10726_p8, %p10720_p3 }
 0x719   : > { %v7660_v58 = vpop.xlane.xlu0 %7659 }
 0x71a   : > { %10676 = vrcp.f32 %v7660_v58 }
 0x71c   : > { %v7658_v55 = vpop.xlane.xlu1 %7657 }
 0x71d   : > { %10678 = vrcp.f32 %v7658_v55 }
 0x724   : > { %v10677_v5 = vpop.eup %10676 }
 0x725   : > { %v7664_v16 = vmul.f32 %v10677_v5, %v15288_v34 }
 0x727   : > { %v10679_v2 = vpop.eup %10678  ;;  %v7666_v23 = vsel %vm7640_vm11, %v7664_v16, %v16125_v21 }
 0x728   : > { %v7663_v51 = vmul.f32 %v10679_v2, %v15299_v12  ;;  %7668 = vst [vmem:[%s303_s21 + $0x8] sm:$0xff] %v7666_v23 }
 0x72a   : > { %v7665_v34 = vsel %vm7640_vm11, %v7663_v51, %v16122_v31 }
 0x72b   : > { %7667 = vst [vmem:[%s303_s21] sm:$0xff] %v7665_v34 }
 0x72c   : > { %10730 = shalt.err (!%p10727_p9)
}
 0x72d   : > { %s10731_s26 = scalar_lea.hbm %s15504_s19, 256  ;;  %s10735_s21 = scalar_lea.hbm %s15559_s7, 512 }
 0x72e   : > { %p10732_p10 = scmp.ne.s32.totalorder %s15504_s19, %s10731_s26  ;;  %p10736_p13 = scmp.lt.u32.totalorder %s15504_s19, %s15559_s7 }
 0x72f   : > { %p10737_p0 = scmp.lt.u32.totalorder %s10735_s21, %s10731_s26  ;;  %p10739_p2 = scmp.lt.u32.totalorder %s10731_s26, %s15504_s19 }
 0x730   : > { %p10733_p11 = pnand %p10732_p10, %p10878_p5 }
 0x731   : > { %p10738_p1 = por %p10737_p0, %p10736_p13 }
 0x732   : > { %p10734_p12 = pneg %p10733_p11 }
 0x733   : > { %p10740_p3 = por %p10739_p2, %p10738_p1 }
 0x735   : > { %p10741_p4 = pnand %p10740_p3, %p10734_p12 }
 0x737   : > { %10744 = shalt.err (!%p10741_p4)
}
 0x738   : > { %s10793_s22 = smov 128   ;;  %s10794_s25 = smov 8  }
 0x739   : > { %10169 = dma.vmem_to_hbm [thread:$0]  (%p10878_p5), %s15506_s18, 256, %s15504_s19, %s7670_s9, %s10793_s22, %s10793_s22, %s10794_s25  }
 0x73a PF: > { %p10180_p7 = scmp.ge.s32.totalorder %s10783_s30, 2  ;;  %s7719_s12 = sand.u32 1, %s10771_s27  }
 0x73b   : > { %s7720_s10 = scalar_lea.sflag [#allocation3], %s7719_s12 }
 0x73c   : > { %p10174_p8 = pnand %p10180_p7, %p10882_p6 }
 0x73e   : > { %10762 = dma.done.wait (!%p10174_p8), %s7720_s10, 256  }
 0x73f   : > { %10764 = vsyncadd (!%p10174_p8), %s7720_s10, 4294967040  ;;  %s7729_s26 = scalar_lea.sflag [#allocation5], %s7719_s12 }
 0x740   : > { %10766 = dma.done.wait (!%p10174_p8), %s7729_s26, 6272  }
 0x741   : > { %10768 = vsyncadd (!%p10174_p8), %s7729_s26, 4294961024  ;;  %p22_p5 = scmp.ge.s32.totalorder %s10865_s11, 4   ;;  %s16207_s27 = smov %s10775_s28 }
 0x742   : > { %s16208_s28 = smov %s10779_s29  ;;  %s16209_s29 = smov %s10876_s14 }
 0x743   : > { %s16210_s30 = smov %s10865_s11  ;;  %24 = sbr.rel (!%p22_p5) target bundleno = 5 (0x5), region = 100 }
 0x74a   :  { %7734 = vsyncpa [#allocation3], 1 }
 0x74b   :  { %7736 = vsyncpa [#allocation3 + $0x1], 1 }
 0x74c   :  { %7737 = vsyncpa [#allocation5], 1 }
 0x74d   :  { %7739 = vsyncpa [#allocation5 + $0x1], 1 }

</bundles_post_ra>
